<compile_context>
chip_gen: v6e
topology: v6e:2x2x1
jax: 0.10.0
libtpu: 0.0.40
codegen_flags: <defaults>
</compile_context>

<pallas_src>
import functools
import math

import jax
import jax.numpy as jnp
from jax import lax
from jax.experimental import pallas as pl
from jax.experimental.pallas import tpu as pltpu


# ----------------------------------------------------------------------------
# In-kernel helpers (traced inside the Pallas kernel)
# ----------------------------------------------------------------------------
def _layernorm(y, g, b, eps):
    mean = jnp.mean(y, axis=-1, keepdims=True)
    yc = y - mean
    var = jnp.mean(yc * yc, axis=-1, keepdims=True)
    return yc * lax.rsqrt(var + eps) * g + b


def _mha(q_bf, k_bf, v_bf, wo_ref, bo_ref, mask, num_heads):
    """q_bf: (B,T,H) bf16 (softmax scale already folded into the Q projection);
    k_bf/v_bf: (B,Tk,H) bf16; wo_ref: (1,H,H) bf16 ref; bo_ref: (1,1,H) f32 ref.

    Per-head scores/softmax/ctx batched over B; all head contexts are concatenated and
    projected with ONE full-K (B*T,H)@(H,H) matmul.  Returns (B*T, H) f32.
    """
    B, T, H = q_bf.shape
    dh = H // num_heads
    ctx_parts = []
    for h in range(num_heads):  # static unroll; nh is small
        sl = slice(h * dh, (h + 1) * dh)
        s = jnp.einsum('bqd,bkd->bqk', q_bf[:, :, sl], k_bf[:, :, sl],
                       preferred_element_type=jnp.float32)          # (B, T, Tk) f32
        if mask is not None:
            s = s + mask
        m = jnp.max(s, axis=-1, keepdims=True)
        p = jnp.exp(s - m)
        p = p * pl.reciprocal(jnp.sum(p, axis=-1, keepdims=True), approx=True)
        ctx_parts.append(jnp.einsum('bqk,bkd->bqd', p.astype(jnp.bfloat16),
                                    v_bf[:, :, sl],
                                    preferred_element_type=jnp.float32))  # (B, T, Dh)
    ctx = jnp.concatenate(ctx_parts, axis=-1).reshape(B * T, H)      # (B*T, H) f32
    return (jnp.dot(ctx.astype(jnp.bfloat16), wo_ref[0],
                    preferred_element_type=jnp.float32) + bo_ref[0])


# ----------------------------------------------------------------------------
# Fused decoder-stack kernel: grid = (num_layers,), activation VMEM-resident
# ----------------------------------------------------------------------------
def _decoder_stack_kernel(x_ref, mem_ref,
                          wqkv_ref, bqkv_ref, wo1_ref, bo1_ref,
                          wq_ref, bq_ref, wkv_ref, bkv_ref, wo2_ref, bo2_ref,
                          w1_ref, b1_ref, w2_ref, b2_ref,
                          lng_ref, lnb_ref,
                          o_ref, act_ref, *, num_heads, eps):
    l = pl.program_id(0)

    @pl.when(l == 0)
    def _():
        act_ref[...] = x_ref[...]                                   # load embeddings once

    B, T, H = act_ref.shape
    S = mem_ref.shape[1]
    x = act_ref[...].reshape(B * T, H)                              # (M, H) f32
    gs = lng_ref[0]                                                 # (3, H) norm1/2/3 gamma
    bs = lnb_ref[0]                                                 # (3, H) norm1/2/3 beta

    # causal additive mask built in-kernel (two iota compares; no HBM mask tensor)
    rows = lax.broadcasted_iota(jnp.int32, (T, T), 0)
    cols = lax.broadcasted_iota(jnp.int32, (T, T), 1)
    causal = jnp.where(cols <= rows, 0.0, -1e30).astype(jnp.float32)

    # ---- self-attention block (post-norm residual, like nn.TransformerDecoderLayer) ----
    qkv = (jnp.dot(x.astype(jnp.bfloat16), wqkv_ref[0],
                   preferred_element_type=jnp.float32) + bqkv_ref[0])     # (M, 3H)
    qkv = qkv.reshape(B, T, 3 * H).astype(jnp.bfloat16)                   # single cast
    attn = _mha(qkv[:, :, :H], qkv[:, :, H:2 * H], qkv[:, :, 2 * H:],
                wo1_ref, bo1_ref, causal, num_heads)
    y = _layernorm(x + attn, gs[0:1], bs[0:1], eps)

    # ---- cross-attention over encoder memory (no mask at all) ----
    mem = mem_ref[...].reshape(B * S, H)
    q = (jnp.dot(y.astype(jnp.bfloat16), wq_ref[0],
                 preferred_element_type=jnp.float32) + bq_ref[0])          # (M, H)
    kv = (jnp.dot(mem.astype(jnp.bfloat16), wkv_ref[0],
                  preferred_element_type=jnp.float32) + bkv_ref[0])        # (B*S, 2H)
    q = q.reshape(B, T, H).astype(jnp.bfloat16)
    kv = kv.reshape(B, S, 2 * H).astype(jnp.bfloat16)
    attn2 = _mha(q, kv[:, :, :H], kv[:, :, H:], wo2_ref, bo2_ref, None, num_heads)
    y = _layernorm(y + attn2, gs[1:2], bs[1:2], eps)

    # ---- feed-forward (full FF width; (B*T,FF) hidden never leaves VMEM/vregs) ----
    hid = (jnp.dot(y.astype(jnp.bfloat16), w1_ref[0],
                   preferred_element_type=jnp.float32) + b1_ref[0])        # (M, FF)
    hid = jnp.maximum(hid, 0.0)
    ff = (jnp.dot(hid.astype(jnp.bfloat16), w2_ref[0],
                  preferred_element_type=jnp.float32) + b2_ref[0])         # (M, H)
    y = _layernorm(y + ff, gs[2:3], bs[2:3], eps)

    act_ref[...] = y.reshape(B, T, H)                               # stays resident

    @pl.when(l == pl.num_programs(0) - 1)
    def _():
        o_ref[...] = act_ref[...].astype(o_ref.dtype)               # single bf16 writeback


def decoder_stack(x, memory, lp, num_heads, eps=1e-5):
    B, T, H = x.shape
    S = memory.shape[1]
    L = lp["w_qkv"].shape[0]
    FF = lp["w1"].shape[2]

    def wspec(d1, d2):
        return pl.BlockSpec((1, d1, d2), lambda l: (l, 0, 0))

    kern = functools.partial(_decoder_stack_kernel, num_heads=num_heads, eps=eps)
    return pl.pallas_call(
        kern,
        out_shape=jax.ShapeDtypeStruct((B, T, H), jnp.bfloat16),
        grid=(L,),
        in_specs=[
            pl.BlockSpec((B, T, H), lambda l: (0, 0, 0)),   # embeddings (resident)
            pl.BlockSpec((B, S, H), lambda l: (0, 0, 0)),   # encoder memory (resident)
            wspec(H, 3 * H), wspec(1, 3 * H),               # w_qkv, b_qkv (Q pre-scaled)
            wspec(H, H), wspec(1, H),                       # self-attn W_o, b_o
            wspec(H, H), wspec(1, H),                       # cross-attn W_q, b_q (pre-scaled)
            wspec(H, 2 * H), wspec(1, 2 * H),               # cross-attn W_kv, b_kv
            wspec(H, H), wspec(1, H),                       # cross-attn W_o, b_o
            wspec(H, FF), wspec(1, FF),                     # lin1
            wspec(FF, H), wspec(1, H),                      # lin2
            wspec(3, H), wspec(3, H),                       # norm1/2/3 gamma, beta stacks
        ],
        out_specs=pl.BlockSpec((B, T, H), lambda l: (0, 0, 0)),
        scratch_shapes=[pltpu.VMEM((B, T, H), jnp.float32)],
        compiler_params=pltpu.CompilerParams(dimension_semantics=("arbitrary",)),
    )(x, memory,
      lp["w_qkv"], lp["b_qkv"], lp["w_o1"], lp["b_o1"],
      lp["w_q"], lp["b_q"], lp["w_kv"], lp["b_kv"], lp["w_o2"], lp["b_o2"],
      lp["w1"], lp["b1"], lp["w2"], lp["b2"],
      lp["ln_g"], lp["ln_b"])


# ----------------------------------------------------------------------------
# fc_out: (M, H) @ (H, V) + b, tiled along the vocab (lane) dimension
# ----------------------------------------------------------------------------
def _fc_out_kernel(x_ref, w_ref, b_ref, o_ref):
    o_ref[...] = (jnp.dot(x_ref[...], w_ref[...],
                          preferred_element_type=jnp.float32) + b_ref[...])


def fc_out(x2d, w, b):
    M, H = x2d.shape
    V = w.shape[1]
    tn = V
    for cand in (512, 256, 128):
        if V % cand == 0:
            tn = cand
            break
    return pl.pallas_call(
        _fc_out_kernel,
        out_shape=jax.ShapeDtypeStruct((M, V), jnp.float32),
        grid=(V // tn,),
        in_specs=[
            pl.BlockSpec((M, H), lambda n: (0, 0)),
            pl.BlockSpec((H, tn), lambda n: (0, n)),
            pl.BlockSpec((1, tn), lambda n: (0, n)),
        ],
        out_specs=pl.BlockSpec((M, tn), lambda n: (0, n)),
        compiler_params=pltpu.CompilerParams(dimension_semantics=("parallel",)),
    )(x2d, w, b.reshape(1, -1))


# ----------------------------------------------------------------------------
# Model glue (plain JAX) — matches nn.TransformerDecoderLayer (post-norm, ReLU)
# ----------------------------------------------------------------------------
def make_positional_encoding(d_model, max_len=500):
    position = jnp.arange(max_len, dtype=jnp.float32)[:, None]
    div_term = jnp.exp(jnp.arange(0, d_model, 2, dtype=jnp.float32)
                       * (-math.log(10000.0) / d_model))
    pe = jnp.zeros((max_len, d_model), jnp.float32)
    pe = pe.at[:, 0::2].set(jnp.sin(position * div_term))
    pe = pe.at[:, 1::2].set(jnp.cos(position * div_term))
    return pe


def transformer_decoder_forward(params, encoder_outputs, tgt, tgt_mask, num_heads):
    """encoder_outputs: (B, S, H); tgt: (B, T) int32.

    tgt_mask is accepted for interface parity with the PyTorch module but the standard
    causal mask is generated in-kernel (broadcasted_iota), so it is not consumed here.
    """
    del tgt_mask
    B, T = tgt.shape
    H = params["embedding"].shape[1]
    x = jnp.take(params["embedding"], tgt, axis=0)        # embedding gather (glue)
    x = x + params["pe"][:T][None, :, :]                  # positional encoding
    y = decoder_stack(x, encoder_outputs, params["layers"], num_heads)
    logits = fc_out(y.reshape(B * T, H), params["fc_w"], params["fc_b"])
    return logits.reshape(B, T, -1)


# ----------------------------------------------------------------------------
# Deterministic parameter init.  Shapes follow the PyTorch module; matmul weights are
# bf16 and stacked along a leading layer axis so they can stream through the layer grid.
# The 1/sqrt(Dh) attention scale is folded offline into the Q projections.
# ----------------------------------------------------------------------------
def _dense(k, shape, scale=0.02, dtype=jnp.float32):
    return (scale * jax.random.normal(k, shape, jnp.float32)).astype(dtype)


def init_params(key, vocab_size, hidden_dim, num_layers, num_heads, ffn_dim):
    H, L, FF = hidden_dim, num_layers, ffn_dim
    dh = H // num_heads
    qscale = 1.0 / math.sqrt(dh)
    ks = jax.random.split(key, 20)

    w_qkv = _dense(ks[0], (L, H, 3 * H))
    w_qkv = w_qkv.at[:, :, :H].multiply(qscale).astype(jnp.bfloat16)
    b_qkv = _dense(ks[1], (L, 1, 3 * H))
    b_qkv = b_qkv.at[:, :, :H].multiply(qscale)

    layers = {
        "w_qkv": w_qkv, "b_qkv": b_qkv,
        "w_o1": _dense(ks[2], (L, H, H), dtype=jnp.bfloat16),
        "b_o1": _dense(ks[3], (L, 1, H)),
        "w_q": (_dense(ks[4], (L, H, H)) * qscale).astype(jnp.bfloat16),
        "b_q": _dense(ks[5], (L, 1, H)) * qscale,
        "w_kv": _dense(ks[6], (L, H, 2 * H), dtype=jnp.bfloat16),
        "b_kv": _dense(ks[7], (L, 1, 2 * H)),
        "w_o2": _dense(ks[8], (L, H, H), dtype=jnp.bfloat16),
        "b_o2": _dense(ks[9], (L, 1, H)),
        "w1": _dense(ks[10], (L, H, FF), dtype=jnp.bfloat16),
        "b1": _dense(ks[11], (L, 1, FF)),
        "w2": _dense(ks[12], (L, FF, H), dtype=jnp.bfloat16),
        "b2": _dense(ks[13], (L, 1, H)),
        "ln_g": jnp.ones((L, 3, H), jnp.float32),
        "ln_b": jnp.zeros((L, 3, H), jnp.float32),
    }
    return {
        "embedding": jax.random.normal(ks[14], (vocab_size, H), jnp.float32),
        "pe": make_positional_encoding(H),
        "layers": layers,
        "fc_w": _dense(ks[15], (H, vocab_size), dtype=jnp.bfloat16),
        "fc_b": _dense(ks[16], (vocab_size,)),
    }


# ----------------------------------------------------------------------------
if __name__ == "__main__":
    # Module defaults are hidden_dim=256, num_layers=4, num_heads=8, dim_feedforward=2048.
    # Small but lane-dense (128-multiple) test shapes:
    vocab_size, hidden_dim, num_layers, num_heads = 128, 128, 2, 8
    ffn_dim = 2048                 # nn.TransformerDecoderLayer default dim_feedforward
    B, T, S = 2, 8, 16             # S = H*W of the (not modeled) encoder feature map

    key = jax.random.PRNGKey(0)
    kp, ke, kt = jax.random.split(key, 3)

    params = init_params(kp, vocab_size, hidden_dim, num_layers, num_heads, ffn_dim)
    encoder_outputs = jax.random.normal(ke, (B, S, hidden_dim), jnp.float32)
    tgt = jax.random.randint(kt, (B, T), 0, vocab_size, dtype=jnp.int32)

    causal = jnp.tril(jnp.ones((T, T), jnp.bool_))
    tgt_mask = jnp.where(causal, 0.0, -1e9).astype(jnp.float32)  # interface parity only

    fwd = jax.jit(functools.partial(transformer_decoder_forward, num_heads=num_heads))
    out = jax.block_until_ready(fwd(params, encoder_outputs, tgt, tgt_mask))
    assert out.shape == (B, T, vocab_size), out.shape
    assert bool(jnp.all(jnp.isfinite(out)))
    print("KERNEL_OK")
</pallas_src>

<mosaic_0001>
module attributes {stable_mosaic.version = 11 : i64} {
  func.func @_fc_out_kernel(%arg0: i32, %arg1: memref<16x128xbf16, #tpu.memory_space<vmem>>, %arg2: memref<128x128xbf16, #tpu.memory_space<vmem>>, %arg3: memref<1x128xf32, #tpu.memory_space<vmem>>, %arg4: memref<16x128xf32, #tpu.memory_space<vmem>>) attributes {dimension_semantics = [#tpu.dimension_semantics<parallel>], iteration_bounds = array<i64: 1>, scalar_prefetch = 0 : i64, scratch_operands = 0 : i64, tpu.core_type = #tpu.core_type<tc>, window_params = [{pipeline_mode = #tpu.pipeline_mode<synchronous>, transform_indices = @transform_0, window_bounds = array<i64: 16, 128>}, {transform_indices = @transform_1, window_bounds = array<i64: 128, 128>}, {transform_indices = @transform_2, window_bounds = array<i64: 1, 128>}, {transform_indices = @transform_3, window_bounds = array<i64: 16, 128>}]} {
    %c0 = arith.constant 0 : index
    %c0_0 = arith.constant 0 : index
    %0 = vector.load %arg1[%c0, %c0_0] : memref<16x128xbf16, #tpu.memory_space<vmem>>, vector<16x128xbf16>
    %c0_1 = arith.constant 0 : index
    %c0_2 = arith.constant 0 : index
    %1 = vector.load %arg2[%c0_1, %c0_2] : memref<128x128xbf16, #tpu.memory_space<vmem>>, vector<128x128xbf16>
    %cst = arith.constant dense<0.000000e+00> : vector<16x128xf32>
    %2 = tpu.matmul %0, %1, %cst {dimension_numbers = #tpu.dot_dimension_numbers<[1], [0], [0], [1], [0, 0, 1, 1], [], []>} : vector<16x128xbf16>, vector<128x128xbf16>, vector<16x128xf32> -> vector<16x128xf32>
    %c0_3 = arith.constant 0 : index
    %c0_4 = arith.constant 0 : index
    %3 = vector.load %arg3[%c0_3, %c0_4] : memref<1x128xf32, #tpu.memory_space<vmem>>, vector<1x128xf32>
    %4 = vector.broadcast %3 : vector<1x128xf32> to vector<16x128xf32>
    %5 = arith.addf %2, %4 : vector<16x128xf32>
    %c0_5 = arith.constant 0 : index
    %c0_6 = arith.constant 0 : index
    %6 = vector.load %arg4[%c0_5, %c0_6] : memref<16x128xf32, #tpu.memory_space<vmem>>, vector<16x128xf32>
    tpu.vector_store %arg4[%c0_5, %c0_6], %5 {strides = array<i32>} : memref<16x128xf32, #tpu.memory_space<vmem>>, vector<16x128xf32>,
    return
  }
  func.func @transform_0(%arg0: i32) -> (i32, i32) {
    %c0_i32 = arith.constant 0 : i32
    %c0_i32_0 = arith.constant 0 : i32
    %c0_i32_1 = arith.constant 0 : i32
    return %c0_i32, %c0_i32_0 : i32, i32
  }
  func.func @transform_1(%arg0: i32) -> (i32, i32) {
    %c0_i32 = arith.constant 0 : i32
    %c0_i32_0 = arith.constant 0 : i32
    return %c0_i32, %arg0 : i32, i32
  }
  func.func @transform_2(%arg0: i32) -> (i32, i32) {
    %c0_i32 = arith.constant 0 : i32
    %c0_i32_0 = arith.constant 0 : i32
    return %c0_i32, %arg0 : i32, i32
  }
  func.func @transform_3(%arg0: i32) -> (i32, i32) {
    %c0_i32 = arith.constant 0 : i32
    %c0_i32_0 = arith.constant 0 : i32
    return %c0_i32, %arg0 : i32, i32
  }
}

module attributes {stable_mosaic.version = 11 : i64} {
  func.func @_decoder_stack_kernel(%arg0: i32, %arg1: memref<2x8x128xf32, #tpu.memory_space<vmem>>, %arg2: memref<2x16x128xf32, #tpu.memory_space<vmem>>, %arg3: memref<1x128x384xbf16, #tpu.memory_space<vmem>>, %arg4: memref<1x1x384xf32, #tpu.memory_space<vmem>>, %arg5: memref<1x128x128xbf16, #tpu.memory_space<vmem>>, %arg6: memref<1x1x128xf32, #tpu.memory_space<vmem>>, %arg7: memref<1x128x128xbf16, #tpu.memory_space<vmem>>, %arg8: memref<1x1x128xf32, #tpu.memory_space<vmem>>, %arg9: memref<1x128x256xbf16, #tpu.memory_space<vmem>>, %arg10: memref<1x1x256xf32, #tpu.memory_space<vmem>>, %arg11: memref<1x128x128xbf16, #tpu.memory_space<vmem>>, %arg12: memref<1x1x128xf32, #tpu.memory_space<vmem>>, %arg13: memref<1x128x2048xbf16, #tpu.memory_space<vmem>>, %arg14: memref<1x1x2048xf32, #tpu.memory_space<vmem>>, %arg15: memref<1x2048x128xbf16, #tpu.memory_space<vmem>>, %arg16: memref<1x1x128xf32, #tpu.memory_space<vmem>>, %arg17: memref<1x3x128xf32, #tpu.memory_space<vmem>>, %arg18: memref<1x3x128xf32, #tpu.memory_space<vmem>>, %arg19: memref<2x8x128xbf16, #tpu.memory_space<vmem>>, %arg20: memref<2x8x128xf32, #tpu.memory_space<vmem>>) attributes {dimension_semantics = [#tpu.dimension_semantics<arbitrary>], iteration_bounds = array<i64: 2>, scalar_prefetch = 0 : i64, scratch_operands = 1 : i64, tpu.core_type = #tpu.core_type<tc>, window_params = [{pipeline_mode = #tpu.pipeline_mode<synchronous>, transform_indices = @transform_0, window_bounds = array<i64: 2, 8, 128>}, {pipeline_mode = #tpu.pipeline_mode<synchronous>, transform_indices = @transform_1, window_bounds = array<i64: 2, 16, 128>}, {transform_indices = @transform_2, window_bounds = array<i64: 1, 128, 384>}, {transform_indices = @transform_3, window_bounds = array<i64: 1, 1, 384>}, {transform_indices = @transform_4, window_bounds = array<i64: 1, 128, 128>}, {transform_indices = @transform_5, window_bounds = array<i64: 1, 1, 128>}, {transform_indices = @transform_6, window_bounds = array<i64: 1, 128, 128>}, {transform_indices = @transform_7, window_bounds = array<i64: 1, 1, 128>}, {transform_indices = @transform_8, window_bounds = array<i64: 1, 128, 256>}, {transform_indices = @transform_9, window_bounds = array<i64: 1, 1, 256>}, {transform_indices = @transform_10, window_bounds = array<i64: 1, 128, 128>}, {transform_indices = @transform_11, window_bounds = array<i64: 1, 1, 128>}, {transform_indices = @transform_12, window_bounds = array<i64: 1, 128, 2048>}, {transform_indices = @transform_13, window_bounds = array<i64: 1, 1, 2048>}, {transform_indices = @transform_14, window_bounds = array<i64: 1, 2048, 128>}, {transform_indices = @transform_15, window_bounds = array<i64: 1, 1, 128>}, {transform_indices = @transform_16, window_bounds = array<i64: 1, 3, 128>}, {transform_indices = @transform_17, window_bounds = array<i64: 1, 3, 128>}, {pipeline_mode = #tpu.pipeline_mode<synchronous>, transform_indices = @transform_18, window_bounds = array<i64: 2, 8, 128>}]} {
    %c0_i32 = arith.constant 0 : i32
    %0 = arith.cmpi eq, %arg0, %c0_i32 : i32
    %1 = arith.extui %0 : i1 to i32
    %c0_i32_0 = arith.constant 0 : i32
    %2 = arith.cmpi ne, %1, %c0_i32_0 : i32
    scf.if %2 {
      %c0_146 = arith.constant 0 : index
      %c0_147 = arith.constant 0 : index
      %c0_148 = arith.constant 0 : index
      %444 = vector.load %arg1[%c0_146, %c0_147, %c0_148] : memref<2x8x128xf32, #tpu.memory_space<vmem>>, vector<2x8x128xf32>
      %c0_149 = arith.constant 0 : index
      %c0_150 = arith.constant 0 : index
      %c0_151 = arith.constant 0 : index
      %445 = vector.load %arg20[%c0_149, %c0_150, %c0_151] : memref<2x8x128xf32, #tpu.memory_space<vmem>>, vector<2x8x128xf32>
      tpu.vector_store %arg20[%c0_149, %c0_150, %c0_151], %444 {strides = array<i32>} : memref<2x8x128xf32, #tpu.memory_space<vmem>>, vector<2x8x128xf32>,
    } else {
    }
    %c0 = arith.constant 0 : index
    %c0_1 = arith.constant 0 : index
    %c0_2 = arith.constant 0 : index
    %3 = vector.load %arg20[%c0, %c0_1, %c0_2] : memref<2x8x128xf32, #tpu.memory_space<vmem>>, vector<2x8x128xf32>
    %4 = vector.shape_cast %3 : vector<2x8x128xf32> to vector<16x128xf32>
    %c0_3 = arith.constant 0 : index
    %c0_4 = arith.constant 0 : index
    %c0_5 = arith.constant 0 : index
    %5 = vector.load %arg17[%c0_3, %c0_4, %c0_5] : memref<1x3x128xf32, #tpu.memory_space<vmem>>, vector<1x3x128xf32>
    %6 = vector.shape_cast %5 : vector<1x3x128xf32> to vector<3x128xf32>
    %c0_6 = arith.constant 0 : index
    %c0_7 = arith.constant 0 : index
    %c0_8 = arith.constant 0 : index
    %7 = vector.load %arg18[%c0_6, %c0_7, %c0_8] : memref<1x3x128xf32, #tpu.memory_space<vmem>>, vector<1x3x128xf32>
    %8 = vector.shape_cast %7 : vector<1x3x128xf32> to vector<3x128xf32>
    %9 = tpu.iota {dimensions = array<i32: 0>} : vector<8x8xi32>
    %10 = tpu.iota {dimensions = array<i32: 1>} : vector<8x8xi32>
    %11 = arith.cmpi sle, %10, %9 : vector<8x8xi32>
    %cst = arith.constant 0.000000e+00 : f32
    %cst_9 = arith.constant -1.000000e+30 : f32
    %12 = vector.broadcast %cst : f32 to vector<8x8xf32>
    %13 = vector.broadcast %cst_9 : f32 to vector<8x8xf32>
    %14 = arith.select %11, %12, %13 : vector<8x8xi1>, vector<8x8xf32>
    %15 = arith.truncf %4 : vector<16x128xf32> to vector<16x128xbf16>
    %c0_10 = arith.constant 0 : index
    %c0_11 = arith.constant 0 : index
    %c0_12 = arith.constant 0 : index
    %16 = vector.load %arg3[%c0_10, %c0_11, %c0_12] : memref<1x128x384xbf16, #tpu.memory_space<vmem>>, vector<1x128x384xbf16>
    %17 = vector.shape_cast %16 : vector<1x128x384xbf16> to vector<128x384xbf16>
    %cst_13 = arith.constant dense<0.000000e+00> : vector<16x384xf32>
    %18 = tpu.matmul %15, %17, %cst_13 {dimension_numbers = #tpu.dot_dimension_numbers<[1], [0], [0], [1], [0, 0, 1, 1], [], []>} : vector<16x128xbf16>, vector<128x384xbf16>, vector<16x384xf32> -> vector<16x384xf32>
    %c0_14 = arith.constant 0 : index
    %c0_15 = arith.constant 0 : index
    %c0_16 = arith.constant 0 : index
    %19 = vector.load %arg4[%c0_14, %c0_15, %c0_16] : memref<1x1x384xf32, #tpu.memory_space<vmem>>, vector<1x1x384xf32>
    %20 = vector.shape_cast %19 : vector<1x1x384xf32> to vector<1x384xf32>
    %21 = vector.broadcast %20 : vector<1x384xf32> to vector<16x384xf32>
    %22 = arith.addf %18, %21 : vector<16x384xf32>
    %23 = vector.shape_cast %22 : vector<16x384xf32> to vector<2x8x384xf32>
    %24 = arith.truncf %23 : vector<2x8x384xf32> to vector<2x8x384xbf16>
    %25 = vector.extract_strided_slice %24 {offsets = [0, 0, 0], sizes = [2, 8, 128], strides = [1, 1, 1]} : vector<2x8x384xbf16> to vector<2x8x128xbf16>
    %26 = vector.extract_strided_slice %24 {offsets = [0, 0, 128], sizes = [2, 8, 128], strides = [1, 1, 1]} : vector<2x8x384xbf16> to vector<2x8x128xbf16>
    %27 = vector.extract_strided_slice %24 {offsets = [0, 0, 256], sizes = [2, 8, 128], strides = [1, 1, 1]} : vector<2x8x384xbf16> to vector<2x8x128xbf16>
    %28 = vector.extract_strided_slice %25 {offsets = [0, 0, 0], sizes = [2, 8, 16], strides = [1, 1, 1]} : vector<2x8x128xbf16> to vector<2x8x16xbf16>
    %29 = vector.extract_strided_slice %26 {offsets = [0, 0, 0], sizes = [2, 8, 16], strides = [1, 1, 1]} : vector<2x8x128xbf16> to vector<2x8x16xbf16>
    "tpu.trace_start"() <{level = 10 : i32, message = "bqd,bkd->bqk"}> : () -> ()
    %cst_17 = arith.constant dense<0.000000e+00> : vector<2x8x8xf32>
    %30 = tpu.matmul %28, %29, %cst_17 {dimension_numbers = #tpu.dot_dimension_numbers<[2], [2], [1], [1], [0, 0, 0, 1, 1, 1], [0], [0]>} : vector<2x8x16xbf16>, vector<2x8x16xbf16>, vector<2x8x8xf32> -> vector<2x8x8xf32>
    "tpu.trace_stop"() : () -> ()
    %31 = vector.shape_cast %14 : vector<8x8xf32> to vector<1x8x8xf32>
    %32 = vector.broadcast %31 : vector<1x8x8xf32> to vector<2x8x8xf32>
    %33 = arith.addf %30, %32 : vector<2x8x8xf32>
    %cst_18 = arith.constant dense<0xFF800000> : vector<2x8xf32>
    %34 = vector.multi_reduction <maximumf>, %33, %cst_18 [2] : vector<2x8x8xf32> to vector<2x8xf32>
    %35 = vector.shape_cast %34 : vector<2x8xf32> to vector<2x8x1xf32>
    %36 = vector.broadcast %35 : vector<2x8x1xf32> to vector<2x8x8xf32>
    %37 = arith.subf %33, %36 : vector<2x8x8xf32>
    %38 = math.exp %37 : vector<2x8x8xf32>
    %cst_19 = arith.constant dense<0.000000e+00> : vector<2x8xf32>
    %39 = vector.multi_reduction <add>, %38, %cst_19 [2] : vector<2x8x8xf32> to vector<2x8xf32>
    %40 = vector.shape_cast %39 : vector<2x8xf32> to vector<2x8x1xf32>
    %41 = tpu.reciprocal %40 {approx = true} : vector<2x8x1xf32> -> vector<2x8x1xf32>
    %42 = vector.broadcast %41 : vector<2x8x1xf32> to vector<2x8x8xf32>
    %43 = arith.mulf %38, %42 : vector<2x8x8xf32>
    %44 = arith.truncf %43 : vector<2x8x8xf32> to vector<2x8x8xbf16>
    %45 = vector.extract_strided_slice %27 {offsets = [0, 0, 0], sizes = [2, 8, 16], strides = [1, 1, 1]} : vector<2x8x128xbf16> to vector<2x8x16xbf16>
    "tpu.trace_start"() <{level = 10 : i32, message = "bqk,bkd->bqd"}> : () -> ()
    %cst_20 = arith.constant dense<0.000000e+00> : vector<2x8x16xf32>
    %46 = tpu.matmul %44, %45, %cst_20 {dimension_numbers = #tpu.dot_dimension_numbers<[2], [1], [1], [2], [0, 0, 0, 1, 1, 2], [0], [0]>} : vector<2x8x8xbf16>, vector<2x8x16xbf16>, vector<2x8x16xf32> -> vector<2x8x16xf32>
    "tpu.trace_stop"() : () -> ()
    %47 = vector.extract_strided_slice %25 {offsets = [0, 0, 16], sizes = [2, 8, 16], strides = [1, 1, 1]} : vector<2x8x128xbf16> to vector<2x8x16xbf16>
    %48 = vector.extract_strided_slice %26 {offsets = [0, 0, 16], sizes = [2, 8, 16], strides = [1, 1, 1]} : vector<2x8x128xbf16> to vector<2x8x16xbf16>
    "tpu.trace_start"() <{level = 10 : i32, message = "bqd,bkd->bqk"}> : () -> ()
    %cst_21 = arith.constant dense<0.000000e+00> : vector<2x8x8xf32>
    %49 = tpu.matmul %47, %48, %cst_21 {dimension_numbers = #tpu.dot_dimension_numbers<[2], [2], [1], [1], [0, 0, 0, 1, 1, 1], [0], [0]>} : vector<2x8x16xbf16>, vector<2x8x16xbf16>, vector<2x8x8xf32> -> vector<2x8x8xf32>
    "tpu.trace_stop"() : () -> ()
    %50 = vector.shape_cast %14 : vector<8x8xf32> to vector<1x8x8xf32>
    %51 = vector.broadcast %50 : vector<1x8x8xf32> to vector<2x8x8xf32>
    %52 = arith.addf %49, %51 : vector<2x8x8xf32>
    %cst_22 = arith.constant dense<0xFF800000> : vector<2x8xf32>
    %53 = vector.multi_reduction <maximumf>, %52, %cst_22 [2] : vector<2x8x8xf32> to vector<2x8xf32>
    %54 = vector.shape_cast %53 : vector<2x8xf32> to vector<2x8x1xf32>
    %55 = vector.broadcast %54 : vector<2x8x1xf32> to vector<2x8x8xf32>
    %56 = arith.subf %52, %55 : vector<2x8x8xf32>
    %57 = math.exp %56 : vector<2x8x8xf32>
    %cst_23 = arith.constant dense<0.000000e+00> : vector<2x8xf32>
    %58 = vector.multi_reduction <add>, %57, %cst_23 [2] : vector<2x8x8xf32> to vector<2x8xf32>
    %59 = vector.shape_cast %58 : vector<2x8xf32> to vector<2x8x1xf32>
    %60 = tpu.reciprocal %59 {approx = true} : vector<2x8x1xf32> -> vector<2x8x1xf32>
    %61 = vector.broadcast %60 : vector<2x8x1xf32> to vector<2x8x8xf32>
    %62 = arith.mulf %57, %61 : vector<2x8x8xf32>
    %63 = arith.truncf %62 : vector<2x8x8xf32> to vector<2x8x8xbf16>
    %64 = vector.extract_strided_slice %27 {offsets = [0, 0, 16], sizes = [2, 8, 16], strides = [1, 1, 1]} : vector<2x8x128xbf16> to vector<2x8x16xbf16>
    "tpu.trace_start"() <{level = 10 : i32, message = "bqk,bkd->bqd"}> : () -> ()
    %cst_24 = arith.constant dense<0.000000e+00> : vector<2x8x16xf32>
    %65 = tpu.matmul %63, %64, %cst_24 {dimension_numbers = #tpu.dot_dimension_numbers<[2], [1], [1], [2], [0, 0, 0, 1, 1, 2], [0], [0]>} : vector<2x8x8xbf16>, vector<2x8x16xbf16>, vector<2x8x16xf32> -> vector<2x8x16xf32>
    "tpu.trace_stop"() : () -> ()
    %66 = vector.extract_strided_slice %25 {offsets = [0, 0, 32], sizes = [2, 8, 16], strides = [1, 1, 1]} : vector<2x8x128xbf16> to vector<2x8x16xbf16>
    %67 = vector.extract_strided_slice %26 {offsets = [0, 0, 32], sizes = [2, 8, 16], strides = [1, 1, 1]} : vector<2x8x128xbf16> to vector<2x8x16xbf16>
    "tpu.trace_start"() <{level = 10 : i32, message = "bqd,bkd->bqk"}> : () -> ()
    %cst_25 = arith.constant dense<0.000000e+00> : vector<2x8x8xf32>
    %68 = tpu.matmul %66, %67, %cst_25 {dimension_numbers = #tpu.dot_dimension_numbers<[2], [2], [1], [1], [0, 0, 0, 1, 1, 1], [0], [0]>} : vector<2x8x16xbf16>, vector<2x8x16xbf16>, vector<2x8x8xf32> -> vector<2x8x8xf32>
    "tpu.trace_stop"() : () -> ()
    %69 = vector.shape_cast %14 : vector<8x8xf32> to vector<1x8x8xf32>
    %70 = vector.broadcast %69 : vector<1x8x8xf32> to vector<2x8x8xf32>
    %71 = arith.addf %68, %70 : vector<2x8x8xf32>
    %cst_26 = arith.constant dense<0xFF800000> : vector<2x8xf32>
    %72 = vector.multi_reduction <maximumf>, %71, %cst_26 [2] : vector<2x8x8xf32> to vector<2x8xf32>
    %73 = vector.shape_cast %72 : vector<2x8xf32> to vector<2x8x1xf32>
    %74 = vector.broadcast %73 : vector<2x8x1xf32> to vector<2x8x8xf32>
    %75 = arith.subf %71, %74 : vector<2x8x8xf32>
    %76 = math.exp %75 : vector<2x8x8xf32>
    %cst_27 = arith.constant dense<0.000000e+00> : vector<2x8xf32>
    %77 = vector.multi_reduction <add>, %76, %cst_27 [2] : vector<2x8x8xf32> to vector<2x8xf32>
    %78 = vector.shape_cast %77 : vector<2x8xf32> to vector<2x8x1xf32>
    %79 = tpu.reciprocal %78 {approx = true} : vector<2x8x1xf32> -> vector<2x8x1xf32>
    %80 = vector.broadcast %79 : vector<2x8x1xf32> to vector<2x8x8xf32>
    %81 = arith.mulf %76, %80 : vector<2x8x8xf32>
    %82 = arith.truncf %81 : vector<2x8x8xf32> to vector<2x8x8xbf16>
    %83 = vector.extract_strided_slice %27 {offsets = [0, 0, 32], sizes = [2, 8, 16], strides = [1, 1, 1]} : vector<2x8x128xbf16> to vector<2x8x16xbf16>
    "tpu.trace_start"() <{level = 10 : i32, message = "bqk,bkd->bqd"}> : () -> ()
    %cst_28 = arith.constant dense<0.000000e+00> : vector<2x8x16xf32>
    %84 = tpu.matmul %82, %83, %cst_28 {dimension_numbers = #tpu.dot_dimension_numbers<[2], [1], [1], [2], [0, 0, 0, 1, 1, 2], [0], [0]>} : vector<2x8x8xbf16>, vector<2x8x16xbf16>, vector<2x8x16xf32> -> vector<2x8x16xf32>
    "tpu.trace_stop"() : () -> ()
    %85 = vector.extract_strided_slice %25 {offsets = [0, 0, 48], sizes = [2, 8, 16], strides = [1, 1, 1]} : vector<2x8x128xbf16> to vector<2x8x16xbf16>
    %86 = vector.extract_strided_slice %26 {offsets = [0, 0, 48], sizes = [2, 8, 16], strides = [1, 1, 1]} : vector<2x8x128xbf16> to vector<2x8x16xbf16>
    "tpu.trace_start"() <{level = 10 : i32, message = "bqd,bkd->bqk"}> : () -> ()
    %cst_29 = arith.constant dense<0.000000e+00> : vector<2x8x8xf32>
    %87 = tpu.matmul %85, %86, %cst_29 {dimension_numbers = #tpu.dot_dimension_numbers<[2], [2], [1], [1], [0, 0, 0, 1, 1, 1], [0], [0]>} : vector<2x8x16xbf16>, vector<2x8x16xbf16>, vector<2x8x8xf32> -> vector<2x8x8xf32>
    "tpu.trace_stop"() : () -> ()
    %88 = vector.shape_cast %14 : vector<8x8xf32> to vector<1x8x8xf32>
    %89 = vector.broadcast %88 : vector<1x8x8xf32> to vector<2x8x8xf32>
    %90 = arith.addf %87, %89 : vector<2x8x8xf32>
    %cst_30 = arith.constant dense<0xFF800000> : vector<2x8xf32>
    %91 = vector.multi_reduction <maximumf>, %90, %cst_30 [2] : vector<2x8x8xf32> to vector<2x8xf32>
    %92 = vector.shape_cast %91 : vector<2x8xf32> to vector<2x8x1xf32>
    %93 = vector.broadcast %92 : vector<2x8x1xf32> to vector<2x8x8xf32>
    %94 = arith.subf %90, %93 : vector<2x8x8xf32>
    %95 = math.exp %94 : vector<2x8x8xf32>
    %cst_31 = arith.constant dense<0.000000e+00> : vector<2x8xf32>
    %96 = vector.multi_reduction <add>, %95, %cst_31 [2] : vector<2x8x8xf32> to vector<2x8xf32>
    %97 = vector.shape_cast %96 : vector<2x8xf32> to vector<2x8x1xf32>
    %98 = tpu.reciprocal %97 {approx = true} : vector<2x8x1xf32> -> vector<2x8x1xf32>
    %99 = vector.broadcast %98 : vector<2x8x1xf32> to vector<2x8x8xf32>
    %100 = arith.mulf %95, %99 : vector<2x8x8xf32>
    %101 = arith.truncf %100 : vector<2x8x8xf32> to vector<2x8x8xbf16>
    %102 = vector.extract_strided_slice %27 {offsets = [0, 0, 48], sizes = [2, 8, 16], strides = [1, 1, 1]} : vector<2x8x128xbf16> to vector<2x8x16xbf16>
    "tpu.trace_start"() <{level = 10 : i32, message = "bqk,bkd->bqd"}> : () -> ()
    %cst_32 = arith.constant dense<0.000000e+00> : vector<2x8x16xf32>
    %103 = tpu.matmul %101, %102, %cst_32 {dimension_numbers = #tpu.dot_dimension_numbers<[2], [1], [1], [2], [0, 0, 0, 1, 1, 2], [0], [0]>} : vector<2x8x8xbf16>, vector<2x8x16xbf16>, vector<2x8x16xf32> -> vector<2x8x16xf32>
    "tpu.trace_stop"() : () -> ()
    %104 = vector.extract_strided_slice %25 {offsets = [0, 0, 64], sizes = [2, 8, 16], strides = [1, 1, 1]} : vector<2x8x128xbf16> to vector<2x8x16xbf16>
    %105 = vector.extract_strided_slice %26 {offsets = [0, 0, 64], sizes = [2, 8, 16], strides = [1, 1, 1]} : vector<2x8x128xbf16> to vector<2x8x16xbf16>
    "tpu.trace_start"() <{level = 10 : i32, message = "bqd,bkd->bqk"}> : () -> ()
    %cst_33 = arith.constant dense<0.000000e+00> : vector<2x8x8xf32>
    %106 = tpu.matmul %104, %105, %cst_33 {dimension_numbers = #tpu.dot_dimension_numbers<[2], [2], [1], [1], [0, 0, 0, 1, 1, 1], [0], [0]>} : vector<2x8x16xbf16>, vector<2x8x16xbf16>, vector<2x8x8xf32> -> vector<2x8x8xf32>
    "tpu.trace_stop"() : () -> ()
    %107 = vector.shape_cast %14 : vector<8x8xf32> to vector<1x8x8xf32>
    %108 = vector.broadcast %107 : vector<1x8x8xf32> to vector<2x8x8xf32>
    %109 = arith.addf %106, %108 : vector<2x8x8xf32>
    %cst_34 = arith.constant dense<0xFF800000> : vector<2x8xf32>
    %110 = vector.multi_reduction <maximumf>, %109, %cst_34 [2] : vector<2x8x8xf32> to vector<2x8xf32>
    %111 = vector.shape_cast %110 : vector<2x8xf32> to vector<2x8x1xf32>
    %112 = vector.broadcast %111 : vector<2x8x1xf32> to vector<2x8x8xf32>
    %113 = arith.subf %109, %112 : vector<2x8x8xf32>
    %114 = math.exp %113 : vector<2x8x8xf32>
    %cst_35 = arith.constant dense<0.000000e+00> : vector<2x8xf32>
    %115 = vector.multi_reduction <add>, %114, %cst_35 [2] : vector<2x8x8xf32> to vector<2x8xf32>
    %116 = vector.shape_cast %115 : vector<2x8xf32> to vector<2x8x1xf32>
    %117 = tpu.reciprocal %116 {approx = true} : vector<2x8x1xf32> -> vector<2x8x1xf32>
    %118 = vector.broadcast %117 : vector<2x8x1xf32> to vector<2x8x8xf32>
    %119 = arith.mulf %114, %118 : vector<2x8x8xf32>
    %120 = arith.truncf %119 : vector<2x8x8xf32> to vector<2x8x8xbf16>
    %121 = vector.extract_strided_slice %27 {offsets = [0, 0, 64], sizes = [2, 8, 16], strides = [1, 1, 1]} : vector<2x8x128xbf16> to vector<2x8x16xbf16>
    "tpu.trace_start"() <{level = 10 : i32, message = "bqk,bkd->bqd"}> : () -> ()
    %cst_36 = arith.constant dense<0.000000e+00> : vector<2x8x16xf32>
    %122 = tpu.matmul %120, %121, %cst_36 {dimension_numbers = #tpu.dot_dimension_numbers<[2], [1], [1], [2], [0, 0, 0, 1, 1, 2], [0], [0]>} : vector<2x8x8xbf16>, vector<2x8x16xbf16>, vector<2x8x16xf32> -> vector<2x8x16xf32>
    "tpu.trace_stop"() : () -> ()
    %123 = vector.extract_strided_slice %25 {offsets = [0, 0, 80], sizes = [2, 8, 16], strides = [1, 1, 1]} : vector<2x8x128xbf16> to vector<2x8x16xbf16>
    %124 = vector.extract_strided_slice %26 {offsets = [0, 0, 80], sizes = [2, 8, 16], strides = [1, 1, 1]} : vector<2x8x128xbf16> to vector<2x8x16xbf16>
    "tpu.trace_start"() <{level = 10 : i32, message = "bqd,bkd->bqk"}> : () -> ()
    %cst_37 = arith.constant dense<0.000000e+00> : vector<2x8x8xf32>
    %125 = tpu.matmul %123, %124, %cst_37 {dimension_numbers = #tpu.dot_dimension_numbers<[2], [2], [1], [1], [0, 0, 0, 1, 1, 1], [0], [0]>} : vector<2x8x16xbf16>, vector<2x8x16xbf16>, vector<2x8x8xf32> -> vector<2x8x8xf32>
    "tpu.trace_stop"() : () -> ()
    %126 = vector.shape_cast %14 : vector<8x8xf32> to vector<1x8x8xf32>
    %127 = vector.broadcast %126 : vector<1x8x8xf32> to vector<2x8x8xf32>
    %128 = arith.addf %125, %127 : vector<2x8x8xf32>
    %cst_38 = arith.constant dense<0xFF800000> : vector<2x8xf32>
    %129 = vector.multi_reduction <maximumf>, %128, %cst_38 [2] : vector<2x8x8xf32> to vector<2x8xf32>
    %130 = vector.shape_cast %129 : vector<2x8xf32> to vector<2x8x1xf32>
    %131 = vector.broadcast %130 : vector<2x8x1xf32> to vector<2x8x8xf32>
    %132 = arith.subf %128, %131 : vector<2x8x8xf32>
    %133 = math.exp %132 : vector<2x8x8xf32>
    %cst_39 = arith.constant dense<0.000000e+00> : vector<2x8xf32>
    %134 = vector.multi_reduction <add>, %133, %cst_39 [2] : vector<2x8x8xf32> to vector<2x8xf32>
    %135 = vector.shape_cast %134 : vector<2x8xf32> to vector<2x8x1xf32>
    %136 = tpu.reciprocal %135 {approx = true} : vector<2x8x1xf32> -> vector<2x8x1xf32>
    %137 = vector.broadcast %136 : vector<2x8x1xf32> to vector<2x8x8xf32>
    %138 = arith.mulf %133, %137 : vector<2x8x8xf32>
    %139 = arith.truncf %138 : vector<2x8x8xf32> to vector<2x8x8xbf16>
    %140 = vector.extract_strided_slice %27 {offsets = [0, 0, 80], sizes = [2, 8, 16], strides = [1, 1, 1]} : vector<2x8x128xbf16> to vector<2x8x16xbf16>
    "tpu.trace_start"() <{level = 10 : i32, message = "bqk,bkd->bqd"}> : () -> ()
    %cst_40 = arith.constant dense<0.000000e+00> : vector<2x8x16xf32>
    %141 = tpu.matmul %139, %140, %cst_40 {dimension_numbers = #tpu.dot_dimension_numbers<[2], [1], [1], [2], [0, 0, 0, 1, 1, 2], [0], [0]>} : vector<2x8x8xbf16>, vector<2x8x16xbf16>, vector<2x8x16xf32> -> vector<2x8x16xf32>
    "tpu.trace_stop"() : () -> ()
    %142 = vector.extract_strided_slice %25 {offsets = [0, 0, 96], sizes = [2, 8, 16], strides = [1, 1, 1]} : vector<2x8x128xbf16> to vector<2x8x16xbf16>
    %143 = vector.extract_strided_slice %26 {offsets = [0, 0, 96], sizes = [2, 8, 16], strides = [1, 1, 1]} : vector<2x8x128xbf16> to vector<2x8x16xbf16>
    "tpu.trace_start"() <{level = 10 : i32, message = "bqd,bkd->bqk"}> : () -> ()
    %cst_41 = arith.constant dense<0.000000e+00> : vector<2x8x8xf32>
    %144 = tpu.matmul %142, %143, %cst_41 {dimension_numbers = #tpu.dot_dimension_numbers<[2], [2], [1], [1], [0, 0, 0, 1, 1, 1], [0], [0]>} : vector<2x8x16xbf16>, vector<2x8x16xbf16>, vector<2x8x8xf32> -> vector<2x8x8xf32>
    "tpu.trace_stop"() : () -> ()
    %145 = vector.shape_cast %14 : vector<8x8xf32> to vector<1x8x8xf32>
    %146 = vector.broadcast %145 : vector<1x8x8xf32> to vector<2x8x8xf32>
    %147 = arith.addf %144, %146 : vector<2x8x8xf32>
    %cst_42 = arith.constant dense<0xFF800000> : vector<2x8xf32>
    %148 = vector.multi_reduction <maximumf>, %147, %cst_42 [2] : vector<2x8x8xf32> to vector<2x8xf32>
    %149 = vector.shape_cast %148 : vector<2x8xf32> to vector<2x8x1xf32>
    %150 = vector.broadcast %149 : vector<2x8x1xf32> to vector<2x8x8xf32>
    %151 = arith.subf %147, %150 : vector<2x8x8xf32>
    %152 = math.exp %151 : vector<2x8x8xf32>
    %cst_43 = arith.constant dense<0.000000e+00> : vector<2x8xf32>
    %153 = vector.multi_reduction <add>, %152, %cst_43 [2] : vector<2x8x8xf32> to vector<2x8xf32>
    %154 = vector.shape_cast %153 : vector<2x8xf32> to vector<2x8x1xf32>
    %155 = tpu.reciprocal %154 {approx = true} : vector<2x8x1xf32> -> vector<2x8x1xf32>
    %156 = vector.broadcast %155 : vector<2x8x1xf32> to vector<2x8x8xf32>
    %157 = arith.mulf %152, %156 : vector<2x8x8xf32>
    %158 = arith.truncf %157 : vector<2x8x8xf32> to vector<2x8x8xbf16>
    %159 = vector.extract_strided_slice %27 {offsets = [0, 0, 96], sizes = [2, 8, 16], strides = [1, 1, 1]} : vector<2x8x128xbf16> to vector<2x8x16xbf16>
    "tpu.trace_start"() <{level = 10 : i32, message = "bqk,bkd->bqd"}> : () -> ()
    %cst_44 = arith.constant dense<0.000000e+00> : vector<2x8x16xf32>
    %160 = tpu.matmul %158, %159, %cst_44 {dimension_numbers = #tpu.dot_dimension_numbers<[2], [1], [1], [2], [0, 0, 0, 1, 1, 2], [0], [0]>} : vector<2x8x8xbf16>, vector<2x8x16xbf16>, vector<2x8x16xf32> -> vector<2x8x16xf32>
    "tpu.trace_stop"() : () -> ()
    %161 = vector.extract_strided_slice %25 {offsets = [0, 0, 112], sizes = [2, 8, 16], strides = [1, 1, 1]} : vector<2x8x128xbf16> to vector<2x8x16xbf16>
    %162 = vector.extract_strided_slice %26 {offsets = [0, 0, 112], sizes = [2, 8, 16], strides = [1, 1, 1]} : vector<2x8x128xbf16> to vector<2x8x16xbf16>
    "tpu.trace_start"() <{level = 10 : i32, message = "bqd,bkd->bqk"}> : () -> ()
    %cst_45 = arith.constant dense<0.000000e+00> : vector<2x8x8xf32>
    %163 = tpu.matmul %161, %162, %cst_45 {dimension_numbers = #tpu.dot_dimension_numbers<[2], [2], [1], [1], [0, 0, 0, 1, 1, 1], [0], [0]>} : vector<2x8x16xbf16>, vector<2x8x16xbf16>, vector<2x8x8xf32> -> vector<2x8x8xf32>
    "tpu.trace_stop"() : () -> ()
    %164 = vector.shape_cast %14 : vector<8x8xf32> to vector<1x8x8xf32>
    %165 = vector.broadcast %164 : vector<1x8x8xf32> to vector<2x8x8xf32>
    %166 = arith.addf %163, %165 : vector<2x8x8xf32>
    %cst_46 = arith.constant dense<0xFF800000> : vector<2x8xf32>
    %167 = vector.multi_reduction <maximumf>, %166, %cst_46 [2] : vector<2x8x8xf32> to vector<2x8xf32>
    %168 = vector.shape_cast %167 : vector<2x8xf32> to vector<2x8x1xf32>
    %169 = vector.broadcast %168 : vector<2x8x1xf32> to vector<2x8x8xf32>
    %170 = arith.subf %166, %169 : vector<2x8x8xf32>
    %171 = math.exp %170 : vector<2x8x8xf32>
    %cst_47 = arith.constant dense<0.000000e+00> : vector<2x8xf32>
    %172 = vector.multi_reduction <add>, %171, %cst_47 [2] : vector<2x8x8xf32> to vector<2x8xf32>
    %173 = vector.shape_cast %172 : vector<2x8xf32> to vector<2x8x1xf32>
    %174 = tpu.reciprocal %173 {approx = true} : vector<2x8x1xf32> -> vector<2x8x1xf32>
    %175 = vector.broadcast %174 : vector<2x8x1xf32> to vector<2x8x8xf32>
    %176 = arith.mulf %171, %175 : vector<2x8x8xf32>
    %177 = arith.truncf %176 : vector<2x8x8xf32> to vector<2x8x8xbf16>
    %178 = vector.extract_strided_slice %27 {offsets = [0, 0, 112], sizes = [2, 8, 16], strides = [1, 1, 1]} : vector<2x8x128xbf16> to vector<2x8x16xbf16>
    "tpu.trace_start"() <{level = 10 : i32, message = "bqk,bkd->bqd"}> : () -> ()
    %cst_48 = arith.constant dense<0.000000e+00> : vector<2x8x16xf32>
    %179 = tpu.matmul %177, %178, %cst_48 {dimension_numbers = #tpu.dot_dimension_numbers<[2], [1], [1], [2], [0, 0, 0, 1, 1, 2], [0], [0]>} : vector<2x8x8xbf16>, vector<2x8x16xbf16>, vector<2x8x16xf32> -> vector<2x8x16xf32>
    "tpu.trace_stop"() : () -> ()
    %180 = tpu.concatenate %46, %65, %84, %103, %122, %141, %160, %179 in 2 : vector<2x8x16xf32>, vector<2x8x16xf32>, vector<2x8x16xf32>, vector<2x8x16xf32>, vector<2x8x16xf32>, vector<2x8x16xf32>, vector<2x8x16xf32>, vector<2x8x16xf32> -> vector<2x8x128xf32>
    %181 = vector.shape_cast %180 : vector<2x8x128xf32> to vector<16x128xf32>
    %182 = arith.truncf %181 : vector<16x128xf32> to vector<16x128xbf16>
    %c0_49 = arith.constant 0 : index
    %c0_50 = arith.constant 0 : index
    %c0_51 = arith.constant 0 : index
    %183 = vector.load %arg5[%c0_49, %c0_50, %c0_51] : memref<1x128x128xbf16, #tpu.memory_space<vmem>>, vector<1x128x128xbf16>
    %184 = vector.shape_cast %183 : vector<1x128x128xbf16> to vector<128x128xbf16>
    %cst_52 = arith.constant dense<0.000000e+00> : vector<16x128xf32>
    %185 = tpu.matmul %182, %184, %cst_52 {dimension_numbers = #tpu.dot_dimension_numbers<[1], [0], [0], [1], [0, 0, 1, 1], [], []>} : vector<16x128xbf16>, vector<128x128xbf16>, vector<16x128xf32> -> vector<16x128xf32>
    %c0_53 = arith.constant 0 : index
    %c0_54 = arith.constant 0 : index
    %c0_55 = arith.constant 0 : index
    %186 = vector.load %arg6[%c0_53, %c0_54, %c0_55] : memref<1x1x128xf32, #tpu.memory_space<vmem>>, vector<1x1x128xf32>
    %187 = vector.shape_cast %186 : vector<1x1x128xf32> to vector<1x128xf32>
    %188 = vector.broadcast %187 : vector<1x128xf32> to vector<16x128xf32>
    %189 = arith.addf %185, %188 : vector<16x128xf32>
    %190 = arith.addf %4, %189 : vector<16x128xf32>
    %191 = vector.extract_strided_slice %6 {offsets = [0, 0], sizes = [1, 128], strides = [1, 1]} : vector<3x128xf32> to vector<1x128xf32>
    %192 = vector.extract_strided_slice %8 {offsets = [0, 0], sizes = [1, 128], strides = [1, 1]} : vector<3x128xf32> to vector<1x128xf32>
    %cst_56 = arith.constant dense<0.000000e+00> : vector<16xf32>
    %193 = vector.multi_reduction <add>, %190, %cst_56 [1] : vector<16x128xf32> to vector<16xf32>
    %194 = vector.shape_cast %193 : vector<16xf32> to vector<16x1xf32>
    %cst_57 = arith.constant 1.280000e+02 : f32
    %195 = vector.broadcast %cst_57 : f32 to vector<16x1xf32>
    %196 = arith.divf %194, %195 : vector<16x1xf32>
    %197 = vector.broadcast %196 : vector<16x1xf32> to vector<16x128xf32>
    %198 = arith.subf %190, %197 : vector<16x128xf32>
    %199 = arith.mulf %198, %198 : vector<16x128xf32>
    %cst_58 = arith.constant dense<0.000000e+00> : vector<16xf32>
    %200 = vector.multi_reduction <add>, %199, %cst_58 [1] : vector<16x128xf32> to vector<16xf32>
    %201 = vector.shape_cast %200 : vector<16xf32> to vector<16x1xf32>
    %cst_59 = arith.constant 1.280000e+02 : f32
    %202 = vector.broadcast %cst_59 : f32 to vector<16x1xf32>
    %203 = arith.divf %201, %202 : vector<16x1xf32>
    %cst_60 = arith.constant 9.99999974E-6 : f32
    %204 = vector.broadcast %cst_60 : f32 to vector<16x1xf32>
    %205 = arith.addf %203, %204 : vector<16x1xf32>
    %206 = math.rsqrt %205 : vector<16x1xf32>
    %207 = vector.broadcast %206 : vector<16x1xf32> to vector<16x128xf32>
    %208 = arith.mulf %198, %207 : vector<16x128xf32>
    %209 = vector.broadcast %191 : vector<1x128xf32> to vector<16x128xf32>
    %210 = arith.mulf %208, %209 : vector<16x128xf32>
    %211 = vector.broadcast %192 : vector<1x128xf32> to vector<16x128xf32>
    %212 = arith.addf %210, %211 : vector<16x128xf32>
    %c0_61 = arith.constant 0 : index
    %c0_62 = arith.constant 0 : index
    %c0_63 = arith.constant 0 : index
    %213 = vector.load %arg2[%c0_61, %c0_62, %c0_63] : memref<2x16x128xf32, #tpu.memory_space<vmem>>, vector<2x16x128xf32>
    %214 = vector.shape_cast %213 : vector<2x16x128xf32> to vector<32x128xf32>
    %215 = arith.truncf %212 : vector<16x128xf32> to vector<16x128xbf16>
    %c0_64 = arith.constant 0 : index
    %c0_65 = arith.constant 0 : index
    %c0_66 = arith.constant 0 : index
    %216 = vector.load %arg7[%c0_64, %c0_65, %c0_66] : memref<1x128x128xbf16, #tpu.memory_space<vmem>>, vector<1x128x128xbf16>
    %217 = vector.shape_cast %216 : vector<1x128x128xbf16> to vector<128x128xbf16>
    %cst_67 = arith.constant dense<0.000000e+00> : vector<16x128xf32>
    %218 = tpu.matmul %215, %217, %cst_67 {dimension_numbers = #tpu.dot_dimension_numbers<[1], [0], [0], [1], [0, 0, 1, 1], [], []>} : vector<16x128xbf16>, vector<128x128xbf16>, vector<16x128xf32> -> vector<16x128xf32>
    %c0_68 = arith.constant 0 : index
    %c0_69 = arith.constant 0 : index
    %c0_70 = arith.constant 0 : index
    %219 = vector.load %arg8[%c0_68, %c0_69, %c0_70] : memref<1x1x128xf32, #tpu.memory_space<vmem>>, vector<1x1x128xf32>
    %220 = vector.shape_cast %219 : vector<1x1x128xf32> to vector<1x128xf32>
    %221 = vector.broadcast %220 : vector<1x128xf32> to vector<16x128xf32>
    %222 = arith.addf %218, %221 : vector<16x128xf32>
    %223 = arith.truncf %214 : vector<32x128xf32> to vector<32x128xbf16>
    %c0_71 = arith.constant 0 : index
    %c0_72 = arith.constant 0 : index
    %c0_73 = arith.constant 0 : index
    %224 = vector.load %arg9[%c0_71, %c0_72, %c0_73] : memref<1x128x256xbf16, #tpu.memory_space<vmem>>, vector<1x128x256xbf16>
    %225 = vector.shape_cast %224 : vector<1x128x256xbf16> to vector<128x256xbf16>
    %cst_74 = arith.constant dense<0.000000e+00> : vector<32x256xf32>
    %226 = tpu.matmul %223, %225, %cst_74 {dimension_numbers = #tpu.dot_dimension_numbers<[1], [0], [0], [1], [0, 0, 1, 1], [], []>} : vector<32x128xbf16>, vector<128x256xbf16>, vector<32x256xf32> -> vector<32x256xf32>
    %c0_75 = arith.constant 0 : index
    %c0_76 = arith.constant 0 : index
    %c0_77 = arith.constant 0 : index
    %227 = vector.load %arg10[%c0_75, %c0_76, %c0_77] : memref<1x1x256xf32, #tpu.memory_space<vmem>>, vector<1x1x256xf32>
    %228 = vector.shape_cast %227 : vector<1x1x256xf32> to vector<1x256xf32>
    %229 = vector.broadcast %228 : vector<1x256xf32> to vector<32x256xf32>
    %230 = arith.addf %226, %229 : vector<32x256xf32>
    %231 = vector.shape_cast %222 : vector<16x128xf32> to vector<2x8x128xf32>
    %232 = arith.truncf %231 : vector<2x8x128xf32> to vector<2x8x128xbf16>
    %233 = vector.shape_cast %230 : vector<32x256xf32> to vector<2x16x256xf32>
    %234 = arith.truncf %233 : vector<2x16x256xf32> to vector<2x16x256xbf16>
    %235 = vector.extract_strided_slice %234 {offsets = [0, 0, 0], sizes = [2, 16, 128], strides = [1, 1, 1]} : vector<2x16x256xbf16> to vector<2x16x128xbf16>
    %236 = vector.extract_strided_slice %234 {offsets = [0, 0, 128], sizes = [2, 16, 128], strides = [1, 1, 1]} : vector<2x16x256xbf16> to vector<2x16x128xbf16>
    %237 = vector.extract_strided_slice %232 {offsets = [0, 0, 0], sizes = [2, 8, 16], strides = [1, 1, 1]} : vector<2x8x128xbf16> to vector<2x8x16xbf16>
    %238 = vector.extract_strided_slice %235 {offsets = [0, 0, 0], sizes = [2, 16, 16], strides = [1, 1, 1]} : vector<2x16x128xbf16> to vector<2x16x16xbf16>
    "tpu.trace_start"() <{level = 10 : i32, message = "bqd,bkd->bqk"}> : () -> ()
    %cst_78 = arith.constant dense<0.000000e+00> : vector<2x8x16xf32>
    %239 = tpu.matmul %237, %238, %cst_78 {dimension_numbers = #tpu.dot_dimension_numbers<[2], [2], [1], [1], [0, 0, 0, 1, 1, 1], [0], [0]>} : vector<2x8x16xbf16>, vector<2x16x16xbf16>, vector<2x8x16xf32> -> vector<2x8x16xf32>
    "tpu.trace_stop"() : () -> ()
    %cst_79 = arith.constant dense<0xFF800000> : vector<2x8xf32>
    %240 = vector.multi_reduction <maximumf>, %239, %cst_79 [2] : vector<2x8x16xf32> to vector<2x8xf32>
    %241 = vector.shape_cast %240 : vector<2x8xf32> to vector<2x8x1xf32>
    %242 = vector.broadcast %241 : vector<2x8x1xf32> to vector<2x8x16xf32>
    %243 = arith.subf %239, %242 : vector<2x8x16xf32>
    %244 = math.exp %243 : vector<2x8x16xf32>
    %cst_80 = arith.constant dense<0.000000e+00> : vector<2x8xf32>
    %245 = vector.multi_reduction <add>, %244, %cst_80 [2] : vector<2x8x16xf32> to vector<2x8xf32>
    %246 = vector.shape_cast %245 : vector<2x8xf32> to vector<2x8x1xf32>
    %247 = tpu.reciprocal %246 {approx = true} : vector<2x8x1xf32> -> vector<2x8x1xf32>
    %248 = vector.broadcast %247 : vector<2x8x1xf32> to vector<2x8x16xf32>
    %249 = arith.mulf %244, %248 : vector<2x8x16xf32>
    %250 = arith.truncf %249 : vector<2x8x16xf32> to vector<2x8x16xbf16>
    %251 = vector.extract_strided_slice %236 {offsets = [0, 0, 0], sizes = [2, 16, 16], strides = [1, 1, 1]} : vector<2x16x128xbf16> to vector<2x16x16xbf16>
    "tpu.trace_start"() <{level = 10 : i32, message = "bqk,bkd->bqd"}> : () -> ()
    %cst_81 = arith.constant dense<0.000000e+00> : vector<2x8x16xf32>
    %252 = tpu.matmul %250, %251, %cst_81 {dimension_numbers = #tpu.dot_dimension_numbers<[2], [1], [1], [2], [0, 0, 0, 1, 1, 2], [0], [0]>} : vector<2x8x16xbf16>, vector<2x16x16xbf16>, vector<2x8x16xf32> -> vector<2x8x16xf32>
    "tpu.trace_stop"() : () -> ()
    %253 = vector.extract_strided_slice %232 {offsets = [0, 0, 16], sizes = [2, 8, 16], strides = [1, 1, 1]} : vector<2x8x128xbf16> to vector<2x8x16xbf16>
    %254 = vector.extract_strided_slice %235 {offsets = [0, 0, 16], sizes = [2, 16, 16], strides = [1, 1, 1]} : vector<2x16x128xbf16> to vector<2x16x16xbf16>
    "tpu.trace_start"() <{level = 10 : i32, message = "bqd,bkd->bqk"}> : () -> ()
    %cst_82 = arith.constant dense<0.000000e+00> : vector<2x8x16xf32>
    %255 = tpu.matmul %253, %254, %cst_82 {dimension_numbers = #tpu.dot_dimension_numbers<[2], [2], [1], [1], [0, 0, 0, 1, 1, 1], [0], [0]>} : vector<2x8x16xbf16>, vector<2x16x16xbf16>, vector<2x8x16xf32> -> vector<2x8x16xf32>
    "tpu.trace_stop"() : () -> ()
    %cst_83 = arith.constant dense<0xFF800000> : vector<2x8xf32>
    %256 = vector.multi_reduction <maximumf>, %255, %cst_83 [2] : vector<2x8x16xf32> to vector<2x8xf32>
    %257 = vector.shape_cast %256 : vector<2x8xf32> to vector<2x8x1xf32>
    %258 = vector.broadcast %257 : vector<2x8x1xf32> to vector<2x8x16xf32>
    %259 = arith.subf %255, %258 : vector<2x8x16xf32>
    %260 = math.exp %259 : vector<2x8x16xf32>
    %cst_84 = arith.constant dense<0.000000e+00> : vector<2x8xf32>
    %261 = vector.multi_reduction <add>, %260, %cst_84 [2] : vector<2x8x16xf32> to vector<2x8xf32>
    %262 = vector.shape_cast %261 : vector<2x8xf32> to vector<2x8x1xf32>
    %263 = tpu.reciprocal %262 {approx = true} : vector<2x8x1xf32> -> vector<2x8x1xf32>
    %264 = vector.broadcast %263 : vector<2x8x1xf32> to vector<2x8x16xf32>
    %265 = arith.mulf %260, %264 : vector<2x8x16xf32>
    %266 = arith.truncf %265 : vector<2x8x16xf32> to vector<2x8x16xbf16>
    %267 = vector.extract_strided_slice %236 {offsets = [0, 0, 16], sizes = [2, 16, 16], strides = [1, 1, 1]} : vector<2x16x128xbf16> to vector<2x16x16xbf16>
    "tpu.trace_start"() <{level = 10 : i32, message = "bqk,bkd->bqd"}> : () -> ()
    %cst_85 = arith.constant dense<0.000000e+00> : vector<2x8x16xf32>
    %268 = tpu.matmul %266, %267, %cst_85 {dimension_numbers = #tpu.dot_dimension_numbers<[2], [1], [1], [2], [0, 0, 0, 1, 1, 2], [0], [0]>} : vector<2x8x16xbf16>, vector<2x16x16xbf16>, vector<2x8x16xf32> -> vector<2x8x16xf32>
    "tpu.trace_stop"() : () -> ()
    %269 = vector.extract_strided_slice %232 {offsets = [0, 0, 32], sizes = [2, 8, 16], strides = [1, 1, 1]} : vector<2x8x128xbf16> to vector<2x8x16xbf16>
    %270 = vector.extract_strided_slice %235 {offsets = [0, 0, 32], sizes = [2, 16, 16], strides = [1, 1, 1]} : vector<2x16x128xbf16> to vector<2x16x16xbf16>
    "tpu.trace_start"() <{level = 10 : i32, message = "bqd,bkd->bqk"}> : () -> ()
    %cst_86 = arith.constant dense<0.000000e+00> : vector<2x8x16xf32>
    %271 = tpu.matmul %269, %270, %cst_86 {dimension_numbers = #tpu.dot_dimension_numbers<[2], [2], [1], [1], [0, 0, 0, 1, 1, 1], [0], [0]>} : vector<2x8x16xbf16>, vector<2x16x16xbf16>, vector<2x8x16xf32> -> vector<2x8x16xf32>
    "tpu.trace_stop"() : () -> ()
    %cst_87 = arith.constant dense<0xFF800000> : vector<2x8xf32>
    %272 = vector.multi_reduction <maximumf>, %271, %cst_87 [2] : vector<2x8x16xf32> to vector<2x8xf32>
    %273 = vector.shape_cast %272 : vector<2x8xf32> to vector<2x8x1xf32>
    %274 = vector.broadcast %273 : vector<2x8x1xf32> to vector<2x8x16xf32>
    %275 = arith.subf %271, %274 : vector<2x8x16xf32>
    %276 = math.exp %275 : vector<2x8x16xf32>
    %cst_88 = arith.constant dense<0.000000e+00> : vector<2x8xf32>
    %277 = vector.multi_reduction <add>, %276, %cst_88 [2] : vector<2x8x16xf32> to vector<2x8xf32>
    %278 = vector.shape_cast %277 : vector<2x8xf32> to vector<2x8x1xf32>
    %279 = tpu.reciprocal %278 {approx = true} : vector<2x8x1xf32> -> vector<2x8x1xf32>
    %280 = vector.broadcast %279 : vector<2x8x1xf32> to vector<2x8x16xf32>
    %281 = arith.mulf %276, %280 : vector<2x8x16xf32>
    %282 = arith.truncf %281 : vector<2x8x16xf32> to vector<2x8x16xbf16>
    %283 = vector.extract_strided_slice %236 {offsets = [0, 0, 32], sizes = [2, 16, 16], strides = [1, 1, 1]} : vector<2x16x128xbf16> to vector<2x16x16xbf16>
    "tpu.trace_start"() <{level = 10 : i32, message = "bqk,bkd->bqd"}> : () -> ()
    %cst_89 = arith.constant dense<0.000000e+00> : vector<2x8x16xf32>
    %284 = tpu.matmul %282, %283, %cst_89 {dimension_numbers = #tpu.dot_dimension_numbers<[2], [1], [1], [2], [0, 0, 0, 1, 1, 2], [0], [0]>} : vector<2x8x16xbf16>, vector<2x16x16xbf16>, vector<2x8x16xf32> -> vector<2x8x16xf32>
    "tpu.trace_stop"() : () -> ()
    %285 = vector.extract_strided_slice %232 {offsets = [0, 0, 48], sizes = [2, 8, 16], strides = [1, 1, 1]} : vector<2x8x128xbf16> to vector<2x8x16xbf16>
    %286 = vector.extract_strided_slice %235 {offsets = [0, 0, 48], sizes = [2, 16, 16], strides = [1, 1, 1]} : vector<2x16x128xbf16> to vector<2x16x16xbf16>
    "tpu.trace_start"() <{level = 10 : i32, message = "bqd,bkd->bqk"}> : () -> ()
    %cst_90 = arith.constant dense<0.000000e+00> : vector<2x8x16xf32>
    %287 = tpu.matmul %285, %286, %cst_90 {dimension_numbers = #tpu.dot_dimension_numbers<[2], [2], [1], [1], [0, 0, 0, 1, 1, 1], [0], [0]>} : vector<2x8x16xbf16>, vector<2x16x16xbf16>, vector<2x8x16xf32> -> vector<2x8x16xf32>
    "tpu.trace_stop"() : () -> ()
    %cst_91 = arith.constant dense<0xFF800000> : vector<2x8xf32>
    %288 = vector.multi_reduction <maximumf>, %287, %cst_91 [2] : vector<2x8x16xf32> to vector<2x8xf32>
    %289 = vector.shape_cast %288 : vector<2x8xf32> to vector<2x8x1xf32>
    %290 = vector.broadcast %289 : vector<2x8x1xf32> to vector<2x8x16xf32>
    %291 = arith.subf %287, %290 : vector<2x8x16xf32>
    %292 = math.exp %291 : vector<2x8x16xf32>
    %cst_92 = arith.constant dense<0.000000e+00> : vector<2x8xf32>
    %293 = vector.multi_reduction <add>, %292, %cst_92 [2] : vector<2x8x16xf32> to vector<2x8xf32>
    %294 = vector.shape_cast %293 : vector<2x8xf32> to vector<2x8x1xf32>
    %295 = tpu.reciprocal %294 {approx = true} : vector<2x8x1xf32> -> vector<2x8x1xf32>
    %296 = vector.broadcast %295 : vector<2x8x1xf32> to vector<2x8x16xf32>
    %297 = arith.mulf %292, %296 : vector<2x8x16xf32>
    %298 = arith.truncf %297 : vector<2x8x16xf32> to vector<2x8x16xbf16>
    %299 = vector.extract_strided_slice %236 {offsets = [0, 0, 48], sizes = [2, 16, 16], strides = [1, 1, 1]} : vector<2x16x128xbf16> to vector<2x16x16xbf16>
    "tpu.trace_start"() <{level = 10 : i32, message = "bqk,bkd->bqd"}> : () -> ()
    %cst_93 = arith.constant dense<0.000000e+00> : vector<2x8x16xf32>
    %300 = tpu.matmul %298, %299, %cst_93 {dimension_numbers = #tpu.dot_dimension_numbers<[2], [1], [1], [2], [0, 0, 0, 1, 1, 2], [0], [0]>} : vector<2x8x16xbf16>, vector<2x16x16xbf16>, vector<2x8x16xf32> -> vector<2x8x16xf32>
    "tpu.trace_stop"() : () -> ()
    %301 = vector.extract_strided_slice %232 {offsets = [0, 0, 64], sizes = [2, 8, 16], strides = [1, 1, 1]} : vector<2x8x128xbf16> to vector<2x8x16xbf16>
    %302 = vector.extract_strided_slice %235 {offsets = [0, 0, 64], sizes = [2, 16, 16], strides = [1, 1, 1]} : vector<2x16x128xbf16> to vector<2x16x16xbf16>
    "tpu.trace_start"() <{level = 10 : i32, message = "bqd,bkd->bqk"}> : () -> ()
    %cst_94 = arith.constant dense<0.000000e+00> : vector<2x8x16xf32>
    %303 = tpu.matmul %301, %302, %cst_94 {dimension_numbers = #tpu.dot_dimension_numbers<[2], [2], [1], [1], [0, 0, 0, 1, 1, 1], [0], [0]>} : vector<2x8x16xbf16>, vector<2x16x16xbf16>, vector<2x8x16xf32> -> vector<2x8x16xf32>
    "tpu.trace_stop"() : () -> ()
    %cst_95 = arith.constant dense<0xFF800000> : vector<2x8xf32>
    %304 = vector.multi_reduction <maximumf>, %303, %cst_95 [2] : vector<2x8x16xf32> to vector<2x8xf32>
    %305 = vector.shape_cast %304 : vector<2x8xf32> to vector<2x8x1xf32>
    %306 = vector.broadcast %305 : vector<2x8x1xf32> to vector<2x8x16xf32>
    %307 = arith.subf %303, %306 : vector<2x8x16xf32>
    %308 = math.exp %307 : vector<2x8x16xf32>
    %cst_96 = arith.constant dense<0.000000e+00> : vector<2x8xf32>
    %309 = vector.multi_reduction <add>, %308, %cst_96 [2] : vector<2x8x16xf32> to vector<2x8xf32>
    %310 = vector.shape_cast %309 : vector<2x8xf32> to vector<2x8x1xf32>
    %311 = tpu.reciprocal %310 {approx = true} : vector<2x8x1xf32> -> vector<2x8x1xf32>
    %312 = vector.broadcast %311 : vector<2x8x1xf32> to vector<2x8x16xf32>
    %313 = arith.mulf %308, %312 : vector<2x8x16xf32>
    %314 = arith.truncf %313 : vector<2x8x16xf32> to vector<2x8x16xbf16>
    %315 = vector.extract_strided_slice %236 {offsets = [0, 0, 64], sizes = [2, 16, 16], strides = [1, 1, 1]} : vector<2x16x128xbf16> to vector<2x16x16xbf16>
    "tpu.trace_start"() <{level = 10 : i32, message = "bqk,bkd->bqd"}> : () -> ()
    %cst_97 = arith.constant dense<0.000000e+00> : vector<2x8x16xf32>
    %316 = tpu.matmul %314, %315, %cst_97 {dimension_numbers = #tpu.dot_dimension_numbers<[2], [1], [1], [2], [0, 0, 0, 1, 1, 2], [0], [0]>} : vector<2x8x16xbf16>, vector<2x16x16xbf16>, vector<2x8x16xf32> -> vector<2x8x16xf32>
    "tpu.trace_stop"() : () -> ()
    %317 = vector.extract_strided_slice %232 {offsets = [0, 0, 80], sizes = [2, 8, 16], strides = [1, 1, 1]} : vector<2x8x128xbf16> to vector<2x8x16xbf16>
    %318 = vector.extract_strided_slice %235 {offsets = [0, 0, 80], sizes = [2, 16, 16], strides = [1, 1, 1]} : vector<2x16x128xbf16> to vector<2x16x16xbf16>
    "tpu.trace_start"() <{level = 10 : i32, message = "bqd,bkd->bqk"}> : () -> ()
    %cst_98 = arith.constant dense<0.000000e+00> : vector<2x8x16xf32>
    %319 = tpu.matmul %317, %318, %cst_98 {dimension_numbers = #tpu.dot_dimension_numbers<[2], [2], [1], [1], [0, 0, 0, 1, 1, 1], [0], [0]>} : vector<2x8x16xbf16>, vector<2x16x16xbf16>, vector<2x8x16xf32> -> vector<2x8x16xf32>
    "tpu.trace_stop"() : () -> ()
    %cst_99 = arith.constant dense<0xFF800000> : vector<2x8xf32>
    %320 = vector.multi_reduction <maximumf>, %319, %cst_99 [2] : vector<2x8x16xf32> to vector<2x8xf32>
    %321 = vector.shape_cast %320 : vector<2x8xf32> to vector<2x8x1xf32>
    %322 = vector.broadcast %321 : vector<2x8x1xf32> to vector<2x8x16xf32>
    %323 = arith.subf %319, %322 : vector<2x8x16xf32>
    %324 = math.exp %323 : vector<2x8x16xf32>
    %cst_100 = arith.constant dense<0.000000e+00> : vector<2x8xf32>
    %325 = vector.multi_reduction <add>, %324, %cst_100 [2] : vector<2x8x16xf32> to vector<2x8xf32>
    %326 = vector.shape_cast %325 : vector<2x8xf32> to vector<2x8x1xf32>
    %327 = tpu.reciprocal %326 {approx = true} : vector<2x8x1xf32> -> vector<2x8x1xf32>
    %328 = vector.broadcast %327 : vector<2x8x1xf32> to vector<2x8x16xf32>
    %329 = arith.mulf %324, %328 : vector<2x8x16xf32>
    %330 = arith.truncf %329 : vector<2x8x16xf32> to vector<2x8x16xbf16>
    %331 = vector.extract_strided_slice %236 {offsets = [0, 0, 80], sizes = [2, 16, 16], strides = [1, 1, 1]} : vector<2x16x128xbf16> to vector<2x16x16xbf16>
    "tpu.trace_start"() <{level = 10 : i32, message = "bqk,bkd->bqd"}> : () -> ()
    %cst_101 = arith.constant dense<0.000000e+00> : vector<2x8x16xf32>
    %332 = tpu.matmul %330, %331, %cst_101 {dimension_numbers = #tpu.dot_dimension_numbers<[2], [1], [1], [2], [0, 0, 0, 1, 1, 2], [0], [0]>} : vector<2x8x16xbf16>, vector<2x16x16xbf16>, vector<2x8x16xf32> -> vector<2x8x16xf32>
    "tpu.trace_stop"() : () -> ()
    %333 = vector.extract_strided_slice %232 {offsets = [0, 0, 96], sizes = [2, 8, 16], strides = [1, 1, 1]} : vector<2x8x128xbf16> to vector<2x8x16xbf16>
    %334 = vector.extract_strided_slice %235 {offsets = [0, 0, 96], sizes = [2, 16, 16], strides = [1, 1, 1]} : vector<2x16x128xbf16> to vector<2x16x16xbf16>
    "tpu.trace_start"() <{level = 10 : i32, message = "bqd,bkd->bqk"}> : () -> ()
    %cst_102 = arith.constant dense<0.000000e+00> : vector<2x8x16xf32>
    %335 = tpu.matmul %333, %334, %cst_102 {dimension_numbers = #tpu.dot_dimension_numbers<[2], [2], [1], [1], [0, 0, 0, 1, 1, 1], [0], [0]>} : vector<2x8x16xbf16>, vector<2x16x16xbf16>, vector<2x8x16xf32> -> vector<2x8x16xf32>
    "tpu.trace_stop"() : () -> ()
    %cst_103 = arith.constant dense<0xFF800000> : vector<2x8xf32>
    %336 = vector.multi_reduction <maximumf>, %335, %cst_103 [2] : vector<2x8x16xf32> to vector<2x8xf32>
    %337 = vector.shape_cast %336 : vector<2x8xf32> to vector<2x8x1xf32>
    %338 = vector.broadcast %337 : vector<2x8x1xf32> to vector<2x8x16xf32>
    %339 = arith.subf %335, %338 : vector<2x8x16xf32>
    %340 = math.exp %339 : vector<2x8x16xf32>
    %cst_104 = arith.constant dense<0.000000e+00> : vector<2x8xf32>
    %341 = vector.multi_reduction <add>, %340, %cst_104 [2] : vector<2x8x16xf32> to vector<2x8xf32>
    %342 = vector.shape_cast %341 : vector<2x8xf32> to vector<2x8x1xf32>
    %343 = tpu.reciprocal %342 {approx = true} : vector<2x8x1xf32> -> vector<2x8x1xf32>
    %344 = vector.broadcast %343 : vector<2x8x1xf32> to vector<2x8x16xf32>
    %345 = arith.mulf %340, %344 : vector<2x8x16xf32>
    %346 = arith.truncf %345 : vector<2x8x16xf32> to vector<2x8x16xbf16>
    %347 = vector.extract_strided_slice %236 {offsets = [0, 0, 96], sizes = [2, 16, 16], strides = [1, 1, 1]} : vector<2x16x128xbf16> to vector<2x16x16xbf16>
    "tpu.trace_start"() <{level = 10 : i32, message = "bqk,bkd->bqd"}> : () -> ()
    %cst_105 = arith.constant dense<0.000000e+00> : vector<2x8x16xf32>
    %348 = tpu.matmul %346, %347, %cst_105 {dimension_numbers = #tpu.dot_dimension_numbers<[2], [1], [1], [2], [0, 0, 0, 1, 1, 2], [0], [0]>} : vector<2x8x16xbf16>, vector<2x16x16xbf16>, vector<2x8x16xf32> -> vector<2x8x16xf32>
    "tpu.trace_stop"() : () -> ()
    %349 = vector.extract_strided_slice %232 {offsets = [0, 0, 112], sizes = [2, 8, 16], strides = [1, 1, 1]} : vector<2x8x128xbf16> to vector<2x8x16xbf16>
    %350 = vector.extract_strided_slice %235 {offsets = [0, 0, 112], sizes = [2, 16, 16], strides = [1, 1, 1]} : vector<2x16x128xbf16> to vector<2x16x16xbf16>
    "tpu.trace_start"() <{level = 10 : i32, message = "bqd,bkd->bqk"}> : () -> ()
    %cst_106 = arith.constant dense<0.000000e+00> : vector<2x8x16xf32>
    %351 = tpu.matmul %349, %350, %cst_106 {dimension_numbers = #tpu.dot_dimension_numbers<[2], [2], [1], [1], [0, 0, 0, 1, 1, 1], [0], [0]>} : vector<2x8x16xbf16>, vector<2x16x16xbf16>, vector<2x8x16xf32> -> vector<2x8x16xf32>
    "tpu.trace_stop"() : () -> ()
    %cst_107 = arith.constant dense<0xFF800000> : vector<2x8xf32>
    %352 = vector.multi_reduction <maximumf>, %351, %cst_107 [2] : vector<2x8x16xf32> to vector<2x8xf32>
    %353 = vector.shape_cast %352 : vector<2x8xf32> to vector<2x8x1xf32>
    %354 = vector.broadcast %353 : vector<2x8x1xf32> to vector<2x8x16xf32>
    %355 = arith.subf %351, %354 : vector<2x8x16xf32>
    %356 = math.exp %355 : vector<2x8x16xf32>
    %cst_108 = arith.constant dense<0.000000e+00> : vector<2x8xf32>
    %357 = vector.multi_reduction <add>, %356, %cst_108 [2] : vector<2x8x16xf32> to vector<2x8xf32>
    %358 = vector.shape_cast %357 : vector<2x8xf32> to vector<2x8x1xf32>
    %359 = tpu.reciprocal %358 {approx = true} : vector<2x8x1xf32> -> vector<2x8x1xf32>
    %360 = vector.broadcast %359 : vector<2x8x1xf32> to vector<2x8x16xf32>
    %361 = arith.mulf %356, %360 : vector<2x8x16xf32>
    %362 = arith.truncf %361 : vector<2x8x16xf32> to vector<2x8x16xbf16>
    %363 = vector.extract_strided_slice %236 {offsets = [0, 0, 112], sizes = [2, 16, 16], strides = [1, 1, 1]} : vector<2x16x128xbf16> to vector<2x16x16xbf16>
    "tpu.trace_start"() <{level = 10 : i32, message = "bqk,bkd->bqd"}> : () -> ()
    %cst_109 = arith.constant dense<0.000000e+00> : vector<2x8x16xf32>
    %364 = tpu.matmul %362, %363, %cst_109 {dimension_numbers = #tpu.dot_dimension_numbers<[2], [1], [1], [2], [0, 0, 0, 1, 1, 2], [0], [0]>} : vector<2x8x16xbf16>, vector<2x16x16xbf16>, vector<2x8x16xf32> -> vector<2x8x16xf32>
    "tpu.trace_stop"() : () -> ()
    %365 = tpu.concatenate %252, %268, %284, %300, %316, %332, %348, %364 in 2 : vector<2x8x16xf32>, vector<2x8x16xf32>, vector<2x8x16xf32>, vector<2x8x16xf32>, vector<2x8x16xf32>, vector<2x8x16xf32>, vector<2x8x16xf32>, vector<2x8x16xf32> -> vector<2x8x128xf32>
    %366 = vector.shape_cast %365 : vector<2x8x128xf32> to vector<16x128xf32>
    %367 = arith.truncf %366 : vector<16x128xf32> to vector<16x128xbf16>
    %c0_110 = arith.constant 0 : index
    %c0_111 = arith.constant 0 : index
    %c0_112 = arith.constant 0 : index
    %368 = vector.load %arg11[%c0_110, %c0_111, %c0_112] : memref<1x128x128xbf16, #tpu.memory_space<vmem>>, vector<1x128x128xbf16>
    %369 = vector.shape_cast %368 : vector<1x128x128xbf16> to vector<128x128xbf16>
    %cst_113 = arith.constant dense<0.000000e+00> : vector<16x128xf32>
    %370 = tpu.matmul %367, %369, %cst_113 {dimension_numbers = #tpu.dot_dimension_numbers<[1], [0], [0], [1], [0, 0, 1, 1], [], []>} : vector<16x128xbf16>, vector<128x128xbf16>, vector<16x128xf32> -> vector<16x128xf32>
    %c0_114 = arith.constant 0 : index
    %c0_115 = arith.constant 0 : index
    %c0_116 = arith.constant 0 : index
    %371 = vector.load %arg12[%c0_114, %c0_115, %c0_116] : memref<1x1x128xf32, #tpu.memory_space<vmem>>, vector<1x1x128xf32>
    %372 = vector.shape_cast %371 : vector<1x1x128xf32> to vector<1x128xf32>
    %373 = vector.broadcast %372 : vector<1x128xf32> to vector<16x128xf32>
    %374 = arith.addf %370, %373 : vector<16x128xf32>
    %375 = arith.addf %212, %374 : vector<16x128xf32>
    %376 = vector.extract_strided_slice %6 {offsets = [1, 0], sizes = [1, 128], strides = [1, 1]} : vector<3x128xf32> to vector<1x128xf32>
    %377 = vector.extract_strided_slice %8 {offsets = [1, 0], sizes = [1, 128], strides = [1, 1]} : vector<3x128xf32> to vector<1x128xf32>
    %cst_117 = arith.constant dense<0.000000e+00> : vector<16xf32>
    %378 = vector.multi_reduction <add>, %375, %cst_117 [1] : vector<16x128xf32> to vector<16xf32>
    %379 = vector.shape_cast %378 : vector<16xf32> to vector<16x1xf32>
    %cst_118 = arith.constant 1.280000e+02 : f32
    %380 = vector.broadcast %cst_118 : f32 to vector<16x1xf32>
    %381 = arith.divf %379, %380 : vector<16x1xf32>
    %382 = vector.broadcast %381 : vector<16x1xf32> to vector<16x128xf32>
    %383 = arith.subf %375, %382 : vector<16x128xf32>
    %384 = arith.mulf %383, %383 : vector<16x128xf32>
    %cst_119 = arith.constant dense<0.000000e+00> : vector<16xf32>
    %385 = vector.multi_reduction <add>, %384, %cst_119 [1] : vector<16x128xf32> to vector<16xf32>
    %386 = vector.shape_cast %385 : vector<16xf32> to vector<16x1xf32>
    %cst_120 = arith.constant 1.280000e+02 : f32
    %387 = vector.broadcast %cst_120 : f32 to vector<16x1xf32>
    %388 = arith.divf %386, %387 : vector<16x1xf32>
    %cst_121 = arith.constant 9.99999974E-6 : f32
    %389 = vector.broadcast %cst_121 : f32 to vector<16x1xf32>
    %390 = arith.addf %388, %389 : vector<16x1xf32>
    %391 = math.rsqrt %390 : vector<16x1xf32>
    %392 = vector.broadcast %391 : vector<16x1xf32> to vector<16x128xf32>
    %393 = arith.mulf %383, %392 : vector<16x128xf32>
    %394 = vector.broadcast %376 : vector<1x128xf32> to vector<16x128xf32>
    %395 = arith.mulf %393, %394 : vector<16x128xf32>
    %396 = vector.broadcast %377 : vector<1x128xf32> to vector<16x128xf32>
    %397 = arith.addf %395, %396 : vector<16x128xf32>
    %398 = arith.truncf %397 : vector<16x128xf32> to vector<16x128xbf16>
    %c0_122 = arith.constant 0 : index
    %c0_123 = arith.constant 0 : index
    %c0_124 = arith.constant 0 : index
    %399 = vector.load %arg13[%c0_122, %c0_123, %c0_124] : memref<1x128x2048xbf16, #tpu.memory_space<vmem>>, vector<1x128x2048xbf16>
    %400 = vector.shape_cast %399 : vector<1x128x2048xbf16> to vector<128x2048xbf16>
    %cst_125 = arith.constant dense<0.000000e+00> : vector<16x2048xf32>
    %401 = tpu.matmul %398, %400, %cst_125 {dimension_numbers = #tpu.dot_dimension_numbers<[1], [0], [0], [1], [0, 0, 1, 1], [], []>} : vector<16x128xbf16>, vector<128x2048xbf16>, vector<16x2048xf32> -> vector<16x2048xf32>
    %c0_126 = arith.constant 0 : index
    %c0_127 = arith.constant 0 : index
    %c0_128 = arith.constant 0 : index
    %402 = vector.load %arg14[%c0_126, %c0_127, %c0_128] : memref<1x1x2048xf32, #tpu.memory_space<vmem>>, vector<1x1x2048xf32>
    %403 = vector.shape_cast %402 : vector<1x1x2048xf32> to vector<1x2048xf32>
    %404 = vector.broadcast %403 : vector<1x2048xf32> to vector<16x2048xf32>
    %405 = arith.addf %401, %404 : vector<16x2048xf32>
    %cst_129 = arith.constant 0.000000e+00 : f32
    %406 = vector.broadcast %cst_129 : f32 to vector<16x2048xf32>
    %407 = arith.maximumf %405, %406 : vector<16x2048xf32>
    %408 = arith.truncf %407 : vector<16x2048xf32> to vector<16x2048xbf16>
    %c0_130 = arith.constant 0 : index
    %c0_131 = arith.constant 0 : index
    %c0_132 = arith.constant 0 : index
    %409 = vector.load %arg15[%c0_130, %c0_131, %c0_132] : memref<1x2048x128xbf16, #tpu.memory_space<vmem>>, vector<1x2048x128xbf16>
    %410 = vector.shape_cast %409 : vector<1x2048x128xbf16> to vector<2048x128xbf16>
    %cst_133 = arith.constant dense<0.000000e+00> : vector<16x128xf32>
    %411 = tpu.matmul %408, %410, %cst_133 {dimension_numbers = #tpu.dot_dimension_numbers<[1], [0], [0], [1], [0, 0, 1, 1], [], []>} : vector<16x2048xbf16>, vector<2048x128xbf16>, vector<16x128xf32> -> vector<16x128xf32>
    %c0_134 = arith.constant 0 : index
    %c0_135 = arith.constant 0 : index
    %c0_136 = arith.constant 0 : index
    %412 = vector.load %arg16[%c0_134, %c0_135, %c0_136] : memref<1x1x128xf32, #tpu.memory_space<vmem>>, vector<1x1x128xf32>
    %413 = vector.shape_cast %412 : vector<1x1x128xf32> to vector<1x128xf32>
    %414 = vector.broadcast %413 : vector<1x128xf32> to vector<16x128xf32>
    %415 = arith.addf %411, %414 : vector<16x128xf32>
    %416 = arith.addf %397, %415 : vector<16x128xf32>
    %417 = vector.extract_strided_slice %6 {offsets = [2, 0], sizes = [1, 128], strides = [1, 1]} : vector<3x128xf32> to vector<1x128xf32>
    %418 = vector.extract_strided_slice %8 {offsets = [2, 0], sizes = [1, 128], strides = [1, 1]} : vector<3x128xf32> to vector<1x128xf32>
    %cst_137 = arith.constant dense<0.000000e+00> : vector<16xf32>
    %419 = vector.multi_reduction <add>, %416, %cst_137 [1] : vector<16x128xf32> to vector<16xf32>
    %420 = vector.shape_cast %419 : vector<16xf32> to vector<16x1xf32>
    %cst_138 = arith.constant 1.280000e+02 : f32
    %421 = vector.broadcast %cst_138 : f32 to vector<16x1xf32>
    %422 = arith.divf %420, %421 : vector<16x1xf32>
    %423 = vector.broadcast %422 : vector<16x1xf32> to vector<16x128xf32>
    %424 = arith.subf %416, %423 : vector<16x128xf32>
    %425 = arith.mulf %424, %424 : vector<16x128xf32>
    %cst_139 = arith.constant dense<0.000000e+00> : vector<16xf32>
    %426 = vector.multi_reduction <add>, %425, %cst_139 [1] : vector<16x128xf32> to vector<16xf32>
    %427 = vector.shape_cast %426 : vector<16xf32> to vector<16x1xf32>
    %cst_140 = arith.constant 1.280000e+02 : f32
    %428 = vector.broadcast %cst_140 : f32 to vector<16x1xf32>
    %429 = arith.divf %427, %428 : vector<16x1xf32>
    %cst_141 = arith.constant 9.99999974E-6 : f32
    %430 = vector.broadcast %cst_141 : f32 to vector<16x1xf32>
    %431 = arith.addf %429, %430 : vector<16x1xf32>
    %432 = math.rsqrt %431 : vector<16x1xf32>
    %433 = vector.broadcast %432 : vector<16x1xf32> to vector<16x128xf32>
    %434 = arith.mulf %424, %433 : vector<16x128xf32>
    %435 = vector.broadcast %417 : vector<1x128xf32> to vector<16x128xf32>
    %436 = arith.mulf %434, %435 : vector<16x128xf32>
    %437 = vector.broadcast %418 : vector<1x128xf32> to vector<16x128xf32>
    %438 = arith.addf %436, %437 : vector<16x128xf32>
    %439 = vector.shape_cast %438 : vector<16x128xf32> to vector<2x8x128xf32>
    %c0_142 = arith.constant 0 : index
    %c0_143 = arith.constant 0 : index
    %c0_144 = arith.constant 0 : index
    %440 = vector.load %arg20[%c0_142, %c0_143, %c0_144] : memref<2x8x128xf32, #tpu.memory_space<vmem>>, vector<2x8x128xf32>
    tpu.vector_store %arg20[%c0_142, %c0_143, %c0_144], %439 {strides = array<i32>} : memref<2x8x128xf32, #tpu.memory_space<vmem>>, vector<2x8x128xf32>,
    %c1_i32 = arith.constant 1 : i32
    %441 = arith.cmpi eq, %arg0, %c1_i32 : i32
    %442 = arith.extui %441 : i1 to i32
    %c0_i32_145 = arith.constant 0 : i32
    %443 = arith.cmpi ne, %442, %c0_i32_145 : i32
    scf.if %443 {
      %c0_146 = arith.constant 0 : index
      %c0_147 = arith.constant 0 : index
      %c0_148 = arith.constant 0 : index
      %444 = vector.load %arg20[%c0_146, %c0_147, %c0_148] : memref<2x8x128xf32, #tpu.memory_space<vmem>>, vector<2x8x128xf32>
      %445 = arith.truncf %444 : vector<2x8x128xf32> to vector<2x8x128xbf16>
      %c0_149 = arith.constant 0 : index
      %c0_150 = arith.constant 0 : index
      %c0_151 = arith.constant 0 : index
      %446 = vector.load %arg19[%c0_149, %c0_150, %c0_151] : memref<2x8x128xbf16, #tpu.memory_space<vmem>>, vector<2x8x128xbf16>
      tpu.vector_store %arg19[%c0_149, %c0_150, %c0_151], %445 {strides = array<i32>} : memref<2x8x128xbf16, #tpu.memory_space<vmem>>, vector<2x8x128xbf16>,
    } else {
    }
    return
  }
  func.func @transform_0(%arg0: i32) -> (i32, i32, i32) {
    %c0_i32 = arith.constant 0 : i32
    %c0_i32_0 = arith.constant 0 : i32
    %c0_i32_1 = arith.constant 0 : i32
    %c0_i32_2 = arith.constant 0 : i32
    return %c0_i32, %c0_i32_0, %c0_i32_1 : i32, i32, i32
  }
  func.func @transform_1(%arg0: i32) -> (i32, i32, i32) {
    %c0_i32 = arith.constant 0 : i32
    %c0_i32_0 = arith.constant 0 : i32
    %c0_i32_1 = arith.constant 0 : i32
    %c0_i32_2 = arith.constant 0 : i32
    return %c0_i32, %c0_i32_0, %c0_i32_1 : i32, i32, i32
  }
  func.func @transform_2(%arg0: i32) -> (i32, i32, i32) {
    %c0_i32 = arith.constant 0 : i32
    %c0_i32_0 = arith.constant 0 : i32
    %c0_i32_1 = arith.constant 0 : i32
    return %arg0, %c0_i32, %c0_i32_0 : i32, i32, i32
  }
  func.func @transform_3(%arg0: i32) -> (i32, i32, i32) {
    %c0_i32 = arith.constant 0 : i32
    %c0_i32_0 = arith.constant 0 : i32
    %c0_i32_1 = arith.constant 0 : i32
    return %arg0, %c0_i32, %c0_i32_0 : i32, i32, i32
  }
  func.func @transform_4(%arg0: i32) -> (i32, i32, i32) {
    %c0_i32 = arith.constant 0 : i32
    %c0_i32_0 = arith.constant 0 : i32
    %c0_i32_1 = arith.constant 0 : i32
    return %arg0, %c0_i32, %c0_i32_0 : i32, i32, i32
  }
  func.func @transform_5(%arg0: i32) -> (i32, i32, i32) {
    %c0_i32 = arith.constant 0 : i32
    %c0_i32_0 = arith.constant 0 : i32
    %c0_i32_1 = arith.constant 0 : i32
    return %arg0, %c0_i32, %c0_i32_0 : i32, i32, i32
  }
  func.func @transform_6(%arg0: i32) -> (i32, i32, i32) {
    %c0_i32 = arith.constant 0 : i32
    %c0_i32_0 = arith.constant 0 : i32
    %c0_i32_1 = arith.constant 0 : i32
    return %arg0, %c0_i32, %c0_i32_0 : i32, i32, i32
  }
  func.func @transform_7(%arg0: i32) -> (i32, i32, i32) {
    %c0_i32 = arith.constant 0 : i32
    %c0_i32_0 = arith.constant 0 : i32
    %c0_i32_1 = arith.constant 0 : i32
    return %arg0, %c0_i32, %c0_i32_0 : i32, i32, i32
  }
  func.func @transform_8(%arg0: i32) -> (i32, i32, i32) {
    %c0_i32 = arith.constant 0 : i32
    %c0_i32_0 = arith.constant 0 : i32
    %c0_i32_1 = arith.constant 0 : i32
    return %arg0, %c0_i32, %c0_i32_0 : i32, i32, i32
  }
  func.func @transform_9(%arg0: i32) -> (i32, i32, i32) {
    %c0_i32 = arith.constant 0 : i32
    %c0_i32_0 = arith.constant 0 : i32
    %c0_i32_1 = arith.constant 0 : i32
    return %arg0, %c0_i32, %c0_i32_0 : i32, i32, i32
  }
  func.func @transform_10(%arg0: i32) -> (i32, i32, i32) {
    %c0_i32 = arith.constant 0 : i32
    %c0_i32_0 = arith.constant 0 : i32
    %c0_i32_1 = arith.constant 0 : i32
    return %arg0, %c0_i32, %c0_i32_0 : i32, i32, i32
  }
  func.func @transform_11(%arg0: i32) -> (i32, i32, i32) {
    %c0_i32 = arith.constant 0 : i32
    %c0_i32_0 = arith.constant 0 : i32
    %c0_i32_1 = arith.constant 0 : i32
    return %arg0, %c0_i32, %c0_i32_0 : i32, i32, i32
  }
  func.func @transform_12(%arg0: i32) -> (i32, i32, i32) {
    %c0_i32 = arith.constant 0 : i32
    %c0_i32_0 = arith.constant 0 : i32
    %c0_i32_1 = arith.constant 0 : i32
    return %arg0, %c0_i32, %c0_i32_0 : i32, i32, i32
  }
  func.func @transform_13(%arg0: i32) -> (i32, i32, i32) {
    %c0_i32 = arith.constant 0 : i32
    %c0_i32_0 = arith.constant 0 : i32
    %c0_i32_1 = arith.constant 0 : i32
    return %arg0, %c0_i32, %c0_i32_0 : i32, i32, i32
  }
  func.func @transform_14(%arg0: i32) -> (i32, i32, i32) {
    %c0_i32 = arith.constant 0 : i32
    %c0_i32_0 = arith.constant 0 : i32
    %c0_i32_1 = arith.constant 0 : i32
    return %arg0, %c0_i32, %c0_i32_0 : i32, i32, i32
  }
  func.func @transform_15(%arg0: i32) -> (i32, i32, i32) {
    %c0_i32 = arith.constant 0 : i32
    %c0_i32_0 = arith.constant 0 : i32
    %c0_i32_1 = arith.constant 0 : i32
    return %arg0, %c0_i32, %c0_i32_0 : i32, i32, i32
  }
  func.func @transform_16(%arg0: i32) -> (i32, i32, i32) {
    %c0_i32 = arith.constant 0 : i32
    %c0_i32_0 = arith.constant 0 : i32
    %c0_i32_1 = arith.constant 0 : i32
    return %arg0, %c0_i32, %c0_i32_0 : i32, i32, i32
  }
  func.func @transform_17(%arg0: i32) -> (i32, i32, i32) {
    %c0_i32 = arith.constant 0 : i32
    %c0_i32_0 = arith.constant 0 : i32
    %c0_i32_1 = arith.constant 0 : i32
    return %arg0, %c0_i32, %c0_i32_0 : i32, i32, i32
  }
  func.func @transform_18(%arg0: i32) -> (i32, i32, i32) {
    %c0_i32 = arith.constant 0 : i32
    %c0_i32_0 = arith.constant 0 : i32
    %c0_i32_1 = arith.constant 0 : i32
    %c0_i32_2 = arith.constant 0 : i32
    return %c0_i32, %c0_i32_0, %c0_i32_1 : i32, i32, i32
  }
}

</mosaic_0001>

<bundles_post_ra>
// kernel: transformer_decoder_forward.3
= control target key start
LH: loop header
LB: loop body
LE: loop exit
PB: predicated region body
PF: predicated region fallthrough
CT: control target
= control target key end

     0   :  { %v229_v1 = vmov 0.0   ;;  %vm230_vm0 = vmmov 0   ;;  %s287_s0 = inlined_call_operand.vmem [shape: bf16[16,128], index: 0, kind: input, shape index: {}]   ;;  %s288_s1 = inlined_call_operand.vmem [shape: bf16[128,128], index: 1, kind: input, shape index: {}]   ;;  %s289_s2 = inlined_call_operand.vmem [shape: f32[1,128], index: 2, kind: input, shape index: {}]   ;;  %s290_s3 = inlined_call_operand.hbm [shape: f32[16,128], index: 3, kind: output, shape index: {}]  }
   0x1   :  { %v198_v0 = vld [vmem:[%s288_s1 + $0x38] sm:$0xff]   ;;  %173 = vmatprep.subr.bf16.mxu0 %v229_v1  ;;  %v199_v2 = vld [vmem:[%s288_s1 + $0x30] sm:$0xff]   ;;  %189 = vmatprep.mubr.msk.bf16.mxu0 %vm230_vm0, %v229_v1  ;;  %v200_v3 = vld [vmem:[%s288_s1 + $0x28] sm:$0xff]  }
   0x2   :  { %174 = vmatpush3.bf16.msra.mxu0 %v198_v0 }
   0x3   :  { %175 = vmatprep.subr.bf16.mxu0 %v229_v1 }
   0x6   :  { %176 = vmatpush3.bf16.msra.mxu0 %v199_v2 }
   0x7   :  { %177 = vmatprep.subr.bf16.mxu0 %v229_v1 }
   0x8   :  { %8 = vsyncpa [#allocation3], 0  ;;  %v201_v4 = vld [vmem:[%s288_s1 + $0x20] sm:$0xff]   ;;  %v202_v5 = vld [vmem:[%s288_s1 + $0x18] sm:$0xff]   ;;  %s231_s5 = smov [#allocation2]  }
   0x9   :  { %v203_v6 = vld [vmem:[%s288_s1 + $0x10] sm:$0xff]   ;;  %v204_v7 = vld [vmem:[%s288_s1 + $0x8] sm:$0xff]   ;;  %v205_v8 = vld [vmem:[%s288_s1] sm:$0xff]   ;;  %s143_s6 = sshll.u32 %s231_s5, 4  ;;  %s144_s6 = int_to_ptr.vmem [resolvable:$true] %s143_s6 }
   0xa   :  { %178 = vmatpush3.bf16.msra.mxu0 %v200_v3  ;;  %v206_v9 = vld [vmem:[%s287_s0] sm:$0xff]   ;;  %s207_s1 = scalar_lea.vmem %s144_s6, 256  ;;  %p212_p1 = scmp.lt.s32.totalorder %s144_s6, %s144_s6 }
   0xb   :  { %179 = vmatprep.subr.bf16.mxu0 %v229_v1  ;;  %v154_v10 = vld [vmem:[%s289_s2] ss:$0 sm:$0xff]  ;;  %p208_p0 = scmp.ne.s32.totalorder %s144_s6, %s207_s1  ;;  %p213_p2 = scmp.lt.s32.totalorder %s207_s1, %s207_s1 }
   0xd   :  { %p214_p3 = por %p213_p2, %p212_p1 }
   0xe   :  { %180 = vmatpush3.bf16.msra.mxu0 %v201_v4 }
   0xf   :  { %181 = vmatprep.subr.bf16.mxu0 %v229_v1  ;;  %p215_p4 = pnand %p214_p3, %p208_p0 }
  0x12   :  { %182 = vmatpush3.bf16.msra.mxu0 %v202_v5 }
  0x13   :  { %183 = vmatprep.subr.bf16.mxu0 %v229_v1 }
  0x16   :  { %184 = vmatpush3.bf16.msra.mxu0 %v203_v6 }
  0x17   :  { %185 = vmatprep.subr.bf16.mxu0 %v229_v1 }
  0x1a   :  { %186 = vmatpush3.bf16.msra.mxu0 %v204_v7 }
  0x1b   :  { %187 = vmatprep.subr.bf16.mxu0 %v229_v1 }
  0x1e   :  { %188 = vmatpush3.bf16.msra.mxu0 %v205_v8 }
  0x21   :  { %190 = vmatmul.mubr.bf16.vlgmr.msra.gmra.mxu0 %v206_v9 }
  0xe1   :  { %v129_v11 = vpop.f32.mrf.mxu0 }
  0xe2   :  { %v130_v12 = vadd.f32 %v154_v10, %v129_v11 }
  0xe3   :  { %v191_v13 = vpop.f32.mrf.mxu0 }
  0xe4   :  { %136 = vst [vmem:[#allocation2] sm:$0xff] %v130_v12 }
  0xe5   :  { %v132_v14 = vpop.f32.mrf.mxu0 }
  0xe6   :  { %v133_v15 = vadd.f32 %v154_v10, %v132_v14 }
  0xe7   :  { %v192_v16 = vpop.f32.mrf.mxu0 }
  0xe8   :  { %137 = vst [vmem:[#allocation2 + $0x8] sm:$0xff] %v133_v15 }
  0xe9   :  { %218 = shalt.err (!%p215_p4)
}
  0xea   :  { %s232_s0 = smov 128   ;;  %s233_s2 = smov 8  }
  0xeb   :  { %149 = dma.vmem_to_hbm [thread:$0]  %s144_s6, 256, %s290_s3, [#allocation3], %s232_s0, %s232_s0, %s233_s2  }
  0xec   :  { %227 = dma.done.wait [#allocation3], 256  }
  0xed   :  { %228 = vsyncadd [#allocation3], 4294967040 }
  0xee   :  { %153 = vsyncpa [#allocation3], 1 }

// kernel: transformer_decoder_forward.2
= control target key start
LH: loop header
LB: loop body
LE: loop exit
PB: predicated region body
PF: predicated region fallthrough
CT: control target
= control target key end

     0   :  { %s12786_s0 = inlined_call_operand.vmem [shape: f32[2,8,128], index: 0, kind: input, shape index: {}]   ;;  %s12787_s1 = inlined_call_operand.hbm [shape: f32[2,16,128], index: 1, kind: input, shape index: {}]   ;;  %s12788_s2 = inlined_call_operand.hbm [shape: bf16[2,128,384], index: 2, kind: input, shape index: {}]   ;;  %s12789_s3 = inlined_call_operand.hbm [shape: f32[2,1,384], index: 3, kind: input, shape index: {}]   ;;  %s12790_s4 = inlined_call_operand.hbm [shape: bf16[2,128,128], index: 4, kind: input, shape index: {}]   ;;  %s12791_s5 = inlined_call_operand.hbm [shape: f32[2,1,128], index: 5, kind: input, shape index: {}]   ;;  %s12792_s6 = inlined_call_operand.hbm [shape: bf16[2,128,128], index: 6, kind: input, shape index: {}]   ;;  %s12793_s7 = inlined_call_operand.hbm [shape: f32[2,1,128], index: 7, kind: input, shape index: {}]   ;;  %s12794_s8 = inlined_call_operand.vmem [shape: bf16[2,128,256], index: 8, kind: input, shape index: {}]   ;;  %s12795_s9 = inlined_call_operand.hbm [shape: f32[2,1,256], index: 9, kind: input, shape index: {}]   ;;  %s12796_s10 = inlined_call_operand.hbm [shape: bf16[2,128,128], index: 10, kind: input, shape index: {}]   ;;  %s12797_s11 = inlined_call_operand.hbm [shape: f32[2,1,128], index: 11, kind: input, shape index: {}]   ;;  %s12798_s12 = inlined_call_operand.hbm [shape: bf16[2,128,2048], index: 12, kind: input, shape index: {}]   ;;  %s12799_s13 = inlined_call_operand.hbm [shape: f32[2,1,2048], index: 13, kind: input, shape index: {}]   ;;  %s12800_s14 = inlined_call_operand.hbm [shape: bf16[2,2048,128], index: 14, kind: input, shape index: {}]   ;;  %s12801_s15 = inlined_call_operand.hbm [shape: f32[2,1,128], index: 15, kind: input, shape index: {}]   ;;  %s12802_s16 = inlined_call_operand.vmem [shape: f32[2,3,128], index: 16, kind: input, shape index: {}]   ;;  %s12803_s17 = inlined_call_operand.vmem [shape: f32[2,3,128], index: 17, kind: input, shape index: {}]   ;;  %s12804_s18 = inlined_call_operand.vmem [shape: bf16[2,8,128], index: 18, kind: output, shape index: {}]  }
   0x1   :  { %12833 = sst [smem:[#allocation40_spill]] %s12786_s0 }
   0x2   :  { %12834 = sst [smem:[#allocation41_spill]] %s12787_s1 }
   0x3   :  { %12835 = sst [smem:[#allocation42_spill]] %s12788_s2 }
   0x4   :  { %12836 = sst [smem:[#allocation43_spill]] %s12789_s3 }
   0x5   :  { %12837 = sst [smem:[#allocation44_spill]] %s12790_s4 }
   0x6   :  { %12838 = sst [smem:[#allocation45_spill]] %s12791_s5 }
   0x7   :  { %12839 = sst [smem:[#allocation46_spill]] %s12792_s6 }
   0x8   :  { %12840 = sst [smem:[#allocation47_spill]] %s12793_s7 }
   0x9   :  { %12841 = sst [smem:[#allocation48_spill]] %s12794_s8 }
   0xa   :  { %12842 = sst [smem:[#allocation49_spill]] %s12795_s9 }
   0xb   :  { %12843 = sst [smem:[#allocation50_spill]] %s12797_s11 }
   0xc   :  { %12844 = sst [smem:[#allocation51_spill]] %s12798_s12 }
   0xd   :  { %12845 = sst [smem:[#allocation52_spill]] %s12799_s13 }
   0xe   :  { %12846 = sst [smem:[#allocation53_spill]] %s12800_s14 }
   0xf   :  { %12847 = sst [smem:[#allocation54_spill]] %s12801_s15 }
  0x10   :  { %12848 = sst [smem:[#allocation55_spill]] %s12802_s16 }
  0x11   :  { %12849 = sst [smem:[#allocation56_spill]] %s12803_s17 }
  0x12   :  { %12850 = sst [smem:[#allocation57_spill]] %s12804_s18 }
  0x13   :  { %23 = vsyncpa [#allocation4], 0 }
  0x14   :  { %24 = vsyncpa [#allocation6], 0 }
  0x15   :  { %26 = vsyncpa [#allocation6 + $0x1], 0 }
  0x16   :  { %27 = vsyncpa [#allocation9], 0 }
  0x17   :  { %29 = vsyncpa [#allocation9 + $0x1], 0 }
  0x18   :  { %30 = vsyncpa [#allocation12], 0 }
  0x19   :  { %32 = vsyncpa [#allocation12 + $0x1], 0 }
  0x1a   :  { %33 = vsyncpa [#allocation15], 0 }
  0x1b   :  { %35 = vsyncpa [#allocation15 + $0x1], 0 }
  0x1c   :  { %36 = vsyncpa [#allocation18], 0 }
  0x1d   :  { %38 = vsyncpa [#allocation18 + $0x1], 0 }
  0x1e   :  { %39 = vsyncpa [#allocation21], 0 }
  0x1f   :  { %41 = vsyncpa [#allocation21 + $0x1], 0 }
  0x20   :  { %42 = vsyncpa [#allocation24], 0 }
  0x21   :  { %44 = vsyncpa [#allocation24 + $0x1], 0  ;;  %s10954_s27 = smov 0   ;;  %s10956_s28 = smov 0  }
  0x22   :  { %s10958_s29 = smov 0   ;;  %s10960_s30 = smov 0  }
  0x23 LB: > { %12851 = sst [smem:[#allocation33_spill]] %s10817_s28  ;;  %s10975_s0 = sadd.s32 1, %s10825_s30   ;;  %s10825_s30 = sphi %s10960_s30, %s12906_s30   ;;  %s10821_s29 = sphi %s10958_s29, %s12909_s29   ;;  %s10817_s28 = sphi %s10956_s28, %s12908_s28   ;;  %s10813_s27 = sphi %s10954_s27, %s12907_s27  }
  0x24   : > { %12852 = sst [smem:[#allocation34_spill]] %s10821_s29  ;;  %s99_s19 = sadd.s32 1, %s10821_s29 }
  0x25   : > { %12853 = sst [smem:[#allocation35_spill]] %s10975_s0  ;;  %s96_s1 = ssub.s32 %s10825_s30, %s10975_s0 }
  0x26   : > { %p106_p0 = scmp.ne.s32.totalorder %s10821_s29, %s10817_s28  ;;  %p97_p1 = scmp.eq.s32.totalorder %s96_s1, 0 }
  0x27   : > { %p107_p2 = scmp.eq.s32.totalorder %s10825_s30, 0  ;;  %p9896_p3 = scmp.lt.s32.totalorder %s10825_s30, 2 }
  0x28   : > { %s10985_s20 = scalar_select %p97_p1, %s10821_s29, %s99_s19  }
  0x29   : > { %p108_p4 = por %p107_p2, %p106_p0  ;;  %s10988_s21 = sand.u32 1, %s10825_s30  }
  0x2a   : > { %12854 = sst [smem:[#allocation36_spill]] %s10985_s20  ;;  %s10991_s22 = sand.u32 1, %s10821_s29  }
  0x2b   : > { %s9815_s2 = smul.u32 192, %s10991_s22  ;;  %p10994_p5 = pnand %p9896_p3, %p108_p4 }
  0x2c   : > { %s9816_s24 = smul.u32 3072, %s10825_s30  ;;  %s12856_s1 = sld [smem:[#allocation42_spill]] }
  0x2d   : > { %s567_s19 = scalar_lea.vmem [#allocation5], %s9815_s2  ;;  %p11011_p7 = pneg %p10994_p5 }
  0x2e   : > { %s574_s20 = sshll.u32 %s567_s19, 4  ;;  %s11004_s20 = int_to_ptr.vmem [resolvable:$true] %s574_s20 }
  0x32   : > { %s11002_s0 = scalar_lea.hbm %s12856_s1, %s9816_s24  ;;  %s10378_s26 = scalar_lea.hbm %s12856_s1, 6144 }
  0x33   : > { %s10373_s18 = scalar_lea.hbm %s11002_s0, 3072  ;;  %p10379_p10 = scmp.lt.s32.totalorder %s11002_s0, %s12856_s1 }
  0x34   : > { %p10374_p6 = scmp.ne.s32.totalorder %s11002_s0, %s10373_s18  ;;  %p10380_p11 = scmp.lt.s32.totalorder %s10378_s26, %s10373_s18 }
  0x36   : > { %p10376_p8 = pnand %p11011_p7, %p10374_p6  ;;  %p10381_p12 = por %p10380_p11, %p10379_p10 }
  0x38   : > { %p10377_p9 = pneg %p10376_p8 }
  0x3a   : > { %p10382_p13 = pnand %p10381_p12, %p10377_p9 }
  0x3c   : > { %10385 = shalt.err (!%p10382_p13)
}
  0x3d   : > { %s10386_s29 = scalar_lea.vmem %s11004_s20, 3072  ;;  %s10827_s16 = smov [#allocation5]  }
  0x3e   : > { %p10387_p0 = scmp.ne.s32.totalorder %s11004_s20, %s10386_s29  ;;  %s10391_s24 = sshll.u32 %s10827_s16, 4  ;;  %s10392_s24 = int_to_ptr.vmem [resolvable:$false] %s10391_s24 }
  0x3f   : > { %s10393_s25 = scalar_lea.vmem %s10392_s24, 6144  ;;  %p10394_p3 = scmp.lt.s32.totalorder %s11004_s20, %s10392_s24 }
  0x40   : > { %p10389_p1 = pnand %p10387_p0, %p11011_p7  ;;  %p10395_p4 = scmp.lt.s32.totalorder %s10393_s25, %s10386_s29 }
  0x42   : > { %p10390_p2 = pneg %p10389_p1  ;;  %p10396_p6 = por %p10395_p4, %p10394_p3 }
  0x44   : > { %p10397_p8 = pnand %p10396_p6, %p10390_p2 }
  0x46   : > { %10400 = shalt.err (!%p10397_p8)
}
  0x47   : > { %s10828_s18 = smov 192   ;;  %s10829_s26 = smov 12  }
  0x48   : > { %s12858_s2 = scalar_lea.sflag [#allocation6], %s10988_s21  ;;  %s11036_s16 = sshll.u32 %s10991_s22, 6 }
  0x49   : > { %9858 = dma.hbm_to_vmem [thread:$0]  (!%p10994_p5), %s11002_s0, 3072, %s11004_s20, %s12858_s2, %s10828_s18, %s10828_s18, %s10829_s26  }
  0x4a   : > { %s11039_s29 = sshll.u32 %s10825_s30, 10  ;;  %s12859_s4 = sld [smem:[#allocation44_spill]] }
  0x4b   : > { %s607_s1 = scalar_lea.vmem [#allocation8], %s11036_s16  ;;  %s12813_s15 = scalar_lea.sflag [#allocation9], %s10988_s21 }
  0x4c   : > { %s614_s8 = sshll.u32 %s607_s1, 4  ;;  %s11048_s8 = int_to_ptr.vmem [resolvable:$true] %s614_s8 }
  0x50   : > { %s11045_s25 = scalar_lea.hbm %s12859_s4, %s11039_s29  ;;  %s10406_s26 = scalar_lea.hbm %s12859_s4, 2048 }
  0x51   : > { %s10401_s0 = scalar_lea.hbm %s11045_s25, 1024  ;;  %p10407_p12 = scmp.lt.s32.totalorder %s11045_s25, %s12859_s4 }
  0x52   : > { %p10402_p9 = scmp.ne.s32.totalorder %s11045_s25, %s10401_s0  ;;  %p10408_p13 = scmp.lt.s32.totalorder %s10406_s26, %s10401_s0 }
  0x54   : > { %p10404_p10 = pnand %p10402_p9, %p11011_p7  ;;  %p10409_p0 = por %p10408_p13, %p10407_p12 }
  0x56   : > { %p10405_p11 = pneg %p10404_p10 }
  0x58   : > { %p10410_p1 = pnand %p10409_p0, %p10405_p11 }
  0x5a   : > { %10413 = shalt.err (!%p10410_p1)
}
  0x5b   : > { %s10414_s1 = scalar_lea.vmem %s11048_s8, 1024  ;;  %s10830_s24 = smov [#allocation8]  }
  0x5c   : > { %p10415_p2 = scmp.ne.s32.totalorder %s11048_s8, %s10414_s1  ;;  %s10419_s20 = sshll.u32 %s10830_s24, 4  ;;  %s10420_s20 = int_to_ptr.vmem [resolvable:$false] %s10419_s20 }
  0x5d   : > { %s10421_s18 = scalar_lea.vmem %s10420_s20, 2048  ;;  %p10422_p6 = scmp.lt.s32.totalorder %s11048_s8, %s10420_s20 }
  0x5e   : > { %p10417_p3 = pnand %p10415_p2, %p11011_p7  ;;  %p10423_p8 = scmp.lt.s32.totalorder %s10421_s18, %s10414_s1 }
  0x60   : > { %p10418_p4 = pneg %p10417_p3  ;;  %p10424_p9 = por %p10423_p8, %p10422_p6 }
  0x62   : > { %p10425_p10 = pnand %p10424_p9, %p10418_p4 }
  0x64   : > { %10428 = shalt.err (!%p10425_p10)
}
  0x65   : > { %s12815_s0 = smov 64   ;;  %s12817_s26 = smov 4  }
  0x66   : > { %9864 = dma.hbm_to_vmem [thread:$0]  (!%p10994_p5), %s11045_s25, 1024, %s11048_s8, %s12813_s15, %s12815_s0, %s12815_s0, %s12817_s26  }
  0x67   : > { %s12860_s6 = sld [smem:[#allocation46_spill]]  ;;  %s645_s24 = scalar_lea.vmem [#allocation11], %s11036_s16 }
  0x68   : > { %s652_s20 = sshll.u32 %s645_s24, 4  ;;  %s12822_s4 = scalar_lea.sflag [#allocation12], %s10988_s21  ;;  %s11083_s20 = int_to_ptr.vmem [resolvable:$true] %s652_s20 }
  0x6d   : > { %s11080_s1 = scalar_lea.hbm %s12860_s6, %s11039_s29  ;;  %s10434_s2 = scalar_lea.hbm %s12860_s6, 2048 }
  0x6e   : > { %s10429_s14 = scalar_lea.hbm %s11080_s1, 1024  ;;  %p10435_p0 = scmp.lt.s32.totalorder %s11080_s1, %s12860_s6 }
  0x6f   : > { %p10430_p11 = scmp.ne.s32.totalorder %s11080_s1, %s10429_s14  ;;  %p10436_p1 = scmp.lt.s32.totalorder %s10434_s2, %s10429_s14 }
  0x71   : > { %p10432_p12 = pnand %p10430_p11, %p11011_p7  ;;  %p10437_p2 = por %p10436_p1, %p10435_p0 }
  0x73   : > { %p10433_p13 = pneg %p10432_p12 }
  0x75   : > { %p10438_p3 = pnand %p10437_p2, %p10433_p13 }
  0x77   : > { %10441 = shalt.err (!%p10438_p3)
}
  0x78   : > { %s10442_s24 = scalar_lea.vmem %s11083_s20, 1024  ;;  %s10833_s18 = smov [#allocation11]  }
  0x79   : > { %p10443_p4 = scmp.ne.s32.totalorder %s11083_s20, %s10442_s24  ;;  %s10447_s8 = sshll.u32 %s10833_s18, 4  ;;  %s10448_s8 = int_to_ptr.vmem [resolvable:$false] %s10447_s8 }
  0x7a   : > { %s10449_s25 = scalar_lea.vmem %s10448_s8, 2048  ;;  %p10450_p9 = scmp.lt.s32.totalorder %s11083_s20, %s10448_s8 }
  0x7b   : > { %p10445_p6 = pnand %p10443_p4, %p11011_p7  ;;  %p10451_p10 = scmp.lt.s32.totalorder %s10449_s25, %s10442_s24 }
  0x7d   : > { %p10446_p8 = pneg %p10445_p6  ;;  %p10452_p11 = por %p10451_p10, %p10450_p9 }
  0x7f   : > { %p10453_p12 = pnand %p10452_p11, %p10446_p8 }
  0x81   : > { %10456 = shalt.err (!%p10453_p12)
}
  0x82   : > { %9870 = dma.hbm_to_vmem [thread:$0]  (!%p10994_p5), %s11080_s1, 1024, %s11083_s20, %s12822_s4, %s12815_s0, %s12815_s0, %s12817_s26  }
  0x83   : > { %s9000_s14 = sshll.u32 %s10825_s30, 5  ;;  %s12861_s9 = sld [smem:[#allocation49_spill]] }
  0x84   : > { %s12862_s19 = sshll.u32 %s10991_s22, 1  ;;  %s11121_s25 = sshll.u32 %s10825_s30, 4 }
  0x85   : > { %s691_s24 = scalar_lea.vmem [#allocation14], %s12862_s19  ;;  %s12819_s6 = scalar_lea.sflag [#allocation15], %s10988_s21 }
  0x86   : > { %s699_s8 = sshll.u32 %s691_s24, 4  ;;  %s700_s8 = int_to_ptr.vmem [resolvable:$true] %s699_s8 }
  0x89   : > { %s11116_s2 = scalar_lea.hbm %s12861_s9, %s9000_s14  ;;  %s10462_s14 = scalar_lea.hbm %s12861_s9, 64 }
  0x8a   : > { %s10457_s12 = scalar_lea.hbm %s11116_s2, 32  ;;  %p10463_p2 = scmp.lt.s32.totalorder %s11116_s2, %s12861_s9 }
  0x8b   : > { %p10458_p13 = scmp.ne.s32.totalorder %s11116_s2, %s10457_s12  ;;  %p10464_p3 = scmp.lt.s32.totalorder %s10462_s14, %s10457_s12 }
  0x8d   : > { %p10460_p0 = pnand %p10458_p13, %p11011_p7  ;;  %p10465_p4 = por %p10464_p3, %p10463_p2 }
  0x8f   : > { %p10461_p1 = pneg %p10460_p0 }
  0x91   : > { %p10466_p6 = pnand %p10465_p4, %p10461_p1 }
  0x93   : > { %10469 = shalt.err (!%p10466_p6)
}
  0x94   : > { %s10470_s19 = scalar_lea.vmem %s700_s8, 32  ;;  %s10834_s24 = smov [#allocation14]  }
  0x95   : > { %p10471_p8 = scmp.ne.s32.totalorder %s700_s8, %s10470_s19  ;;  %s10475_s0 = sshll.u32 %s10834_s24, 4  ;;  %s10476_s0 = int_to_ptr.vmem [resolvable:$false] %s10475_s0 }
  0x96   : > { %s10477_s26 = scalar_lea.vmem %s10476_s0, 64  ;;  %p10478_p11 = scmp.lt.s32.totalorder %s700_s8, %s10476_s0 }
  0x97   : > { %p10473_p9 = pnand %p10471_p8, %p11011_p7  ;;  %p10479_p12 = scmp.lt.s32.totalorder %s10477_s26, %s10470_s19 }
  0x99   : > { %p10474_p10 = pneg %p10473_p9  ;;  %p10480_p13 = por %p10479_p12, %p10478_p11 }
  0x9b   : > { %p10481_p0 = pnand %p10480_p13, %p10474_p10 }
  0x9d   : > { %10484 = shalt.err (!%p10481_p0)
}
  0x9e   : > { %9876 = dma.hbm_to_vmem [thread:$0]  (!%p10994_p5), %s11116_s2, 32, %s700_s8, %s12819_s6  }
  0x9f   : > { %s12863_s11 = sld [smem:[#allocation50_spill]]  ;;  %s730_s0 = scalar_lea.vmem [#allocation17], %s10991_s22 }
  0xa0   : > { %s737_s26 = sshll.u32 %s730_s0, 4  ;;  %s12820_s14 = scalar_lea.sflag [#allocation18], %s10988_s21  ;;  %s738_s26 = int_to_ptr.vmem [resolvable:$true] %s737_s26 }
  0xa5   : > { %s11146_s20 = scalar_lea.hbm %s12863_s11, %s11121_s25  ;;  %s10490_s2 = scalar_lea.hbm %s12863_s11, 32 }
  0xa6   : > { %s10485_s15 = scalar_lea.hbm %s11146_s20, 16  ;;  %p10491_p4 = scmp.lt.s32.totalorder %s11146_s20, %s12863_s11 }
  0xa7   : > { %p10486_p1 = scmp.ne.s32.totalorder %s11146_s20, %s10485_s15  ;;  %p10492_p6 = scmp.lt.s32.totalorder %s10490_s2, %s10485_s15 }
  0xa9   : > { %p10488_p2 = pnand %p10486_p1, %p11011_p7  ;;  %p10493_p8 = por %p10492_p6, %p10491_p4 }
  0xab   : > { %p10489_p3 = pneg %p10488_p2 }
  0xad   : > { %p10494_p9 = pnand %p10493_p8, %p10489_p3 }
  0xaf   : > { %10497 = shalt.err (!%p10494_p9)
}
  0xb0   : > { %s10498_s12 = scalar_lea.vmem %s738_s26, 16  ;;  %s10835_s1 = smov [#allocation17]  }
  0xb1   : > { %p10499_p10 = scmp.ne.s32.totalorder %s738_s26, %s10498_s12  ;;  %s10503_s0 = sshll.u32 %s10835_s1, 4  ;;  %s10504_s0 = int_to_ptr.vmem [resolvable:$false] %s10503_s0 }
  0xb2   : > { %s10505_s6 = scalar_lea.vmem %s10504_s0, 32  ;;  %p10506_p13 = scmp.lt.s32.totalorder %s738_s26, %s10504_s0 }
  0xb3   : > { %p10501_p11 = pnand %p10499_p10, %p11011_p7  ;;  %p10507_p0 = scmp.lt.s32.totalorder %s10505_s6, %s10498_s12 }
  0xb5   : > { %p10502_p12 = pneg %p10501_p11  ;;  %p10508_p1 = por %p10507_p0, %p10506_p13 }
  0xb7   : > { %p10509_p2 = pnand %p10508_p1, %p10502_p12 }
  0xb9   : > { %10512 = shalt.err (!%p10509_p2)
}
  0xba   : > { %9882 = dma.hbm_to_vmem [thread:$0]  (!%p10994_p5), %s11146_s20, 16, %s738_s26, %s12820_s14  }
  0xbb   : > { %s8586_s15 = sshll.u32 %s10991_s22, 4  ;;  %s9003_s18 = sshll.u32 %s10825_s30, 8 }
  0xbc   : > { %s12864_s13 = sld [smem:[#allocation52_spill]]  ;;  %s769_s6 = scalar_lea.vmem [#allocation20], %s8586_s15 }
  0xbd   : > { %s777_s24 = sshll.u32 %s769_s6, 4  ;;  %s12821_s12 = scalar_lea.sflag [#allocation21], %s10988_s21  ;;  %s778_s24 = int_to_ptr.vmem [resolvable:$true] %s777_s24 }
  0xc2   : > { %s11173_s8 = scalar_lea.hbm %s12864_s13, %s9003_s18  ;;  %s10518_s0 = scalar_lea.hbm %s12864_s13, 512 }
  0xc3   : > { %s10513_s1 = scalar_lea.hbm %s11173_s8, 256  ;;  %p10519_p8 = scmp.lt.s32.totalorder %s11173_s8, %s12864_s13 }
  0xc4   : > { %p10514_p3 = scmp.ne.s32.totalorder %s11173_s8, %s10513_s1  ;;  %p10520_p9 = scmp.lt.s32.totalorder %s10518_s0, %s10513_s1 }
  0xc6   : > { %p10516_p4 = pnand %p10514_p3, %p11011_p7  ;;  %p10521_p10 = por %p10520_p9, %p10519_p8 }
  0xc8   : > { %p10517_p6 = pneg %p10516_p4 }
  0xca   : > { %p10522_p11 = pnand %p10521_p10, %p10517_p6 }
  0xcc   : > { %10525 = shalt.err (!%p10522_p11)
}
  0xcd   : > { %s10526_s15 = scalar_lea.vmem %s778_s24, 256  ;;  %s10836_s18 = smov [#allocation20]  }
  0xce   : > { %p10527_p12 = scmp.ne.s32.totalorder %s778_s24, %s10526_s15  ;;  %s10531_s2 = sshll.u32 %s10836_s18, 4  ;;  %s10532_s2 = int_to_ptr.vmem [resolvable:$false] %s10531_s2 }
  0xcf   : > { %s10533_s6 = scalar_lea.vmem %s10532_s2, 512  ;;  %p10534_p1 = scmp.lt.s32.totalorder %s778_s24, %s10532_s2 }
  0xd0   : > { %p10529_p13 = pnand %p10527_p12, %p11011_p7  ;;  %p10535_p2 = scmp.lt.s32.totalorder %s10533_s6, %s10526_s15 }
  0xd2   : > { %p10530_p0 = pneg %p10529_p13  ;;  %p10536_p3 = por %p10535_p2, %p10534_p1 }
  0xd4   : > { %p10537_p4 = pnand %p10536_p3, %p10530_p0 }
  0xd6   : > { %10540 = shalt.err (!%p10537_p4)
}
  0xd7   : > { %9888 = dma.hbm_to_vmem [thread:$0]  (!%p10994_p5), %s11173_s8, 256, %s778_s24, %s12821_s12  }
  0xd8   : > { %s11195_s14 = sadd.s32 4294967295, %s10825_s30   ;;  %p112_p6 = scmp.ne.s32.totalorder %s10817_s28, %s10813_s27 }
  0xd9   : > { %12865 = sst [smem:[#allocation37_spill]] %s11195_s14  ;;  %p12829_p8 = scmp.eq.s32.totalorder %s11195_s14, 0 }
  0xda   : > { %p8563_p9 = scmp.ge.s32.totalorder %s10825_s30, 1  ;;  %p534_p10 = scmp.lt.s32.totalorder %s10825_s30, 3 }
  0xdb   : > { %p11205_p12 = por %p12829_p8, %p112_p6  ;;  %s10837_s8 = smov [#allocation3]  }
  0xdc   : > { %p11209_p13 = pnand %p8563_p9, %p534_p10  ;;  %s549_s24 = sshll.u32 %s10837_s8, 4  ;;  %s550_s24 = int_to_ptr.vmem [resolvable:$true] %s549_s24 }
  0xdd   : > { %s12866_s1 = scalar_select %p11205_p12, 1, 0 }
  0xde   : > { %s12868_s20 = scalar_select %p11209_p13, 1, 0 }
  0xdf   : > { %12867 = sst [smem:[#allocation38_spill]] %s12866_s1  ;;  %p9851_p0 = pneg %p11209_p13 }
  0xe0   : > { %12869 = sst [smem:[#allocation39_spill]] %s12868_s20  ;;  %s9817_s27 = smul.u32 3, %s10991_s22 }
  0xe1   : > { %p11218_p1 = pnand %p9851_p0, %p12829_p8  ;;  %s9818_s0 = smul.u32 48, %s10825_s30 }
  0xe2   : > { %s12871_s5 = sld [smem:[#allocation45_spill]]  ;;  %s10552_s12 = scalar_lea.vmem %s550_s24, 512 }
  0xe3   : > { %s12872_s3 = sld [smem:[#allocation43_spill]]  ;;  %p10543_p2 = pneg %p11218_p1 }
  0xe4   : > { %p10553_p3 = scmp.ne.s32.totalorder %s550_s24, %s10552_s12  ;;  %p10560_p9 = scmp.lt.s32.totalorder %s550_s24, %s550_s24 }
  0xe5   : > { %p10561_p10 = scmp.lt.s32.totalorder %s10552_s12, %s10552_s12 }
  0xe6   : > { %p10555_p4 = pnand %p10553_p3, %p10543_p2 }
  0xe7   : > { %p10562_p0 = por %p10561_p10, %p10560_p9 }
  0xe8   : > { %s11227_s18 = scalar_lea.hbm %s12871_s5, %s11121_s25  ;;  %p10556_p6 = pneg %p10555_p4 }
  0xe9   : > { %s11232_s8 = scalar_lea.hbm %s12872_s3, %s9818_s0 }
  0xea   : > { %p10563_p11 = pnand %p10562_p0, %p10556_p6 }
  0xec   : > { %10566 = shalt.err (!%p10563_p11)
}
  0xed   : > { %s10838_s4 = smov 128   ;;  %s10839_s0 = smov 8  }
  0xee   : > { %s12873_s2 = sld [smem:[#allocation41_spill]]  ;;  %s588_s6 = scalar_lea.vmem [#allocation7], %s9817_s27 }
  0xef   : > { %s596_s9 = sshll.u32 %s588_s6, 4  ;;  %s627_s11 = scalar_lea.vmem [#allocation10], %s10991_s22  ;;  %s597_s9 = int_to_ptr.vmem [resolvable:$true] %s596_s9 }
  0xf0   : > { %s634_s12 = sshll.u32 %s627_s11, 4  ;;  %s10567_s13 = scalar_lea.hbm %s11232_s8, 48  ;;  %s11242_s12 = int_to_ptr.vmem [resolvable:$true] %s634_s12 }
  0xf1   : > { %p10568_p11 = scmp.ne.s32.totalorder %s11232_s8, %s10567_s13  ;;  %s10572_s26 = scalar_lea.hbm %s12872_s3, 96 }
  0xf2   : > { %p10574_p4 = scmp.lt.s32.totalorder %s10572_s26, %s10567_s13 }
  0xf3   : > { %p10570_p2 = pnand %p10568_p11, %p11011_p7 }
  0xf4   : > { %9854 = dma.hbm_to_vmem [thread:$0]  (!%p11218_p1), %s12873_s2, 512, %s550_s24, [#allocation4], %s10838_s4, %s10838_s4, %s10839_s0  }
  0xf5   : > { %p10571_p3 = pneg %p10570_p2  ;;  %p10573_p1 = scmp.lt.s32.totalorder %s11232_s8, %s12872_s3 }
  0xf7   : > { %p10575_p6 = por %p10574_p4, %p10573_p1 }
  0xf9   : > { %p10576_p9 = pnand %p10575_p6, %p10571_p3 }
  0xfb   : > { %10579 = shalt.err (!%p10576_p9)
}
  0xfc   : > { %s10580_s4 = scalar_lea.vmem %s597_s9, 48  ;;  %s10840_s11 = smov [#allocation7]  }
  0xfd   : > { %p10581_p10 = scmp.ne.s32.totalorder %s597_s9, %s10580_s4  ;;  %s10585_s24 = sshll.u32 %s10840_s11, 4  ;;  %s10586_s24 = int_to_ptr.vmem [resolvable:$false] %s10585_s24 }
  0xfe   : > { %s10587_s27 = scalar_lea.vmem %s10586_s24, 96  ;;  %p10588_p11 = scmp.lt.s32.totalorder %s597_s9, %s10586_s24 }
  0xff   : > { %p10583_p0 = pnand %p10581_p10, %p11011_p7  ;;  %p10589_p2 = scmp.lt.s32.totalorder %s10587_s27, %s10580_s4 }
 0x101   : > { %p10584_p8 = pneg %p10583_p0  ;;  %p10590_p12 = por %p10589_p2, %p10588_p11 }
 0x103   : > { %p10591_p13 = pnand %p10590_p12, %p10584_p8 }
 0x105   : > { %10594 = shalt.err (!%p10591_p13)
}
 0x106   : > { %s12874_s13 = scalar_lea.sflag [#allocation6], %s10988_s21  ;;  %s10595_s28 = scalar_lea.hbm %s11227_s18, 16 }
 0x107   : > { %9861 = dma.hbm_to_vmem [thread:$0]  (!%p10994_p5), %s11232_s8, 48, %s597_s9, %s12874_s13  }
 0x108   : > { %p10596_p3 = scmp.ne.s32.totalorder %s11227_s18, %s10595_s28  ;;  %s10600_s20 = scalar_lea.hbm %s12871_s5, 32 }
 0x109   : > { %p10601_p8 = scmp.lt.s32.totalorder %s11227_s18, %s12871_s5  ;;  %p10602_p12 = scmp.lt.s32.totalorder %s10600_s20, %s10595_s28 }
 0x10a   : > { %p10598_p1 = pnand %p10596_p3, %p11011_p7 }
 0x10b   : > { %p10603_p13 = por %p10602_p12, %p10601_p8 }
 0x10c   : > { %p10599_p4 = pneg %p10598_p1 }
 0x10e   : > { %p10604_p6 = pnand %p10603_p13, %p10599_p4 }
 0x110   : > { %10607 = shalt.err (!%p10604_p6)
}
 0x111   : > { %s10608_s9 = scalar_lea.vmem %s11242_s12, 16  ;;  %s10841_s8 = smov [#allocation10]  }
 0x112   : > { %p10609_p9 = scmp.ne.s32.totalorder %s11242_s12, %s10608_s9  ;;  %s10613_s15 = sshll.u32 %s10841_s8, 4  ;;  %s10614_s15 = int_to_ptr.vmem [resolvable:$false] %s10613_s15 }
 0x113   : > { %s10615_s2 = scalar_lea.vmem %s10614_s15, 32  ;;  %p10616_p11 = scmp.lt.s32.totalorder %s11242_s12, %s10614_s15 }
 0x114   : > { %p10611_p10 = pnand %p10609_p9, %p11011_p7  ;;  %p10617_p2 = scmp.lt.s32.totalorder %s10615_s2, %s10608_s9 }
 0x116   : > { %p10612_p0 = pneg %p10611_p10  ;;  %p10618_p3 = por %p10617_p2, %p10616_p11 }
 0x118   : > { %p10619_p1 = pnand %p10618_p3, %p10612_p0 }
 0x11a   : > { %10622 = shalt.err (!%p10619_p1)
}
 0x11b   : > { %s12875_s6 = scalar_lea.sflag [#allocation9], %s10988_s21  ;;  %s12876_s7 = sld [smem:[#allocation47_spill]] }
 0x11c   : > { %9867 = dma.hbm_to_vmem [thread:$0]  (!%p10994_p5), %s11227_s18, 16, %s11242_s12, %s12875_s6  }
 0x11d   : > { %s665_s24 = scalar_lea.vmem [#allocation13], %s10991_s22  ;;  %s11295_s14 = scalar_lea.hbm %s12796_s10, %s11039_s29 }
 0x11e   : > { %s672_s27 = sshll.u32 %s665_s24, 4  ;;  %s673_s27 = int_to_ptr.vmem [resolvable:$true] %s672_s27 }
 0x121   : > { %s11288_s11 = scalar_lea.hbm %s12876_s7, %s11121_s25  ;;  %s10628_s20 = scalar_lea.hbm %s12876_s7, 32 }
 0x122   : > { %s10623_s1 = scalar_lea.hbm %s11288_s11, 16  ;;  %p10629_p13 = scmp.lt.s32.totalorder %s11288_s11, %s12876_s7 }
 0x123   : > { %p10624_p4 = scmp.ne.s32.totalorder %s11288_s11, %s10623_s1  ;;  %p10630_p6 = scmp.lt.s32.totalorder %s10628_s20, %s10623_s1 }
 0x125   : > { %p10626_p8 = pnand %p10624_p4, %p11011_p7  ;;  %p10631_p9 = por %p10630_p6, %p10629_p13 }
 0x127   : > { %p10627_p12 = pneg %p10626_p8 }
 0x129   : > { %p10632_p10 = pnand %p10631_p9, %p10627_p12 }
 0x12b   : > { %10635 = shalt.err (!%p10632_p10)
}
 0x12c   : > { %s10636_s9 = scalar_lea.vmem %s673_s27, 16  ;;  %s10842_s29 = smov [#allocation13]  }
 0x12d   : > { %p10637_p0 = scmp.ne.s32.totalorder %s673_s27, %s10636_s9  ;;  %s10641_s8 = sshll.u32 %s10842_s29, 4  ;;  %s10642_s8 = int_to_ptr.vmem [resolvable:$false] %s10641_s8 }
 0x12e   : > { %s10643_s15 = scalar_lea.vmem %s10642_s8, 32  ;;  %p10644_p3 = scmp.lt.s32.totalorder %s673_s27, %s10642_s8 }
 0x12f   : > { %p10639_p11 = pnand %p10637_p0, %p11011_p7  ;;  %p10645_p1 = scmp.lt.s32.totalorder %s10643_s15, %s10636_s9 }
 0x131   : > { %p10640_p2 = pneg %p10639_p11  ;;  %p10646_p4 = por %p10645_p1, %p10644_p3 }
 0x133   : > { %p10647_p8 = pnand %p10646_p4, %p10640_p2 }
 0x135   : > { %10650 = shalt.err (!%p10647_p8)
}
 0x136   : > { %s12877_s2 = scalar_lea.sflag [#allocation12], %s10988_s21  ;;  %s710_s6 = scalar_lea.vmem [#allocation16], %s11036_s16 }
 0x137   : > { %9873 = dma.hbm_to_vmem [thread:$0]  (!%p10994_p5), %s11288_s11, 16, %s673_s27, %s12877_s2  }
 0x138   : > { %s717_s26 = sshll.u32 %s710_s6, 4  ;;  %s8583_s4 = sshll.u32 %s10991_s22, 10  ;;  %s718_s26 = int_to_ptr.vmem [resolvable:$true] %s717_s26 }
 0x139   : > { %s10651_s24 = scalar_lea.hbm %s11295_s14, 1024  ;;  %s10656_s1 = scalar_lea.hbm %s12796_s10, 2048 }
 0x13a   : > { %p10652_p12 = scmp.ne.s32.totalorder %s11295_s14, %s10651_s24  ;;  %p10657_p9 = scmp.lt.s32.totalorder %s11295_s14, %s12796_s10 }
 0x13b   : > { %p10658_p10 = scmp.lt.s32.totalorder %s10656_s1, %s10651_s24 }
 0x13c   : > { %p10654_p13 = pnand %p10652_p12, %p11011_p7 }
 0x13d   : > { %p10659_p0 = por %p10658_p10, %p10657_p9 }
 0x13e   : > { %p10655_p6 = pneg %p10654_p13 }
 0x140   : > { %p10660_p11 = pnand %p10659_p0, %p10655_p6 }
 0x142   : > { %10663 = shalt.err (!%p10660_p11)
}
 0x143   : > { %s10664_s16 = scalar_lea.vmem %s718_s26, 1024  ;;  %s10843_s11 = smov [#allocation16]  }
 0x144   : > { %p10665_p2 = scmp.ne.s32.totalorder %s718_s26, %s10664_s16  ;;  %s10669_s27 = sshll.u32 %s10843_s11, 4  ;;  %s10670_s27 = int_to_ptr.vmem [resolvable:$false] %s10669_s27 }
 0x145   : > { %s10671_s20 = scalar_lea.vmem %s10670_s27, 2048  ;;  %p10672_p4 = scmp.lt.s32.totalorder %s718_s26, %s10670_s27 }
 0x146   : > { %p10667_p3 = pnand %p10665_p2, %p11011_p7  ;;  %p10673_p8 = scmp.lt.s32.totalorder %s10671_s20, %s10664_s16 }
 0x148   : > { %p10668_p1 = pneg %p10667_p3  ;;  %p10674_p12 = por %p10673_p8, %p10672_p4 }
 0x14a   : > { %p10675_p13 = pnand %p10674_p12, %p10668_p1 }
 0x14c   : > { %10678 = shalt.err (!%p10675_p13)
}
 0x14d   : > { %s12878_s0 = smov 4   ;;  %s12879_s19 = smov 64  }
 0x14e   : > { %s12880_s9 = scalar_lea.sflag [#allocation15], %s10988_s21  ;;  %s9002_s29 = sshll.u32 %s10825_s30, 14 }
 0x14f   : > { %9879 = dma.hbm_to_vmem [thread:$0]  (!%p10994_p5), %s11295_s14, 1024, %s718_s26, %s12880_s9, %s12879_s19, %s12879_s19, %s12878_s0  }
 0x150   : > { %s748_s8 = scalar_lea.vmem [#allocation19], %s8583_s4  ;;  %s12881_s24 = sld [smem:[#allocation51_spill]] }
 0x151   : > { %s755_s15 = sshll.u32 %s748_s8, 4  ;;  %s11348_s15 = int_to_ptr.vmem [resolvable:$true] %s755_s15 }
 0x156   : > { %s11346_s13 = scalar_lea.hbm %s12881_s24, %s9002_s29  ;;  %s10684_s1 = scalar_lea.hbm %s12881_s24, 32768 }
 0x157   : > { %s10679_s28 = scalar_lea.hbm %s11346_s13, 16384  ;;  %p10685_p0 = scmp.lt.s32.totalorder %s11346_s13, %s12881_s24 }
 0x158   : > { %p10680_p6 = scmp.ne.s32.totalorder %s11346_s13, %s10679_s28  ;;  %p10686_p11 = scmp.lt.s32.totalorder %s10684_s1, %s10679_s28 }
 0x15a   : > { %p10682_p9 = pnand %p10680_p6, %p11011_p7  ;;  %p10687_p2 = por %p10686_p11, %p10685_p0 }
 0x15c   : > { %p10683_p10 = pneg %p10682_p9 }
 0x15e   : > { %p10688_p3 = pnand %p10687_p2, %p10683_p10 }
 0x160   : > { %10691 = shalt.err (!%p10688_p3)
}
 0x161   : > { %s10692_s16 = scalar_lea.vmem %s11348_s15, 16384  ;;  %s10844_s11 = smov [#allocation19]  }
 0x162   : > { %p10693_p1 = scmp.ne.s32.totalorder %s11348_s15, %s10692_s16  ;;  %s10697_s27 = sshll.u32 %s10844_s11, 4  ;;  %s10698_s27 = int_to_ptr.vmem [resolvable:$false] %s10697_s27 }
 0x163   : > { %s10699_s20 = scalar_lea.vmem %s10698_s27, 32768  ;;  %p10700_p12 = scmp.lt.s32.totalorder %s11348_s15, %s10698_s27 }
 0x164   : > { %p10695_p4 = pnand %p10693_p1, %p11011_p7  ;;  %p10701_p13 = scmp.lt.s32.totalorder %s10699_s20, %s10692_s16 }
 0x166   : > { %p10696_p8 = pneg %p10695_p4  ;;  %p10702_p6 = por %p10701_p13, %p10700_p12 }
 0x168   : > { %p10703_p9 = pnand %p10702_p6, %p10696_p8 }
 0x16a   : > { %10706 = shalt.err (!%p10703_p9)
}
 0x16b   : > { %s10845_s9 = smov 1024   ;;  %s12882_s8 = scalar_lea.sflag [#allocation18], %s10988_s21 }
 0x16c   : > { %9885 = dma.hbm_to_vmem [thread:$0]  (!%p10994_p5), %s11346_s13, 16384, %s11348_s15, %s12882_s8, %s10845_s9, %s10845_s9, %s12879_s19  }
 0x16d   : > { %s12883_s28 = sld [smem:[#allocation53_spill]]  ;;  %s788_s1 = scalar_lea.vmem [#allocation22], %s8583_s4 }
 0x16e   : > { %s795_s18 = sshll.u32 %s788_s1, 4  ;;  %s796_s18 = int_to_ptr.vmem [resolvable:$true] %s795_s18 }
 0x173   : > { %s12884_s14 = smov %s12883_s28  ;;  %s11378_s26 = scalar_lea.hbm %s12883_s28, %s9002_s29 }
 0x174   : > { %s10707_s12 = scalar_lea.hbm %s11378_s26, 16384  ;;  %s10712_s30 = scalar_lea.hbm %s12884_s14, 32768 }
 0x175   : > { %p10708_p10 = scmp.ne.s32.totalorder %s11378_s26, %s10707_s12  ;;  %p10713_p2 = scmp.lt.s32.totalorder %s11378_s26, %s12884_s14 }
 0x176   : > { %p10714_p3 = scmp.lt.s32.totalorder %s10712_s30, %s10707_s12 }
 0x177   : > { %p10710_p0 = pnand %p10708_p10, %p11011_p7 }
 0x178   : > { %p10715_p1 = por %p10714_p3, %p10713_p2 }
 0x179   : > { %p10711_p11 = pneg %p10710_p0 }
 0x17b   : > { %p10716_p4 = pnand %p10715_p1, %p10711_p11 }
 0x17d   : > { %10719 = shalt.err (!%p10716_p4)
}
 0x17e   : > { %s10720_s4 = scalar_lea.vmem %s796_s18, 16384  ;;  %s10846_s29 = smov [#allocation22]  }
 0x17f   : > { %p10721_p8 = scmp.ne.s32.totalorder %s796_s18, %s10720_s4  ;;  %s10725_s27 = sshll.u32 %s10846_s29, 4  ;;  %s10726_s27 = int_to_ptr.vmem [resolvable:$false] %s10725_s27 }
 0x180   : > { %s10727_s20 = scalar_lea.vmem %s10726_s27, 32768  ;;  %p10728_p6 = scmp.lt.s32.totalorder %s796_s18, %s10726_s27 }
 0x181   : > { %p10723_p12 = pnand %p10721_p8, %p11011_p7  ;;  %p10729_p9 = scmp.lt.s32.totalorder %s10727_s20, %s10720_s4 }
 0x183   : > { %p10724_p13 = pneg %p10723_p12  ;;  %p10730_p10 = por %p10729_p9, %p10728_p6 }
 0x185   : > { %p10731_p0 = pnand %p10730_p10, %p10724_p13 }
 0x187   : > { %10734 = shalt.err (!%p10731_p0)
}
 0x188   : > { %s12885_s9 = scalar_lea.sflag [#allocation21], %s10988_s21  ;;  %s12886_s6 = sld [smem:[#allocation54_spill]] }
 0x189   : > { %9891 = dma.hbm_to_vmem [thread:$0]  (!%p10994_p5), %s11378_s26, 16384, %s796_s18, %s12885_s9, %s12879_s19, %s12879_s19, %s12878_s0  }
 0x18a   : > { %s808_s1 = scalar_lea.vmem [#allocation23], %s10991_s22  ;;  %s806_s16 = scalar_lea.sflag [#allocation24], %s10991_s22 }
 0x18b   : > { %s815_s12 = sshll.u32 %s808_s1, 4  ;;  %s816_s12 = int_to_ptr.vmem [resolvable:$true] %s815_s12 }
 0x18e   : > { %s11407_s28 = scalar_lea.hbm %s12886_s6, %s11121_s25  ;;  %s10740_s0 = scalar_lea.hbm %s12886_s6, 32 }
 0x18f   : > { %s10735_s15 = scalar_lea.hbm %s11407_s28, 16  ;;  %p10741_p1 = scmp.lt.s32.totalorder %s11407_s28, %s12886_s6 }
 0x190   : > { %p10736_p11 = scmp.ne.s32.totalorder %s11407_s28, %s10735_s15  ;;  %p10742_p4 = scmp.lt.s32.totalorder %s10740_s0, %s10735_s15 }
 0x192   : > { %p10738_p2 = pnand %p10736_p11, %p11011_p7  ;;  %p10743_p8 = por %p10742_p4, %p10741_p1 }
 0x194   : > { %p10739_p3 = pneg %p10738_p2 }
 0x196   : > { %p10744_p12 = pnand %p10743_p8, %p10739_p3 }
 0x198   : > { %10747 = shalt.err (!%p10744_p12)
}
 0x199   : > { %s10748_s25 = scalar_lea.vmem %s816_s12, 16  ;;  %s10847_s22 = smov [#allocation23]  }
 0x19a   : > { %p10749_p13 = scmp.ne.s32.totalorder %s816_s12, %s10748_s25  ;;  %s10753_s18 = sshll.u32 %s10847_s22, 4  ;;  %s10754_s18 = int_to_ptr.vmem [resolvable:$false] %s10753_s18 }
 0x19b   : > { %s10755_s13 = scalar_lea.vmem %s10754_s18, 32  ;;  %p10756_p10 = scmp.lt.s32.totalorder %s816_s12, %s10754_s18 }
 0x19c   : > { %p10751_p6 = pnand %p10749_p13, %p11011_p7  ;;  %p10757_p0 = scmp.lt.s32.totalorder %s10755_s13, %s10748_s25 }
 0x19e   : > { %p10752_p9 = pneg %p10751_p6  ;;  %p10758_p11 = por %p10757_p0, %p10756_p10 }
 0x1a0   : > { %p10759_p2 = pnand %p10758_p11, %p10752_p9 }
 0x1a2   : > { %10762 = shalt.err (!%p10759_p2)
}
 0x1a3   : > { %9894 = dma.hbm_to_vmem [thread:$0]  (!%p10994_p5), %s11407_s28, 16, %s816_s12, %s806_s16  }
 0x1a4   : > { %s12887_s11 = sld [smem:[#allocation39_spill]] }
 0x1aa   : > { %p12888_p3 = scmp.ne.s32.totalorder %s12887_s11, 0 }
 0x1ab   : > { %s12889_s4 = sld [smem:[#allocation37_spill]] (!%p12888_p3) }
 0x1ac   : > { %838 = sbr.rel (%p12888_p3) target bundleno = 11644 (0x2d7c), region = 92 }
 0x1b1   : > { %p12890_p1 = scmp.eq.s32.totalorder %s12889_s4, 0 }
 0x1b3   : > { %10780 = dma.done.wait (%p12890_p1), [#allocation4], 512   ;;  %p12891_p7 = pmov %p12890_p1 }
 0x1b4   : > { %s12892_s17 = sld [smem:[#allocation33_spill]]  ;;  %s11434_s27 = sand.u32 1, %s12889_s4  }
 0x1b5   : > { %10782 = vsyncadd (%p12891_p7), [#allocation4], 4294966784  ;;  %s12893_s29 = sld [smem:[#allocation38_spill]]  ;;  %s845_s9 = scalar_lea.sflag [#allocation6], %s11434_s27 }
 0x1ba   : > { %s11437_s20 = sand.u32 1, %s12892_s17  }
 0x1bb   : > { %s9819_s23 = smul.u32 192, %s11437_s20  ;;  %p12894_p5 = scmp.ne.s32.totalorder %s12893_s29, 0 }
 0x1bd   : > { %s11441_s8 = scalar_lea.vmem [#allocation5], %s9819_s23 }
 0x1be   : > { %10784 = dma.done.wait (%p12894_p5), %s845_s9, 3120  }
 0x1bf   : > { %10786 = vsyncadd (%p12894_p5), %s845_s9, 4294964176  ;;  %s9820_s2 = smul.u32 3, %s11437_s20  ;;  %s8595_s28 = sshll.u32 %s11437_s20, 6 }
 0x1c0   : > { %s863_s12 = scalar_lea.sflag [#allocation9], %s11434_s27  ;;  %s11452_s16 = scalar_lea.vmem [#allocation8], %s8595_s28 }
 0x1c1   : > { %s11449_s1 = scalar_lea.vmem [#allocation7], %s9820_s2 }
 0x1c2   : > { %10788 = dma.done.wait (%p12894_p5), %s863_s12, 1040  }
 0x1c3   : > { %10790 = vsyncadd (%p12894_p5), %s863_s12, 4294966256  ;;  %s880_s21 = scalar_lea.sflag [#allocation12], %s11434_s27  ;;  %s11460_s30 = scalar_lea.vmem [#allocation11], %s8595_s28 }
 0x1c4   : > { %10792 = dma.done.wait (%p12894_p5), %s880_s21, 1040  }
 0x1c5   : > { %10794 = vsyncadd (%p12894_p5), %s880_s21, 4294966256  ;;  %s8597_s0 = sshll.u32 %s11437_s20, 1  ;;  %s897_s26 = scalar_lea.sflag [#allocation15], %s11434_s27 }
 0x1c6   : > { %s11469_s25 = scalar_lea.vmem [#allocation14], %s8597_s0 }
 0x1c7   : > { %10796 = dma.done.wait (%p12894_p5), %s897_s26, 1056  }
 0x1c8   : > { %10798 = vsyncadd (%p12894_p5), %s897_s26, 4294966240  ;;  %s11475_s22 = scalar_lea.vmem [#allocation16], %s8595_s28  ;;  %s915_s18 = scalar_lea.sflag [#allocation18], %s11434_s27 }
 0x1c9   : > { %10800 = dma.done.wait (%p12894_p5), %s915_s18, 16400  }
 0x1ca   : > { %10802 = vsyncadd (%p12894_p5), %s915_s18, 4294950896  ;;  %s8599_s11 = sshll.u32 %s11437_s20, 10  ;;  %s8600_s17 = sshll.u32 %s11437_s20, 4 }
 0x1cb   : > { %s11485_s23 = scalar_lea.vmem [#allocation19], %s8599_s11  ;;  %s932_s9 = scalar_lea.sflag [#allocation21], %s11434_s27 }
 0x1cc   : > { %s11488_s2 = scalar_lea.vmem [#allocation20], %s8600_s17 }
 0x1cd   : > { %10804 = dma.done.wait (%p12894_p5), %s932_s9, 16640  }
 0x1ce   : > { %10806 = vsyncadd (%p12894_p5), %s932_s9, 4294950656  ;;  %s11494_s28 = scalar_lea.vmem [#allocation22], %s8599_s11  ;;  %s950_s12 = scalar_lea.sflag [#allocation24], %s11437_s20 }
 0x1cf   : > { %10808 = dma.done.wait (%p12894_p5), %s950_s12, 16  }
 0x1d0   : > { %10810 = vsyncadd (%p12894_p5), %s950_s12, 4294967280  ;;  %p1069_p4 = scmp.lt.s32.totalorder %s12889_s4, 1  ;;  %s12895_s9 = sld [smem:[#allocation48_spill]] }
 0x1d1   : > { %s12896_s15 = sld [smem:[#allocation55_spill]]  ;;  %p12898_p8 = scmp.ne.s32.totalorder %s12889_s4, 0 }
 0x1d2   : > { %s1070_s27 = scalar_select %p1069_p4, %s12889_s4, 1 }
 0x1d3   : > { %s12897_s29 = sld [smem:[#allocation56_spill]] }
 0x1d4   : > { %s9005_s0 = sshll.u32 %s1070_s27, 7  ;;  %s8604_s26 = sshll.u32 %s1070_s27, 2 }
 0x1d5   : > { %1086 = sbr.rel (%p12898_p8) target bundleno = 477 (0x1dd), region = 152  ;;  %s12899_s7 = sld [smem:[#allocation40_spill]] (!%p12898_p8) }
 0x1d6   : > { %s11507_s13 = scalar_lea.vmem %s12895_s9, %s9005_s0 }
 0x1d7   : > { %s11512_s21 = scalar_lea.vmem %s12896_s15, %s8604_s26 }
 0x1d9   : > { %s11517_s12 = scalar_lea.vmem %s12897_s29, %s8604_s26 }
 0x1db   : > { %v1087_v0 = vld [vmem:[%s12899_s7] sm:$0xff]  ;;  %v1088_v1 = vld [vmem:[%s12899_s7 + $0x8] sm:$0xff] }
 0x1dc   : > { %1089 = vst [vmem:[#allocation2] sm:$0xff] %v1087_v0  ;;  %1090 = vst [vmem:[#allocation2 + $0x8] sm:$0xff] %v1088_v1 }
 0x1dd PF: > { %v10019_v2 = vld [vmem:[%s11441_s8 + $0xac] ss:$12 sps:$4 sm:$0xff]   ;;  %v10021_v3 = vld [vmem:[%s11441_s8 + $0xa8] ss:$12 sps:$4 sm:$0xff]   ;;  %v10848_v4 = vmov 0   ;;  %v10849_v22 = vmov 0.0   ;;  %v1095_v23 = vlaneseq }
 0x1de   : > { %1311 = vmatprep.mubr.bf16.mxu0 %v10848_v4  ;;  %1279 = vmatprep.subr.bf16.mxu0 %v10019_v2  ;;  %v10022_v5 = vld [vmem:[%s11441_s8 + $0x94] ss:$12 sps:$4 sm:$0xff]   ;;  %v10024_v6 = vld [vmem:[%s11441_s8 + $0x90] ss:$12 sps:$4 sm:$0xff]   ;;  %v10027_v8 = vld [vmem:[%s11441_s8 + $0x78] ss:$12 sps:$4 sm:$0xff]  }
 0x1df   : > { %1280 = vmatpush1.bf16.msra.mxu0 %v10021_v3  ;;  %v10025_v7 = vld [vmem:[%s11441_s8 + $0x7c] ss:$12 sps:$4 sm:$0xff]   ;;  %v10028_v9 = vld [vmem:[%s11441_s8 + $0x64] ss:$12 sps:$4 sm:$0xff]   ;;  %v10030_v10 = vld [vmem:[%s11441_s8 + $0x60] ss:$12 sps:$4 sm:$0xff]   ;;  %9351 = vmatprep.subr.bf16.mxu1 %v10849_v22 }
 0x1e0   : > { %1281 = vmatprep.subr.bf16.mxu0 %v10022_v5  ;;  %v10031_v11 = vld [vmem:[%s11441_s8 + $0x4c] ss:$12 sps:$4 sm:$0xff]   ;;  %v10033_v12 = vld [vmem:[%s11441_s8 + $0x48] ss:$12 sps:$4 sm:$0xff]   ;;  %v10036_v14 = vld [vmem:[%s11441_s8 + $0x30] ss:$12 sps:$4 sm:$0xff]  }
 0x1e1   : > { %v10034_v13 = vld [vmem:[%s11441_s8 + $0x34] ss:$12 sps:$4 sm:$0xff]   ;;  %v10037_v15 = vld [vmem:[%s11441_s8 + $0x1c] ss:$12 sps:$4 sm:$0xff]   ;;  %v10039_v16 = vld [vmem:[%s11441_s8 + $0x18] ss:$12 sps:$4 sm:$0xff]  }
 0x1e2   : > { %v10040_v17 = vld [vmem:[%s11441_s8 + $0x4] ss:$12 sps:$4 sm:$0xff]   ;;  %v10042_v18 = vld [vmem:[%s11441_s8] ss:$12 sps:$4 sm:$0xff]   ;;  %vm10850_vm0 = vmmov 0   ;;  %v11553_v24 = vshrl.u32 %v1095_v23, 7 }
 0x1e3   : > { %1282 = vmatpush1.bf16.msra.mxu0 %v10024_v6  ;;  %v1091_v19 = vld [vmem:[#allocation2] sm:$0xff]  ;;  %v1092_v20 = vld [vmem:[#allocation2 + $0x8] sm:$0xff]  ;;  %9367 = vmatprep.mubr.msk.bf16.mxu1 %vm10850_vm0, %v10849_v22  ;;  %v11559_v26 = vld [vmem:[%s11449_s1] sm:$0x7]  ;;  %vm1369_vm1 = vcmask 130048   ;;  %s10851_s3 = smov 112  }
 0x1e4   : > { %1283 = vmatprep.subr.bf16.mxu0 %v10025_v7  ;;  %v11544_v21 = vpack.c.bf16 %v1092_v20, %v1091_v19  ;;  %v11556_v25 = vsub.s32 1, %v11553_v24  ;;  %v11564_v29 = vsub.s32 0, %v11553_v24  ;;  %v10043_v44 = vld [vmem:[%s11441_s8 + $0xb0] ss:$12 sps:$4 sm:$0xff]   ;;  %v10044_v45 = vld [vmem:[%s11441_s8 + $0x98] ss:$12 sps:$4 sm:$0xff]  }
 0x1e5   : > { %9352 = vmatpush3.bf16.msra.mxu1 %v10043_v44  ;;  %v10045_v46 = vld [vmem:[%s11441_s8 + $0x80] ss:$12 sps:$4 sm:$0xff]   ;;  %v10046_v47 = vld [vmem:[%s11441_s8 + $0x68] ss:$12 sps:$4 sm:$0xff]   ;;  %v10047_v48 = vld [vmem:[%s11441_s8 + $0x50] ss:$12 sps:$4 sm:$0xff]  }
 0x1e6   : > { %v1143_v27 = vrot.slane %v11559_v26, %v11556_v25  ;;  %v1139_v33 = vrot.slane %v11559_v26, %v11564_v29  ;;  %9353 = vmatprep.subr.bf16.mxu1 %v10849_v22  ;;  %v10048_v49 = vld [vmem:[%s11441_s8 + $0x38] ss:$12 sps:$4 sm:$0xff]   ;;  %v10049_v50 = vld [vmem:[%s11441_s8 + $0x20] ss:$12 sps:$4 sm:$0xff]   ;;  %v10050_v51 = vld [vmem:[%s11441_s8 + $0x8] ss:$12 sps:$4 sm:$0xff]  }
 0x1e7   : > { %1284 = vmatpush1.bf16.msra.mxu0 %v10027_v8  ;;  %v1098_v52 = vand.u32 127, %v1095_v23  ;;  %v10852_v53 = vmov -1e+30   ;;  %vm1462_vm3 = vcmask 64512   ;;  %vm1490_vm4 = vcmask 1043456   ;;  %s10853_s5 = smov 96  }
 0x1e8   : > { %1285 = vmatprep.subr.bf16.mxu0 %v10028_v9  ;;  %s10854_s6 = smov 80   ;;  %s10855_s4 = smov 64   ;;  %vm3184_vm5 = vcmask 261120   ;;  %vm3187_vm6 = vcmask 392192   ;;  %vm3190_vm7 = vcmask 523264   ;;  %vm3193_vm8 = vcmask 654336  }
 0x1e9   : > { %9354 = vmatpush3.bf16.msra.mxu1 %v10044_v45  ;;  %vm1099_vm2 = vcmp.le.s32.totalorder %v1098_v52, %v11553_v24  ;;  %s10856_s8 = smov 48   ;;  %s10857_s1 = smov 32   ;;  %vm3196_vm9 = vcmask 785408   ;;  %vm3199_vm10 = vcmask 916480  }
 0x1ea   : > { %9355 = vmatprep.subr.bf16.mxu1 %v10849_v22  ;;  %v11612_v54 = vsel %vm1099_vm2, 0.0, %v10852_v53  ;;  %s10858_s15 = smov 16   ;;  %s12902_s19 = scalar_lea.vmem [#allocation17], %s11437_s20 }
 0x1eb   : > { %1286 = vmatpush1.bf16.msra.mxu0 %v10030_v10 }
 0x1ec   : > { %1287 = vmatprep.subr.bf16.mxu0 %v10031_v11 }
 0x1ed   : > { %9356 = vmatpush3.bf16.msra.mxu1 %v10045_v46 }
 0x1ee   : > { %9357 = vmatprep.subr.bf16.mxu1 %v10849_v22 }
 0x1ef   : > { %1288 = vmatpush1.bf16.msra.mxu0 %v10033_v12 }
 0x1f0   : > { %1289 = vmatprep.subr.bf16.mxu0 %v10034_v13 }
 0x1f1   : > { %9358 = vmatpush3.bf16.msra.mxu1 %v10046_v47 }
 0x1f2   : > { %9359 = vmatprep.subr.bf16.mxu1 %v10849_v22 }
 0x1f3   : > { %1290 = vmatpush1.bf16.msra.mxu0 %v10036_v14  ;;  %v11623_v14 = vsub.s32 2, %v11553_v24 }
 0x1f4   : > { %1291 = vmatprep.subr.bf16.mxu0 %v10037_v15 }
 0x1f5   : > { %9360 = vmatpush3.bf16.msra.mxu1 %v10047_v48 }
 0x1f6   : > { %9361 = vmatprep.subr.bf16.mxu1 %v10849_v22 }
 0x1f7   : > { %1292 = vmatpush1.bf16.msra.mxu0 %v10039_v16  ;;  %v1147_v16 = vrot.slane %v11559_v26, %v11623_v14 }
 0x1f8   : > { %1293 = vmatprep.subr.bf16.mxu0 %v10040_v17 }
 0x1f9   : > { %9362 = vmatpush3.bf16.msra.mxu1 %v10048_v49 }
 0x1fa   : > { %9363 = vmatprep.subr.bf16.mxu1 %v10849_v22 }
 0x1fb   : > { %1294 = vmatpush1.bf16.msra.mxu0 %v10042_v18 }
 0x1fc   : > { %9371 = vmatprep.subr.bf16.mxu0 %v10849_v22 }
 0x1fd   : > { %9364 = vmatpush3.bf16.msra.mxu1 %v10049_v50 }
 0x1fe   : > { %1312 = vmatmul.mubr.bf16.vlgmr.msra.gmra.mxu0 %v11544_v21  ;;  %9365 = vmatprep.subr.bf16.mxu1 %v10849_v22 }
 0x1ff   : > { %9373 = vmatprep.mubr.msk.bf16.mxu0 %vm10850_vm0, %v10849_v22 }
 0x201   : > { %9366 = vmatpush3.bf16.msra.mxu1 %v10050_v51 }
 0x202   : > { %9389 = vmatprep.subr.bf16.mxu1 %v10849_v22 }
 0x204   : > { %9368 = vmatmul.mubr.bf16.vlgmr.msra.gmra.mxu1 %v11544_v21 }
 0x205   : > { %9391 = vmatprep.mubr.msk.bf16.mxu1 %vm10850_vm0, %v10849_v22 }
 0x2be   : > { %v1313_v28 = vpop.f32.mrf.mxu0 }
 0x2bf   : > { %v1314_v38 = vadd.f32 %v1313_v28, %v1139_v33 }
 0x2c0   : > { %v1315_v30 = vpop.f32.mrf.mxu0 }
 0x2c1   : > { %v1316_v31 = vadd.f32 %v1315_v30, %v1143_v27  ;;  %v11577_v40 = vpack.c.bf16 %v1314_v38, %v1314_v38 }
 0x2c2   : > { %v1317_v32 = vpop.f32.mrf.mxu0 }
 0x2c3   : > { %v11568_v34 = vpack.c.bf16 %v1316_v31, %v1316_v31  ;;  %v1318_v42 = vadd.f32 %v1317_v32, %v1139_v33 }
 0x2c4   : > { %v1319_v35 = vpop.f32.mrf.mxu0  ;;  %v1356_v15 = vpop.f32.mrf.mxu1 }
 0x2c5   : > { %v1320_v36 = vadd.f32 %v1319_v35, %v1143_v27  ;;  %v1374_v37 = vsel %vm1369_vm1, %v11568_v34, 0  ;;  %v11586_v43 = vpack.c.bf16 %v1318_v42, %v1318_v42  ;;  %v1357_v18 = vadd.f32 %v1356_v15, %v1147_v16 }
 0x2c6   : > { %9372 = vmatpush3.bf16.xpose.msra.mxu0 %v1374_v37  ;;  %v9369_v17 = vpop.f32.mrf.mxu1 }
 0x2c7   : > { %v11572_v39 = vpack.c.bf16 %v1320_v36, %v1320_v36  ;;  %9377 = vmatprep.subr.bf16.mxu0 %v10849_v22  ;;  %v11627_v23 = vpack.c.bf16 %v1357_v18, %v1357_v18 }
 0x2c8   : > { %v1359_v19 = vpop.f32.mrf.mxu1 }
 0x2c9   : > { %1636 = vrot.lane.b32.xlu1 %v11572_v39, %s10851_s3  ;;  %v1420_v41 = vsel %vm1369_vm1, %v11572_v39, 0  ;;  %v1360_v20 = vadd.f32 %v1359_v19, %v1147_v16  ;;  %v1492_v28 = vsel %vm1490_vm4, %v11627_v23, 0 }
 0x2ca   : > { %v9370_v21 = vpop.f32.mrf.mxu1 }
 0x2cb   : > { %v11629_v27 = vpack.c.bf16 %v1360_v20, %v1360_v20 }
 0x2cd   : > { %9374 = vmatmul.mubr.msk.bf16.vlgmr.msra.gmra.mxu0 %vm1369_vm1, %v11577_v40  ;;  %v1538_v30 = vsel %vm1490_vm4, %v11629_v27, 0 }
 0x2ce   : > { %9378 = vmatpush3.bf16.xpose.msra.mxu0 %v1420_v41  ;;  %9379 = vmatprep.mubr.msk.bf16.mxu0 %vm10850_vm0, %v10849_v22 }
 0x2cf   : > { %9383 = vmatprep.subr.bf16.mxu0 %v10849_v22  ;;  %9390 = vmatpush3.bf16.msra.mxu1 %v1538_v30 }
 0x2d0   : > { %9401 = vmatprep.subr.bf16.mxu1 %v10849_v22 }
 0x2d5   : > { %9380 = vmatmul.mubr.msk.bf16.vlgmr.msra.gmra.mxu0 %vm1369_vm1, %v11586_v43 }
 0x2d6   : > { %9385 = vmatprep.mubr.msk.bf16.mxu0 %vm10850_vm0, %v10849_v22  ;;  %9384 = vmatpush3.bf16.msra.mxu0 %v1492_v28 }
 0x2d7   : > { %9395 = vmatprep.subr.bf16.mxu0 %v10849_v22 }
 0x33b   : > { %v1637_v26 = vpop.permute.xlu1 %1636 }
 0x33c   : > { %v1642_v46 = vsel %vm1369_vm1, %v1637_v26, 0 }
 0x38d   : > { %v1410_v55 = vpop.f32.mrf.mxu0 }
 0x38e   : > { %v1411_v56 = vadd.f32 %v1410_v55, %v11612_v54 }
 0x38f   : > { %v9375_v57 = vpop.f32.mrf.mxu0 }
 0x390   : > { %v1463_v58 = vsel %vm1462_vm3, %v1411_v56, -inf }
 0x391   : > { %1464 = vmax.xlane.f32.xlu0 %v1463_v58  ;;  %v1413_v59 = vpop.f32.mrf.mxu0 }
 0x393   : > { %v9376_v60 = vpop.f32.mrf.mxu0 }
 0x395   : > { %v1456_v61 = vpop.f32.mrf.mxu0 }
 0x396   : > { %v1457_v62 = vadd.f32 %v1456_v61, %v11612_v54 }
 0x397   : > { %v9381_v63 = vpop.f32.mrf.mxu0 }
 0x398   : > { %v1466_v0 = vsel %vm1462_vm3, %v1457_v62, -inf }
 0x399   : > { %1467 = vmax.xlane.f32.xlu0 %v1466_v0  ;;  %v1459_v1 = vpop.f32.mrf.mxu0 }
 0x39b   : > { %v9382_v2 = vpop.f32.mrf.mxu0 }
 0x3af   : > { %1584 = vrot.lane.b32.xlu0 %v11568_v34, %s10851_s3 }
 0x41a   : > { %v1465_v3 = vpop.xlane.xlu0 %1464 }
 0x41b   : > { %v1469_v5 = vsub.f32 %v1411_v56, %v1465_v3 }
 0x41d   : > { %v1471_v6 = vmul.f32 1.442695, %v1469_v5 }
 0x41f   : > { %10227 = vpow2.f32 %v1471_v6 }
 0x422   : > { %v1468_v7 = vpop.xlane.xlu0 %1467 }
 0x423   : > { %v1470_v8 = vsub.f32 %v1457_v62, %v1468_v7 }
 0x425   : > { %v1473_v9 = vmul.f32 1.442695, %v1470_v8 }
 0x426   : > { %v1585_v36 = vpop.permute.xlu0 %1584 }
 0x427   : > { %10229 = vpow2.f32 %v1473_v9  ;;  %v1590_v38 = vsel %vm1369_vm1, %v1585_v36, 0 }
 0x42c   : > { %v10228_v10 = vpop.eup %10227 }
 0x42d   : > { %v1475_v11 = vsel %vm1462_vm3, %v10228_v10, 0.0 }
 0x42e   : > { %1476 = vadd.xlane.f32.xlu1 %v1475_v11 }
 0x434   : > { %v10230_v12 = vpop.eup %10229 }
 0x435   : > { %v1478_v13 = vsel %vm1462_vm3, %v10230_v12, 0.0 }
 0x436   : > { %1479 = vadd.xlane.f32.xlu1 %v1478_v13 }
 0x447   : > { %1581 = vrot.lane.b32.xlu1 %v11577_v40, %s10851_s3 }
 0x44b   : > { %1633 = vrot.lane.b32.xlu1 %v11586_v43, %s10851_s3 }
 0x4b7   : > { %v1477_v31 = vpop.xlane.xlu1 %1476 }
 0x4b8   : > { %10231 = vrcp.f32 %v1477_v31 }
 0x4bf   : > { %v1480_v32 = vpop.xlane.xlu1 %1479 }
 0x4c0   : > { %10233 = vrcp.f32 %v1480_v32 }
 0x4c3   : > { %v1582_v45 = vpop.permute.xlu1 %1581 }
 0x4c5   : > { %v10232_v33 = vpop.eup %10231 }
 0x4c6   : > { %v1483_v35 = vmul.f32 %v10232_v33, %v10228_v10 }
 0x4c7   : > { %v1634_v47 = vpop.permute.xlu1 %1633 }
 0x4c8   : > { %v1485_v37 = vpack.c.bf16 %v1483_v35, %v1483_v35 }
 0x4ca   : > { %9386 = vmatmul.mubr.msk.bf16.vlgmr.msra.gmra.mxu0 %vm1462_vm3, %v1485_v37 }
 0x4cb   : > { %9396 = vmatpush3.bf16.xpose.msra.mxu0 %v1590_v38  ;;  %9397 = vmatprep.mubr.msk.bf16.mxu0 %vm10850_vm0, %v10849_v22 }
 0x4cc   : > { %9407 = vmatprep.subr.bf16.mxu0 %v10849_v22 }
 0x4cd   : > { %v10234_v41 = vpop.eup %10233 }
 0x4ce   : > { %v1484_v42 = vmul.f32 %v10234_v41, %v10230_v12 }
 0x4d0   : > { %v1486_v44 = vpack.c.bf16 %v1484_v42, %v1484_v42 }
 0x4d2   : > { %9392 = vmatmul.mubr.msk.bf16.vlgmr.msra.gmra.mxu1 %vm1462_vm3, %v1486_v44  ;;  %9398 = vmatmul.mubr.msk.bf16.vlgmr.msra.gmra.mxu0 %vm1369_vm1, %v1582_v45 }
 0x4d3   : > { %9402 = vmatpush3.bf16.xpose.msra.mxu1 %v1642_v46  ;;  %9403 = vmatprep.mubr.msk.bf16.mxu1 %vm10850_vm0, %v10849_v22 }
 0x4d4   : > { %9413 = vmatprep.subr.bf16.mxu1 %v10849_v22  ;;  %9409 = vmatprep.mubr.msk.bf16.mxu0 %vm10850_vm0, %v10849_v22 }
 0x4da   : > { %9404 = vmatmul.mubr.msk.bf16.vlgmr.msra.gmra.mxu1 %vm1369_vm1, %v1634_v47 }
 0x4db   : > { %9415 = vmatprep.mubr.msk.bf16.mxu1 %vm10850_vm0, %v10849_v22 }
 0x58a   : > { %v11657_v48 = vpop.f32.mrf.mxu0 }
 0x58c   : > { %v9387_v49 = vpop.f32.mrf.mxu0 }
 0x58e   : > { %v1531_v50 = vpop.f32.mrf.mxu0 }
 0x590   : > { %v9388_v51 = vpop.f32.mrf.mxu0 }
 0x592   : > { %v11659_v52 = vpop.f32.mrf.mxu1  ;;  %v1626_v53 = vpop.f32.mrf.mxu0 }
 0x593   : > { %v1627_v55 = vadd.f32 %v1626_v53, %v11612_v54 }
 0x594   : > { %v9393_v56 = vpop.f32.mrf.mxu1  ;;  %v9399_v57 = vpop.f32.mrf.mxu0 }
 0x595   : > { %v1684_v58 = vsel %vm1462_vm3, %v1627_v55, -inf }
 0x596   : > { %v1577_v59 = vpop.f32.mrf.mxu1  ;;  %1685 = vmax.xlane.f32.xlu0 %v1684_v58  ;;  %v1629_v60 = vpop.f32.mrf.mxu0 }
 0x598   : > { %v9394_v61 = vpop.f32.mrf.mxu1  ;;  %v9400_v62 = vpop.f32.mrf.mxu0 }
 0x59a   : > { %v1678_v63 = vpop.f32.mrf.mxu1 }
 0x59b   : > { %v1679_v0 = vadd.f32 %v1678_v63, %v11612_v54 }
 0x59c   : > { %v9405_v1 = vpop.f32.mrf.mxu1 }
 0x59d   : > { %v1687_v2 = vsel %vm1462_vm3, %v1679_v0, -inf }
 0x59e   : > { %1688 = vmax.xlane.f32.xlu1 %v1687_v2  ;;  %v1681_v3 = vpop.f32.mrf.mxu1 }
 0x5a0   : > { %v9406_v5 = vpop.f32.mrf.mxu1 }
 0x5af   : > { %1758 = vrot.lane.b32.xlu1 %v11629_v27, %s10851_s3 }
 0x5b3   : > { %1808 = vrot.lane.b32.xlu1 %v11568_v34, %s10853_s5 }
 0x5b7   : > { %1858 = vrot.lane.b32.xlu1 %v11572_v39, %s10853_s5 }
 0x5bb   : > { %1856 = vrot.lane.b32.xlu1 %v11586_v43, %s10853_s5 }
 0x61f   : > { %v1686_v6 = vpop.xlane.xlu0 %1685 }
 0x620   : > { %v1690_v7 = vsub.f32 %v1627_v55, %v1686_v6 }
 0x622   : > { %v1692_v8 = vmul.f32 1.442695, %v1690_v7 }
 0x624   : > { %10235 = vpow2.f32 %v1692_v8 }
 0x627   : > { %v1689_v9 = vpop.xlane.xlu1 %1688 }
 0x628   : > { %v1691_v10 = vsub.f32 %v1679_v0, %v1689_v9 }
 0x62a   : > { %v1694_v11 = vmul.f32 1.442695, %v1691_v10 }
 0x62b   : > { %v1759_v12 = vpop.permute.xlu1 %1758 }
 0x62c   : > { %10237 = vpow2.f32 %v1694_v11  ;;  %v1764_v13 = vsel %vm1490_vm4, %v1759_v12, 0 }
 0x62d   : > { %9414 = vmatpush3.bf16.msra.mxu1 %v1764_v13 }
 0x62e   : > { %9425 = vmatprep.subr.bf16.mxu1 %v10849_v22 }
 0x62f   : > { %v1809_v31 = vpop.permute.xlu1 %1808 }
 0x630   : > { %v1814_v33 = vsel %vm1369_vm1, %v1809_v31, 0 }
 0x631   : > { %v10236_v15 = vpop.eup %10235 }
 0x632   : > { %v1696_v16 = vsel %vm1462_vm3, %v10236_v15, 0.0 }
 0x633   : > { %1697 = vadd.xlane.f32.xlu0 %v1696_v16  ;;  %v1859_v37 = vpop.permute.xlu1 %1858 }
 0x634   : > { %v1864_v42 = vsel %vm1369_vm1, %v1859_v37, 0 }
 0x637   : > { %v1857_v44 = vpop.permute.xlu1 %1856 }
 0x639   : > { %v10238_v17 = vpop.eup %10237 }
 0x63a   : > { %v1699_v18 = vsel %vm1462_vm3, %v10238_v17, 0.0 }
 0x63b   : > { %1700 = vadd.xlane.f32.xlu0 %v1699_v18 }
 0x651   : > { %1709 = vrot.lane.b32.xlu0 %v11627_v23, %s10851_s3 }
 0x655   : > { %1806 = vrot.lane.b32.xlu0 %v11577_v40, %s10853_s5 }
 0x6bc   : > { %v1698_v19 = vpop.xlane.xlu0 %1697 }
 0x6bd   : > { %10239 = vrcp.f32 %v1698_v19 }
 0x6c4   : > { %v1701_v20 = vpop.xlane.xlu0 %1700 }
 0x6c5   : > { %10241 = vrcp.f32 %v1701_v20 }
 0x6c8   : > { %v1710_v21 = vpop.permute.xlu0 %1709 }
 0x6c9   : > { %v1715_v28 = vsel %vm1490_vm4, %v1710_v21, 0 }
 0x6ca   : > { %v10240_v30 = vpop.eup %10239  ;;  %9408 = vmatpush3.bf16.msra.mxu0 %v1715_v28 }
 0x6cb   : > { %9419 = vmatprep.subr.bf16.mxu0 %v10849_v22  ;;  %v1704_v26 = vmul.f32 %v10240_v30, %v10236_v15 }
 0x6cc   : > { %v1807_v41 = vpop.permute.xlu0 %1806 }
 0x6cd   : > { %v1706_v32 = vpack.c.bf16 %v1704_v26, %v1704_v26 }
 0x6cf   : > { %9410 = vmatmul.mubr.msk.bf16.vlgmr.msra.gmra.mxu0 %vm1462_vm3, %v1706_v32 }
 0x6d0   : > { %9420 = vmatpush3.bf16.xpose.msra.mxu0 %v1814_v33  ;;  %9421 = vmatprep.mubr.msk.bf16.mxu0 %vm10850_vm0, %v10849_v22 }
 0x6d1   : > { %9431 = vmatprep.subr.bf16.mxu0 %v10849_v22 }
 0x6d2   : > { %v10242_v35 = vpop.eup %10241 }
 0x6d3   : > { %v1705_v36 = vmul.f32 %v10242_v35, %v10238_v17 }
 0x6d5   : > { %v1707_v38 = vpack.c.bf16 %v1705_v36, %v1705_v36 }
 0x6d7   : > { %9416 = vmatmul.mubr.msk.bf16.vlgmr.msra.gmra.mxu1 %vm1462_vm3, %v1707_v38  ;;  %9422 = vmatmul.mubr.msk.bf16.vlgmr.msra.gmra.mxu0 %vm1369_vm1, %v1807_v41 }
 0x6d8   : > { %9426 = vmatpush3.bf16.xpose.msra.mxu1 %v1864_v42  ;;  %9427 = vmatprep.mubr.msk.bf16.mxu1 %vm10850_vm0, %v10849_v22 }
 0x6d9   : > { %9437 = vmatprep.subr.bf16.mxu1 %v10849_v22  ;;  %9433 = vmatprep.mubr.msk.bf16.mxu0 %vm10850_vm0, %v10849_v22 }
 0x6df   : > { %9428 = vmatmul.mubr.msk.bf16.vlgmr.msra.gmra.mxu1 %vm1369_vm1, %v1857_v44 }
 0x6e0   : > { %9439 = vmatprep.mubr.msk.bf16.mxu1 %vm10850_vm0, %v10849_v22 }
 0x78f   : > { %v11699_v45 = vpop.f32.mrf.mxu0 }
 0x791   : > { %v9411_v46 = vpop.f32.mrf.mxu0 }
 0x793   : > { %v1754_v47 = vpop.f32.mrf.mxu0 }
 0x795   : > { %v9412_v49 = vpop.f32.mrf.mxu0 }
 0x797   : > { %v11701_v50 = vpop.f32.mrf.mxu1  ;;  %v1850_v51 = vpop.f32.mrf.mxu0 }
 0x798   : > { %v9949_v53 = vpack.i.bf16 %v11701_v50, %v11699_v45  ;;  %v1851_v55 = vadd.f32 %v1850_v51, %v11612_v54 }
 0x799   : > { %v9417_v56 = vpop.f32.mrf.mxu1  ;;  %v9423_v57 = vpop.f32.mrf.mxu0 }
 0x79a   : > { %v1906_v58 = vsel %vm1462_vm3, %v1851_v55, -inf }
 0x79b   : > { %v1803_v59 = vpop.f32.mrf.mxu1  ;;  %1907 = vmax.xlane.f32.xlu0 %v1906_v58  ;;  %v1853_v60 = vpop.f32.mrf.mxu0 }
 0x79d   : > { %v9418_v61 = vpop.f32.mrf.mxu1  ;;  %v9424_v62 = vpop.f32.mrf.mxu0 }
 0x79f   : > { %v1900_v63 = vpop.f32.mrf.mxu1 }
 0x7a0   : > { %v1901_v0 = vadd.f32 %v1900_v63, %v11612_v54 }
 0x7a1   : > { %v9429_v1 = vpop.f32.mrf.mxu1 }
 0x7a2   : > { %v1909_v2 = vsel %vm1462_vm3, %v1901_v0, -inf }
 0x7a3   : > { %1910 = vmax.xlane.f32.xlu1 %v1909_v2  ;;  %v1903_v3 = vpop.f32.mrf.mxu1 }
 0x7a5   : > { %v9430_v5 = vpop.f32.mrf.mxu1 }
 0x7b4   : > { %1978 = vrot.lane.b32.xlu1 %v11629_v27, %s10853_s5 }
 0x7b8   : > { %2028 = vrot.lane.b32.xlu1 %v11568_v34, %s10854_s6 }
 0x7bc   : > { %2078 = vrot.lane.b32.xlu1 %v11572_v39, %s10854_s6 }
 0x7c0   : > { %2076 = vrot.lane.b32.xlu1 %v11586_v43, %s10854_s6 }
 0x824   : > { %v1908_v6 = vpop.xlane.xlu0 %1907 }
 0x825   : > { %v1912_v7 = vsub.f32 %v1851_v55, %v1908_v6 }
 0x827   : > { %v1914_v8 = vmul.f32 1.442695, %v1912_v7 }
 0x829   : > { %10243 = vpow2.f32 %v1914_v8 }
 0x82c   : > { %v1911_v9 = vpop.xlane.xlu1 %1910 }
 0x82d   : > { %v1913_v10 = vsub.f32 %v1901_v0, %v1911_v9 }
 0x82f   : > { %v1916_v11 = vmul.f32 1.442695, %v1913_v10 }
 0x830   : > { %v1979_v12 = vpop.permute.xlu1 %1978 }
 0x831   : > { %10245 = vpow2.f32 %v1916_v11  ;;  %v1984_v13 = vsel %vm1490_vm4, %v1979_v12, 0 }
 0x832   : > { %9438 = vmatpush3.bf16.msra.mxu1 %v1984_v13 }
 0x833   : > { %9449 = vmatprep.subr.bf16.mxu1 %v10849_v22 }
 0x834   : > { %v2029_v31 = vpop.permute.xlu1 %2028 }
 0x835   : > { %v2034_v33 = vsel %vm1369_vm1, %v2029_v31, 0 }
 0x836   : > { %v10244_v15 = vpop.eup %10243 }
 0x837   : > { %v1918_v16 = vsel %vm1462_vm3, %v10244_v15, 0.0 }
 0x838   : > { %1919 = vadd.xlane.f32.xlu0 %v1918_v16  ;;  %v2079_v37 = vpop.permute.xlu1 %2078 }
 0x839   : > { %v2084_v42 = vsel %vm1369_vm1, %v2079_v37, 0 }
 0x83c   : > { %v2077_v44 = vpop.permute.xlu1 %2076 }
 0x83e   : > { %v10246_v17 = vpop.eup %10245 }
 0x83f   : > { %v1921_v18 = vsel %vm1462_vm3, %v10246_v17, 0.0 }
 0x840   : > { %1922 = vadd.xlane.f32.xlu0 %v1921_v18 }
 0x856   : > { %1930 = vrot.lane.b32.xlu0 %v11627_v23, %s10853_s5 }
 0x85a   : > { %2026 = vrot.lane.b32.xlu0 %v11577_v40, %s10854_s6 }
 0x8c1   : > { %v1920_v19 = vpop.xlane.xlu0 %1919 }
 0x8c2   : > { %10247 = vrcp.f32 %v1920_v19 }
 0x8c9   : > { %v1923_v20 = vpop.xlane.xlu0 %1922 }
 0x8ca   : > { %10249 = vrcp.f32 %v1923_v20 }
 0x8cd   : > { %v1931_v21 = vpop.permute.xlu0 %1930 }
 0x8ce   : > { %v1936_v28 = vsel %vm1490_vm4, %v1931_v21, 0 }
 0x8cf   : > { %v10248_v30 = vpop.eup %10247  ;;  %9432 = vmatpush3.bf16.msra.mxu0 %v1936_v28 }
 0x8d0   : > { %9443 = vmatprep.subr.bf16.mxu0 %v10849_v22  ;;  %v1926_v26 = vmul.f32 %v10248_v30, %v10244_v15 }
 0x8d1   : > { %v2027_v41 = vpop.permute.xlu0 %2026 }
 0x8d2   : > { %v1928_v32 = vpack.c.bf16 %v1926_v26, %v1926_v26 }
 0x8d4   : > { %9434 = vmatmul.mubr.msk.bf16.vlgmr.msra.gmra.mxu0 %vm1462_vm3, %v1928_v32 }
 0x8d5   : > { %9444 = vmatpush3.bf16.xpose.msra.mxu0 %v2034_v33  ;;  %9445 = vmatprep.mubr.msk.bf16.mxu0 %vm10850_vm0, %v10849_v22 }
 0x8d6   : > { %9455 = vmatprep.subr.bf16.mxu0 %v10849_v22 }
 0x8d7   : > { %v10250_v35 = vpop.eup %10249 }
 0x8d8   : > { %v1927_v36 = vmul.f32 %v10250_v35, %v10246_v17 }
 0x8da   : > { %v1929_v38 = vpack.c.bf16 %v1927_v36, %v1927_v36 }
 0x8dc   : > { %9440 = vmatmul.mubr.msk.bf16.vlgmr.msra.gmra.mxu1 %vm1462_vm3, %v1929_v38  ;;  %9446 = vmatmul.mubr.msk.bf16.vlgmr.msra.gmra.mxu0 %vm1369_vm1, %v2027_v41 }
 0x8dd   : > { %9450 = vmatpush3.bf16.xpose.msra.mxu1 %v2084_v42  ;;  %9451 = vmatprep.mubr.msk.bf16.mxu1 %vm10850_vm0, %v10849_v22 }
 0x8de   : > { %9461 = vmatprep.subr.bf16.mxu1 %v10849_v22  ;;  %9457 = vmatprep.mubr.msk.bf16.mxu0 %vm10850_vm0, %v10849_v22 }
 0x8e4   : > { %9452 = vmatmul.mubr.msk.bf16.vlgmr.msra.gmra.mxu1 %vm1369_vm1, %v2077_v44 }
 0x8e5   : > { %9463 = vmatprep.mubr.msk.bf16.mxu1 %vm10850_vm0, %v10849_v22 }
 0x994   : > { %v11743_v46 = vpop.f32.mrf.mxu0 }
 0x996   : > { %v9435_v47 = vpop.f32.mrf.mxu0 }
 0x998   : > { %v1975_v49 = vpop.f32.mrf.mxu0 }
 0x99a   : > { %v9436_v51 = vpop.f32.mrf.mxu0 }
 0x99c   : > { %v11745_v55 = vpop.f32.mrf.mxu1  ;;  %v2070_v56 = vpop.f32.mrf.mxu0 }
 0x99d   : > { %v9954_v57 = vpack.i.bf16 %v11745_v55, %v11743_v46  ;;  %v2071_v58 = vadd.f32 %v2070_v56, %v11612_v54 }
 0x99e   : > { %v9441_v59 = vpop.f32.mrf.mxu1  ;;  %v9447_v60 = vpop.f32.mrf.mxu0 }
 0x99f   : > { %v2126_v61 = vsel %vm1462_vm3, %v2071_v58, -inf }
 0x9a0   : > { %v2023_v62 = vpop.f32.mrf.mxu1  ;;  %2127 = vmax.xlane.f32.xlu0 %v2126_v61  ;;  %v2073_v63 = vpop.f32.mrf.mxu0 }
 0x9a2   : > { %v9442_v0 = vpop.f32.mrf.mxu1  ;;  %v9448_v1 = vpop.f32.mrf.mxu0 }
 0x9a4   : > { %v2120_v2 = vpop.f32.mrf.mxu1 }
 0x9a5   : > { %v2121_v3 = vadd.f32 %v2120_v2, %v11612_v54 }
 0x9a6   : > { %v9453_v5 = vpop.f32.mrf.mxu1 }
 0x9a7   : > { %v2129_v6 = vsel %vm1462_vm3, %v2121_v3, -inf }
 0x9a8   : > { %2130 = vmax.xlane.f32.xlu1 %v2129_v6  ;;  %v2123_v7 = vpop.f32.mrf.mxu1 }
 0x9aa   : > { %v9454_v8 = vpop.f32.mrf.mxu1 }
 0x9b9   : > { %2198 = vrot.lane.b32.xlu1 %v11629_v27, %s10854_s6 }
 0x9bd   : > { %2248 = vrot.lane.b32.xlu1 %v11568_v34, %s10855_s4 }
 0x9c1   : > { %2298 = vrot.lane.b32.xlu1 %v11572_v39, %s10855_s4 }
 0x9c5   : > { %2296 = vrot.lane.b32.xlu1 %v11586_v43, %s10855_s4 }
 0xa29   : > { %v2128_v9 = vpop.xlane.xlu0 %2127 }
 0xa2a   : > { %v2132_v10 = vsub.f32 %v2071_v58, %v2128_v9 }
 0xa2c   : > { %v2134_v11 = vmul.f32 1.442695, %v2132_v10 }
 0xa2e   : > { %10251 = vpow2.f32 %v2134_v11 }
 0xa31   : > { %v2131_v12 = vpop.xlane.xlu1 %2130 }
 0xa32   : > { %v2133_v13 = vsub.f32 %v2121_v3, %v2131_v12 }
 0xa34   : > { %v2136_v15 = vmul.f32 1.442695, %v2133_v13 }
 0xa35   : > { %v2199_v16 = vpop.permute.xlu1 %2198 }
 0xa36   : > { %10253 = vpow2.f32 %v2136_v15  ;;  %v2204_v17 = vsel %vm1490_vm4, %v2199_v16, 0 }
 0xa37   : > { %9462 = vmatpush3.bf16.msra.mxu1 %v2204_v17 }
 0xa38   : > { %9473 = vmatprep.subr.bf16.mxu1 %v10849_v22 }
 0xa39   : > { %v2249_v35 = vpop.permute.xlu1 %2248 }
 0xa3a   : > { %v2254_v37 = vsel %vm1369_vm1, %v2249_v35, 0 }
 0xa3b   : > { %v10252_v18 = vpop.eup %10251 }
 0xa3c   : > { %v2138_v19 = vsel %vm1462_vm3, %v10252_v18, 0.0 }
 0xa3d   : > { %2139 = vadd.xlane.f32.xlu0 %v2138_v19  ;;  %v2299_v42 = vpop.permute.xlu1 %2298 }
 0xa3e   : > { %v2304_v49 = vsel %vm1369_vm1, %v2299_v42, 0 }
 0xa41   : > { %v2297_v51 = vpop.permute.xlu1 %2296 }
 0xa43   : > { %v10254_v20 = vpop.eup %10253 }
 0xa44   : > { %v2141_v21 = vsel %vm1462_vm3, %v10254_v20, 0.0 }
 0xa45   : > { %2142 = vadd.xlane.f32.xlu0 %v2141_v21 }
 0xa5b   : > { %2150 = vrot.lane.b32.xlu0 %v11627_v23, %s10854_s6 }
 0xa5f   : > { %2246 = vrot.lane.b32.xlu0 %v11577_v40, %s10855_s4 }
 0xac6   : > { %v2140_v28 = vpop.xlane.xlu0 %2139 }
 0xac7   : > { %10255 = vrcp.f32 %v2140_v28 }
 0xace   : > { %v2143_v30 = vpop.xlane.xlu0 %2142 }
 0xacf   : > { %10257 = vrcp.f32 %v2143_v30 }
 0xad2   : > { %v2151_v26 = vpop.permute.xlu0 %2150 }
 0xad3   : > { %v2156_v31 = vsel %vm1490_vm4, %v2151_v26, 0 }
 0xad4   : > { %v10256_v32 = vpop.eup %10255  ;;  %9456 = vmatpush3.bf16.msra.mxu0 %v2156_v31 }
 0xad5   : > { %9467 = vmatprep.subr.bf16.mxu0 %v10849_v22  ;;  %v2146_v33 = vmul.f32 %v10256_v32, %v10252_v18 }
 0xad6   : > { %v2247_v47 = vpop.permute.xlu0 %2246 }
 0xad7   : > { %v2148_v36 = vpack.c.bf16 %v2146_v33, %v2146_v33 }
 0xad9   : > { %9458 = vmatmul.mubr.msk.bf16.vlgmr.msra.gmra.mxu0 %vm1462_vm3, %v2148_v36 }
 0xada   : > { %9468 = vmatpush3.bf16.xpose.msra.mxu0 %v2254_v37  ;;  %9469 = vmatprep.mubr.msk.bf16.mxu0 %vm10850_vm0, %v10849_v22 }
 0xadb   : > { %9479 = vmatprep.subr.bf16.mxu0 %v10849_v22 }
 0xadc   : > { %v10258_v38 = vpop.eup %10257 }
 0xadd   : > { %v2147_v41 = vmul.f32 %v10258_v38, %v10254_v20 }
 0xadf   : > { %v2149_v44 = vpack.c.bf16 %v2147_v41, %v2147_v41 }
 0xae1   : > { %9464 = vmatmul.mubr.msk.bf16.vlgmr.msra.gmra.mxu1 %vm1462_vm3, %v2149_v44  ;;  %9470 = vmatmul.mubr.msk.bf16.vlgmr.msra.gmra.mxu0 %vm1369_vm1, %v2247_v47 }
 0xae2   : > { %9474 = vmatpush3.bf16.xpose.msra.mxu1 %v2304_v49  ;;  %9475 = vmatprep.mubr.msk.bf16.mxu1 %vm10850_vm0, %v10849_v22 }
 0xae3   : > { %9485 = vmatprep.subr.bf16.mxu1 %v10849_v22  ;;  %9481 = vmatprep.mubr.msk.bf16.mxu0 %vm10850_vm0, %v10849_v22 }
 0xae9   : > { %9476 = vmatmul.mubr.msk.bf16.vlgmr.msra.gmra.mxu1 %vm1369_vm1, %v2297_v51 }
 0xaea   : > { %9487 = vmatprep.mubr.msk.bf16.mxu1 %vm10850_vm0, %v10849_v22 }
 0xb99   : > { %v11787_v56 = vpop.f32.mrf.mxu0 }
 0xb9b   : > { %v9459_v58 = vpop.f32.mrf.mxu0 }
 0xb9d   : > { %v2195_v59 = vpop.f32.mrf.mxu0 }
 0xb9f   : > { %v9460_v60 = vpop.f32.mrf.mxu0 }
 0xba1   : > { %v11789_v61 = vpop.f32.mrf.mxu1  ;;  %v2290_v62 = vpop.f32.mrf.mxu0 }
 0xba2   : > { %v9959_v63 = vpack.i.bf16 %v11789_v61, %v11787_v56  ;;  %v2291_v0 = vadd.f32 %v2290_v62, %v11612_v54 }
 0xba3   : > { %v9465_v1 = vpop.f32.mrf.mxu1  ;;  %v9471_v2 = vpop.f32.mrf.mxu0 }
 0xba4   : > { %v2346_v3 = vsel %vm1462_vm3, %v2291_v0, -inf }
 0xba5   : > { %v2243_v5 = vpop.f32.mrf.mxu1  ;;  %2347 = vmax.xlane.f32.xlu0 %v2346_v3  ;;  %v2293_v6 = vpop.f32.mrf.mxu0 }
 0xba7   : > { %v9466_v7 = vpop.f32.mrf.mxu1  ;;  %v9472_v8 = vpop.f32.mrf.mxu0 }
 0xba9   : > { %v2340_v9 = vpop.f32.mrf.mxu1 }
 0xbaa   : > { %v2341_v10 = vadd.f32 %v2340_v9, %v11612_v54 }
 0xbab   : > { %v9477_v11 = vpop.f32.mrf.mxu1 }
 0xbac   : > { %v2349_v12 = vsel %vm1462_vm3, %v2341_v10, -inf }
 0xbad   : > { %2350 = vmax.xlane.f32.xlu1 %v2349_v12  ;;  %v2343_v13 = vpop.f32.mrf.mxu1 }
 0xbaf   : > { %v9478_v15 = vpop.f32.mrf.mxu1 }
 0xbbe   : > { %2418 = vrot.lane.b32.xlu1 %v11629_v27, %s10855_s4 }
 0xbc2   : > { %2468 = vrot.lane.b32.xlu1 %v11568_v34, %s10856_s8 }
 0xbc6   : > { %2518 = vrot.lane.b32.xlu1 %v11572_v39, %s10856_s8 }
 0xbca   : > { %2516 = vrot.lane.b32.xlu1 %v11586_v43, %s10856_s8 }
 0xc2e   : > { %v2348_v16 = vpop.xlane.xlu0 %2347 }
 0xc2f   : > { %v2352_v17 = vsub.f32 %v2291_v0, %v2348_v16 }
 0xc31   : > { %v2354_v18 = vmul.f32 1.442695, %v2352_v17 }
 0xc33   : > { %10259 = vpow2.f32 %v2354_v18 }
 0xc36   : > { %v2351_v19 = vpop.xlane.xlu1 %2350 }
 0xc37   : > { %v2353_v20 = vsub.f32 %v2341_v10, %v2351_v19 }
 0xc39   : > { %v2356_v21 = vmul.f32 1.442695, %v2353_v20 }
 0xc3a   : > { %v2419_v28 = vpop.permute.xlu1 %2418 }
 0xc3b   : > { %10261 = vpow2.f32 %v2356_v21  ;;  %v2424_v30 = vsel %vm1490_vm4, %v2419_v28, 0 }
 0xc3c   : > { %9486 = vmatpush3.bf16.msra.mxu1 %v2424_v30 }
 0xc3d   : > { %9497 = vmatprep.subr.bf16.mxu1 %v10849_v22 }
 0xc3e   : > { %v2469_v44 = vpop.permute.xlu1 %2468 }
 0xc3f   : > { %v2474_v49 = vsel %vm1369_vm1, %v2469_v44, 0 }
 0xc40   : > { %v10260_v26 = vpop.eup %10259 }
 0xc41   : > { %v2358_v31 = vsel %vm1462_vm3, %v10260_v26, 0.0 }
 0xc42   : > { %2359 = vadd.xlane.f32.xlu0 %v2358_v31  ;;  %v2519_v59 = vpop.permute.xlu1 %2518 }
 0xc43   : > { %v2524_v0 = vsel %vm1369_vm1, %v2519_v59, 0 }
 0xc46   : > { %v2517_v1 = vpop.permute.xlu1 %2516 }
 0xc48   : > { %v10262_v32 = vpop.eup %10261 }
 0xc49   : > { %v2361_v33 = vsel %vm1462_vm3, %v10262_v32, 0.0 }
 0xc4a   : > { %2362 = vadd.xlane.f32.xlu0 %v2361_v33 }
 0xc60   : > { %2370 = vrot.lane.b32.xlu0 %v11627_v23, %s10855_s4 }
 0xc64   : > { %2466 = vrot.lane.b32.xlu0 %v11577_v40, %s10856_s8 }
 0xccb   : > { %v2360_v35 = vpop.xlane.xlu0 %2359 }
 0xccc   : > { %10263 = vrcp.f32 %v2360_v35 }
 0xcd3   : > { %v2363_v36 = vpop.xlane.xlu0 %2362 }
 0xcd4   : > { %10265 = vrcp.f32 %v2363_v36 }
 0xcd7   : > { %v2371_v37 = vpop.permute.xlu0 %2370 }
 0xcd8   : > { %v2376_v38 = vsel %vm1490_vm4, %v2371_v37, 0 }
 0xcd9   : > { %v10264_v41 = vpop.eup %10263  ;;  %9480 = vmatpush3.bf16.msra.mxu0 %v2376_v38 }
 0xcda   : > { %9491 = vmatprep.subr.bf16.mxu0 %v10849_v22  ;;  %v2366_v42 = vmul.f32 %v10264_v41, %v10260_v26 }
 0xcdb   : > { %v2467_v62 = vpop.permute.xlu0 %2466 }
 0xcdc   : > { %v2368_v47 = vpack.c.bf16 %v2366_v42, %v2366_v42 }
 0xcde   : > { %9482 = vmatmul.mubr.msk.bf16.vlgmr.msra.gmra.mxu0 %vm1462_vm3, %v2368_v47 }
 0xcdf   : > { %9492 = vmatpush3.bf16.xpose.msra.mxu0 %v2474_v49  ;;  %9493 = vmatprep.mubr.msk.bf16.mxu0 %vm10850_vm0, %v10849_v22 }
 0xce0   : > { %9503 = vmatprep.subr.bf16.mxu0 %v10849_v22 }
 0xce1   : > { %v10266_v51 = vpop.eup %10265 }
 0xce2   : > { %v2367_v58 = vmul.f32 %v10266_v51, %v10262_v32 }
 0xce4   : > { %v2369_v60 = vpack.c.bf16 %v2367_v58, %v2367_v58 }
 0xce6   : > { %9488 = vmatmul.mubr.msk.bf16.vlgmr.msra.gmra.mxu1 %vm1462_vm3, %v2369_v60  ;;  %9494 = vmatmul.mubr.msk.bf16.vlgmr.msra.gmra.mxu0 %vm1369_vm1, %v2467_v62 }
 0xce7   : > { %9498 = vmatpush3.bf16.xpose.msra.mxu1 %v2524_v0  ;;  %9499 = vmatprep.mubr.msk.bf16.mxu1 %vm10850_vm0, %v10849_v22 }
 0xce8   : > { %9509 = vmatprep.subr.bf16.mxu1 %v10849_v22  ;;  %9505 = vmatprep.mubr.msk.bf16.mxu0 %vm10850_vm0, %v10849_v22 }
 0xcee   : > { %9500 = vmatmul.mubr.msk.bf16.vlgmr.msra.gmra.mxu1 %vm1369_vm1, %v2517_v1 }
 0xcef   : > { %9511 = vmatprep.mubr.msk.bf16.mxu1 %vm10850_vm0, %v10849_v22 }
 0xd9e   : > { %v11831_v2 = vpop.f32.mrf.mxu0 }
 0xda0   : > { %v9483_v3 = vpop.f32.mrf.mxu0 }
 0xda2   : > { %v2415_v5 = vpop.f32.mrf.mxu0 }
 0xda4   : > { %v9484_v6 = vpop.f32.mrf.mxu0 }
 0xda6   : > { %v11833_v7 = vpop.f32.mrf.mxu1  ;;  %v2510_v8 = vpop.f32.mrf.mxu0 }
 0xda7   : > { %v9964_v9 = vpack.i.bf16 %v11833_v7, %v11831_v2  ;;  %v2511_v10 = vadd.f32 %v2510_v8, %v11612_v54 }
 0xda8   : > { %v9489_v11 = vpop.f32.mrf.mxu1  ;;  %v9495_v12 = vpop.f32.mrf.mxu0 }
 0xda9   : > { %v2566_v13 = vsel %vm1462_vm3, %v2511_v10, -inf }
 0xdaa   : > { %v2463_v15 = vpop.f32.mrf.mxu1  ;;  %2567 = vmax.xlane.f32.xlu0 %v2566_v13  ;;  %v2513_v16 = vpop.f32.mrf.mxu0 }
 0xdac   : > { %v9490_v17 = vpop.f32.mrf.mxu1  ;;  %v9496_v18 = vpop.f32.mrf.mxu0 }
 0xdae   : > { %v2560_v19 = vpop.f32.mrf.mxu1 }
 0xdaf   : > { %v2561_v20 = vadd.f32 %v2560_v19, %v11612_v54 }
 0xdb0   : > { %v9501_v21 = vpop.f32.mrf.mxu1 }
 0xdb1   : > { %v2569_v28 = vsel %vm1462_vm3, %v2561_v20, -inf }
 0xdb2   : > { %2570 = vmax.xlane.f32.xlu1 %v2569_v28  ;;  %v2563_v30 = vpop.f32.mrf.mxu1 }
 0xdb4   : > { %v9502_v26 = vpop.f32.mrf.mxu1 }
 0xdc3   : > { %2638 = vrot.lane.b32.xlu1 %v11629_v27, %s10856_s8 }
 0xdc7   : > { %2688 = vrot.lane.b32.xlu1 %v11568_v34, %s10857_s1 }
 0xdcb   : > { %2738 = vrot.lane.b32.xlu1 %v11572_v39, %s10857_s1 }
 0xdcf   : > { %2736 = vrot.lane.b32.xlu1 %v11586_v43, %s10857_s1 }
 0xe33   : > { %v2568_v31 = vpop.xlane.xlu0 %2567 }
 0xe34   : > { %v2572_v32 = vsub.f32 %v2511_v10, %v2568_v31 }
 0xe36   : > { %v2574_v33 = vmul.f32 1.442695, %v2572_v32 }
 0xe38   : > { %10267 = vpow2.f32 %v2574_v33 }
 0xe3b   : > { %v2571_v35 = vpop.xlane.xlu1 %2570 }
 0xe3c   : > { %v2573_v36 = vsub.f32 %v2561_v20, %v2571_v35 }
 0xe3e   : > { %v2576_v37 = vmul.f32 1.442695, %v2573_v36 }
 0xe3f   : > { %v2639_v38 = vpop.permute.xlu1 %2638 }
 0xe40   : > { %10269 = vpow2.f32 %v2576_v37  ;;  %v2644_v41 = vsel %vm1490_vm4, %v2639_v38, 0 }
 0xe41   : > { %9510 = vmatpush3.bf16.msra.mxu1 %v2644_v41 }
 0xe42   : > { %9521 = vmatprep.subr.bf16.mxu1 %v10849_v22 }
 0xe43   : > { %v2689_v1 = vpop.permute.xlu1 %2688 }
 0xe44   : > { %v2694_v5 = vsel %vm1369_vm1, %v2689_v1, 0 }
 0xe45   : > { %v10268_v42 = vpop.eup %10267 }
 0xe46   : > { %v2578_v44 = vsel %vm1462_vm3, %v10268_v42, 0.0 }
 0xe47   : > { %2579 = vadd.xlane.f32.xlu0 %v2578_v44  ;;  %v2739_v10 = vpop.permute.xlu1 %2738 }
 0xe48   : > { %v2744_v13 = vsel %vm1369_vm1, %v2739_v10, 0 }
 0xe4b   : > { %v2737_v15 = vpop.permute.xlu1 %2736 }
 0xe4d   : > { %v10270_v47 = vpop.eup %10269 }
 0xe4e   : > { %v2581_v49 = vsel %vm1462_vm3, %v10270_v47, 0.0 }
 0xe4f   : > { %2582 = vadd.xlane.f32.xlu0 %v2581_v49 }
 0xe65   : > { %2590 = vrot.lane.b32.xlu0 %v11627_v23, %s10856_s8 }
 0xe69   : > { %2686 = vrot.lane.b32.xlu0 %v11577_v40, %s10857_s1 }
 0xed0   : > { %v2580_v51 = vpop.xlane.xlu0 %2579 }
 0xed1   : > { %10271 = vrcp.f32 %v2580_v51 }
 0xed8   : > { %v2583_v58 = vpop.xlane.xlu0 %2582 }
 0xed9   : > { %10273 = vrcp.f32 %v2583_v58 }
 0xedc   : > { %v2591_v59 = vpop.permute.xlu0 %2590 }
 0xedd   : > { %v2596_v60 = vsel %vm1490_vm4, %v2591_v59, 0 }
 0xede   : > { %v10272_v62 = vpop.eup %10271  ;;  %9504 = vmatpush3.bf16.msra.mxu0 %v2596_v60 }
 0xedf   : > { %9515 = vmatprep.subr.bf16.mxu0 %v10849_v22  ;;  %v2586_v0 = vmul.f32 %v10272_v62, %v10268_v42 }
 0xee0   : > { %v2687_v12 = vpop.permute.xlu0 %2686 }
 0xee1   : > { %v2588_v3 = vpack.c.bf16 %v2586_v0, %v2586_v0 }
 0xee3   : > { %9506 = vmatmul.mubr.msk.bf16.vlgmr.msra.gmra.mxu0 %vm1462_vm3, %v2588_v3 }
 0xee4   : > { %9516 = vmatpush3.bf16.xpose.msra.mxu0 %v2694_v5  ;;  %9517 = vmatprep.mubr.msk.bf16.mxu0 %vm10850_vm0, %v10849_v22 }
 0xee5   : > { %9527 = vmatprep.subr.bf16.mxu0 %v10849_v22 }
 0xee6   : > { %v10274_v6 = vpop.eup %10273 }
 0xee7   : > { %v2587_v8 = vmul.f32 %v10274_v6, %v10270_v47 }
 0xee9   : > { %v2589_v11 = vpack.c.bf16 %v2587_v8, %v2587_v8 }
 0xeeb   : > { %9512 = vmatmul.mubr.msk.bf16.vlgmr.msra.gmra.mxu1 %vm1462_vm3, %v2589_v11  ;;  %9518 = vmatmul.mubr.msk.bf16.vlgmr.msra.gmra.mxu0 %vm1369_vm1, %v2687_v12 }
 0xeec   : > { %9522 = vmatpush3.bf16.xpose.msra.mxu1 %v2744_v13  ;;  %9523 = vmatprep.mubr.msk.bf16.mxu1 %vm10850_vm0, %v10849_v22 }
 0xeed   : > { %9533 = vmatprep.subr.bf16.mxu1 %v10849_v22  ;;  %9529 = vmatprep.mubr.msk.bf16.mxu0 %vm10850_vm0, %v10849_v22 }
 0xef3   : > { %9524 = vmatmul.mubr.msk.bf16.vlgmr.msra.gmra.mxu1 %vm1369_vm1, %v2737_v15 }
 0xef4   : > { %9535 = vmatprep.mubr.msk.bf16.mxu1 %vm10850_vm0, %v10849_v22 }
 0xfa3   : > { %v11875_v16 = vpop.f32.mrf.mxu0 }
 0xfa5   : > { %v9507_v17 = vpop.f32.mrf.mxu0 }
 0xfa7   : > { %v2635_v18 = vpop.f32.mrf.mxu0 }
 0xfa9   : > { %v9508_v19 = vpop.f32.mrf.mxu0 }
 0xfab   : > { %v11877_v20 = vpop.f32.mrf.mxu1  ;;  %v2730_v21 = vpop.f32.mrf.mxu0 }
 0xfac   : > { %v9969_v28 = vpack.i.bf16 %v11877_v20, %v11875_v16  ;;  %v2731_v30 = vadd.f32 %v2730_v21, %v11612_v54  ;;  %v10051_v20 = vld [vmem:[%s11452_s16 + $0x38] sm:$0xff]  }
 0xfad   : > { %v9513_v26 = vpop.f32.mrf.mxu1  ;;  %v9519_v31 = vpop.f32.mrf.mxu0 }
 0xfae   : > { %v2786_v32 = vsel %vm1462_vm3, %v2731_v30, -inf }
 0xfaf   : > { %v2683_v33 = vpop.f32.mrf.mxu1  ;;  %2787 = vmax.xlane.f32.xlu0 %v2786_v32  ;;  %v2733_v35 = vpop.f32.mrf.mxu0 }
 0xfb1   : > { %v9514_v36 = vpop.f32.mrf.mxu1  ;;  %v9520_v37 = vpop.f32.mrf.mxu0 }
 0xfb3   : > { %v2780_v38 = vpop.f32.mrf.mxu1 }
 0xfb4   : > { %v2781_v41 = vadd.f32 %v2780_v38, %v11612_v54 }
 0xfb5   : > { %v9525_v42 = vpop.f32.mrf.mxu1 }
 0xfb6   : > { %v2789_v44 = vsel %vm1462_vm3, %v2781_v41, -inf }
 0xfb7   : > { %2790 = vmax.xlane.f32.xlu1 %v2789_v44  ;;  %v2783_v47 = vpop.f32.mrf.mxu1 }
 0xfb9   : > { %v9526_v49 = vpop.f32.mrf.mxu1 }
 0xfc8   : > { %2858 = vrot.lane.b32.xlu1 %v11629_v27, %s10857_s1 }
 0xfcc   : > { %2908 = vrot.lane.b32.xlu1 %v11568_v34, %s10858_s15 }
 0xfd0   : > { %2958 = vrot.lane.b32.xlu1 %v11572_v39, %s10858_s15 }
 0xfd4   : > { %2956 = vrot.lane.b32.xlu1 %v11586_v43, %s10858_s15 }
0x1038   : > { %v2788_v51 = vpop.xlane.xlu0 %2787 }
0x1039   : > { %v2792_v58 = vsub.f32 %v2731_v30, %v2788_v51 }
0x103b   : > { %v2794_v59 = vmul.f32 1.442695, %v2792_v58 }
0x103d   : > { %10275 = vpow2.f32 %v2794_v59 }
0x1040   : > { %v2791_v60 = vpop.xlane.xlu1 %2790 }
0x1041   : > { %v2793_v62 = vsub.f32 %v2781_v41, %v2791_v60 }
0x1043   : > { %v2796_v0 = vmul.f32 1.442695, %v2793_v62 }
0x1044   : > { %v2859_v1 = vpop.permute.xlu1 %2858 }
0x1045   : > { %10277 = vpow2.f32 %v2796_v0  ;;  %v2864_v3 = vsel %vm1490_vm4, %v2859_v1, 0 }
0x1046   : > { %9534 = vmatpush3.bf16.msra.mxu1 %v2864_v3 }
0x1047   : > { %9545 = vmatprep.subr.bf16.mxu1 %v10849_v22 }
0x1048   : > { %v2909_v15 = vpop.permute.xlu1 %2908 }
0x1049   : > { %v2914_v18 = vsel %vm1369_vm1, %v2909_v15, 0  ;;  %v10054_v15 = vld [vmem:[%s11452_s16 + $0x20] sm:$0xff]  }
0x104a   : > { %v10276_v34 = vpop.eup %10275 }
0x104b   : > { %v2798_v39 = vsel %vm1462_vm3, %v10276_v34, 0.0 }
0x104c   : > { %2799 = vadd.xlane.f32.xlu0 %v2798_v39  ;;  %v2959_v21 = vpop.permute.xlu1 %2958 }
0x104d   : > { %v2964_v31 = vsel %vm1369_vm1, %v2959_v21, 0 }
0x1050   : > { %v2957_v32 = vpop.permute.xlu1 %2956 }
0x1052   : > { %v10278_v5 = vpop.eup %10277 }
0x1053   : > { %v2801_v43 = vsel %vm1462_vm3, %v10278_v5, 0.0 }
0x1054   : > { %2802 = vadd.xlane.f32.xlu0 %v2801_v43 }
0x106a   : > { %2810 = vrot.lane.b32.xlu0 %v11627_v23, %s10857_s1 }
0x106e   : > { %2906 = vrot.lane.b32.xlu0 %v11577_v40, %s10858_s15 }
0x10d5   : > { %v2800_v6 = vpop.xlane.xlu0 %2799 }
0x10d6   : > { %10279 = vrcp.f32 %v2800_v6 }
0x10dd   : > { %v2803_v8 = vpop.xlane.xlu0 %2802 }
0x10de   : > { %10281 = vrcp.f32 %v2803_v8 }
0x10e1   : > { %v2811_v10 = vpop.permute.xlu0 %2810 }
0x10e2   : > { %v2816_v11 = vsel %vm1490_vm4, %v2811_v10, 0 }
0x10e3   : > { %v10280_v12 = vpop.eup %10279  ;;  %9528 = vmatpush3.bf16.msra.mxu0 %v2816_v11 }
0x10e4   : > { %9539 = vmatprep.subr.bf16.mxu0 %v10849_v22  ;;  %v2806_v13 = vmul.f32 %v10280_v12, %v10276_v34 }
0x10e5   : > { %v2907_v26 = vpop.permute.xlu0 %2906 }
0x10e6   : > { %v2808_v17 = vpack.c.bf16 %v2806_v13, %v2806_v13  ;;  %v10053_v13 = vld [vmem:[%s11452_s16 + $0x28] sm:$0xff]  }
0x10e8   : > { %9530 = vmatmul.mubr.msk.bf16.vlgmr.msra.gmra.mxu0 %vm1462_vm3, %v2808_v17  ;;  %v10055_v17 = vld [vmem:[%s11452_s16 + $0x18] sm:$0xff]  }
0x10e9   : > { %9540 = vmatpush3.bf16.xpose.msra.mxu0 %v2914_v18  ;;  %9541 = vmatprep.mubr.msk.bf16.mxu0 %vm10850_vm0, %v10849_v22  ;;  %v10056_v18 = vld [vmem:[%s11452_s16 + $0x10] sm:$0xff]  }
0x10ea   : > { %9551 = vmatprep.subr.bf16.mxu0 %v10849_v22 }
0x10eb   : > { %v10282_v40 = vpop.eup %10281 }
0x10ec   : > { %v2807_v19 = vmul.f32 %v10282_v40, %v10278_v5  ;;  %v10057_v40 = vld [vmem:[%s11452_s16 + $0x8] sm:$0xff]  }
0x10ee   : > { %v2809_v30 = vpack.c.bf16 %v2807_v19, %v2807_v19  ;;  %v10058_v19 = vld [vmem:[%s11452_s16] sm:$0xff]  }
0x10f0   : > { %9536 = vmatmul.mubr.msk.bf16.vlgmr.msra.gmra.mxu1 %vm1462_vm3, %v2809_v30  ;;  %9542 = vmatmul.mubr.msk.bf16.vlgmr.msra.gmra.mxu0 %vm1369_vm1, %v2907_v26 }
0x10f1   : > { %9546 = vmatpush3.bf16.xpose.msra.mxu1 %v2964_v31  ;;  %9547 = vmatprep.mubr.msk.bf16.mxu1 %vm10850_vm0, %v10849_v22 }
0x10f2   : > { %9557 = vmatprep.subr.bf16.mxu1 %v10849_v22  ;;  %9553 = vmatprep.mubr.msk.bf16.mxu0 %vm10850_vm0, %v10849_v22 }
0x10f8   : > { %9548 = vmatmul.mubr.msk.bf16.vlgmr.msra.gmra.mxu1 %vm1369_vm1, %v2957_v32 }
0x10f9   : > { %9559 = vmatprep.mubr.msk.bf16.mxu1 %vm10850_vm0, %v10849_v22 }
0x11a8   : > { %v2852_v33 = vpop.f32.mrf.mxu0 }
0x11aa   : > { %v9531_v35 = vpop.f32.mrf.mxu0 }
0x11ac   : > { %v2855_v36 = vpop.f32.mrf.mxu0 }
0x11ae   : > { %v9532_v37 = vpop.f32.mrf.mxu0 }
0x11b0   : > { %v2900_v38 = vpop.f32.mrf.mxu1  ;;  %v2950_v41 = vpop.f32.mrf.mxu0 }
0x11b1   : > { %v2951_v42 = vadd.f32 %v2950_v41, %v11612_v54 }
0x11b2   : > { %v9537_v44 = vpop.f32.mrf.mxu1  ;;  %v9543_v47 = vpop.f32.mrf.mxu0 }
0x11b3   : > { %v3006_v49 = vsel %vm1462_vm3, %v2951_v42, -inf }
0x11b4   : > { %v2903_v51 = vpop.f32.mrf.mxu1  ;;  %3007 = vmax.xlane.f32.xlu0 %v3006_v49  ;;  %v2953_v58 = vpop.f32.mrf.mxu0 }
0x11b6   : > { %v9538_v59 = vpop.f32.mrf.mxu1  ;;  %v9544_v60 = vpop.f32.mrf.mxu0 }
0x11b8   : > { %v3000_v62 = vpop.f32.mrf.mxu1 }
0x11b9   : > { %v3001_v0 = vadd.f32 %v3000_v62, %v11612_v54  ;;  %v9974_v54 = vpack.i.bf16 %v2900_v38, %v2852_v33 }
0x11ba   : > { %v9549_v1 = vpop.f32.mrf.mxu1 }
0x11bb   : > { %v3009_v3 = vsel %vm1462_vm3, %v3001_v0, -inf }
0x11bc   : > { %3010 = vmax.xlane.f32.xlu1 %v3009_v3  ;;  %v3003_v34 = vpop.f32.mrf.mxu1 }
0x11be   : > { %v9550_v39 = vpop.f32.mrf.mxu1 }
0x11cd   : > { %3078 = vrot.lane.b32.xlu1 %v11629_v27, %s10858_s15 }
0x11d1   : > { %9950 = vrot.lane.b32.xlu1 %v9949_v53, %s10858_s15 }
0x11d5   : > { %9955 = vrot.lane.b32.xlu1 %v9954_v57, %s10857_s1 }
0x11d9   : > { %9965 = vrot.lane.b32.xlu1 %v9964_v9, %s10855_s4 }
0x11dd   : > { %9975 = vrot.lane.b32.xlu1 %v9974_v54, %s10853_s5 }
0x123d   : > { %v3008_v5 = vpop.xlane.xlu0 %3007 }
0x123e   : > { %v3012_v27 = vsub.f32 %v2951_v42, %v3008_v5 }
0x1240   : > { %v3014_v43 = vmul.f32 1.442695, %v3012_v27 }
0x1242   : > { %10283 = vpow2.f32 %v3014_v43 }
0x1245   : > { %v3011_v6 = vpop.xlane.xlu1 %3010 }
0x1246   : > { %v3013_v45 = vsub.f32 %v3001_v0, %v3011_v6 }
0x1248   : > { %v3016_v50 = vmul.f32 1.442695, %v3013_v45 }
0x1249   : > { %v3079_v53 = vpop.permute.xlu1 %3078 }
0x124a   : > { %10285 = vpow2.f32 %v3016_v50  ;;  %v3084_v46 = vsel %vm1490_vm4, %v3079_v53, 0 }
0x124b   : > { %9558 = vmatpush3.bf16.msra.mxu1 %v3084_v46 }
0x124c   : > { %9583 = vmatprep.subr.bf16.mxu1 %v10849_v22 }
0x124d   : > { %v9951_v38 = vpop.permute.xlu1 %9950 }
0x124e   : > { %v9953_v44 = vunpack.i.h.bf16 %v9951_v38  ;;  %v9952_v47 = vunpack.i.l.bf16 %v9951_v38 }
0x124f   : > { %v10284_v55 = vpop.eup %10283 }
0x1250   : > { %v3018_v57 = vsel %vm1462_vm3, %v10284_v55, 0.0  ;;  %v3183_v0 = vsel %vm1369_vm1, %v11659_v52, %v9953_v44  ;;  %v3182_v1 = vsel %vm1369_vm1, %v11657_v48, %v9952_v47 }
0x1251   : > { %3019 = vadd.xlane.f32.xlu0 %v3018_v57  ;;  %v9956_v41 = vpop.permute.xlu1 %9955 }
0x1252   : > { %v9958_v49 = vunpack.i.h.bf16 %v9956_v41  ;;  %v9957_v51 = vunpack.i.l.bf16 %v9956_v41 }
0x1254   : > { %v3185_v3 = vsel %vm3184_vm5, %v3182_v1, %v9957_v51  ;;  %v3186_v34 = vsel %vm3184_vm5, %v3183_v0, %v9958_v49  ;;  %v10081_v0 = vld [vmem:[%s11507_s13 + $0x14] ss:$8 sps:$4 sm:$0xff]   ;;  %v10079_v1 = vld [vmem:[%s11507_s13 + $0x10] ss:$8 sps:$4 sm:$0xff]  }
0x1255   : > { %v9966_v58 = vpop.permute.xlu1 %9965 }
0x1256   : > { %v9968_v43 = vunpack.i.h.bf16 %v9966_v58  ;;  %v9967_v6 = vunpack.i.l.bf16 %v9966_v58 }
0x1257   : > { %v10286_v2 = vpop.eup %10285 }
0x1258   : > { %v3021_v7 = vsel %vm1462_vm3, %v10286_v2, 0.0 }
0x1259   : > { %3022 = vadd.xlane.f32.xlu0 %v3021_v7  ;;  %v9976_v45 = vpop.permute.xlu1 %9975 }
0x125a   : > { %v9978_v46 = vunpack.i.h.bf16 %v9976_v45 }
0x126f   : > { %3030 = vrot.lane.b32.xlu0 %v11627_v23, %s10858_s15 }
0x1273   : > { %9960 = vrot.lane.b32.xlu0 %v9959_v63, %s10856_s8 }
0x1277   : > { %9970 = vrot.lane.b32.xlu0 %v9969_v28, %s10854_s6  ;;  %v10052_v28 = vld [vmem:[%s11452_s16 + $0x30] sm:$0xff]   ;;  %s12900_s16 = scalar_lea.vmem [#allocation10], %s11437_s20 }
0x12da   : > { %v3020_v9 = vpop.xlane.xlu0 %3019 }
0x12db   : > { %10287 = vrcp.f32 %v3020_v9 }
0x12e2   : > { %v3023_v8 = vpop.xlane.xlu0 %3022 }
0x12e3   : > { %10289 = vrcp.f32 %v3023_v8 }
0x12e6   : > { %v3031_v10 = vpop.permute.xlu0 %3030 }
0x12e7   : > { %v3036_v11 = vsel %vm1490_vm4, %v3031_v10, 0 }
0x12e8   : > { %v10288_v23 = vpop.eup %10287  ;;  %9552 = vmatpush3.bf16.msra.mxu0 %v3036_v11 }
0x12e9   : > { %v3026_v12 = vmul.f32 %v10288_v23, %v10284_v55  ;;  %9563 = vmatprep.subr.bf16.mxu0 %v10849_v22  ;;  %v9977_v55 = vunpack.i.l.bf16 %v9976_v45  ;;  %v3354_v45 = vld [vmem:[#allocation3 + $0x10] sm:$0xff] }
0x12ea   : > { %v9961_v42 = vpop.permute.xlu0 %9960 }
0x12eb   : > { %v3028_v56 = vpack.c.bf16 %v3026_v12, %v3026_v12  ;;  %v9963_v59 = vunpack.i.h.bf16 %v9961_v42  ;;  %v9962_v60 = vunpack.i.l.bf16 %v9961_v42  ;;  %v8663_v12 = vld [vmem:[%s12900_s16] ss:$0 sm:$0xff] }
0x12ed   : > { %9554 = vmatmul.mubr.msk.bf16.vlgmr.msra.gmra.mxu0 %vm1462_vm3, %v3028_v56  ;;  %v3189_v39 = vsel %vm3187_vm6, %v3186_v34, %v9963_v59  ;;  %v3188_v54 = vsel %vm3187_vm6, %v3185_v3, %v9962_v60  ;;  %v10077_v59 = vld [vmem:[%s11507_s13 + $0x24] ss:$8 sps:$4 sm:$0xff]   ;;  %v10075_v60 = vld [vmem:[%s11507_s13 + $0x20] ss:$8 sps:$4 sm:$0xff]  }
0x12ee   : > { %9579 = vmatprep.mubr.msk.bf16.mxu0 %vm10850_vm0, %v10849_v22  ;;  %9564 = vmatpush3.bf16.msra.mxu0 %v10051_v20  ;;  %v9971_v62 = vpop.permute.xlu0 %9970  ;;  %v3191_v52 = vsel %vm3190_vm7, %v3188_v54, %v9967_v6  ;;  %v3192_v50 = vsel %vm3190_vm7, %v3189_v39, %v9968_v43  ;;  %v10082_v3 = vld [vmem:[%s11460_s30 + $0x28] sm:$0xff]   ;;  %v10086_v54 = vld [vmem:[%s11460_s30 + $0x20] sm:$0xff]   ;;  %v10087_v6 = vld [vmem:[%s11460_s30 + $0x18] sm:$0xff]  }
0x12ef   : > { %9565 = vmatprep.subr.bf16.mxu0 %v10849_v22  ;;  %v9973_v5 = vunpack.i.h.bf16 %v9971_v62  ;;  %v9972_v27 = vunpack.i.l.bf16 %v9971_v62  ;;  %v10078_v62 = vld [vmem:[%s11460_s30 + $0x30] sm:$0xff]  }
0x12f0   : > { %v10290_v61 = vpop.eup %10289  ;;  %v10085_v34 = vld [vmem:[%s11507_s13 + $0x4] ss:$8 sps:$4 sm:$0xff]   ;;  %v10083_v39 = vld [vmem:[%s11507_s13] ss:$8 sps:$4 sm:$0xff]  }
0x12f1   : > { %v3027_v63 = vmul.f32 %v10290_v61, %v10286_v2  ;;  %v3194_v48 = vsel %vm3193_vm8, %v3191_v52, %v9972_v27  ;;  %v3195_v53 = vsel %vm3193_vm8, %v3192_v50, %v9973_v5  ;;  %v3352_v5 = vld [vmem:[#allocation3] sm:$0xff]  ;;  %v3353_v27 = vld [vmem:[#allocation3 + $0x8] sm:$0xff]  ;;  %v3355_v52 = vld [vmem:[#allocation3 + $0x18] sm:$0xff] }
0x12f2   : > { %9566 = vmatpush3.bf16.msra.mxu0 %v10052_v28  ;;  %v3197_v9 = vsel %vm3196_vm9, %v3194_v48, %v9977_v55  ;;  %v3198_v8 = vsel %vm3196_vm9, %v3195_v53, %v9978_v46  ;;  %v3469_v43 = vpack.c.bf16 %v3353_v27, %v3352_v5  ;;  %v10088_v50 = vld [vmem:[%s11460_s30 + $0x10] sm:$0xff]   ;;  %v3470_v48 = vpack.c.bf16 %v3355_v52, %v3354_v45  ;;  %v10089_v53 = vld [vmem:[%s11460_s30 + $0x8] sm:$0xff]   ;;  %v10090_v46 = vld [vmem:[%s11460_s30] sm:$0xff]  }
0x12f3   : > { %v3029_v16 = vpack.c.bf16 %v3027_v63, %v3027_v63  ;;  %9567 = vmatprep.subr.bf16.mxu0 %v10849_v22 }
0x12f5   : > { %9560 = vmatmul.mubr.msk.bf16.vlgmr.msra.gmra.mxu1 %vm1462_vm3, %v3029_v16  ;;  %v10367_v16 = vld [vmem:[#allocation2] sm:$0xff] }
0x12f6   : > { %9599 = vmatprep.mubr.msk.bf16.mxu1 %vm10850_vm0, %v10849_v22  ;;  %9568 = vmatpush3.bf16.msra.mxu0 %v10053_v13 }
0x12f7   : > { %9569 = vmatprep.subr.bf16.mxu0 %v10849_v22 }
0x12fa   : > { %9570 = vmatpush3.bf16.msra.mxu0 %v10054_v15 }
0x12fb   : > { %9571 = vmatprep.subr.bf16.mxu0 %v10849_v22 }
0x12fe   : > { %9572 = vmatpush3.bf16.msra.mxu0 %v10055_v17  ;;  %v10368_v17 = vld [vmem:[#allocation2 + $0x8] sm:$0xff] }
0x12ff   : > { %9573 = vmatprep.subr.bf16.mxu0 %v10849_v22 }
0x1302   : > { %9574 = vmatpush3.bf16.msra.mxu0 %v10056_v18 }
0x1303   : > { %9575 = vmatprep.subr.bf16.mxu0 %v10849_v22 }
0x1306   : > { %9576 = vmatpush3.bf16.msra.mxu0 %v10057_v40  ;;  %v10059_v40 = vld [vmem:[%s11507_s13 + $0x70] ss:$8 sps:$4 sm:$0xff]  }
0x1307   : > { %9577 = vmatprep.subr.bf16.mxu0 %v10849_v22 }
0x130a   : > { %9578 = vmatpush3.bf16.msra.mxu0 %v10058_v19  ;;  %v10061_v19 = vld [vmem:[%s11507_s13 + $0x74] ss:$8 sps:$4 sm:$0xff]  }
0x130b   : > { %3579 = vmatprep.subr.bf16.mxu0 %v10061_v19 }
0x13ad   : > { %v3072_v21 = vpop.f32.mrf.mxu0 }
0x13af   : > { %v9555_v30 = vpop.f32.mrf.mxu0 }
0x13b0   : > { %v10062_v30 = vld [vmem:[%s11507_s13 + $0x60] ss:$8 sps:$4 sm:$0xff]  }
0x13b1   : > { %v3075_v26 = vpop.f32.mrf.mxu0 }
0x13b2   : > { %v10074_v26 = vld [vmem:[%s11460_s30 + $0x38] sm:$0xff]   ;;  %s12901_s30 = scalar_lea.vmem [#allocation13], %s11437_s20 }
0x13b3   : > { %v9556_v31 = vpop.f32.mrf.mxu0  ;;  %9584 = vmatpush3.bf16.msra.mxu1 %v10074_v26 }
0x13b4   : > { %v10067_v31 = vld [vmem:[%s11507_s13 + $0x54] ss:$8 sps:$4 sm:$0xff]   ;;  %9585 = vmatprep.subr.bf16.mxu1 %v10849_v22 }
0x13b5   : > { %v3120_v32 = vpop.f32.mrf.mxu1 }
0x13b6   : > { %v9979_v33 = vpack.i.bf16 %v3120_v32, %v3072_v21  ;;  %v10064_v21 = vld [vmem:[%s11507_s13 + $0x64] ss:$8 sps:$4 sm:$0xff]   ;;  %v10065_v32 = vld [vmem:[%s11507_s13 + $0x50] ss:$8 sps:$4 sm:$0xff]  }
0x13b7   : > { %v9561_v35 = vpop.f32.mrf.mxu1  ;;  %9586 = vmatpush3.bf16.msra.mxu1 %v10078_v62 }
0x13b8   : > { %9980 = vrot.lane.b32.xlu0 %v9979_v33, %s10851_s3  ;;  %v10070_v33 = vld [vmem:[%s11507_s13 + $0x44] ss:$8 sps:$4 sm:$0xff]   ;;  %v10068_v35 = vld [vmem:[%s11507_s13 + $0x40] ss:$8 sps:$4 sm:$0xff]   ;;  %9587 = vmatprep.subr.bf16.mxu1 %v10849_v22 }
0x13b9   : > { %v3123_v36 = vpop.f32.mrf.mxu1 }
0x13ba   : > { %v10073_v36 = vld [vmem:[%s11507_s13 + $0x34] ss:$8 sps:$4 sm:$0xff]  }
0x13bb   : > { %v9562_v37 = vpop.f32.mrf.mxu1  ;;  %9588 = vmatpush3.bf16.msra.mxu1 %v10082_v3 }
0x13bc   : > { %v10071_v37 = vld [vmem:[%s11507_s13 + $0x30] ss:$8 sps:$4 sm:$0xff]   ;;  %9589 = vmatprep.subr.bf16.mxu1 %v10849_v22 }
0x13bf   : > { %9590 = vmatpush3.bf16.msra.mxu1 %v10086_v54 }
0x13c0   : > { %9591 = vmatprep.subr.bf16.mxu1 %v10849_v22 }
0x13c3   : > { %9592 = vmatpush3.bf16.msra.mxu1 %v10087_v6 }
0x13c4   : > { %9593 = vmatprep.subr.bf16.mxu1 %v10849_v22 }
0x13c7   : > { %9594 = vmatpush3.bf16.msra.mxu1 %v10088_v50 }
0x13c8   : > { %9595 = vmatprep.subr.bf16.mxu1 %v10849_v22 }
0x13cb   : > { %9596 = vmatpush3.bf16.msra.mxu1 %v10089_v53 }
0x13cc   : > { %9597 = vmatprep.subr.bf16.mxu1 %v10849_v22 }
0x13cf   : > { %9598 = vmatpush3.bf16.msra.mxu1 %v10090_v46 }
0x13d0   : > { %9603 = vmatprep.subr.bf16.mxu1 %v10849_v22 }
0x142a   : > { %v9981_v57 = vpop.permute.xlu0 %9980 }
0x142b   : > { %v9983_v2 = vunpack.i.h.bf16 %v9981_v57  ;;  %v9982_v7 = vunpack.i.l.bf16 %v9981_v57 }
0x142d   : > { %v3201_v10 = vsel %vm3199_vm10, %v3198_v8, %v9983_v2  ;;  %v3200_v11 = vsel %vm3199_vm10, %v3197_v9, %v9982_v7 }
0x142e   : > { %v3202_v23 = vpack.c.bf16 %v3201_v10, %v3200_v11  ;;  %v1093_v10 = vld [vmem:[%s11512_s21] sm:$0x7] }
0x1430   : > { %9580 = vmatmul.mubr.bf16.vlgmr.msra.gmra.mxu0 %v3202_v23 }
0x1431   : > { %3611 = vmatprep.mubr.bf16.mxu0 %v10848_v4  ;;  %3580 = vmatpush1.bf16.msra.mxu0 %v10059_v40 }
0x1432   : > { %3581 = vmatprep.subr.bf16.mxu0 %v10064_v21 }
0x1435   : > { %3582 = vmatpush1.bf16.msra.mxu0 %v10062_v30 }
0x1436   : > { %3583 = vmatprep.subr.bf16.mxu0 %v10067_v31 }
0x1439   : > { %3584 = vmatpush1.bf16.msra.mxu0 %v10065_v32 }
0x143a   : > { %3585 = vmatprep.subr.bf16.mxu0 %v10070_v33 }
0x143d   : > { %3586 = vmatpush1.bf16.msra.mxu0 %v10068_v35 }
0x143e   : > { %3587 = vmatprep.subr.bf16.mxu0 %v10073_v36 }
0x1441   : > { %3588 = vmatpush1.bf16.msra.mxu0 %v10071_v37 }
0x1442   : > { %3589 = vmatprep.subr.bf16.mxu0 %v10077_v59 }
0x1445   : > { %3590 = vmatpush1.bf16.msra.mxu0 %v10075_v60 }
0x1446   : > { %3591 = vmatprep.subr.bf16.mxu0 %v10081_v0  ;;  %v8672_v0 = vld [vmem:[%s12901_s30] ss:$0 sm:$0xff] }
0x1449   : > { %3592 = vmatpush1.bf16.msra.mxu0 %v10079_v1 }
0x144a   : > { %3593 = vmatprep.subr.bf16.mxu0 %v10085_v34 }
0x144d   : > { %3594 = vmatpush1.bf16.msra.mxu0 %v10083_v39 }
0x144e   : > { %9633 = vmatprep.subr.bf16.mxu0 %v10849_v22 }
0x1450   : > { %3612 = vmatmul.mubr.bf16.vlgmr.msra.gmra.mxu0 %v3469_v43 }
0x1451   : > { %3621 = vmatprep.mubr.bf16.mxu0 %v10848_v4 }
0x1458   : > { %3622 = vmatmul.mubr.bf16.gmra.mxu0 %v3470_v48 }
0x1459   : > { %9635 = vmatprep.mubr.msk.bf16.mxu0 %vm10850_vm0, %v10849_v22 }
0x14f0   : > { %v3308_v56 = vpop.f32.mrf.mxu0 }
0x14f1   : > { %v3309_v61 = vadd.f32 %v8663_v12, %v3308_v56  ;;  %v1094_v56 = vld [vmem:[%s11517_s12] sm:$0x7] }
0x14f2   : > { %v9581_v63 = vpop.f32.mrf.mxu0 }
0x14f3   : > { %v3315_v20 = vadd.f32 %v10367_v16, %v3309_v61 }
0x14f4   : > { %v3311_v28 = vpop.f32.mrf.mxu0 }
0x14f5   : > { %v3312_v13 = vadd.f32 %v8663_v12, %v3311_v28  ;;  %3317 = vadd.xlane.f32.xlu1 %v3315_v20  ;;  %v3343_v12 = vrot.slane %v1093_v10, %v11564_v29 }
0x14f6   : > { %v9582_v15 = vpop.f32.mrf.mxu0 }
0x14f7   : > { %v3316_v18 = vadd.f32 %v10368_v17, %v3312_v13 }
0x14f9   : > { %3319 = vadd.xlane.f32.xlu0 %v3316_v18 }
0x1510   : > { %v3613_v21 = vpop.f32.mrf.mxu0 }
0x1512   : > { %v3615_v30 = vpop.f32.mrf.mxu0 }
0x1514   : > { %v3617_v32 = vpop.f32.mrf.mxu0 }
0x1516   : > { %v3619_v35 = vpop.f32.mrf.mxu0 }
0x157e   : > { %v3318_v38 = vpop.xlane.xlu1 %3317 }
0x157f   : > { %v3322_v41 = vmul.f32 0.0078125, %v3318_v38  ;;  %v3623_v38 = vpop.f32.mrf.mxu0 }
0x1581   : > { %v3324_v42 = vsub.f32 %v3315_v20, %v3322_v41  ;;  %v3349_v20 = vrot.slane %v1094_v56, %v11564_v29 }
0x1582   : > { %v3320_v44 = vpop.xlane.xlu0 %3319 }
0x1583   : > { %v3323_v47 = vmul.f32 0.0078125, %v3320_v44  ;;  %v3326_v49 = vmul.f32 %v3324_v42, %v3324_v42  ;;  %v3625_v44 = vpop.f32.mrf.mxu0 }
0x1585   : > { %v3325_v51 = vsub.f32 %v3316_v18, %v3323_v47  ;;  %3328 = vadd.xlane.f32.xlu0 %v3326_v49  ;;  %v3487_v18 = vld [vmem:[%s11469_s25] sm:$0x3]  ;;  %v3627_v49 = vpop.f32.mrf.mxu0  ;;  %s12903_s25 = scalar_lea.vmem [#allocation23], %s11437_s20  ;;  %s12904_s20 = sld [smem:[#allocation37_spill]] }
0x1586   : > { %v3492_v40 = vrot.slane %v3487_v18, %v11564_v29  ;;  %v3496_v19 = vrot.slane %v3487_v18, %v11556_v25 }
0x1587   : > { %v3327_v58 = vmul.f32 %v3325_v51, %v3325_v51 }
0x1588   : > { %v3614_v26 = vadd.f32 %v3613_v21, %v3492_v40  ;;  %v3616_v31 = vadd.f32 %v3615_v30, %v3496_v19  ;;  %v3618_v33 = vadd.f32 %v3617_v32, %v3492_v40  ;;  %v3620_v37 = vadd.f32 %v3619_v35, %v3496_v19 }
0x1589   : > { %3330 = vadd.xlane.f32.xlu0 %v3327_v58  ;;  %v3626_v47 = vadd.f32 %v3625_v44, %v3496_v19  ;;  %v3624_v60 = vadd.f32 %v3623_v38, %v3492_v40  ;;  %v3628_v62 = vadd.f32 %v3627_v49, %v3492_v40 }
0x158a   : > { %v12046_v36 = vpack.c.bf16 %v3618_v33, %v3614_v26  ;;  %v12048_v41 = vpack.c.bf16 %v3620_v37, %v3616_v31 }
0x158b   : > { %v12057_v3 = vpack.c.bf16 %v3628_v62, %v3624_v60  ;;  %p8995_p12 = scmp.ne.s32.totalorder %s12904_s20, 1 }
0x158d   : > { %v3688_v27 = vsel %vm1369_vm1, %v12057_v3, 0 }
0x160e   : > { %v3329_v55 = vpop.xlane.xlu0 %3328 }
0x160f   : > { %v3332_v57 = vmul.f32 0.0078125, %v3329_v55 }
0x1611   : > { %v3334_v2 = vadd.f32 1e-05, %v3332_v57 }
0x1612   : > { %v3331_v7 = vpop.xlane.xlu0 %3330 }
0x1613   : > { %10291 = vrsqrt.f32 %v3334_v2  ;;  %v3333_v9 = vmul.f32 0.0078125, %v3331_v7 }
0x1615   : > { %v3335_v8 = vadd.f32 1e-05, %v3333_v9 }
0x1617   : > { %10293 = vrsqrt.f32 %v3335_v8 }
0x1620   : > { %v10292_v11 = vpop.eup %10291 }
0x1621   : > { %v3338_v23 = vmul.f32 %v10292_v11, %v3324_v42  ;;  %v3642_v42 = vsel %vm1369_vm1, %v12046_v36, 0 }
0x1623   : > { %v3344_v16 = vmul.f32 %v3343_v12, %v3338_v23 }
0x1624   : > { %v10294_v61 = vpop.eup %10293 }
0x1625   : > { %v3339_v63 = vmul.f32 %v10294_v61, %v3325_v51  ;;  %v12035_v13 = vadd.f32 %v3349_v20, %v3344_v16  ;;  %v3629_v51 = vpop.f32.mrf.mxu0 }
0x1626   : > { %v3630_v58 = vadd.f32 %v3629_v51, %v3496_v19 }
0x1627   : > { %v3345_v28 = vmul.f32 %v3343_v12, %v3339_v63 }
0x1628   : > { %v12053_v59 = vpack.c.bf16 %v3630_v58, %v3626_v47 }
0x1629   : > { %v12037_v15 = vadd.f32 %v3349_v20, %v3345_v28 }
0x162b   : > { %v3356_v17 = vpack.c.bf16 %v12037_v15, %v12035_v13 }
0x162d   : > { %9600 = vmatmul.mubr.bf16.vlgmr.msra.gmra.mxu1 %v3356_v17 }
0x162e   : > { %9605 = vmatprep.mubr.msk.bf16.mxu1 %vm10850_vm0, %v10849_v22  ;;  %9604 = vmatpush3.bf16.xpose.msra.mxu1 %v3642_v42 }
0x162f   : > { %9609 = vmatprep.subr.bf16.mxu1 %v10849_v22 }
0x16ed   : > { %v3462_v1 = vpop.f32.mrf.mxu1 }
0x16ee   : > { %v3463_v34 = vadd.f32 %v8672_v0, %v3462_v1 }
0x16ef   : > { %v9601_v39 = vpop.f32.mrf.mxu1 }
0x16f0   : > { %v12059_v54 = vpack.c.bf16 %v3463_v34, %v3463_v34 }
0x16f1   : > { %v3465_v5 = vpop.f32.mrf.mxu1 }
0x16f2   : > { %9606 = vmatmul.mubr.msk.bf16.vlgmr.msra.gmra.mxu1 %vm1369_vm1, %v12059_v54  ;;  %v3466_v6 = vadd.f32 %v8672_v0, %v3465_v5 }
0x16f3   : > { %9610 = vmatpush3.bf16.xpose.msra.mxu1 %v3688_v27  ;;  %v9602_v43 = vpop.f32.mrf.mxu1  ;;  %9611 = vmatprep.mubr.msk.bf16.mxu1 %vm10850_vm0, %v10849_v22 }
0x16f4   : > { %9615 = vmatprep.subr.bf16.mxu1 %v10849_v22  ;;  %v12068_v45 = vpack.c.bf16 %v3466_v6, %v3466_v6 }
0x16fa   : > { %9612 = vmatmul.mubr.msk.bf16.vlgmr.msra.gmra.mxu1 %vm1369_vm1, %v12068_v45 }
0x16fb   : > { %9616 = vmatpush3.bf16.msra.mxu1 %v12048_v41  ;;  %9617 = vmatprep.mubr.msk.bf16.mxu1 %vm10850_vm0, %v10849_v22 }
0x16fc   : > { %9621 = vmatprep.subr.bf16.mxu1 %v10849_v22 }
0x17b2   : > { %v3678_v52 = vpop.f32.mrf.mxu1 }
0x17b3   : > { %v3730_v50 = vsel %vm1369_vm1, %v3678_v52, -inf }
0x17b4   : > { %3731 = vmax.xlane.f32.xlu1 %v3730_v50  ;;  %v9607_v48 = vpop.f32.mrf.mxu1 }
0x17b6   : > { %v3681_v53 = vpop.f32.mrf.mxu1 }
0x17b8   : > { %v9608_v46 = vpop.f32.mrf.mxu1 }
0x17ba   : > { %v3724_v55 = vpop.f32.mrf.mxu1 }
0x17bb   : > { %v3733_v57 = vsel %vm1369_vm1, %v3724_v55, -inf }
0x17bc   : > { %3734 = vmax.xlane.f32.xlu0 %v3733_v57  ;;  %v9613_v2 = vpop.f32.mrf.mxu1 }
0x17be   : > { %v3727_v7 = vpop.f32.mrf.mxu1 }
0x17c0   : > { %v9614_v9 = vpop.f32.mrf.mxu1 }
0x183d   : > { %v3732_v8 = vpop.xlane.xlu1 %3731 }
0x183e   : > { %v3736_v10 = vsub.f32 %v3678_v52, %v3732_v8 }
0x1840   : > { %v3738_v11 = vmul.f32 1.442695, %v3736_v10 }
0x1842   : > { %10295 = vpow2.f32 %v3738_v11 }
0x1845   : > { %v3735_v23 = vpop.xlane.xlu0 %3734 }
0x1846   : > { %v3737_v12 = vsub.f32 %v3724_v55, %v3735_v23 }
0x1848   : > { %v3740_v56 = vmul.f32 1.442695, %v3737_v12 }
0x184a   : > { %10297 = vpow2.f32 %v3740_v56 }
0x184f   : > { %v10296_v61 = vpop.eup %10295 }
0x1850   : > { %v3742_v63 = vsel %vm1369_vm1, %v10296_v61, 0.0 }
0x1851   : > { %3743 = vadd.xlane.f32.xlu1 %v3742_v63 }
0x1857   : > { %v10298_v16 = vpop.eup %10297 }
0x1858   : > { %v3745_v20 = vsel %vm1369_vm1, %v10298_v16, 0.0 }
0x1859   : > { %3746 = vadd.xlane.f32.xlu0 %v3745_v20 }
0x1862   : > { %3844 = vrot.lane.b32.xlu1 %v12046_v36, %s10851_s3 }
0x1866   : > { %3841 = vrot.lane.b32.xlu1 %v12059_v54, %s10851_s3 }
0x186a   : > { %3893 = vrot.lane.b32.xlu1 %v12068_v45, %s10851_s3 }
0x186f   : > { %3896 = vrot.lane.b32.xlu0 %v12057_v3, %s10851_s3 }
0x18da   : > { %v3744_v28 = vpop.xlane.xlu1 %3743 }
0x18db   : > { %10299 = vrcp.f32 %v3744_v28 }
0x18de   : > { %v3845_v17 = vpop.permute.xlu1 %3844 }
0x18df   : > { %v3850_v38 = vsel %vm1369_vm1, %v3845_v17, 0 }
0x18e2   : > { %v3747_v18 = vpop.xlane.xlu0 %3746  ;;  %v3842_v30 = vpop.permute.xlu1 %3841 }
0x18e3   : > { %10301 = vrcp.f32 %v3747_v18 }
0x18e6   : > { %v3897_v40 = vpop.permute.xlu0 %3896  ;;  %v3894_v32 = vpop.permute.xlu1 %3893 }
0x18e7   : > { %v3902_v19 = vsel %vm1369_vm1, %v3897_v40, 0 }
0x18e8   : > { %v10300_v21 = vpop.eup %10299  ;;  %9634 = vmatpush3.bf16.xpose.msra.mxu0 %v3902_v19 }
0x18e9   : > { %v3750_v26 = vmul.f32 %v10300_v21, %v10296_v61  ;;  %9645 = vmatprep.subr.bf16.mxu0 %v10849_v22 }
0x18eb   : > { %v3752_v31 = vpack.c.bf16 %v3750_v26, %v3750_v26 }
0x18ed   : > { %9618 = vmatmul.mubr.msk.bf16.vlgmr.msra.gmra.mxu1 %vm1369_vm1, %v3752_v31 }
0x18ee   : > { %9622 = vmatpush3.bf16.msra.mxu1 %v12053_v59  ;;  %9623 = vmatprep.mubr.msk.bf16.mxu1 %vm10850_vm0, %v10849_v22 }
0x18ef   : > { %9636 = vmatmul.mubr.msk.bf16.vlgmr.msra.gmra.mxu0 %vm1369_vm1, %v3894_v32  ;;  %9627 = vmatprep.subr.bf16.mxu1 %v10849_v22 }
0x18f0   : > { %v10302_v33 = vpop.eup %10301  ;;  %9647 = vmatprep.mubr.msk.bf16.mxu0 %vm10850_vm0, %v10849_v22 }
0x18f1   : > { %v3751_v35 = vmul.f32 %v10302_v33, %v10298_v16 }
0x18f3   : > { %v3753_v37 = vpack.c.bf16 %v3751_v35, %v3751_v35 }
0x18f5   : > { %9624 = vmatmul.mubr.msk.bf16.vlgmr.msra.gmra.mxu1 %vm1369_vm1, %v3753_v37 }
0x18f6   : > { %9628 = vmatpush3.bf16.xpose.msra.mxu1 %v3850_v38  ;;  %9629 = vmatprep.mubr.msk.bf16.mxu1 %vm10850_vm0, %v10849_v22 }
0x18f7   : > { %9639 = vmatprep.subr.bf16.mxu1 %v10849_v22 }
0x18fd   : > { %9630 = vmatmul.mubr.msk.bf16.vlgmr.msra.gmra.mxu1 %vm1369_vm1, %v3842_v30 }
0x18fe   : > { %9641 = vmatprep.mubr.msk.bf16.mxu1 %vm10850_vm0, %v10849_v22 }
0x19ad   : > { %v12106_v42 = vpop.f32.mrf.mxu1 }
0x19af   : > { %v9619_v44 = vpop.f32.mrf.mxu1  ;;  %v3938_v47 = vpop.f32.mrf.mxu0 }
0x19b0   : > { %v3947_v49 = vsel %vm1369_vm1, %v3938_v47, -inf }
0x19b1   : > { %3948 = vmax.xlane.f32.xlu0 %v3947_v49  ;;  %v3794_v51 = vpop.f32.mrf.mxu1  ;;  %v9637_v58 = vpop.f32.mrf.mxu0 }
0x19b3   : > { %v9620_v60 = vpop.f32.mrf.mxu1  ;;  %v3941_v62 = vpop.f32.mrf.mxu0 }
0x19b5   : > { %v12109_v0 = vpop.f32.mrf.mxu1  ;;  %v9638_v1 = vpop.f32.mrf.mxu0 }
0x19b7   : > { %v9625_v34 = vpop.f32.mrf.mxu1 }
0x19b9   : > { %v3837_v39 = vpop.f32.mrf.mxu1 }
0x19bb   : > { %v9626_v5 = vpop.f32.mrf.mxu1 }
0x19bd   : > { %v3886_v27 = vpop.f32.mrf.mxu1 }
0x19be   : > { %v3944_v43 = vsel %vm1369_vm1, %v3886_v27, -inf }
0x19bf   : > { %3945 = vmax.xlane.f32.xlu1 %v3944_v43  ;;  %v9631_v6 = vpop.f32.mrf.mxu1 }
0x19c1   : > { %v3889_v52 = vpop.f32.mrf.mxu1 }
0x19c3   : > { %v9632_v50 = vpop.f32.mrf.mxu1 }
0x19d0   : > { %3969 = vrot.lane.b32.xlu1 %v12048_v41, %s10851_s3 }
0x19d4   : > { %4064 = vrot.lane.b32.xlu1 %v12046_v36, %s10853_s5 }
0x19d8   : > { %4114 = vrot.lane.b32.xlu1 %v12057_v3, %s10853_s5 }
0x19dc   : > { %4062 = vrot.lane.b32.xlu1 %v12059_v54, %s10853_s5 }
0x1a3a   : > { %v3949_v48 = vpop.xlane.xlu0 %3948 }
0x1a3b   : > { %v3951_v53 = vsub.f32 %v3938_v47, %v3949_v48 }
0x1a3d   : > { %v3954_v46 = vmul.f32 1.442695, %v3951_v53 }
0x1a3f   : > { %10303 = vpow2.f32 %v3954_v46 }
0x1a48   : > { %v3946_v55 = vpop.xlane.xlu1 %3945 }
0x1a49   : > { %v3950_v57 = vsub.f32 %v3886_v27, %v3946_v55 }
0x1a4b   : > { %v3952_v2 = vmul.f32 1.442695, %v3950_v57 }
0x1a4c   : > { %v10304_v7 = vpop.eup %10303  ;;  %v3970_v9 = vpop.permute.xlu1 %3969 }
0x1a4d   : > { %10305 = vpow2.f32 %v3952_v2  ;;  %9640 = vmatpush3.bf16.msra.mxu1 %v3970_v9  ;;  %v3959_v8 = vsel %vm1369_vm1, %v10304_v7, 0.0 }
0x1a4e   : > { %3960 = vadd.xlane.f32.xlu0 %v3959_v8  ;;  %9651 = vmatprep.subr.bf16.mxu1 %v10849_v22 }
0x1a50   : > { %v4065_v12 = vpop.permute.xlu1 %4064 }
0x1a51   : > { %v4070_v30 = vsel %vm1369_vm1, %v4065_v12, 0 }
0x1a54   : > { %v4115_v20 = vpop.permute.xlu1 %4114 }
0x1a55   : > { %v4120_v17 = vsel %vm1369_vm1, %v4115_v20, 0 }
0x1a58   : > { %v4063_v26 = vpop.permute.xlu1 %4062 }
0x1a5a   : > { %v10306_v10 = vpop.eup %10305 }
0x1a5b   : > { %v3956_v11 = vsel %vm1369_vm1, %v10306_v10, 0.0 }
0x1a5c   : > { %3957 = vadd.xlane.f32.xlu0 %v3956_v11 }
0x1a72   : > { %4016 = vrot.lane.b32.xlu0 %v12053_v59, %s10851_s3 }
0x1a76   : > { %4112 = vrot.lane.b32.xlu0 %v12068_v45, %s10853_s5 }
0x1ad7   : > { %v3961_v23 = vpop.xlane.xlu0 %3960 }
0x1ad8   : > { %10307 = vrcp.f32 %v3961_v23 }
0x1ae5   : > { %v10308_v56 = vpop.eup %10307  ;;  %v3958_v61 = vpop.xlane.xlu0 %3957 }
0x1ae6   : > { %10309 = vrcp.f32 %v3958_v61  ;;  %v3965_v63 = vmul.f32 %v10308_v56, %v10304_v7 }
0x1ae8   : > { %v3967_v28 = vpack.c.bf16 %v3965_v63, %v3965_v63 }
0x1ae9   : > { %v4017_v16 = vpop.permute.xlu0 %4016 }
0x1aea   : > { %9646 = vmatpush3.bf16.msra.mxu0 %v4017_v16 }
0x1aeb   : > { %9657 = vmatprep.subr.bf16.mxu0 %v10849_v22 }
0x1aed   : > { %9648 = vmatmul.mubr.msk.bf16.vlgmr.msra.gmra.mxu0 %vm1369_vm1, %v3967_v28  ;;  %v4113_v40 = vpop.permute.xlu0 %4112 }
0x1aee   : > { %9658 = vmatpush3.bf16.xpose.msra.mxu0 %v4120_v17  ;;  %9659 = vmatprep.mubr.msk.bf16.mxu0 %vm10850_vm0, %v10849_v22 }
0x1aef   : > { %9669 = vmatprep.subr.bf16.mxu0 %v10849_v22 }
0x1af3   : > { %v10310_v18 = vpop.eup %10309 }
0x1af4   : > { %v3964_v19 = vmul.f32 %v10310_v18, %v10306_v10 }
0x1af5   : > { %9660 = vmatmul.mubr.msk.bf16.vlgmr.msra.gmra.mxu0 %vm1369_vm1, %v4113_v40 }
0x1af6   : > { %v3966_v21 = vpack.c.bf16 %v3964_v19, %v3964_v19  ;;  %9671 = vmatprep.mubr.msk.bf16.mxu0 %vm10850_vm0, %v10849_v22 }
0x1af8   : > { %9642 = vmatmul.mubr.msk.bf16.vlgmr.msra.gmra.mxu1 %vm1369_vm1, %v3966_v21 }
0x1af9   : > { %9652 = vmatpush3.bf16.xpose.msra.mxu1 %v4070_v30  ;;  %9653 = vmatprep.mubr.msk.bf16.mxu1 %vm10850_vm0, %v10849_v22 }
0x1afa   : > { %9663 = vmatprep.subr.bf16.mxu1 %v10849_v22 }
0x1b00   : > { %9654 = vmatmul.mubr.msk.bf16.vlgmr.msra.gmra.mxu1 %vm1369_vm1, %v4063_v26 }
0x1b01   : > { %9665 = vmatprep.mubr.msk.bf16.mxu1 %vm10850_vm0, %v10849_v22 }
0x1bad   : > { %v12144_v31 = vpop.f32.mrf.mxu0 }
0x1baf   : > { %v9649_v32 = vpop.f32.mrf.mxu0 }
0x1bb1   : > { %v4059_v33 = vpop.f32.mrf.mxu0 }
0x1bb3   : > { %v9650_v35 = vpop.f32.mrf.mxu0 }
0x1bb5   : > { %v4156_v37 = vpop.f32.mrf.mxu0 }
0x1bb6   : > { %v4165_v38 = vsel %vm1369_vm1, %v4156_v37, -inf }
0x1bb7   : > { %4166 = vmax.xlane.f32.xlu0 %v4165_v38  ;;  %v9661_v44 = vpop.f32.mrf.mxu0 }
0x1bb8   : > { %v12147_v47 = vpop.f32.mrf.mxu1 }
0x1bb9   : > { %v9984_v49 = vpack.i.bf16 %v12144_v31, %v12147_v47  ;;  %v4159_v51 = vpop.f32.mrf.mxu0 }
0x1bba   : > { %v9643_v58 = vpop.f32.mrf.mxu1 }
0x1bbb   : > { %v9662_v60 = vpop.f32.mrf.mxu0 }
0x1bbc   : > { %v4012_v62 = vpop.f32.mrf.mxu1 }
0x1bbe   : > { %v9644_v1 = vpop.f32.mrf.mxu1 }
0x1bc0   : > { %v4106_v34 = vpop.f32.mrf.mxu1 }
0x1bc1   : > { %v4162_v39 = vsel %vm1369_vm1, %v4106_v34, -inf }
0x1bc2   : > { %4163 = vmax.xlane.f32.xlu1 %v4162_v39  ;;  %v9655_v5 = vpop.f32.mrf.mxu1 }
0x1bc4   : > { %v4109_v27 = vpop.f32.mrf.mxu1 }
0x1bc6   : > { %v9656_v43 = vpop.f32.mrf.mxu1 }
0x1bd3   : > { %4186 = vrot.lane.b32.xlu1 %v12048_v41, %s10853_s5 }
0x1bd7   : > { %4280 = vrot.lane.b32.xlu1 %v12046_v36, %s10854_s6 }
0x1bdb   : > { %4330 = vrot.lane.b32.xlu1 %v12057_v3, %s10854_s6 }
0x1bdf   : > { %4278 = vrot.lane.b32.xlu1 %v12059_v54, %s10854_s6 }
0x1c40   : > { %v4167_v6 = vpop.xlane.xlu0 %4166 }
0x1c41   : > { %v4169_v52 = vsub.f32 %v4156_v37, %v4167_v6 }
0x1c43   : > { %v4172_v50 = vmul.f32 1.442695, %v4169_v52 }
0x1c45   : > { %10311 = vpow2.f32 %v4172_v50 }
0x1c4b   : > { %v4164_v48 = vpop.xlane.xlu1 %4163 }
0x1c4c   : > { %v4168_v53 = vsub.f32 %v4106_v34, %v4164_v48 }
0x1c4e   : > { %v4170_v46 = vmul.f32 1.442695, %v4168_v53 }
0x1c4f   : > { %v4187_v55 = vpop.permute.xlu1 %4186 }
0x1c50   : > { %10313 = vpow2.f32 %v4170_v46  ;;  %9664 = vmatpush3.bf16.msra.mxu1 %v4187_v55 }
0x1c51   : > { %9675 = vmatprep.subr.bf16.mxu1 %v10849_v22 }
0x1c52   : > { %v10312_v57 = vpop.eup %10311 }
0x1c53   : > { %v4177_v2 = vsel %vm1369_vm1, %v10312_v57, 0.0  ;;  %v4281_v10 = vpop.permute.xlu1 %4280 }
0x1c54   : > { %4178 = vadd.xlane.f32.xlu0 %v4177_v2  ;;  %v4286_v40 = vsel %vm1369_vm1, %v4281_v10, 0 }
0x1c57   : > { %v4331_v61 = vpop.permute.xlu1 %4330 }
0x1c58   : > { %v4336_v16 = vsel %vm1369_vm1, %v4331_v61, 0 }
0x1c5b   : > { %v4279_v19 = vpop.permute.xlu1 %4278 }
0x1c5d   : > { %v10314_v7 = vpop.eup %10313 }
0x1c5e   : > { %v4174_v9 = vsel %vm1369_vm1, %v10314_v7, 0.0 }
0x1c5f   : > { %4175 = vadd.xlane.f32.xlu0 %v4174_v9 }
0x1c75   : > { %4232 = vrot.lane.b32.xlu0 %v12053_v59, %s10853_s5 }
0x1c79   : > { %4328 = vrot.lane.b32.xlu0 %v12068_v45, %s10854_s6 }
0x1cdd   : > { %v4179_v8 = vpop.xlane.xlu0 %4178 }
0x1cde   : > { %10315 = vrcp.f32 %v4179_v8 }
0x1ce8   : > { %v4176_v11 = vpop.xlane.xlu0 %4175 }
0x1ce9   : > { %10317 = vrcp.f32 %v4176_v11 }
0x1ceb   : > { %v10316_v23 = vpop.eup %10315 }
0x1cec   : > { %v4233_v12 = vpop.permute.xlu0 %4232  ;;  %v4183_v56 = vmul.f32 %v10316_v23, %v10312_v57 }
0x1ced   : > { %9670 = vmatpush3.bf16.msra.mxu0 %v4233_v12 }
0x1cee   : > { %v4185_v63 = vpack.c.bf16 %v4183_v56, %v4183_v56  ;;  %9681 = vmatprep.subr.bf16.mxu0 %v10849_v22 }
0x1cf0   : > { %9672 = vmatmul.mubr.msk.bf16.vlgmr.msra.gmra.mxu0 %vm1369_vm1, %v4185_v63  ;;  %v4329_v28 = vpop.permute.xlu0 %4328 }
0x1cf1   : > { %9682 = vmatpush3.bf16.xpose.msra.mxu0 %v4336_v16  ;;  %9683 = vmatprep.mubr.msk.bf16.mxu0 %vm10850_vm0, %v10849_v22 }
0x1cf2   : > { %9693 = vmatprep.subr.bf16.mxu0 %v10849_v22 }
0x1cf6   : > { %v10318_v20 = vpop.eup %10317 }
0x1cf7   : > { %v4182_v17 = vmul.f32 %v10318_v20, %v10314_v7 }
0x1cf8   : > { %9684 = vmatmul.mubr.msk.bf16.vlgmr.msra.gmra.mxu0 %vm1369_vm1, %v4329_v28 }
0x1cf9   : > { %v4184_v18 = vpack.c.bf16 %v4182_v17, %v4182_v17  ;;  %9695 = vmatprep.mubr.msk.bf16.mxu0 %vm10850_vm0, %v10849_v22 }
0x1cfb   : > { %9666 = vmatmul.mubr.msk.bf16.vlgmr.msra.gmra.mxu1 %vm1369_vm1, %v4184_v18 }
0x1cfc   : > { %9676 = vmatpush3.bf16.xpose.msra.mxu1 %v4286_v40  ;;  %9677 = vmatprep.mubr.msk.bf16.mxu1 %vm10850_vm0, %v10849_v22 }
0x1cfd   : > { %9687 = vmatprep.subr.bf16.mxu1 %v10849_v22 }
0x1d03   : > { %9678 = vmatmul.mubr.msk.bf16.vlgmr.msra.gmra.mxu1 %vm1369_vm1, %v4279_v19 }
0x1d04   : > { %9689 = vmatprep.mubr.msk.bf16.mxu1 %vm10850_vm0, %v10849_v22 }
0x1db0   : > { %v12184_v21 = vpop.f32.mrf.mxu0 }
0x1db2   : > { %v9673_v30 = vpop.f32.mrf.mxu0 }
0x1db4   : > { %v4275_v26 = vpop.f32.mrf.mxu0 }
0x1db6   : > { %v9674_v32 = vpop.f32.mrf.mxu0 }
0x1db8   : > { %v4372_v33 = vpop.f32.mrf.mxu0 }
0x1db9   : > { %v4381_v35 = vsel %vm1369_vm1, %v4372_v33, -inf }
0x1dba   : > { %4382 = vmax.xlane.f32.xlu0 %v4381_v35  ;;  %v9685_v37 = vpop.f32.mrf.mxu0 }
0x1dbb   : > { %v12187_v38 = vpop.f32.mrf.mxu1 }
0x1dbc   : > { %v9989_v44 = vpack.i.bf16 %v12184_v21, %v12187_v38  ;;  %v4375_v51 = vpop.f32.mrf.mxu0 }
0x1dbd   : > { %v9667_v58 = vpop.f32.mrf.mxu1 }
0x1dbe   : > { %v9686_v60 = vpop.f32.mrf.mxu0 }
0x1dbf   : > { %v4229_v62 = vpop.f32.mrf.mxu1 }
0x1dc1   : > { %v9668_v1 = vpop.f32.mrf.mxu1 }
0x1dc3   : > { %v4322_v34 = vpop.f32.mrf.mxu1 }
0x1dc4   : > { %v4378_v39 = vsel %vm1369_vm1, %v4322_v34, -inf }
0x1dc5   : > { %4379 = vmax.xlane.f32.xlu1 %v4378_v39  ;;  %v9679_v5 = vpop.f32.mrf.mxu1 }
0x1dc7   : > { %v4325_v27 = vpop.f32.mrf.mxu1 }
0x1dc9   : > { %v9680_v43 = vpop.f32.mrf.mxu1 }
0x1dd6   : > { %4402 = vrot.lane.b32.xlu1 %v12048_v41, %s10854_s6 }
0x1dda   : > { %4496 = vrot.lane.b32.xlu1 %v12046_v36, %s10855_s4 }
0x1dde   : > { %4546 = vrot.lane.b32.xlu1 %v12057_v3, %s10855_s4 }
0x1de2   : > { %4494 = vrot.lane.b32.xlu1 %v12059_v54, %s10855_s4 }
0x1e43   : > { %v4383_v6 = vpop.xlane.xlu0 %4382 }
0x1e44   : > { %v4385_v52 = vsub.f32 %v4372_v33, %v4383_v6 }
0x1e46   : > { %v4388_v50 = vmul.f32 1.442695, %v4385_v52 }
0x1e48   : > { %10319 = vpow2.f32 %v4388_v50 }
0x1e4e   : > { %v4380_v48 = vpop.xlane.xlu1 %4379 }
0x1e4f   : > { %v4384_v53 = vsub.f32 %v4322_v34, %v4380_v48 }
0x1e51   : > { %v4386_v46 = vmul.f32 1.442695, %v4384_v53 }
0x1e52   : > { %v4403_v55 = vpop.permute.xlu1 %4402 }
0x1e53   : > { %10321 = vpow2.f32 %v4386_v46  ;;  %9688 = vmatpush3.bf16.msra.mxu1 %v4403_v55 }
0x1e54   : > { %9699 = vmatprep.subr.bf16.mxu1 %v10849_v22 }
0x1e55   : > { %v10320_v57 = vpop.eup %10319 }
0x1e56   : > { %v4393_v2 = vsel %vm1369_vm1, %v10320_v57, 0.0  ;;  %v4497_v10 = vpop.permute.xlu1 %4496 }
0x1e57   : > { %4394 = vadd.xlane.f32.xlu0 %v4393_v2  ;;  %v4502_v40 = vsel %vm1369_vm1, %v4497_v10, 0 }
0x1e5a   : > { %v4547_v61 = vpop.permute.xlu1 %4546 }
0x1e5b   : > { %v4552_v16 = vsel %vm1369_vm1, %v4547_v61, 0 }
0x1e5e   : > { %v4495_v19 = vpop.permute.xlu1 %4494 }
0x1e60   : > { %v10322_v7 = vpop.eup %10321 }
0x1e61   : > { %v4390_v9 = vsel %vm1369_vm1, %v10322_v7, 0.0 }
0x1e62   : > { %4391 = vadd.xlane.f32.xlu0 %v4390_v9 }
0x1e78   : > { %4448 = vrot.lane.b32.xlu0 %v12053_v59, %s10854_s6 }
0x1e7c   : > { %4544 = vrot.lane.b32.xlu0 %v12068_v45, %s10855_s4 }
0x1ee0   : > { %v4395_v8 = vpop.xlane.xlu0 %4394 }
0x1ee1   : > { %10323 = vrcp.f32 %v4395_v8 }
0x1eeb   : > { %v4392_v11 = vpop.xlane.xlu0 %4391 }
0x1eec   : > { %10325 = vrcp.f32 %v4392_v11 }
0x1eee   : > { %v10324_v23 = vpop.eup %10323 }
0x1eef   : > { %v4449_v12 = vpop.permute.xlu0 %4448  ;;  %v4399_v56 = vmul.f32 %v10324_v23, %v10320_v57 }
0x1ef0   : > { %9694 = vmatpush3.bf16.msra.mxu0 %v4449_v12 }
0x1ef1   : > { %v4401_v63 = vpack.c.bf16 %v4399_v56, %v4399_v56  ;;  %9705 = vmatprep.subr.bf16.mxu0 %v10849_v22 }
0x1ef3   : > { %9696 = vmatmul.mubr.msk.bf16.vlgmr.msra.gmra.mxu0 %vm1369_vm1, %v4401_v63  ;;  %v4545_v28 = vpop.permute.xlu0 %4544 }
0x1ef4   : > { %9706 = vmatpush3.bf16.xpose.msra.mxu0 %v4552_v16  ;;  %9707 = vmatprep.mubr.msk.bf16.mxu0 %vm10850_vm0, %v10849_v22 }
0x1ef5   : > { %9717 = vmatprep.subr.bf16.mxu0 %v10849_v22 }
0x1ef9   : > { %v10326_v20 = vpop.eup %10325 }
0x1efa   : > { %v4398_v17 = vmul.f32 %v10326_v20, %v10322_v7 }
0x1efb   : > { %9708 = vmatmul.mubr.msk.bf16.vlgmr.msra.gmra.mxu0 %vm1369_vm1, %v4545_v28 }
0x1efc   : > { %v4400_v18 = vpack.c.bf16 %v4398_v17, %v4398_v17  ;;  %9719 = vmatprep.mubr.msk.bf16.mxu0 %vm10850_vm0, %v10849_v22 }
0x1efe   : > { %9690 = vmatmul.mubr.msk.bf16.vlgmr.msra.gmra.mxu1 %vm1369_vm1, %v4400_v18 }
0x1eff   : > { %9700 = vmatpush3.bf16.xpose.msra.mxu1 %v4502_v40  ;;  %9701 = vmatprep.mubr.msk.bf16.mxu1 %vm10850_vm0, %v10849_v22 }
0x1f00   : > { %9711 = vmatprep.subr.bf16.mxu1 %v10849_v22 }
0x1f06   : > { %9702 = vmatmul.mubr.msk.bf16.vlgmr.msra.gmra.mxu1 %vm1369_vm1, %v4495_v19 }
0x1f07   : > { %9713 = vmatprep.mubr.msk.bf16.mxu1 %vm10850_vm0, %v10849_v22 }
0x1fb3   : > { %v12224_v30 = vpop.f32.mrf.mxu0 }
0x1fb5   : > { %v9697_v26 = vpop.f32.mrf.mxu0 }
0x1fb7   : > { %v4491_v32 = vpop.f32.mrf.mxu0 }
0x1fb9   : > { %v9698_v33 = vpop.f32.mrf.mxu0 }
0x1fbb   : > { %v4588_v35 = vpop.f32.mrf.mxu0 }
0x1fbc   : > { %v4597_v37 = vsel %vm1369_vm1, %v4588_v35, -inf }
0x1fbd   : > { %4598 = vmax.xlane.f32.xlu0 %v4597_v37  ;;  %v9709_v51 = vpop.f32.mrf.mxu0 }
0x1fbe   : > { %v12227_v58 = vpop.f32.mrf.mxu1 }
0x1fbf   : > { %v9994_v60 = vpack.i.bf16 %v12224_v30, %v12227_v58  ;;  %v4591_v62 = vpop.f32.mrf.mxu0 }
0x1fc0   : > { %v9691_v1 = vpop.f32.mrf.mxu1 }
0x1fc1   : > { %v9710_v34 = vpop.f32.mrf.mxu0 }
0x1fc2   : > { %v4445_v39 = vpop.f32.mrf.mxu1 }
0x1fc4   : > { %v9692_v5 = vpop.f32.mrf.mxu1 }
0x1fc6   : > { %v4538_v27 = vpop.f32.mrf.mxu1 }
0x1fc7   : > { %v4594_v43 = vsel %vm1369_vm1, %v4538_v27, -inf }
0x1fc8   : > { %4595 = vmax.xlane.f32.xlu1 %v4594_v43  ;;  %v9703_v6 = vpop.f32.mrf.mxu1 }
0x1fca   : > { %v4541_v52 = vpop.f32.mrf.mxu1 }
0x1fcc   : > { %v9704_v50 = vpop.f32.mrf.mxu1 }
0x1fd9   : > { %4618 = vrot.lane.b32.xlu1 %v12048_v41, %s10855_s4 }
0x1fdd   : > { %4712 = vrot.lane.b32.xlu1 %v12046_v36, %s10856_s8 }
0x1fe1   : > { %4762 = vrot.lane.b32.xlu1 %v12057_v3, %s10856_s8 }
0x1fe5   : > { %4710 = vrot.lane.b32.xlu1 %v12059_v54, %s10856_s8 }
0x2046   : > { %v4599_v48 = vpop.xlane.xlu0 %4598 }
0x2047   : > { %v4601_v53 = vsub.f32 %v4588_v35, %v4599_v48 }
0x2049   : > { %v4604_v46 = vmul.f32 1.442695, %v4601_v53 }
0x204b   : > { %10327 = vpow2.f32 %v4604_v46 }
0x2051   : > { %v4596_v55 = vpop.xlane.xlu1 %4595 }
0x2052   : > { %v4600_v57 = vsub.f32 %v4538_v27, %v4596_v55 }
0x2054   : > { %v4602_v2 = vmul.f32 1.442695, %v4600_v57 }
0x2055   : > { %v4619_v7 = vpop.permute.xlu1 %4618 }
0x2056   : > { %10329 = vpow2.f32 %v4602_v2  ;;  %9712 = vmatpush3.bf16.msra.mxu1 %v4619_v7 }
0x2057   : > { %9723 = vmatprep.subr.bf16.mxu1 %v10849_v22 }
0x2058   : > { %v10328_v9 = vpop.eup %10327 }
0x2059   : > { %v4609_v8 = vsel %vm1369_vm1, %v10328_v9, 0.0  ;;  %v4713_v12 = vpop.permute.xlu1 %4712 }
0x205a   : > { %4610 = vadd.xlane.f32.xlu0 %v4609_v8  ;;  %v4718_v32 = vsel %vm1369_vm1, %v4713_v12, 0 }
0x205d   : > { %v4763_v20 = vpop.permute.xlu1 %4762 }
0x205e   : > { %v4768_v17 = vsel %vm1369_vm1, %v4763_v20, 0 }
0x2061   : > { %v4711_v33 = vpop.permute.xlu1 %4710 }
0x2063   : > { %v10330_v10 = vpop.eup %10329 }
0x2064   : > { %v4606_v11 = vsel %vm1369_vm1, %v10330_v10, 0.0 }
0x2065   : > { %4607 = vadd.xlane.f32.xlu0 %v4606_v11 }
0x207b   : > { %4664 = vrot.lane.b32.xlu0 %v12053_v59, %s10855_s4 }
0x207f   : > { %4760 = vrot.lane.b32.xlu0 %v12068_v45, %s10856_s8 }
0x20e3   : > { %v4611_v23 = vpop.xlane.xlu0 %4610 }
0x20e4   : > { %10331 = vrcp.f32 %v4611_v23 }
0x20ee   : > { %v4608_v56 = vpop.xlane.xlu0 %4607 }
0x20ef   : > { %10333 = vrcp.f32 %v4608_v56 }
0x20f1   : > { %v10332_v61 = vpop.eup %10331 }
0x20f2   : > { %v4615_v63 = vmul.f32 %v10332_v61, %v10328_v9  ;;  %v4665_v16 = vpop.permute.xlu0 %4664 }
0x20f3   : > { %9718 = vmatpush3.bf16.msra.mxu0 %v4665_v16 }
0x20f4   : > { %v4617_v28 = vpack.c.bf16 %v4615_v63, %v4615_v63  ;;  %9729 = vmatprep.subr.bf16.mxu0 %v10849_v22 }
0x20f6   : > { %9720 = vmatmul.mubr.msk.bf16.vlgmr.msra.gmra.mxu0 %vm1369_vm1, %v4617_v28  ;;  %v4761_v19 = vpop.permute.xlu0 %4760 }
0x20f7   : > { %9730 = vmatpush3.bf16.xpose.msra.mxu0 %v4768_v17  ;;  %9731 = vmatprep.mubr.msk.bf16.mxu0 %vm10850_vm0, %v10849_v22 }
0x20f8   : > { %9741 = vmatprep.subr.bf16.mxu0 %v10849_v22 }
0x20fc   : > { %v10334_v18 = vpop.eup %10333 }
0x20fd   : > { %v4614_v40 = vmul.f32 %v10334_v18, %v10330_v10 }
0x20fe   : > { %9732 = vmatmul.mubr.msk.bf16.vlgmr.msra.gmra.mxu0 %vm1369_vm1, %v4761_v19 }
0x20ff   : > { %v4616_v26 = vpack.c.bf16 %v4614_v40, %v4614_v40  ;;  %9743 = vmatprep.mubr.msk.bf16.mxu0 %vm10850_vm0, %v10849_v22 }
0x2101   : > { %9714 = vmatmul.mubr.msk.bf16.vlgmr.msra.gmra.mxu1 %vm1369_vm1, %v4616_v26 }
0x2102   : > { %9724 = vmatpush3.bf16.xpose.msra.mxu1 %v4718_v32  ;;  %9725 = vmatprep.mubr.msk.bf16.mxu1 %vm10850_vm0, %v10849_v22 }
0x2103   : > { %9735 = vmatprep.subr.bf16.mxu1 %v10849_v22 }
0x2109   : > { %9726 = vmatmul.mubr.msk.bf16.vlgmr.msra.gmra.mxu1 %vm1369_vm1, %v4711_v33 }
0x210a   : > { %9737 = vmatprep.mubr.msk.bf16.mxu1 %vm10850_vm0, %v10849_v22 }
0x21b6   : > { %v12264_v35 = vpop.f32.mrf.mxu0 }
0x21b8   : > { %v9721_v37 = vpop.f32.mrf.mxu0 }
0x21ba   : > { %v4707_v51 = vpop.f32.mrf.mxu0 }
0x21bc   : > { %v9722_v62 = vpop.f32.mrf.mxu0 }
0x21be   : > { %v4804_v1 = vpop.f32.mrf.mxu0 }
0x21bf   : > { %v4813_v34 = vsel %vm1369_vm1, %v4804_v1, -inf }
0x21c0   : > { %4814 = vmax.xlane.f32.xlu0 %v4813_v34  ;;  %v9733_v39 = vpop.f32.mrf.mxu0 }
0x21c1   : > { %v12267_v5 = vpop.f32.mrf.mxu1 }
0x21c2   : > { %v9999_v27 = vpack.i.bf16 %v12264_v35, %v12267_v5  ;;  %v4807_v43 = vpop.f32.mrf.mxu0 }
0x21c3   : > { %v9715_v6 = vpop.f32.mrf.mxu1 }
0x21c4   : > { %v9734_v52 = vpop.f32.mrf.mxu0 }
0x21c5   : > { %v4661_v50 = vpop.f32.mrf.mxu1 }
0x21c7   : > { %v9716_v48 = vpop.f32.mrf.mxu1 }
0x21c9   : > { %v4754_v53 = vpop.f32.mrf.mxu1 }
0x21ca   : > { %v4810_v46 = vsel %vm1369_vm1, %v4754_v53, -inf }
0x21cb   : > { %4811 = vmax.xlane.f32.xlu1 %v4810_v46  ;;  %v9727_v55 = vpop.f32.mrf.mxu1 }
0x21cd   : > { %v4757_v57 = vpop.f32.mrf.mxu1 }
0x21cf   : > { %v9728_v2 = vpop.f32.mrf.mxu1 }
0x21dc   : > { %4834 = vrot.lane.b32.xlu1 %v12048_v41, %s10856_s8 }
0x21e0   : > { %4928 = vrot.lane.b32.xlu1 %v12046_v36, %s10857_s1 }
0x21e4   : > { %4978 = vrot.lane.b32.xlu1 %v12057_v3, %s10857_s1 }
0x21e8   : > { %4926 = vrot.lane.b32.xlu1 %v12059_v54, %s10857_s1 }
0x2249   : > { %v4815_v7 = vpop.xlane.xlu0 %4814 }
0x224a   : > { %v4817_v9 = vsub.f32 %v4804_v1, %v4815_v7 }
0x224c   : > { %v4820_v8 = vmul.f32 1.442695, %v4817_v9 }
0x224e   : > { %10335 = vpow2.f32 %v4820_v8 }
0x2254   : > { %v4812_v10 = vpop.xlane.xlu1 %4811 }
0x2255   : > { %v4816_v11 = vsub.f32 %v4754_v53, %v4812_v10 }
0x2257   : > { %v4818_v23 = vmul.f32 1.442695, %v4816_v11 }
0x2258   : > { %v4835_v12 = vpop.permute.xlu1 %4834 }
0x2259   : > { %10337 = vpow2.f32 %v4818_v23  ;;  %9736 = vmatpush3.bf16.msra.mxu1 %v4835_v12 }
0x225a   : > { %9747 = vmatprep.subr.bf16.mxu1 %v10849_v22 }
0x225b   : > { %v10336_v56 = vpop.eup %10335 }
0x225c   : > { %v4825_v61 = vsel %vm1369_vm1, %v10336_v56, 0.0  ;;  %v4929_v28 = vpop.permute.xlu1 %4928 }
0x225d   : > { %4826 = vadd.xlane.f32.xlu0 %v4825_v61  ;;  %v4934_v34 = vsel %vm1369_vm1, %v4929_v28, 0 }
0x2260   : > { %v4979_v26 = vpop.permute.xlu1 %4978 }
0x2261   : > { %v4984_v33 = vsel %vm1369_vm1, %v4979_v26, 0 }
0x2264   : > { %v4927_v39 = vpop.permute.xlu1 %4926 }
0x2266   : > { %v10338_v63 = vpop.eup %10337 }
0x2267   : > { %v4822_v16 = vsel %vm1369_vm1, %v10338_v63, 0.0 }
0x2268   : > { %4823 = vadd.xlane.f32.xlu0 %v4822_v16 }
0x227e   : > { %4880 = vrot.lane.b32.xlu0 %v12053_v59, %s10856_s8 }
0x2282   : > { %4976 = vrot.lane.b32.xlu0 %v12068_v45, %s10857_s1 }
0x22e6   : > { %v4827_v20 = vpop.xlane.xlu0 %4826 }
0x22e7   : > { %10339 = vrcp.f32 %v4827_v20 }
0x22f1   : > { %v4824_v17 = vpop.xlane.xlu0 %4823 }
0x22f2   : > { %10341 = vrcp.f32 %v4824_v17 }
0x22f4   : > { %v10340_v18 = vpop.eup %10339 }
0x22f5   : > { %v4831_v40 = vmul.f32 %v10340_v18, %v10336_v56  ;;  %v4881_v19 = vpop.permute.xlu0 %4880 }
0x22f6   : > { %9742 = vmatpush3.bf16.msra.mxu0 %v4881_v19 }
0x22f7   : > { %v4833_v32 = vpack.c.bf16 %v4831_v40, %v4831_v40  ;;  %9753 = vmatprep.subr.bf16.mxu0 %v10849_v22 }
0x22f9   : > { %9744 = vmatmul.mubr.msk.bf16.vlgmr.msra.gmra.mxu0 %vm1369_vm1, %v4833_v32  ;;  %v4977_v62 = vpop.permute.xlu0 %4976 }
0x22fa   : > { %9754 = vmatpush3.bf16.xpose.msra.mxu0 %v4984_v33  ;;  %9755 = vmatprep.mubr.msk.bf16.mxu0 %vm10850_vm0, %v10849_v22 }
0x22fb   : > { %9765 = vmatprep.subr.bf16.mxu0 %v10849_v22 }
0x22ff   : > { %v10342_v37 = vpop.eup %10341 }
0x2300   : > { %v4830_v51 = vmul.f32 %v10342_v37, %v10338_v63 }
0x2301   : > { %9756 = vmatmul.mubr.msk.bf16.vlgmr.msra.gmra.mxu0 %vm1369_vm1, %v4977_v62 }
0x2302   : > { %v4832_v1 = vpack.c.bf16 %v4830_v51, %v4830_v51  ;;  %9767 = vmatprep.mubr.msk.bf16.mxu0 %vm10850_vm0, %v10849_v22 }
0x2304   : > { %9738 = vmatmul.mubr.msk.bf16.vlgmr.msra.gmra.mxu1 %vm1369_vm1, %v4832_v1 }
0x2305   : > { %9748 = vmatpush3.bf16.xpose.msra.mxu1 %v4934_v34  ;;  %9749 = vmatprep.mubr.msk.bf16.mxu1 %vm10850_vm0, %v10849_v22 }
0x2306   : > { %9759 = vmatprep.subr.bf16.mxu1 %v10849_v22 }
0x230c   : > { %9750 = vmatmul.mubr.msk.bf16.vlgmr.msra.gmra.mxu1 %vm1369_vm1, %v4927_v39 }
0x230d   : > { %9761 = vmatprep.mubr.msk.bf16.mxu1 %vm10850_vm0, %v10849_v22 }
0x23b9   : > { %v12304_v43 = vpop.f32.mrf.mxu0 }
0x23bb   : > { %v9745_v6 = vpop.f32.mrf.mxu0 }
0x23bd   : > { %v4923_v52 = vpop.f32.mrf.mxu0 }
0x23bf   : > { %v9746_v50 = vpop.f32.mrf.mxu0 }
0x23c1   : > { %v5020_v48 = vpop.f32.mrf.mxu0 }
0x23c2   : > { %v5029_v53 = vsel %vm1369_vm1, %v5020_v48, -inf }
0x23c3   : > { %5030 = vmax.xlane.f32.xlu0 %v5029_v53  ;;  %v9757_v46 = vpop.f32.mrf.mxu0 }
0x23c4   : > { %v12307_v55 = vpop.f32.mrf.mxu1 }
0x23c5   : > { %v10004_v57 = vpack.i.bf16 %v12304_v43, %v12307_v55  ;;  %v5023_v2 = vpop.f32.mrf.mxu0 }
0x23c6   : > { %v9739_v7 = vpop.f32.mrf.mxu1 }
0x23c7   : > { %v9758_v9 = vpop.f32.mrf.mxu0 }
0x23c8   : > { %v4877_v8 = vpop.f32.mrf.mxu1 }
0x23ca   : > { %v9740_v10 = vpop.f32.mrf.mxu1 }
0x23cc   : > { %v4970_v11 = vpop.f32.mrf.mxu1 }
0x23cd   : > { %v5026_v23 = vsel %vm1369_vm1, %v4970_v11, -inf }
0x23ce   : > { %5027 = vmax.xlane.f32.xlu1 %v5026_v23  ;;  %v9751_v12 = vpop.f32.mrf.mxu1 }
0x23d0   : > { %v4973_v56 = vpop.f32.mrf.mxu1 }
0x23d2   : > { %v9752_v61 = vpop.f32.mrf.mxu1 }
0x23df   : > { %5050 = vrot.lane.b32.xlu1 %v12048_v41, %s10857_s1 }
0x23e3   : > { %5144 = vrot.lane.b32.xlu1 %v12046_v36, %s10858_s15 }
0x23e7   : > { %5194 = vrot.lane.b32.xlu1 %v12057_v3, %s10858_s15 }
0x23eb   : > { %5142 = vrot.lane.b32.xlu1 %v12059_v54, %s10858_s15 }
0x244c   : > { %v5031_v63 = vpop.xlane.xlu0 %5030 }
0x244d   : > { %v5033_v16 = vsub.f32 %v5020_v48, %v5031_v63 }
0x244f   : > { %v5036_v20 = vmul.f32 1.442695, %v5033_v16 }
0x2451   : > { %10343 = vpow2.f32 %v5036_v20 }
0x2457   : > { %v5028_v28 = vpop.xlane.xlu1 %5027 }
0x2458   : > { %v5032_v17 = vsub.f32 %v4970_v11, %v5028_v28 }
0x245a   : > { %v5034_v18 = vmul.f32 1.442695, %v5032_v17 }
0x245b   : > { %v5051_v40 = vpop.permute.xlu1 %5050 }
0x245c   : > { %10345 = vpow2.f32 %v5034_v18  ;;  %9760 = vmatpush3.bf16.msra.mxu1 %v5051_v40 }
0x245d   : > { %9771 = vmatprep.subr.bf16.mxu1 %v10849_v22 }
0x245e   : > { %v10344_v19 = vpop.eup %10343 }
0x245f   : > { %v5041_v36 = vsel %vm1369_vm1, %v10344_v19, 0.0  ;;  %v5145_v32 = vpop.permute.xlu1 %5144 }
0x2460   : > { %5042 = vadd.xlane.f32.xlu0 %v5041_v36  ;;  %v5150_v48 = vsel %vm1369_vm1, %v5145_v32, 0  ;;  %v10092_v32 = vld [vmem:[%s11475_s22 + $0x30] sm:$0xff]  }
0x2463   : > { %v5195_v1 = vpop.permute.xlu1 %5194 }
0x2464   : > { %v5200_v39 = vsel %vm1369_vm1, %v5195_v1, 0  ;;  %v10097_v1 = vld [vmem:[%s11475_s22 + $0x8] sm:$0xff]  }
0x2467   : > { %v5143_v53 = vpop.permute.xlu1 %5142 }
0x2469   : > { %v10346_v3 = vpop.eup %10345 }
0x246a   : > { %v5038_v26 = vsel %vm1369_vm1, %v10346_v3, 0.0 }
0x246b   : > { %5039 = vadd.xlane.f32.xlu0 %v5038_v26 }
0x2481   : > { %5096 = vrot.lane.b32.xlu0 %v12053_v59, %s10857_s1 }
0x2485   : > { %5192 = vrot.lane.b32.xlu0 %v12068_v45, %s10858_s15 }
0x24e9   : > { %v5043_v54 = vpop.xlane.xlu0 %5042 }
0x24ea   : > { %10347 = vrcp.f32 %v5043_v54 }
0x24f4   : > { %v5040_v33 = vpop.xlane.xlu0 %5039 }
0x24f5   : > { %10349 = vrcp.f32 %v5040_v33  ;;  %v10093_v33 = vld [vmem:[%s11475_s22 + $0x28] sm:$0xff]  }
0x24f7   : > { %v10348_v37 = vpop.eup %10347 }
0x24f8   : > { %v5047_v51 = vmul.f32 %v10348_v37, %v10344_v19  ;;  %v5097_v62 = vpop.permute.xlu0 %5096  ;;  %v10094_v37 = vld [vmem:[%s11475_s22 + $0x20] sm:$0xff]  }
0x24f9   : > { %9766 = vmatpush3.bf16.msra.mxu0 %v5097_v62  ;;  %v10096_v62 = vld [vmem:[%s11475_s22 + $0x10] sm:$0xff]  }
0x24fa   : > { %v5049_v34 = vpack.c.bf16 %v5047_v51, %v5047_v51  ;;  %9777 = vmatprep.subr.bf16.mxu0 %v10849_v22  ;;  %v10095_v51 = vld [vmem:[%s11475_s22 + $0x18] sm:$0xff]  }
0x24fc   : > { %9768 = vmatmul.mubr.msk.bf16.vlgmr.msra.gmra.mxu0 %vm1369_vm1, %v5049_v34  ;;  %v5193_v52 = vpop.permute.xlu0 %5192 }
0x24fd   : > { %9778 = vmatpush3.bf16.xpose.msra.mxu0 %v5200_v39  ;;  %9779 = vmatprep.mubr.msk.bf16.mxu0 %vm10850_vm0, %v10849_v22 }
0x24fe   : > { %9789 = vmatprep.subr.bf16.mxu0 %v10849_v22 }
0x2502   : > { %v10350_v45 = vpop.eup %10349 }
0x2503   : > { %v5046_v6 = vmul.f32 %v10350_v45, %v10346_v3  ;;  %v10098_v45 = vld [vmem:[%s11475_s22] sm:$0xff]  }
0x2504   : > { %9780 = vmatmul.mubr.msk.bf16.vlgmr.msra.gmra.mxu0 %vm1369_vm1, %v5193_v52 }
0x2505   : > { %v5048_v50 = vpack.c.bf16 %v5046_v6, %v5046_v6  ;;  %9791 = vmatprep.mubr.msk.bf16.mxu0 %vm10850_vm0, %v10849_v22 }
0x2507   : > { %9762 = vmatmul.mubr.msk.bf16.vlgmr.msra.gmra.mxu1 %vm1369_vm1, %v5048_v50 }
0x2508   : > { %9772 = vmatpush3.bf16.xpose.msra.mxu1 %v5150_v48  ;;  %9773 = vmatprep.mubr.msk.bf16.mxu1 %vm10850_vm0, %v10849_v22 }
0x2509   : > { %9783 = vmatprep.subr.bf16.mxu1 %v10849_v22 }
0x250f   : > { %9774 = vmatmul.mubr.msk.bf16.vlgmr.msra.gmra.mxu1 %vm1369_vm1, %v5143_v53 }
0x2510   : > { %9785 = vmatprep.mubr.msk.bf16.mxu1 %vm10850_vm0, %v10849_v22 }
0x25bc   : > { %v5136_v46 = vpop.f32.mrf.mxu0 }
0x25be   : > { %v9769_v2 = vpop.f32.mrf.mxu0 }
0x25c0   : > { %v5139_v7 = vpop.f32.mrf.mxu0 }
0x25c2   : > { %v9770_v9 = vpop.f32.mrf.mxu0 }
0x25c4   : > { %v5236_v8 = vpop.f32.mrf.mxu0 }
0x25c5   : > { %v5245_v10 = vsel %vm1369_vm1, %v5236_v8, -inf }
0x25c6   : > { %5246 = vmax.xlane.f32.xlu0 %v5245_v10  ;;  %v9781_v11 = vpop.f32.mrf.mxu0 }
0x25c7   : > { %v5090_v23 = vpop.f32.mrf.mxu1 }
0x25c8   : > { %v10009_v12 = vpack.i.bf16 %v5136_v46, %v5090_v23  ;;  %v5239_v56 = vpop.f32.mrf.mxu0 }
0x25c9   : > { %v9763_v61 = vpop.f32.mrf.mxu1 }
0x25ca   : > { %v9782_v63 = vpop.f32.mrf.mxu0 }
0x25cb   : > { %v5093_v16 = vpop.f32.mrf.mxu1 }
0x25cd   : > { %v9764_v20 = vpop.f32.mrf.mxu1 }
0x25cf   : > { %v5186_v28 = vpop.f32.mrf.mxu1 }
0x25d0   : > { %v5242_v17 = vsel %vm1369_vm1, %v5186_v28, -inf }
0x25d1   : > { %5243 = vmax.xlane.f32.xlu1 %v5242_v17  ;;  %v9775_v18 = vpop.f32.mrf.mxu1 }
0x25d3   : > { %v5189_v40 = vpop.f32.mrf.mxu1 }
0x25d5   : > { %v9776_v19 = vpop.f32.mrf.mxu1 }
0x25e2   : > { %5266 = vrot.lane.b32.xlu1 %v12048_v41, %s10858_s15 }
0x25e6   : > { %9985 = vrot.lane.b32.xlu1 %v9984_v49, %s10858_s15 }
0x25ea   : > { %9990 = vrot.lane.b32.xlu1 %v9989_v44, %s10857_s1 }
0x25ee   : > { %9995 = vrot.lane.b32.xlu1 %v9994_v60, %s10856_s8 }
0x25f2   : > { %10005 = vrot.lane.b32.xlu1 %v10004_v57, %s10854_s6 }
0x264f   : > { %v5247_v41 = vpop.xlane.xlu0 %5246 }
0x2650   : > { %v5249_v36 = vsub.f32 %v5236_v8, %v5247_v41 }
0x2652   : > { %v5252_v3 = vmul.f32 1.442695, %v5249_v36 }
0x2654   : > { %10351 = vpow2.f32 %v5252_v3 }
0x265a   : > { %v5244_v31 = vpop.xlane.xlu1 %5243 }
0x265b   : > { %v5248_v47 = vsub.f32 %v5186_v28, %v5244_v31 }
0x265d   : > { %v5250_v49 = vmul.f32 1.442695, %v5248_v47 }
0x265e   : > { %v5267_v26 = vpop.permute.xlu1 %5266 }
0x265f   : > { %10353 = vpow2.f32 %v5250_v49  ;;  %9784 = vmatpush3.bf16.msra.mxu1 %v5267_v26 }
0x2660   : > { %9795 = vmatprep.subr.bf16.mxu1 %v10849_v22 }
0x2661   : > { %v10352_v21 = vpop.eup %10351 }
0x2662   : > { %v5257_v38 = vsel %vm1369_vm1, %v10352_v21, 0.0  ;;  %v9986_v7 = vpop.permute.xlu1 %9985 }
0x2663   : > { %5258 = vadd.xlane.f32.xlu0 %v5257_v38  ;;  %v9988_v11 = vunpack.i.h.bf16 %v9986_v7  ;;  %v9987_v23 = vunpack.i.l.bf16 %v9986_v7 }
0x2665   : > { %v5415_v20 = vsel %vm1369_vm1, %v12109_v0, %v9988_v11  ;;  %v5414_v28 = vsel %vm1369_vm1, %v12106_v42, %v9987_v23  ;;  %v5675_v11 = vld [vmem:[%s11485_s23 + $0x308] sm:$0xff] }
0x2666   : > { %v9991_v9 = vpop.permute.xlu1 %9990 }
0x266a   : > { %v9996_v10 = vpop.permute.xlu1 %9995 }
0x266b   : > { %v9998_v56 = vunpack.i.h.bf16 %v9996_v10  ;;  %v9997_v61 = vunpack.i.l.bf16 %v9996_v10  ;;  %v5682_v10 = vld [vmem:[%s11485_s23 + $0x340] sm:$0xff] }
0x266c   : > { %v10354_v44 = vpop.eup %10353 }
0x266d   : > { %v5254_v30 = vsel %vm1369_vm1, %v10354_v44, 0.0 }
0x266e   : > { %5255 = vadd.xlane.f32.xlu0 %v5254_v30  ;;  %v10006_v19 = vpop.permute.xlu1 %10005 }
0x266f   : > { %v10008_v49 = vunpack.i.h.bf16 %v10006_v19  ;;  %v10007_v26 = vunpack.i.l.bf16 %v10006_v19 }
0x2684   : > { %5312 = vrot.lane.b32.xlu0 %v12053_v59, %s10858_s15 }
0x2688   : > { %10000 = vrot.lane.b32.xlu0 %v9999_v27, %s10855_s4  ;;  %v10091_v27 = vld [vmem:[%s11475_s22 + $0x38] sm:$0xff]  }
0x268c   : > { %10010 = vrot.lane.b32.xlu0 %v10009_v12, %s10853_s5  ;;  %v9992_v12 = vunpack.i.l.bf16 %v9991_v9 }
0x268e   : > { %v5416_v18 = vsel %vm3184_vm5, %v5414_v28, %v9992_v12 }
0x268f   : > { %v5418_v41 = vsel %vm3187_vm6, %v5416_v18, %v9997_v61 }
0x26ec   : > { %v5259_v58 = vpop.xlane.xlu0 %5258 }
0x26ed   : > { %10355 = vrcp.f32 %v5259_v58 }
0x26f7   : > { %v5256_v60 = vpop.xlane.xlu0 %5255 }
0x26f8   : > { %10357 = vrcp.f32 %v5256_v60 }
0x26fa   : > { %v10356_v43 = vpop.eup %10355 }
0x26fb   : > { %v5263_v55 = vmul.f32 %v10356_v43, %v10352_v21  ;;  %v5313_v57 = vpop.permute.xlu0 %5312 }
0x26fc   : > { %9790 = vmatpush3.bf16.msra.mxu0 %v5313_v57 }
0x26fd   : > { %v5265_v54 = vpack.c.bf16 %v5263_v55, %v5263_v55 }
0x26ff   : > { %9792 = vmatmul.mubr.msk.bf16.vlgmr.msra.gmra.mxu0 %vm1369_vm1, %v5265_v54  ;;  %v10001_v8 = vpop.permute.xlu0 %10000  ;;  %v8729_v54 = vld [vmem:[%s12902_s19] ss:$0 sm:$0xff] }
0x2700   : > { %6462 = vmatprep.mubr.bf16.mxu0 %v10848_v4  ;;  %v10003_v63 = vunpack.i.h.bf16 %v10001_v8  ;;  %v10002_v16 = vunpack.i.l.bf16 %v10001_v8  ;;  %v5674_v8 = vld [vmem:[%s11485_s23 + $0x300] sm:$0xff] }
0x2701   : > { %v8835_v23 = vcombine.high %v5674_v8, %v5682_v10  ;;  %v8834_v12 = vcombine.low %v5674_v8, %v5682_v10  ;;  %v5700_v8 = vld [vmem:[%s11485_s23 + $0x3d0] sm:$0xff]  ;;  %v5693_v10 = vld [vmem:[%s11485_s23 + $0x398] sm:$0xff] }
0x2702   : > { %v5420_v3 = vsel %vm3190_vm7, %v5418_v41, %v10002_v16  ;;  %v5666_v16 = vld [vmem:[%s11485_s23 + $0x2c0] sm:$0xff] }
0x2703   : > { %v10011_v17 = vpop.permute.xlu0 %10010  ;;  %v5422_v21 = vsel %vm3193_vm8, %v5420_v3, %v10007_v26  ;;  %v5642_v41 = vld [vmem:[%s11485_s23 + $0x200] sm:$0xff]  ;;  %v5643_v3 = vld [vmem:[%s11485_s23 + $0x208] sm:$0xff] }
0x2704   : > { %v10013_v47 = vunpack.i.h.bf16 %v10011_v17  ;;  %v10012_v0 = vunpack.i.l.bf16 %v10011_v17  ;;  %v5667_v17 = vld [vmem:[%s11485_s23 + $0x2c8] sm:$0xff] }
0x2705   : > { %v10358_v59 = vpop.eup %10357 }
0x2706   : > { %v5262_v35 = vmul.f32 %v10358_v59, %v10354_v44  ;;  %v5424_v58 = vsel %vm3196_vm9, %v5422_v21, %v10012_v0  ;;  %v5634_v21 = vld [vmem:[%s11485_s23 + $0x1c0] sm:$0xff] }
0x2708   : > { %v5264_v5 = vpack.c.bf16 %v5262_v35, %v5262_v35 }
0x270a   : > { %9786 = vmatmul.mubr.msk.bf16.vlgmr.msra.gmra.mxu1 %vm1369_vm1, %v5264_v5 }
0x270b   : > { %9811 = vmatprep.mubr.msk.bf16.mxu1 %vm10850_vm0, %v10849_v22  ;;  %9796 = vmatpush3.bf16.msra.mxu1 %v10091_v27 }
0x270c   : > { %9797 = vmatprep.subr.bf16.mxu1 %v10849_v22 }
0x270f   : > { %9798 = vmatpush3.bf16.msra.mxu1 %v10092_v32 }
0x2710   : > { %9799 = vmatprep.subr.bf16.mxu1 %v10849_v22 }
0x2713   : > { %9800 = vmatpush3.bf16.msra.mxu1 %v10093_v33 }
0x2714   : > { %9801 = vmatprep.subr.bf16.mxu1 %v10849_v22 }
0x2717   : > { %9802 = vmatpush3.bf16.msra.mxu1 %v10094_v37 }
0x2718   : > { %9803 = vmatprep.subr.bf16.mxu1 %v10849_v22 }
0x271b   : > { %9804 = vmatpush3.bf16.msra.mxu1 %v10095_v51 }
0x271c   : > { %9805 = vmatprep.subr.bf16.mxu1 %v10849_v22 }
0x271f   : > { %9806 = vmatpush3.bf16.msra.mxu1 %v10096_v62  ;;  %v5690_v62 = vld [vmem:[%s11485_s23 + $0x380] sm:$0xff] }
0x2720   : > { %9807 = vmatprep.subr.bf16.mxu1 %v10849_v22 }
0x2723   : > { %9808 = vmatpush3.bf16.msra.mxu1 %v10097_v1  ;;  %v5698_v1 = vld [vmem:[%s11485_s23 + $0x3c0] sm:$0xff] }
0x2724   : > { %9809 = vmatprep.subr.bf16.mxu1 %v10849_v22  ;;  %v9993_v22 = vunpack.i.h.bf16 %v9991_v9 }
0x2726   : > { %v5417_v40 = vsel %vm3184_vm5, %v5415_v20, %v9993_v22  ;;  %v5683_v22 = vld [vmem:[%s11485_s23 + $0x348] sm:$0xff] }
0x2727   : > { %9810 = vmatpush3.bf16.msra.mxu1 %v10098_v45  ;;  %v5419_v36 = vsel %vm3187_vm6, %v5417_v40, %v9998_v56  ;;  %v8851_v45 = vcombine.high %v5690_v62, %v5698_v1  ;;  %v8836_v56 = vcombine.low %v5675_v11, %v5683_v22  ;;  %v8837_v61 = vcombine.high %v5675_v11, %v5683_v22  ;;  %v5659_v20 = vld [vmem:[%s11485_s23 + $0x288] sm:$0xff]  ;;  %v5701_v22 = vld [vmem:[%s11485_s23 + $0x3d8] sm:$0xff] }
0x2728   : > { %v5421_v31 = vsel %vm3190_vm7, %v5419_v36, %v10003_v63  ;;  %v5658_v63 = vld [vmem:[%s11485_s23 + $0x280] sm:$0xff]  ;;  %v8820_v40 = vcombine.low %v5659_v20, %v5667_v17  ;;  %v8821_v19 = vcombine.high %v5659_v20, %v5667_v17 }
0x2729   : > { %v5423_v38 = vsel %vm3193_vm8, %v5421_v31, %v10008_v49  ;;  %6430 = vmatprep.subr.bf16.mxu0 %v8851_v45  ;;  %v8819_v28 = vcombine.high %v5658_v63, %v5666_v16  ;;  %v8818_v18 = vcombine.low %v5658_v63, %v5666_v16  ;;  %v5650_v36 = vld [vmem:[%s11485_s23 + $0x240] sm:$0xff] }
0x272a   : > { %v5425_v60 = vsel %vm3196_vm9, %v5423_v38, %v10013_v47  ;;  %v8803_v31 = vcombine.high %v5642_v41, %v5650_v36  ;;  %v5651_v47 = vld [vmem:[%s11485_s23 + $0x248] sm:$0xff]  ;;  %v8802_v0 = vcombine.low %v5642_v41, %v5650_v36  ;;  %v10370_v41 = vld [vmem:[%s11517_s12] sm:$0x7] }
0x272b   : > { %v8804_v49 = vcombine.low %v5643_v3, %v5651_v47  ;;  %v8805_v26 = vcombine.high %v5643_v3, %v5651_v47  ;;  %v5627_v38 = vld [vmem:[%s11485_s23 + $0x188] sm:$0xff]  ;;  %v5574_v36 = vrot.slane %v10370_v41, %v11556_v25  ;;  %v5589_v41 = vld [vmem:[%s11485_s23 + $0x58] sm:$0xff] }
0x27bf   : > { %v5352_v34 = vpop.f32.mrf.mxu0 }
0x27c1   : > { %v9793_v39 = vpop.f32.mrf.mxu0 }
0x27c2   : > { %v8850_v39 = vcombine.low %v5690_v62, %v5698_v1  ;;  %v5603_v1 = vld [vmem:[%s11485_s23 + $0xc8] sm:$0xff] }
0x27c3   : > { %v5355_v6 = vpop.f32.mrf.mxu0 }
0x27c4   : > { %v5699_v6 = vld [vmem:[%s11485_s23 + $0x3c8] sm:$0xff]  ;;  %6431 = vmatpush1.bf16.msra.mxu0 %v8850_v39 }
0x27c5   : > { %v9794_v52 = vpop.f32.mrf.mxu0  ;;  %6432 = vmatprep.subr.bf16.mxu0 %v8835_v23 }
0x27c8   : > { %6433 = vmatpush1.bf16.msra.mxu0 %v8834_v12  ;;  %v8856_v12 = vcombine.low %v5693_v10, %v5701_v22 }
0x27c9   : > { %6434 = vmatprep.subr.bf16.mxu0 %v8819_v28 }
0x27ca   : > { %v5306_v50 = vpop.f32.mrf.mxu1 }
0x27cb   : > { %v10014_v48 = vpack.i.bf16 %v5352_v34, %v5306_v50  ;;  %v5691_v34 = vld [vmem:[%s11485_s23 + $0x388] sm:$0xff] }
0x27cc   : > { %v9787_v53 = vpop.f32.mrf.mxu1  ;;  %v8852_v52 = vcombine.low %v5691_v34, %v5699_v6  ;;  %v8853_v50 = vcombine.high %v5691_v34, %v5699_v6  ;;  %6435 = vmatpush1.bf16.msra.mxu0 %v8818_v18  ;;  %v5578_v6 = vld [vmem:[%s11485_s23] sm:$0xff] }
0x27cd   : > { %10015 = vrot.lane.b32.xlu1 %v10014_v48, %s10851_s3  ;;  %6436 = vmatprep.subr.bf16.mxu0 %v8803_v31  ;;  %v10369_v18 = vld [vmem:[%s11512_s21] sm:$0x7] }
0x27ce   : > { %v5309_v46 = vpop.f32.mrf.mxu1  ;;  %6473 = vmatprep.subr.bf16.mxu1 %v8853_v50  ;;  %v5579_v50 = vld [vmem:[%s11485_s23 + $0x8] sm:$0xff] }
0x27d0   : > { %v9788_v2 = vpop.f32.mrf.mxu1  ;;  %6437 = vmatpush1.bf16.msra.mxu0 %v8802_v0 }
0x283f   : > { %v10016_v42 = vpop.permute.xlu1 %10015 }
0x2840   : > { %v10018_v44 = vunpack.i.h.bf16 %v10016_v42  ;;  %v10017_v30 = vunpack.i.l.bf16 %v10016_v42  ;;  %v5626_v42 = vld [vmem:[%s11485_s23 + $0x180] sm:$0xff] }
0x2842   : > { %v5427_v43 = vsel %vm3199_vm10, %v5425_v60, %v10018_v44  ;;  %v5426_v55 = vsel %vm3199_vm10, %v5424_v58, %v10017_v30  ;;  %v8787_v44 = vcombine.high %v5626_v42, %v5634_v21  ;;  %v5635_v30 = vld [vmem:[%s11485_s23 + $0x1c8] sm:$0xff]  ;;  %v8786_v58 = vcombine.low %v5626_v42, %v5634_v21  ;;  %v5676_v42 = vld [vmem:[%s11485_s23 + $0x310] sm:$0xff] }
0x2843   : > { %v5428_v57 = vpack.c.bf16 %v5427_v43, %v5426_v55  ;;  %v8788_v60 = vcombine.low %v5627_v38, %v5635_v30  ;;  %v8789_v43 = vcombine.high %v5627_v38, %v5635_v30  ;;  %v5610_v55 = vld [vmem:[%s11485_s23 + $0x100] sm:$0xff]  ;;  %v5684_v21 = vld [vmem:[%s11485_s23 + $0x350] sm:$0xff]  ;;  %v5677_v38 = vld [vmem:[%s11485_s23 + $0x318] sm:$0xff] }
0x2844   : > { %6438 = vmatprep.subr.bf16.mxu0 %v8787_v44  ;;  %v5685_v44 = vld [vmem:[%s11485_s23 + $0x358] sm:$0xff] }
0x2845   : > { %9812 = vmatmul.mubr.bf16.vlgmr.msra.gmra.mxu1 %v5428_v57  ;;  %6439 = vmatpush1.bf16.msra.mxu0 %v8786_v58  ;;  %v5618_v57 = vld [vmem:[%s11485_s23 + $0x140] sm:$0xff] }
0x2846   : > { %6505 = vmatprep.mubr.bf16.mxu1 %v10848_v4  ;;  %6474 = vmatpush1.bf16.msra.mxu1 %v8852_v52  ;;  %v5586_v52 = vld [vmem:[%s11485_s23 + $0x40] sm:$0xff] }
0x2847   : > { %6475 = vmatprep.subr.bf16.mxu1 %v8837_v61 }
0x284a   : > { %6476 = vmatpush1.bf16.msra.mxu1 %v8836_v56  ;;  %v8857_v56 = vcombine.high %v5693_v10, %v5701_v22 }
0x284b   : > { %6477 = vmatprep.subr.bf16.mxu1 %v8821_v19 }
0x284e   : > { %6478 = vmatpush1.bf16.msra.mxu1 %v8820_v40  ;;  %v5568_v40 = vrot.slane %v10369_v18, %v11556_v25  ;;  %v5580_v18 = vld [vmem:[%s11485_s23 + $0x10] sm:$0xff] }
0x284f   : > { %6479 = vmatprep.subr.bf16.mxu1 %v8805_v26 }
0x2852   : > { %6480 = vmatpush1.bf16.msra.mxu1 %v8804_v49 }
0x2853   : > { %6481 = vmatprep.subr.bf16.mxu1 %v8789_v43  ;;  %v5660_v43 = vld [vmem:[%s11485_s23 + $0x290] sm:$0xff] }
0x2856   : > { %6482 = vmatpush1.bf16.msra.mxu1 %v8788_v60  ;;  %v8841_v60 = vcombine.high %v5677_v38, %v5685_v44 }
0x2905   : > { %v5534_v59 = vpop.f32.mrf.mxu1 }
0x2906   : > { %v5535_v35 = vadd.f32 %v8729_v54, %v5534_v59  ;;  %v8771_v59 = vcombine.high %v5610_v55, %v5618_v57 }
0x2907   : > { %v9813_v5 = vpop.f32.mrf.mxu1 }
0x2908   : > { %v5541_v27 = vadd.f32 %v5535_v35, %v12035_v13  ;;  %v5619_v35 = vld [vmem:[%s11485_s23 + $0x148] sm:$0xff]  ;;  %v8770_v5 = vcombine.low %v5610_v55, %v5618_v57  ;;  %6440 = vmatprep.subr.bf16.mxu0 %v8771_v59  ;;  %v5668_v55 = vld [vmem:[%s11485_s23 + $0x2d0] sm:$0xff]  ;;  %v5669_v57 = vld [vmem:[%s11485_s23 + $0x2d8] sm:$0xff]  ;;  %v8840_v59 = vcombine.low %v5677_v38, %v5685_v44 }
0x2909   : > { %v5537_v32 = vpop.f32.mrf.mxu1 }
0x290a   : > { %v5538_v33 = vadd.f32 %v8729_v54, %v5537_v32  ;;  %5543 = vadd.xlane.f32.xlu0 %v5541_v27  ;;  %v5611_v54 = vld [vmem:[%s11485_s23 + $0x108] sm:$0xff]  ;;  %6441 = vmatpush1.bf16.msra.mxu0 %v8770_v5 }
0x290b   : > { %v9814_v37 = vpop.f32.mrf.mxu1  ;;  %v8773_v32 = vcombine.high %v5611_v54, %v5619_v35 }
0x290c   : > { %v5542_v51 = vadd.f32 %v5538_v33, %v12037_v15  ;;  %v5594_v33 = vld [vmem:[%s11485_s23 + $0x80] sm:$0xff] }
0x290d   : > { %6483 = vmatprep.subr.bf16.mxu1 %v8773_v32  ;;  %v5602_v37 = vld [vmem:[%s11485_s23 + $0xc0] sm:$0xff]  ;;  %v5652_v32 = vld [vmem:[%s11485_s23 + $0x250] sm:$0xff] }
0x290e   : > { %5545 = vadd.xlane.f32.xlu1 %v5542_v51  ;;  %v8755_v62 = vcombine.high %v5594_v33, %v5602_v37  ;;  %v8754_v34 = vcombine.low %v5594_v33, %v5602_v37  ;;  %v5645_v33 = vld [vmem:[%s11485_s23 + $0x218] sm:$0xff] }
0x290f   : > { %v5653_v37 = vld [vmem:[%s11485_s23 + $0x258] sm:$0xff] }
0x2910   : > { %6442 = vmatprep.subr.bf16.mxu0 %v8755_v62 }
0x2911   : > { %6443 = vmatpush1.bf16.msra.mxu0 %v8754_v34  ;;  %v8809_v34 = vcombine.high %v5645_v33, %v5653_v37 }
0x2993   : > { %v5544_v13 = vpop.xlane.xlu0 %5543 }
0x2994   : > { %v5547_v48 = vmul.f32 0.0078125, %v5544_v13  ;;  %v8739_v13 = vcombine.high %v5578_v6, %v5586_v52 }
0x2996   : > { %v12420_v15 = vsub.f32 %v5541_v27, %v5547_v48  ;;  %v8772_v27 = vcombine.low %v5611_v54, %v5619_v35  ;;  %v5587_v48 = vld [vmem:[%s11485_s23 + $0x48] sm:$0xff]  ;;  %6444 = vmatprep.subr.bf16.mxu0 %v8739_v13  ;;  %v8838_v54 = vcombine.low %v5676_v42, %v5684_v21  ;;  %v8823_v35 = vcombine.high %v5660_v43, %v5668_v55 }
0x2997   : > { %v5546_v53 = vpop.xlane.xlu1 %5545  ;;  %v8808_v13 = vcombine.low %v5645_v33, %v5653_v37  ;;  %v5663_v33 = vld [vmem:[%s11485_s23 + $0x2a8] sm:$0xff] }
0x2998   : > { %v5548_v46 = vmul.f32 0.0078125, %v5546_v53  ;;  %v5551_v2 = vmul.f32 %v12420_v15, %v12420_v15  ;;  %6484 = vmatpush1.bf16.msra.mxu1 %v8772_v27  ;;  %v8738_v53 = vcombine.low %v5578_v6, %v5586_v52  ;;  %v5644_v27 = vld [vmem:[%s11485_s23 + $0x210] sm:$0xff]  ;;  %v5629_v6 = vld [vmem:[%s11485_s23 + $0x198] sm:$0xff]  ;;  %v5671_v37 = vld [vmem:[%s11485_s23 + $0x2e8] sm:$0xff] }
0x2999   : > { %v5637_v52 = vld [vmem:[%s11485_s23 + $0x1d8] sm:$0xff] }
0x299a   : > { %v12424_v7 = vsub.f32 %v5542_v51, %v5548_v46  ;;  %5553 = vadd.xlane.f32.xlu0 %v5551_v2  ;;  %v5595_v51 = vld [vmem:[%s11485_s23 + $0x88] sm:$0xff]  ;;  %v8740_v46 = vcombine.low %v5579_v50, %v5587_v48  ;;  %v8741_v2 = vcombine.high %v5579_v50, %v5587_v48  ;;  %6445 = vmatpush1.bf16.msra.mxu0 %v8738_v53 }
0x299b   : > { %v8756_v39 = vcombine.low %v5595_v51, %v5603_v1  ;;  %v8757_v45 = vcombine.high %v5595_v51, %v5603_v1  ;;  %v8822_v51 = vcombine.low %v5660_v43, %v5668_v55  ;;  %v8807_v1 = vcombine.high %v5644_v27, %v5652_v32  ;;  %v5678_v43 = vld [vmem:[%s11485_s23 + $0x320] sm:$0xff] }
0x299c   : > { %v5552_v9 = vmul.f32 %v12424_v7, %v12424_v7  ;;  %v8806_v50 = vcombine.low %v5644_v27, %v5652_v32  ;;  %v8793_v53 = vcombine.high %v5629_v6, %v5637_v52  ;;  %v5686_v55 = vld [vmem:[%s11485_s23 + $0x360] sm:$0xff] }
0x299d   : > { %6485 = vmatprep.subr.bf16.mxu1 %v8757_v45  ;;  %v5636_v45 = vld [vmem:[%s11485_s23 + $0x1d0] sm:$0xff]  ;;  %v5662_v27 = vld [vmem:[%s11485_s23 + $0x2a0] sm:$0xff] }
0x299e   : > { %5555 = vadd.xlane.f32.xlu0 %v5552_v9  ;;  %6486 = vmatpush1.bf16.msra.mxu1 %v8756_v39  ;;  %v5692_v9 = vld [vmem:[%s11485_s23 + $0x390] sm:$0xff]  ;;  %v5670_v32 = vld [vmem:[%s11485_s23 + $0x2e0] sm:$0xff] }
0x299f   : > { %6487 = vmatprep.subr.bf16.mxu1 %v8741_v2  ;;  %v8854_v11 = vcombine.low %v5692_v9, %v5700_v8  ;;  %v8855_v23 = vcombine.high %v5692_v9, %v5700_v8  ;;  %v5628_v39 = vld [vmem:[%s11485_s23 + $0x190] sm:$0xff]  ;;  %v5613_v9 = vld [vmem:[%s11485_s23 + $0x118] sm:$0xff] }
0x29a0   : > { %v8791_v48 = vcombine.high %v5628_v39, %v5636_v45  ;;  %v5620_v2 = vld [vmem:[%s11485_s23 + $0x150] sm:$0xff]  ;;  %v5621_v8 = vld [vmem:[%s11485_s23 + $0x158] sm:$0xff]  ;;  %v8790_v10 = vcombine.low %v5628_v39, %v5636_v45  ;;  %v5646_v39 = vld [vmem:[%s11485_s23 + $0x220] sm:$0xff] }
0x29a1   : > { %6516 = vmatprep.subr.bf16.mxu0 %v8855_v23  ;;  %v8777_v22 = vcombine.high %v5613_v9, %v5621_v8  ;;  %v5654_v45 = vld [vmem:[%s11485_s23 + $0x260] sm:$0xff] }
0x29a2   : > { %6488 = vmatpush1.bf16.msra.mxu1 %v8740_v46  ;;  %v5612_v46 = vld [vmem:[%s11485_s23 + $0x110] sm:$0xff] }
0x29a3   : > { %6559 = vmatprep.subr.bf16.mxu1 %v8857_v56  ;;  %v8775_v23 = vcombine.high %v5612_v46, %v5620_v2  ;;  %v5604_v56 = vld [vmem:[%s11485_s23 + $0xd0] sm:$0xff] }
0x2a23   : > { %v5554_v61 = vpop.xlane.xlu0 %5553 }
0x2a24   : > { %v5557_v63 = vmul.f32 0.0078125, %v5554_v61  ;;  %v5597_v61 = vld [vmem:[%s11485_s23 + $0x98] sm:$0xff] }
0x2a26   : > { %v5559_v16 = vadd.f32 1e-05, %v5557_v63  ;;  %v5605_v63 = vld [vmem:[%s11485_s23 + $0xd8] sm:$0xff] }
0x2a27   : > { %v5556_v20 = vpop.xlane.xlu0 %5555 }
0x2a28   : > { %10359 = vrsqrt.f32 %v5559_v16  ;;  %v5558_v28 = vmul.f32 0.0078125, %v5556_v20  ;;  %v8774_v16 = vcombine.low %v5612_v46, %v5620_v2  ;;  %v8776_v20 = vcombine.low %v5613_v9, %v5621_v8  ;;  %v5630_v46 = vld [vmem:[%s11485_s23 + $0x1a0] sm:$0xff]  ;;  %v5631_v9 = vld [vmem:[%s11485_s23 + $0x1a8] sm:$0xff] }
0x2a29   : > { %v5638_v2 = vld [vmem:[%s11485_s23 + $0x1e0] sm:$0xff]  ;;  %v5639_v8 = vld [vmem:[%s11485_s23 + $0x1e8] sm:$0xff] }
0x2a2a   : > { %v5560_v17 = vadd.f32 1e-05, %v5558_v28 }
0x2a2c   : > { %10361 = vrsqrt.f32 %v5560_v17  ;;  %v8761_v17 = vcombine.high %v5597_v61, %v5605_v63 }
0x2a35   : > { %v10360_v19 = vpop.eup %10359 }
0x2a36   : > { %v5563_v3 = vmul.f32 %v10360_v19, %v12420_v15  ;;  %v8839_v15 = vcombine.high %v5676_v42, %v5684_v21  ;;  %v5581_v19 = vld [vmem:[%s11485_s23 + $0x18] sm:$0xff]  ;;  %v5695_v42 = vld [vmem:[%s11485_s23 + $0x3a8] sm:$0xff] }
0x2a37   : > { %v5703_v21 = vld [vmem:[%s11485_s23 + $0x3e8] sm:$0xff]  ;;  %v8744_v44 = vcombine.low %v5581_v19, %v5589_v41 }
0x2a38   : > { %v5569_v31 = vmul.f32 %v5568_v40, %v5563_v3  ;;  %v8760_v3 = vcombine.low %v5597_v61, %v5605_v63  ;;  %v5615_v61 = vld [vmem:[%s11485_s23 + $0x128] sm:$0xff] }
0x2a39   : > { %v10362_v47 = vpop.eup %10361  ;;  %v5623_v63 = vld [vmem:[%s11485_s23 + $0x168] sm:$0xff] }
0x2a3a   : > { %v12465_v0 = vadd.f32 %v5574_v36, %v5569_v31  ;;  %v5564_v49 = vmul.f32 %v10362_v47, %v12424_v7  ;;  %v5661_v7 = vld [vmem:[%s11485_s23 + $0x298] sm:$0xff]  ;;  %v8745_v47 = vcombine.high %v5581_v19, %v5589_v41  ;;  %v5599_v19 = vld [vmem:[%s11485_s23 + $0xa8] sm:$0xff] }
0x2a3b   : > { %v8825_v5 = vcombine.high %v5661_v7, %v5669_v57  ;;  %v8824_v62 = vcombine.low %v5661_v7, %v5669_v57  ;;  %v5679_v7 = vld [vmem:[%s11485_s23 + $0x328] sm:$0xff] }
0x2a3c   : > { %v5570_v26 = vmul.f32 %v5568_v40, %v5564_v49  ;;  %v5588_v40 = vld [vmem:[%s11485_s23 + $0x50] sm:$0xff]  ;;  %v5694_v49 = vld [vmem:[%s11485_s23 + $0x3a0] sm:$0xff]  ;;  %v5687_v57 = vld [vmem:[%s11485_s23 + $0x368] sm:$0xff] }
0x2a3d   : > { %v8743_v31 = vcombine.high %v5580_v18, %v5588_v40  ;;  %v8742_v38 = vcombine.low %v5580_v18, %v5588_v40  ;;  %v5598_v18 = vld [vmem:[%s11485_s23 + $0xa0] sm:$0xff]  ;;  %v5607_v41 = vld [vmem:[%s11485_s23 + $0xe8] sm:$0xff] }
0x2a3e   : > { %v12472_v30 = vadd.f32 %v5574_v36, %v5570_v26  ;;  %v5702_v26 = vld [vmem:[%s11485_s23 + $0x3e0] sm:$0xff] }
0x2a3f   : > { %v5606_v40 = vld [vmem:[%s11485_s23 + $0xe0] sm:$0xff] }
0x2a40   : > { %v12476_v58 = vpack.c.bf16 %v12472_v30, %v12465_v0 }
0x2a42   : > { %6463 = vmatmul.mubr.bf16.vlgmr.msra.gmra.mxu0 %v12476_v58  ;;  %6506 = vmatmul.mubr.bf16.vlgmr.msra.gmra.mxu1 %v12476_v58 }
0x2a43   : > { %6517 = vmatpush1.bf16.msra.mxu0 %v8854_v11  ;;  %6560 = vmatpush1.bf16.msra.mxu1 %v8856_v12  ;;  %v8792_v11 = vcombine.low %v5629_v6, %v5637_v52  ;;  %v5596_v12 = vld [vmem:[%s11485_s23 + $0x90] sm:$0xff]  ;;  %v5647_v6 = vld [vmem:[%s11485_s23 + $0x228] sm:$0xff] }
0x2a44   : > { %6518 = vmatprep.subr.bf16.mxu0 %v8839_v15  ;;  %6561 = vmatprep.subr.bf16.mxu1 %v8841_v60  ;;  %v8759_v28 = vcombine.high %v5596_v12, %v5604_v56  ;;  %v8758_v36 = vcombine.low %v5596_v12, %v5604_v56  ;;  %v8859_v15 = vcombine.high %v5694_v49, %v5702_v26  ;;  %v5655_v52 = vld [vmem:[%s11485_s23 + $0x268] sm:$0xff]  ;;  %v5614_v12 = vld [vmem:[%s11485_s23 + $0x120] sm:$0xff] }
0x2a45   : > { %6548 = vmatprep.mubr.bf16.mxu0 %v10848_v4  ;;  %6591 = vmatprep.mubr.bf16.mxu1 %v10848_v4  ;;  %v8861_v60 = vcombine.high %v5695_v42, %v5703_v21  ;;  %v5622_v56 = vld [vmem:[%s11485_s23 + $0x160] sm:$0xff] }
0x2a47   : > { %6519 = vmatpush1.bf16.msra.mxu0 %v8838_v54  ;;  %6562 = vmatpush1.bf16.msra.mxu1 %v8840_v59  ;;  %v8858_v54 = vcombine.low %v5694_v49, %v5702_v26  ;;  %v8860_v59 = vcombine.low %v5695_v42, %v5703_v21  ;;  %v5582_v49 = vld [vmem:[%s11485_s23 + $0x20] sm:$0xff]  ;;  %v5583_v42 = vld [vmem:[%s11485_s23 + $0x28] sm:$0xff] }
0x2a48   : > { %6520 = vmatprep.subr.bf16.mxu0 %v8823_v35  ;;  %6563 = vmatprep.subr.bf16.mxu1 %v8825_v5  ;;  %v8843_v35 = vcombine.high %v5678_v43, %v5686_v55  ;;  %v8845_v5 = vcombine.high %v5679_v7, %v5687_v57  ;;  %v5590_v26 = vld [vmem:[%s11485_s23 + $0x60] sm:$0xff]  ;;  %v5591_v21 = vld [vmem:[%s11485_s23 + $0x68] sm:$0xff] }
0x2a4b   : > { %6521 = vmatpush1.bf16.msra.mxu0 %v8822_v51  ;;  %6564 = vmatpush1.bf16.msra.mxu1 %v8824_v62  ;;  %v8842_v51 = vcombine.low %v5678_v43, %v5686_v55  ;;  %v8844_v62 = vcombine.low %v5679_v7, %v5687_v57  ;;  %v5696_v43 = vld [vmem:[%s11485_s23 + $0x3b0] sm:$0xff]  ;;  %v5697_v7 = vld [vmem:[%s11485_s23 + $0x3b8] sm:$0xff] }
0x2a4c   : > { %6522 = vmatprep.subr.bf16.mxu0 %v8807_v1  ;;  %6565 = vmatprep.subr.bf16.mxu1 %v8809_v34  ;;  %v8827_v1 = vcombine.high %v5662_v27, %v5670_v32  ;;  %v8829_v34 = vcombine.high %v5663_v33, %v5671_v37  ;;  %v5704_v55 = vld [vmem:[%s11485_s23 + $0x3f0] sm:$0xff]  ;;  %v5705_v57 = vld [vmem:[%s11485_s23 + $0x3f8] sm:$0xff] }
0x2a4f   : > { %6523 = vmatpush1.bf16.msra.mxu0 %v8806_v50  ;;  %6566 = vmatpush1.bf16.msra.mxu1 %v8808_v13  ;;  %v8826_v50 = vcombine.low %v5662_v27, %v5670_v32  ;;  %v8828_v13 = vcombine.low %v5663_v33, %v5671_v37  ;;  %v5680_v27 = vld [vmem:[%s11485_s23 + $0x330] sm:$0xff]  ;;  %v5681_v33 = vld [vmem:[%s11485_s23 + $0x338] sm:$0xff] }
0x2a50   : > { %6524 = vmatprep.subr.bf16.mxu0 %v8791_v48  ;;  %6567 = vmatprep.subr.bf16.mxu1 %v8793_v53  ;;  %v8811_v48 = vcombine.high %v5646_v39, %v5654_v45  ;;  %v8813_v53 = vcombine.high %v5647_v6, %v5655_v52  ;;  %v5688_v32 = vld [vmem:[%s11485_s23 + $0x370] sm:$0xff]  ;;  %v5689_v37 = vld [vmem:[%s11485_s23 + $0x378] sm:$0xff] }
0x2a53   : > { %6525 = vmatpush1.bf16.msra.mxu0 %v8790_v10  ;;  %6568 = vmatpush1.bf16.msra.mxu1 %v8792_v11  ;;  %v8810_v10 = vcombine.low %v5646_v39, %v5654_v45  ;;  %v8812_v11 = vcombine.low %v5647_v6, %v5655_v52  ;;  %v5664_v39 = vld [vmem:[%s11485_s23 + $0x2b0] sm:$0xff]  ;;  %v5665_v6 = vld [vmem:[%s11485_s23 + $0x2b8] sm:$0xff] }
0x2a54   : > { %6526 = vmatprep.subr.bf16.mxu0 %v8775_v23  ;;  %6569 = vmatprep.subr.bf16.mxu1 %v8777_v22  ;;  %v8795_v23 = vcombine.high %v5630_v46, %v5638_v2  ;;  %v8797_v22 = vcombine.high %v5631_v9, %v5639_v8  ;;  %v5672_v45 = vld [vmem:[%s11485_s23 + $0x2f0] sm:$0xff]  ;;  %v5673_v52 = vld [vmem:[%s11485_s23 + $0x2f8] sm:$0xff] }
0x2a57   : > { %6527 = vmatpush1.bf16.msra.mxu0 %v8774_v16  ;;  %6570 = vmatpush1.bf16.msra.mxu1 %v8776_v20  ;;  %v8794_v16 = vcombine.low %v5630_v46, %v5638_v2  ;;  %v8796_v20 = vcombine.low %v5631_v9, %v5639_v8  ;;  %v5648_v46 = vld [vmem:[%s11485_s23 + $0x230] sm:$0xff]  ;;  %v5649_v9 = vld [vmem:[%s11485_s23 + $0x238] sm:$0xff] }
0x2a58   : > { %6528 = vmatprep.subr.bf16.mxu0 %v8759_v28  ;;  %6571 = vmatprep.subr.bf16.mxu1 %v8761_v17  ;;  %v8779_v28 = vcombine.high %v5614_v12, %v5622_v56  ;;  %v8781_v17 = vcombine.high %v5615_v61, %v5623_v63  ;;  %v5656_v2 = vld [vmem:[%s11485_s23 + $0x270] sm:$0xff]  ;;  %v5657_v8 = vld [vmem:[%s11485_s23 + $0x278] sm:$0xff] }
0x2a5b   : > { %6529 = vmatpush1.bf16.msra.mxu0 %v8758_v36  ;;  %6572 = vmatpush1.bf16.msra.mxu1 %v8760_v3  ;;  %v8778_v36 = vcombine.low %v5614_v12, %v5622_v56  ;;  %v8780_v3 = vcombine.low %v5615_v61, %v5623_v63  ;;  %v5632_v12 = vld [vmem:[%s11485_s23 + $0x1b0] sm:$0xff]  ;;  %v5633_v61 = vld [vmem:[%s11485_s23 + $0x1b8] sm:$0xff] }
0x2a5c   : > { %6530 = vmatprep.subr.bf16.mxu0 %v8743_v31  ;;  %6573 = vmatprep.subr.bf16.mxu1 %v8745_v47  ;;  %v8763_v31 = vcombine.high %v5598_v18, %v5606_v40  ;;  %v8765_v47 = vcombine.high %v5599_v19, %v5607_v41  ;;  %v5640_v56 = vld [vmem:[%s11485_s23 + $0x1f0] sm:$0xff]  ;;  %v5641_v63 = vld [vmem:[%s11485_s23 + $0x1f8] sm:$0xff] }
0x2a5f   : > { %6531 = vmatpush1.bf16.msra.mxu0 %v8742_v38  ;;  %6574 = vmatpush1.bf16.msra.mxu1 %v8744_v44  ;;  %v8762_v38 = vcombine.low %v5598_v18, %v5606_v40  ;;  %v8764_v44 = vcombine.low %v5599_v19, %v5607_v41  ;;  %v5624_v18 = vld [vmem:[%s11485_s23 + $0x170] sm:$0xff]  ;;  %v5617_v40 = vld [vmem:[%s11485_s23 + $0x138] sm:$0xff]  ;;  %v8798_v41 = vcombine.low %v5632_v12, %v5640_v56 }
0x2a60   : > { %6602 = vmatprep.subr.bf16.mxu0 %v8859_v15  ;;  %6645 = vmatprep.subr.bf16.mxu1 %v8861_v60  ;;  %v8747_v15 = vcombine.high %v5582_v49, %v5590_v26  ;;  %v8749_v60 = vcombine.high %v5583_v42, %v5591_v21  ;;  %v5625_v19 = vld [vmem:[%s11485_s23 + $0x178] sm:$0xff] }
0x2a62   : > { %6549 = vmatmul.mubr.bf16.vlgmr.msra.gmra.mxu0 %v12476_v58  ;;  %6592 = vmatmul.mubr.bf16.vlgmr.msra.gmra.mxu1 %v12476_v58 }
0x2a63   : > { %6603 = vmatpush1.bf16.msra.mxu0 %v8858_v54  ;;  %6646 = vmatpush1.bf16.msra.mxu1 %v8860_v59  ;;  %v8746_v54 = vcombine.low %v5582_v49, %v5590_v26  ;;  %v8748_v59 = vcombine.low %v5583_v42, %v5591_v21  ;;  %v5608_v49 = vld [vmem:[%s11485_s23 + $0xf0] sm:$0xff]  ;;  %v5601_v26 = vld [vmem:[%s11485_s23 + $0xb8] sm:$0xff] }
0x2a64   : > { %6604 = vmatprep.subr.bf16.mxu0 %v8843_v35  ;;  %6647 = vmatprep.subr.bf16.mxu1 %v8845_v5  ;;  %v8863_v35 = vcombine.high %v5696_v43, %v5704_v55  ;;  %v8865_v5 = vcombine.high %v5697_v7, %v5705_v57  ;;  %v5609_v42 = vld [vmem:[%s11485_s23 + $0xf8] sm:$0xff] }
0x2a65   : > { %6634 = vmatprep.mubr.bf16.mxu0 %v10848_v4  ;;  %6677 = vmatprep.mubr.bf16.mxu1 %v10848_v4 }
0x2a67   : > { %6605 = vmatpush1.bf16.msra.mxu0 %v8842_v51  ;;  %6648 = vmatpush1.bf16.msra.mxu1 %v8844_v62  ;;  %v8862_v51 = vcombine.low %v5696_v43, %v5704_v55  ;;  %v8864_v62 = vcombine.low %v5697_v7, %v5705_v57  ;;  %v5592_v43 = vld [vmem:[%s11485_s23 + $0x70] sm:$0xff]  ;;  %v5585_v55 = vld [vmem:[%s11485_s23 + $0x38] sm:$0xff] }
0x2a68   : > { %6606 = vmatprep.subr.bf16.mxu0 %v8827_v1  ;;  %6649 = vmatprep.subr.bf16.mxu1 %v8829_v34  ;;  %v8847_v1 = vcombine.high %v5680_v27, %v5688_v32  ;;  %v8849_v34 = vcombine.high %v5681_v33, %v5689_v37  ;;  %v5593_v7 = vld [vmem:[%s11485_s23 + $0x78] sm:$0xff] }
0x2a6b   : > { %6607 = vmatpush1.bf16.msra.mxu0 %v8826_v50  ;;  %6650 = vmatpush1.bf16.msra.mxu1 %v8828_v13  ;;  %v8846_v50 = vcombine.low %v5680_v27, %v5688_v32  ;;  %v8848_v13 = vcombine.low %v5681_v33, %v5689_v37  ;;  %v8752_v27 = vcombine.low %v5585_v55, %v5593_v7  ;;  %v10099_v32 = vld [vmem:[%s11494_s28 + $0x78] sm:$0xff]  }
0x2a6c   : > { %6608 = vmatprep.subr.bf16.mxu0 %v8811_v48  ;;  %6651 = vmatprep.subr.bf16.mxu1 %v8813_v53  ;;  %v8831_v48 = vcombine.high %v5664_v39, %v5672_v45  ;;  %v8833_v53 = vcombine.high %v5665_v6, %v5673_v52  ;;  %v10100_v33 = vld [vmem:[%s11494_s28 + $0xf8] sm:$0xff]  }
0x2a6d   : > { %v10101_v37 = vld [vmem:[%s11494_s28 + $0x38] sm:$0xff]  }
0x2a6f   : > { %6609 = vmatpush1.bf16.msra.mxu0 %v8810_v10  ;;  %6652 = vmatpush1.bf16.msra.mxu1 %v8812_v11  ;;  %v8830_v10 = vcombine.low %v5664_v39, %v5672_v45  ;;  %v8832_v11 = vcombine.low %v5665_v6, %v5673_v52  ;;  %v10106_v39 = vld [vmem:[%s11494_s28 + $0xb0] sm:$0xff]   ;;  %v10107_v45 = vld [vmem:[%s11494_s28 + $0x68] sm:$0xff]  }
0x2a70   : > { %6610 = vmatprep.subr.bf16.mxu0 %v8795_v23  ;;  %6653 = vmatprep.subr.bf16.mxu1 %v8797_v22  ;;  %v8815_v23 = vcombine.high %v5648_v46, %v5656_v2  ;;  %v8817_v22 = vcombine.high %v5649_v9, %v5657_v8  ;;  %v10108_v6 = vld [vmem:[%s11494_s28 + $0xe8] sm:$0xff]  }
0x2a71   : > { %v10109_v52 = vld [vmem:[%s11494_s28 + $0x28] sm:$0xff]  }
0x2a73   : > { %6611 = vmatpush1.bf16.msra.mxu0 %v8794_v16  ;;  %6654 = vmatpush1.bf16.msra.mxu1 %v8796_v20  ;;  %v8814_v16 = vcombine.low %v5648_v46, %v5656_v2  ;;  %v8799_v20 = vcombine.high %v5632_v12, %v5640_v56  ;;  %v10115_v46 = vld [vmem:[%s11494_s28 + $0x58] sm:$0xff]   ;;  %v10123_v12 = vld [vmem:[%s11494_s28 + $0x48] sm:$0xff]  }
0x2a74   : > { %6612 = vmatprep.subr.bf16.mxu0 %v8779_v28  ;;  %6655 = vmatprep.subr.bf16.mxu1 %v8781_v17  ;;  %v8801_v28 = vcombine.high %v5633_v61, %v5641_v63  ;;  %v5616_v17 = vld [vmem:[%s11485_s23 + $0x130] sm:$0xff]  ;;  %v10116_v2 = vld [vmem:[%s11494_s28 + $0xd8] sm:$0xff]   ;;  %v10124_v56 = vld [vmem:[%s11494_s28 + $0xc8] sm:$0xff]  }
0x2a75   : > { %v8782_v21 = vcombine.low %v5616_v17, %v5624_v18 }
0x2a77   : > { %6613 = vmatpush1.bf16.msra.mxu0 %v8778_v36  ;;  %6656 = vmatpush1.bf16.msra.mxu1 %v8780_v3  ;;  %v8800_v36 = vcombine.low %v5633_v61, %v5641_v63  ;;  %v8783_v3 = vcombine.high %v5616_v17, %v5624_v18  ;;  %v10125_v61 = vld [vmem:[%s11494_s28 + $0x8] sm:$0xff]   ;;  %v10131_v17 = vld [vmem:[%s11494_s28 + $0x178] sm:$0xff]  }
0x2a78   : > { %6614 = vmatprep.subr.bf16.mxu0 %v8763_v31  ;;  %6657 = vmatprep.subr.bf16.mxu1 %v8765_v47  ;;  %v8785_v31 = vcombine.high %v5617_v40, %v5625_v19  ;;  %v5600_v47 = vld [vmem:[%s11485_s23 + $0xb0] sm:$0xff]  ;;  %v10126_v63 = vld [vmem:[%s11494_s28 + $0x88] sm:$0xff]   ;;  %v10132_v18 = vld [vmem:[%s11494_s28 + $0x1f8] sm:$0xff]  }
0x2a79   : > { %v8766_v57 = vcombine.low %v5600_v47, %v5608_v49 }
0x2a7b   : > { %6615 = vmatpush1.bf16.msra.mxu0 %v8762_v38  ;;  %6658 = vmatpush1.bf16.msra.mxu1 %v8764_v44  ;;  %v8784_v38 = vcombine.low %v5617_v40, %v5625_v19  ;;  %v8767_v44 = vcombine.high %v5600_v47, %v5608_v49  ;;  %v5724_v40 = vsub.s32 3, %v11553_v24  ;;  %v12616_v19 = vld [vmem:[%s11488_s2] sm:$0xff] }
0x2a7c   : > { %6616 = vmatprep.subr.bf16.mxu0 %v8747_v15  ;;  %6659 = vmatprep.subr.bf16.mxu1 %v8749_v60  ;;  %v8769_v15 = vcombine.high %v5601_v26, %v5609_v42  ;;  %v5584_v60 = vld [vmem:[%s11485_s23 + $0x30] sm:$0xff]  ;;  %v5713_v47 = vrot.slane %v12616_v19, %v11564_v29  ;;  %v5721_v49 = vrot.slane %v12616_v19, %v11623_v14  ;;  %s12905_s23 = sld [smem:[#allocation57_spill]] (!%p8995_p12) }
0x2a7f   : > { %6617 = vmatpush1.bf16.msra.mxu0 %v8746_v54  ;;  %6660 = vmatpush1.bf16.msra.mxu1 %v8748_v59  ;;  %v8768_v54 = vcombine.low %v5601_v26, %v5609_v42  ;;  %v8751_v59 = vcombine.high %v5584_v60, %v5592_v43 }
0x2a80   : > { %6688 = vmatprep.subr.bf16.mxu0 %v8863_v35  ;;  %6731 = vmatprep.subr.bf16.mxu1 %v8865_v5  ;;  %v8753_v35 = vcombine.high %v5585_v55, %v5593_v7  ;;  %v8750_v5 = vcombine.low %v5584_v60, %v5592_v43 }
0x2a82   : > { %6635 = vmatmul.mubr.bf16.vlgmr.msra.gmra.mxu0 %v12476_v58  ;;  %6678 = vmatmul.mubr.bf16.vlgmr.msra.gmra.mxu1 %v12476_v58 }
0x2a83   : > { %6689 = vmatpush1.bf16.msra.mxu0 %v8862_v51  ;;  %6732 = vmatpush1.bf16.msra.mxu1 %v8864_v62  ;;  %v10102_v51 = vld [vmem:[%s11494_s28 + $0xb8] sm:$0xff]   ;;  %v10103_v62 = vld [vmem:[%s11494_s28 + $0x70] sm:$0xff]  }
0x2a84   : > { %6690 = vmatprep.subr.bf16.mxu0 %v8847_v1  ;;  %6733 = vmatprep.subr.bf16.mxu1 %v8849_v34  ;;  %v10104_v1 = vld [vmem:[%s11494_s28 + $0xf0] sm:$0xff]  }
0x2a85   : > { %6720 = vmatprep.mubr.bf16.mxu0 %v10848_v4  ;;  %6763 = vmatprep.mubr.bf16.mxu1 %v10848_v4  ;;  %v8816_v4 = vcombine.low %v5649_v9, %v5657_v8  ;;  %v10105_v34 = vld [vmem:[%s11494_s28 + $0x30] sm:$0xff]   ;;  %v10117_v9 = vld [vmem:[%s11494_s28 + $0x18] sm:$0xff]  }
0x2a86   : > { %v10118_v8 = vld [vmem:[%s11494_s28 + $0x98] sm:$0xff]  }
0x2a87   : > { %6691 = vmatpush1.bf16.msra.mxu0 %v8846_v50  ;;  %6734 = vmatpush1.bf16.msra.mxu1 %v8848_v13  ;;  %v10110_v50 = vld [vmem:[%s11494_s28 + $0xa8] sm:$0xff]   ;;  %v10112_v13 = vld [vmem:[%s11494_s28 + $0xe0] sm:$0xff]  }
0x2a88   : > { %6692 = vmatprep.subr.bf16.mxu0 %v8831_v48  ;;  %6735 = vmatprep.subr.bf16.mxu1 %v8833_v53  ;;  %v10113_v48 = vld [vmem:[%s11494_s28 + $0x20] sm:$0xff]  }
0x2a89   : > { %v10114_v53 = vld [vmem:[%s11494_s28 + $0xa0] sm:$0xff]  }
0x2a8b   : > { %6693 = vmatpush1.bf16.msra.mxu0 %v8830_v10  ;;  %6736 = vmatpush1.bf16.msra.mxu1 %v8832_v11  ;;  %v10119_v10 = vld [vmem:[%s11494_s28 + $0x50] sm:$0xff]  }
0x2a8c   : > { %6694 = vmatprep.subr.bf16.mxu0 %v8815_v23  ;;  %6737 = vmatprep.subr.bf16.mxu1 %v8817_v22  ;;  %v10120_v11 = vld [vmem:[%s11494_s28 + $0xd0] sm:$0xff]  }
0x2a8d   : > { %v10121_v23 = vld [vmem:[%s11494_s28 + $0x10] sm:$0xff]  }
0x2a8e   : > { %v10122_v22 = vld [vmem:[%s11494_s28 + $0x90] sm:$0xff]  }
0x2a8f   : > { %6695 = vmatpush1.bf16.msra.mxu0 %v8814_v16  ;;  %6738 = vmatpush1.bf16.msra.mxu1 %v8816_v4  ;;  %v10127_v16 = vld [vmem:[%s11494_s28 + $0x40] sm:$0xff]  }
0x2a90   : > { %6696 = vmatprep.subr.bf16.mxu0 %v8799_v20  ;;  %6739 = vmatprep.subr.bf16.mxu1 %v8801_v28  ;;  %v10128_v4 = vld [vmem:[%s11494_s28 + $0xc0] sm:$0xff]  }
0x2a91   : > { %v10129_v20 = vld [vmem:[%s11494_s28] sm:$0xff]  }
0x2a92   : > { %v10130_v28 = vld [vmem:[%s11494_s28 + $0x80] sm:$0xff]  }
0x2a93   : > { %6697 = vmatpush1.bf16.msra.mxu0 %v8798_v41  ;;  %6740 = vmatpush1.bf16.msra.mxu1 %v8800_v36 }
0x2a94   : > { %6698 = vmatprep.subr.bf16.mxu0 %v8783_v3  ;;  %6741 = vmatprep.subr.bf16.mxu1 %v8785_v31  ;;  %v5717_v3 = vrot.slane %v12616_v19, %v11556_v25  ;;  %v5725_v31 = vrot.slane %v12616_v19, %v5724_v40 }
0x2a97   : > { %6699 = vmatpush1.bf16.msra.mxu0 %v8782_v21  ;;  %6742 = vmatpush1.bf16.msra.mxu1 %v8784_v38 }
0x2a98   : > { %6700 = vmatprep.subr.bf16.mxu0 %v8767_v44  ;;  %6743 = vmatprep.subr.bf16.mxu1 %v8769_v15 }
0x2a9b   : > { %6701 = vmatpush1.bf16.msra.mxu0 %v8766_v57  ;;  %6744 = vmatpush1.bf16.msra.mxu1 %v8768_v54 }
0x2a9c   : > { %6702 = vmatprep.subr.bf16.mxu0 %v8751_v59  ;;  %6745 = vmatprep.subr.bf16.mxu1 %v8753_v35 }
0x2a9f   : > { %6703 = vmatpush1.bf16.msra.mxu0 %v8750_v5  ;;  %6746 = vmatpush1.bf16.msra.mxu1 %v8752_v27 }
0x2aa0   : > { %9175 = vmatprep.subr.bf16.mxu0 %v10099_v32  ;;  %9197 = vmatprep.subr.bf16.mxu1 %v10100_v33 }
0x2aa2   : > { %6721 = vmatmul.mubr.bf16.vlgmr.msra.gmra.mxu0 %v12476_v58  ;;  %6764 = vmatmul.mubr.bf16.vlgmr.msra.gmra.mxu1 %v12476_v58  ;;  %v10111_v58 = vld [vmem:[%s11494_s28 + $0x60] sm:$0xff]  }
0x2aa3   : > { %9176 = vmatpush3.bf16.msra.mxu0 %v10101_v37  ;;  %9198 = vmatpush3.bf16.msra.mxu1 %v10102_v51 }
0x2aa4   : > { %9177 = vmatprep.subr.bf16.mxu0 %v10103_v62  ;;  %9199 = vmatprep.subr.bf16.mxu1 %v10104_v1 }
0x2aa7   : > { %9178 = vmatpush3.bf16.msra.mxu0 %v10105_v34  ;;  %9200 = vmatpush3.bf16.msra.mxu1 %v10106_v39 }
0x2aa8   : > { %9179 = vmatprep.subr.bf16.mxu0 %v10107_v45  ;;  %9201 = vmatprep.subr.bf16.mxu1 %v10108_v6  ;;  %v10133_v45 = vld [vmem:[%s11494_s28 + $0x138] sm:$0xff]  }
0x2aa9   : > { %v10134_v6 = vld [vmem:[%s11494_s28 + $0x1b8] sm:$0xff]  }
0x2aab   : > { %9180 = vmatpush3.bf16.msra.mxu0 %v10109_v52  ;;  %9202 = vmatpush3.bf16.msra.mxu1 %v10110_v50 }
0x2aac   : > { %9181 = vmatprep.subr.bf16.mxu0 %v10111_v58  ;;  %9203 = vmatprep.subr.bf16.mxu1 %v10112_v13  ;;  %v10135_v58 = vld [vmem:[%s11494_s28 + $0x170] sm:$0xff]  }
0x2aad   : > { %v10136_v13 = vld [vmem:[%s11494_s28 + $0x1f0] sm:$0xff]  }
0x2aaf   : > { %9182 = vmatpush3.bf16.msra.mxu0 %v10113_v48  ;;  %9204 = vmatpush3.bf16.msra.mxu1 %v10114_v53  ;;  %v10137_v48 = vld [vmem:[%s11494_s28 + $0x130] sm:$0xff]  }
0x2ab0   : > { %9183 = vmatprep.subr.bf16.mxu0 %v10115_v46  ;;  %9205 = vmatprep.subr.bf16.mxu1 %v10116_v2  ;;  %v10138_v53 = vld [vmem:[%s11494_s28 + $0x1b0] sm:$0xff]   ;;  %v10139_v46 = vld [vmem:[%s11494_s28 + $0x168] sm:$0xff]  }
0x2ab1   : > { %v10140_v2 = vld [vmem:[%s11494_s28 + $0x1e8] sm:$0xff]  }
0x2ab3   : > { %9184 = vmatpush3.bf16.msra.mxu0 %v10117_v9  ;;  %9206 = vmatpush3.bf16.msra.mxu1 %v10118_v8  ;;  %v10141_v9 = vld [vmem:[%s11494_s28 + $0x128] sm:$0xff]  }
0x2ab4   : > { %9185 = vmatprep.subr.bf16.mxu0 %v10119_v10  ;;  %9207 = vmatprep.subr.bf16.mxu1 %v10120_v11  ;;  %v10142_v8 = vld [vmem:[%s11494_s28 + $0x1a8] sm:$0xff]   ;;  %v10143_v10 = vld [vmem:[%s11494_s28 + $0x160] sm:$0xff]  }
0x2ab5   : > { %v10144_v11 = vld [vmem:[%s11494_s28 + $0x1e0] sm:$0xff]  }
0x2ab7   : > { %9186 = vmatpush3.bf16.msra.mxu0 %v10121_v23  ;;  %9208 = vmatpush3.bf16.msra.mxu1 %v10122_v22  ;;  %v10145_v23 = vld [vmem:[%s11494_s28 + $0x120] sm:$0xff]  }
0x2ab8   : > { %9187 = vmatprep.subr.bf16.mxu0 %v10123_v12  ;;  %9209 = vmatprep.subr.bf16.mxu1 %v10124_v56  ;;  %v10146_v22 = vld [vmem:[%s11494_s28 + $0x1a0] sm:$0xff]   ;;  %v10147_v12 = vld [vmem:[%s11494_s28 + $0x158] sm:$0xff]  }
0x2ab9   : > { %v10148_v56 = vld [vmem:[%s11494_s28 + $0x1d8] sm:$0xff]  }
0x2abb   : > { %9188 = vmatpush3.bf16.msra.mxu0 %v10125_v61  ;;  %9210 = vmatpush3.bf16.msra.mxu1 %v10126_v63  ;;  %v10149_v61 = vld [vmem:[%s11494_s28 + $0x118] sm:$0xff]  }
0x2abc   : > { %9189 = vmatprep.subr.bf16.mxu0 %v10127_v16  ;;  %9211 = vmatprep.subr.bf16.mxu1 %v10128_v4  ;;  %v10150_v63 = vld [vmem:[%s11494_s28 + $0x198] sm:$0xff]   ;;  %v10151_v16 = vld [vmem:[%s11494_s28 + $0x150] sm:$0xff]  }
0x2abd   : > { %v10152_v4 = vld [vmem:[%s11494_s28 + $0x1d0] sm:$0xff]  }
0x2abf   : > { %9190 = vmatpush3.bf16.msra.mxu0 %v10129_v20  ;;  %9212 = vmatpush3.bf16.msra.mxu1 %v10130_v28  ;;  %v5732_v20 = vsub.s32 5, %v11553_v24  ;;  %v5740_v28 = vsub.s32 7, %v11553_v24 }
0x2ac0   : > { %9219 = vmatprep.subr.bf16.mxu0 %v10131_v17  ;;  %9241 = vmatprep.subr.bf16.mxu1 %v10132_v18  ;;  %v5728_v17 = vsub.s32 4, %v11553_v24  ;;  %v5736_v18 = vsub.s32 6, %v11553_v24 }
0x2b02   : > { %v6464_v41 = vpop.f32.mrf.mxu0  ;;  %v6507_v36 = vpop.f32.mrf.mxu1 }
0x2b03   : > { %v6465_v55 = vadd.f32 %v6464_v41, %v5713_v47  ;;  %v6508_v7 = vadd.f32 %v6507_v36, %v5721_v49  ;;  %v10153_v41 = vld [vmem:[%s11494_s28 + $0x110] sm:$0xff]  }
0x2b04   : > { %v6466_v26 = vpop.f32.mrf.mxu0  ;;  %v6509_v42 = vpop.f32.mrf.mxu1  ;;  %v10154_v36 = vld [vmem:[%s11494_s28 + $0x190] sm:$0xff]  }
0x2b05   : > { %v6467_v44 = vadd.f32 %v6466_v26, %v5717_v3  ;;  %v6510_v15 = vadd.f32 %v6509_v42, %v5725_v31  ;;  %v6774_v62 = vmax.f32 %v6465_v55, 0.0  ;;  %v6776_v1 = vmax.f32 %v6508_v7, 0.0 }
0x2b06   : > { %v6468_v21 = vpop.f32.mrf.mxu0  ;;  %v6511_v38 = vpop.f32.mrf.mxu1  ;;  %v5733_v26 = vrot.slane %v12616_v19, %v5732_v20  ;;  %v5741_v42 = vrot.slane %v12616_v19, %v5740_v28 }
0x2b07   : > { %v6469_v60 = vadd.f32 %v6468_v21, %v5713_v47  ;;  %v6512_v43 = vadd.f32 %v6511_v38, %v5721_v49  ;;  %v6775_v32 = vmax.f32 %v6467_v44, 0.0  ;;  %v6777_v33 = vmax.f32 %v6510_v15, 0.0  ;;  %v10155_v47 = vld [vmem:[%s11494_s28 + $0x148] sm:$0xff]  }
0x2b08   : > { %v6470_v57 = vpop.f32.mrf.mxu0  ;;  %v6513_v54 = vpop.f32.mrf.mxu1  ;;  %v10156_v49 = vld [vmem:[%s11494_s28 + $0x1c8] sm:$0xff]   ;;  %v5729_v21 = vrot.slane %v12616_v19, %v5728_v17  ;;  %v5737_v38 = vrot.slane %v12616_v19, %v5736_v18 }
0x2b09   : > { %v6471_v59 = vadd.f32 %v6470_v57, %v5717_v3  ;;  %v6514_v35 = vadd.f32 %v6513_v54, %v5725_v31  ;;  %v6790_v5 = vmax.f32 %v6469_v60, 0.0  ;;  %v6792_v27 = vmax.f32 %v6512_v43, 0.0  ;;  %v10157_v60 = vld [vmem:[%s11494_s28 + $0x108] sm:$0xff]   ;;  %v10159_v57 = vld [vmem:[%s11494_s28 + $0x140] sm:$0xff]  }
0x2b0a   : > { %v10158_v43 = vld [vmem:[%s11494_s28 + $0x188] sm:$0xff]   ;;  %v10160_v54 = vld [vmem:[%s11494_s28 + $0x1c0] sm:$0xff]  }
0x2b0b   : > { %v6791_v37 = vmax.f32 %v6471_v59, 0.0  ;;  %v6793_v51 = vmax.f32 %v6514_v35, 0.0  ;;  %v6806_v52 = vpack.c.bf16 %v6790_v5, %v6774_v62  ;;  %v6808_v50 = vpack.c.bf16 %v6792_v27, %v6776_v1  ;;  %v10161_v1 = vld [vmem:[%s11494_s28 + $0x100] sm:$0xff]  }
0x2b0d   : > { %v6807_v34 = vpack.c.bf16 %v6791_v37, %v6775_v32  ;;  %v6809_v39 = vpack.c.bf16 %v6793_v51, %v6777_v33 }
0x2b0f   : > { %7885 = vmatprep.mubr.bf16.mxu0 %v6807_v34  ;;  %7926 = vmatprep.mubr.bf16.mxu1 %v6809_v39  ;;  %v10162_v34 = vld [vmem:[%s11494_s28 + $0x180] sm:$0xff]  }
0x2b10   : > { %7886 = vmatmul.mubr.bf16.vlgmr.msra.gmra.mxu0 %v6806_v52  ;;  %7927 = vmatmul.mubr.bf16.vlgmr.msra.gmra.mxu1 %v6808_v50  ;;  %v10164_v52 = vld [vmem:[%s11494_s28 + $0x2f8] sm:$0xff]  }
0x2b11   : > { %9220 = vmatpush3.bf16.msra.mxu0 %v10133_v45  ;;  %9242 = vmatpush3.bf16.msra.mxu1 %v10134_v6  ;;  %v10163_v6 = vld [vmem:[%s11494_s28 + $0x278] sm:$0xff]  }
0x2b12   : > { %9221 = vmatprep.subr.bf16.mxu0 %v10135_v58  ;;  %9243 = vmatprep.subr.bf16.mxu1 %v10136_v13 }
0x2b15   : > { %9222 = vmatpush3.bf16.msra.mxu0 %v10137_v48  ;;  %9244 = vmatpush3.bf16.msra.mxu1 %v10138_v53 }
0x2b16   : > { %9223 = vmatprep.subr.bf16.mxu0 %v10139_v46  ;;  %9245 = vmatprep.subr.bf16.mxu1 %v10140_v2 }
0x2b19   : > { %9224 = vmatpush3.bf16.msra.mxu0 %v10141_v9  ;;  %9246 = vmatpush3.bf16.msra.mxu1 %v10142_v8  ;;  %v10165_v8 = vld [vmem:[%s11494_s28 + $0x238] sm:$0xff]  }
0x2b1a   : > { %9225 = vmatprep.subr.bf16.mxu0 %v10143_v10  ;;  %9247 = vmatprep.subr.bf16.mxu1 %v10144_v11  ;;  %v10166_v10 = vld [vmem:[%s11494_s28 + $0x2b8] sm:$0xff]  }
0x2b1d   : > { %9226 = vmatpush3.bf16.msra.mxu0 %v10145_v23  ;;  %9248 = vmatpush3.bf16.msra.mxu1 %v10146_v22  ;;  %v10167_v22 = vld [vmem:[%s11494_s28 + $0x270] sm:$0xff]  }
0x2b1e   : > { %9227 = vmatprep.subr.bf16.mxu0 %v10147_v12  ;;  %9249 = vmatprep.subr.bf16.mxu1 %v10148_v56  ;;  %v10168_v12 = vld [vmem:[%s11494_s28 + $0x2f0] sm:$0xff]  }
0x2b1f   : > { %v10169_v56 = vld [vmem:[%s11494_s28 + $0x230] sm:$0xff]  }
0x2b21   : > { %9228 = vmatpush3.bf16.msra.mxu0 %v10149_v61  ;;  %9250 = vmatpush3.bf16.msra.mxu1 %v10150_v63  ;;  %v10170_v61 = vld [vmem:[%s11494_s28 + $0x2b0] sm:$0xff]   ;;  %v10171_v63 = vld [vmem:[%s11494_s28 + $0x268] sm:$0xff]  }
0x2b22   : > { %v6550_v3 = vpop.f32.mrf.mxu0  ;;  %v6593_v31 = vpop.f32.mrf.mxu1  ;;  %9229 = vmatprep.subr.bf16.mxu0 %v10151_v16  ;;  %9251 = vmatprep.subr.bf16.mxu1 %v10152_v4  ;;  %v10172_v16 = vld [vmem:[%s11494_s28 + $0x2e8] sm:$0xff]  }
0x2b23   : > { %v6551_v19 = vadd.f32 %v6550_v3, %v5729_v21  ;;  %v6594_v32 = vadd.f32 %v6593_v31, %v5737_v38  ;;  %v10173_v4 = vld [vmem:[%s11494_s28 + $0x228] sm:$0xff]   ;;  %v10176_v3 = vld [vmem:[%s11494_s28 + $0x2e0] sm:$0xff]  }
0x2b24   : > { %v6552_v44 = vpop.f32.mrf.mxu0  ;;  %v6595_v15 = vpop.f32.mrf.mxu1  ;;  %v10177_v31 = vld [vmem:[%s11494_s28 + $0x220] sm:$0xff]  }
0x2b25   : > { %9230 = vmatpush3.bf16.msra.mxu0 %v10153_v41  ;;  %9252 = vmatpush3.bf16.msra.mxu1 %v10154_v36  ;;  %v6553_v59 = vadd.f32 %v6552_v44, %v5733_v26  ;;  %v6596_v35 = vadd.f32 %v6595_v15, %v5741_v42  ;;  %v6778_v53 = vmax.f32 %v6551_v19, 0.0  ;;  %v6780_v46 = vmax.f32 %v6594_v32, 0.0  ;;  %v10174_v41 = vld [vmem:[%s11494_s28 + $0x2a8] sm:$0xff]   ;;  %v10175_v36 = vld [vmem:[%s11494_s28 + $0x260] sm:$0xff]   ;;  %v10184_v44 = vld [vmem:[%s11494_s28 + $0x2d0] sm:$0xff]  }
0x2b26   : > { %v6554_v55 = vpop.f32.mrf.mxu0  ;;  %v6597_v7 = vpop.f32.mrf.mxu1  ;;  %9231 = vmatprep.subr.bf16.mxu0 %v10155_v47  ;;  %9253 = vmatprep.subr.bf16.mxu1 %v10156_v49  ;;  %v10178_v47 = vld [vmem:[%s11494_s28 + $0x2a0] sm:$0xff]   ;;  %v10179_v49 = vld [vmem:[%s11494_s28 + $0x258] sm:$0xff]  }
0x2b27   : > { %v6555_v5 = vadd.f32 %v6554_v55, %v5729_v21  ;;  %v6598_v27 = vadd.f32 %v6597_v7, %v5737_v38  ;;  %v6779_v50 = vmax.f32 %v6553_v59, 0.0  ;;  %v6781_v58 = vmax.f32 %v6596_v35, 0.0  ;;  %v10182_v21 = vld [vmem:[%s11494_s28 + $0x298] sm:$0xff]   ;;  %v10183_v38 = vld [vmem:[%s11494_s28 + $0x250] sm:$0xff]  }
0x2b28   : > { %v6556_v33 = vpop.f32.mrf.mxu0  ;;  %v6599_v37 = vpop.f32.mrf.mxu1  ;;  %v12696_v15 = vld [vmem:[%s11488_s2 + $0x8] sm:$0xff] }
0x2b29   : > { %v6557_v51 = vadd.f32 %v6556_v33, %v5733_v26  ;;  %v6600_v62 = vadd.f32 %v6599_v37, %v5741_v42  ;;  %9232 = vmatpush3.bf16.msra.mxu0 %v10157_v60  ;;  %9254 = vmatpush3.bf16.msra.mxu1 %v10158_v43  ;;  %v6794_v39 = vmax.f32 %v6555_v5, 0.0  ;;  %v6796_v45 = vmax.f32 %v6598_v27, 0.0  ;;  %v10180_v26 = vld [vmem:[%s11494_s28 + $0x2d8] sm:$0xff]   ;;  %v10185_v60 = vld [vmem:[%s11494_s28 + $0x210] sm:$0xff]   ;;  %v10189_v33 = vld [vmem:[%s11494_s28 + $0x208] sm:$0xff]  }
0x2b2a   : > { %9233 = vmatprep.subr.bf16.mxu0 %v10159_v57  ;;  %9255 = vmatprep.subr.bf16.mxu1 %v10160_v54  ;;  %v10181_v42 = vld [vmem:[%s11494_s28 + $0x218] sm:$0xff]   ;;  %v10186_v43 = vld [vmem:[%s11494_s28 + $0x290] sm:$0xff]   ;;  %v10187_v57 = vld [vmem:[%s11494_s28 + $0x248] sm:$0xff]   ;;  %v5749_v59 = vrot.slane %v12696_v15, %v11556_v25  ;;  %v5757_v35 = vrot.slane %v12696_v15, %v5724_v40  ;;  %v5745_v5 = vrot.slane %v12696_v15, %v11564_v29 }
0x2b2b   : > { %v6795_v13 = vmax.f32 %v6557_v51, 0.0  ;;  %v6797_v48 = vmax.f32 %v6600_v62, 0.0  ;;  %v6810_v11 = vpack.c.bf16 %v6794_v39, %v6778_v53  ;;  %v6812_v23 = vpack.c.bf16 %v6796_v45, %v6780_v46  ;;  %v10188_v54 = vld [vmem:[%s11494_s28 + $0x2c8] sm:$0xff]   ;;  %v10191_v25 = vld [vmem:[%s11494_s28 + $0x240] sm:$0xff]  }
0x2b2c   : > { %v5753_v27 = vrot.slane %v12696_v15, %v11623_v14  ;;  %v10190_v37 = vld [vmem:[%s11494_s28 + $0x288] sm:$0xff]   ;;  %v10192_v40 = vld [vmem:[%s11494_s28 + $0x2c0] sm:$0xff]  }
0x2b2d   : > { %v6811_v2 = vpack.c.bf16 %v6795_v13, %v6779_v50  ;;  %v6813_v9 = vpack.c.bf16 %v6797_v48, %v6781_v58  ;;  %9234 = vmatpush3.bf16.msra.mxu0 %v10161_v1  ;;  %9256 = vmatpush3.bf16.msra.mxu1 %v10162_v34  ;;  %v10193_v48 = vld [vmem:[%s11494_s28 + $0x200] sm:$0xff]  }
0x2b2e   : > { %9263 = vmatprep.subr.bf16.mxu0 %v10163_v6  ;;  %9285 = vmatprep.subr.bf16.mxu1 %v10164_v52  ;;  %v10194_v53 = vld [vmem:[%s11494_s28 + $0x280] sm:$0xff]  }
0x2b2f   : > { %7967 = vmatprep.mubr.bf16.mxu0 %v6811_v2  ;;  %8008 = vmatprep.mubr.bf16.mxu1 %v6813_v9  ;;  %v10195_v9 = vld [vmem:[%s11494_s28 + $0x378] sm:$0xff]  }
0x2b30   : > { %7968 = vmatmul.mubr.bf16.vlgmr.msra.gmra.mxu0 %v6810_v11  ;;  %8009 = vmatmul.mubr.bf16.vlgmr.msra.gmra.mxu1 %v6812_v23 }
0x2b31   : > { %9264 = vmatpush3.bf16.msra.mxu0 %v10165_v8  ;;  %9286 = vmatpush3.bf16.msra.mxu1 %v10166_v10  ;;  %v10196_v8 = vld [vmem:[%s11494_s28 + $0x3f8] sm:$0xff]  }
0x2b32   : > { %9265 = vmatprep.subr.bf16.mxu0 %v10167_v22  ;;  %9287 = vmatprep.subr.bf16.mxu1 %v10168_v12 }
0x2b35   : > { %9266 = vmatpush3.bf16.msra.mxu0 %v10169_v56  ;;  %9288 = vmatpush3.bf16.msra.mxu1 %v10170_v61 }
0x2b36   : > { %9267 = vmatprep.subr.bf16.mxu0 %v10171_v63  ;;  %9289 = vmatprep.subr.bf16.mxu1 %v10172_v16  ;;  %v10197_v16 = vld [vmem:[%s11494_s28 + $0x338] sm:$0xff]  }
0x2b39   : > { %9268 = vmatpush3.bf16.msra.mxu0 %v10173_v4  ;;  %9290 = vmatpush3.bf16.msra.mxu1 %v10174_v41  ;;  %v10198_v4 = vld [vmem:[%s11494_s28 + $0x3b8] sm:$0xff]  }
0x2b3a   : > { %9269 = vmatprep.subr.bf16.mxu0 %v10175_v36  ;;  %9291 = vmatprep.subr.bf16.mxu1 %v10176_v3  ;;  %v10199_v3 = vld [vmem:[%s11494_s28 + $0x370] sm:$0xff]  }
0x2b3d   : > { %9270 = vmatpush3.bf16.msra.mxu0 %v10177_v31  ;;  %9292 = vmatpush3.bf16.msra.mxu1 %v10178_v47  ;;  %v10200_v31 = vld [vmem:[%s11494_s28 + $0x3f0] sm:$0xff]  }
0x2b3e   : > { %9271 = vmatprep.subr.bf16.mxu0 %v10179_v49  ;;  %9293 = vmatprep.subr.bf16.mxu1 %v10180_v26  ;;  %v10201_v47 = vld [vmem:[%s11494_s28 + $0x330] sm:$0xff]   ;;  %v10203_v26 = vld [vmem:[%s11494_s28 + $0x368] sm:$0xff]  }
0x2b3f   : > { %v10202_v49 = vld [vmem:[%s11494_s28 + $0x3b0] sm:$0xff]  }
0x2b41   : > { %9272 = vmatpush3.bf16.msra.mxu0 %v10181_v42  ;;  %9294 = vmatpush3.bf16.msra.mxu1 %v10182_v21  ;;  %v10204_v42 = vld [vmem:[%s11494_s28 + $0x3e8] sm:$0xff]  }
0x2b42   : > { %v6636_v55 = vpop.f32.mrf.mxu0  ;;  %v6679_v7 = vpop.f32.mrf.mxu1  ;;  %9273 = vmatprep.subr.bf16.mxu0 %v10183_v38  ;;  %9295 = vmatprep.subr.bf16.mxu1 %v10184_v44  ;;  %v10205_v21 = vld [vmem:[%s11494_s28 + $0x328] sm:$0xff]   ;;  %v10207_v44 = vld [vmem:[%s11494_s28 + $0x360] sm:$0xff]  }
0x2b43   : > { %v6637_v45 = vadd.f32 %v6636_v55, %v5745_v5  ;;  %v6680_v6 = vadd.f32 %v6679_v7, %v5753_v27  ;;  %v10206_v38 = vld [vmem:[%s11494_s28 + $0x3a8] sm:$0xff]   ;;  %v10210_v55 = vld [vmem:[%s11494_s28 + $0x3a0] sm:$0xff]   ;;  %v10211_v7 = vld [vmem:[%s11494_s28 + $0x358] sm:$0xff]  }
0x2b44   : > { %v6638_v19 = vpop.f32.mrf.mxu0  ;;  %v6681_v32 = vpop.f32.mrf.mxu1 }
0x2b45   : > { %9274 = vmatpush3.bf16.msra.mxu0 %v10185_v60  ;;  %9296 = vmatpush3.bf16.msra.mxu1 %v10186_v43  ;;  %v6639_v1 = vadd.f32 %v6638_v19, %v5749_v59  ;;  %v6682_v34 = vadd.f32 %v6681_v32, %v5757_v35  ;;  %v6782_v12 = vmax.f32 %v6637_v45, 0.0  ;;  %v6784_v56 = vmax.f32 %v6680_v6, 0.0  ;;  %v10208_v60 = vld [vmem:[%s11494_s28 + $0x3e0] sm:$0xff]   ;;  %v10218_v19 = vld [vmem:[%s11494_s28 + $0x390] sm:$0xff]   ;;  %v10222_v45 = vld [vmem:[%s11494_s28 + $0x388] sm:$0xff]  }
0x2b46   : > { %v6640_v51 = vpop.f32.mrf.mxu0  ;;  %v6683_v62 = vpop.f32.mrf.mxu1  ;;  %9275 = vmatprep.subr.bf16.mxu0 %v10187_v57  ;;  %9297 = vmatprep.subr.bf16.mxu1 %v10188_v54  ;;  %v10209_v43 = vld [vmem:[%s11494_s28 + $0x320] sm:$0xff]   ;;  %v10212_v57 = vld [vmem:[%s11494_s28 + $0x3d8] sm:$0xff]  }
0x2b47   : > { %v6641_v29 = vadd.f32 %v6640_v51, %v5745_v5  ;;  %v6684_v39 = vadd.f32 %v6683_v62, %v5753_v27  ;;  %v6783_v10 = vmax.f32 %v6639_v1, 0.0  ;;  %v6785_v11 = vmax.f32 %v6682_v34, 0.0  ;;  %v10213_v54 = vld [vmem:[%s11494_s28 + $0x318] sm:$0xff]   ;;  %v10216_v5 = vld [vmem:[%s11494_s28 + $0x3d0] sm:$0xff]   ;;  %v10220_v51 = vld [vmem:[%s11494_s28 + $0x3c8] sm:$0xff]  }
0x2b48   : > { %v6642_v52 = vpop.f32.mrf.mxu0  ;;  %v6685_v50 = vpop.f32.mrf.mxu1  ;;  %v10217_v27 = vld [vmem:[%s11494_s28 + $0x310] sm:$0xff]   ;;  %v5765_v62 = vrot.slane %v12696_v15, %v5732_v20  ;;  %v5769_v1 = vrot.slane %v12696_v15, %v5736_v18 }
0x2b49   : > { %v6643_v58 = vadd.f32 %v6642_v52, %v5749_v59  ;;  %v6686_v13 = vadd.f32 %v6685_v50, %v5757_v35  ;;  %9276 = vmatpush3.bf16.msra.mxu0 %v10189_v33  ;;  %9298 = vmatpush3.bf16.msra.mxu1 %v10190_v37  ;;  %v6798_v46 = vmax.f32 %v6641_v29, 0.0  ;;  %v6800_v2 = vmax.f32 %v6684_v39, 0.0  ;;  %v10214_v59 = vld [vmem:[%s11494_s28 + $0x398] sm:$0xff]   ;;  %v10215_v35 = vld [vmem:[%s11494_s28 + $0x350] sm:$0xff]   ;;  %v10219_v37 = vld [vmem:[%s11494_s28 + $0x348] sm:$0xff]  }
0x2b4a   : > { %9277 = vmatprep.subr.bf16.mxu0 %v10191_v25  ;;  %9299 = vmatprep.subr.bf16.mxu1 %v10192_v40  ;;  %v5773_v25 = vrot.slane %v12696_v15, %v5740_v28  ;;  %v5761_v40 = vrot.slane %v12696_v15, %v5728_v17  ;;  %v10221_v39 = vld [vmem:[%s11494_s28 + $0x308] sm:$0xff]   ;;  %v10223_v28 = vld [vmem:[%s11494_s28 + $0x340] sm:$0xff]  }
0x2b4b   : > { %v6799_v23 = vmax.f32 %v6643_v58, 0.0  ;;  %v6801_v22 = vmax.f32 %v6686_v13, 0.0  ;;  %v6814_v41 = vpack.c.bf16 %v6798_v46, %v6782_v12  ;;  %v6816_v36 = vpack.c.bf16 %v6800_v2, %v6784_v56  ;;  %v10224_v52 = vld [vmem:[%s11494_s28 + $0x3c0] sm:$0xff]  }
0x2b4c   : > { %v10225_v2 = vld [vmem:[%s11494_s28 + $0x300] sm:$0xff]  }
0x2b4d   : > { %v6815_v61 = vpack.c.bf16 %v6799_v23, %v6783_v10  ;;  %v6817_v63 = vpack.c.bf16 %v6801_v22, %v6785_v11  ;;  %9278 = vmatpush3.bf16.msra.mxu0 %v10193_v48  ;;  %9300 = vmatpush3.bf16.msra.mxu1 %v10194_v53 }
0x2b4e   : > { %9307 = vmatprep.subr.bf16.mxu0 %v10195_v9  ;;  %9329 = vmatprep.subr.bf16.mxu1 %v10196_v8  ;;  %v10226_v9 = vld [vmem:[%s11494_s28 + $0x380] sm:$0xff]  }
0x2b4f   : > { %8049 = vmatprep.mubr.bf16.mxu0 %v6815_v61  ;;  %8090 = vmatprep.mubr.bf16.mxu1 %v6817_v63 }
0x2b50   : > { %8050 = vmatmul.mubr.bf16.vlgmr.msra.gmra.mxu0 %v6814_v41  ;;  %8091 = vmatmul.mubr.bf16.vlgmr.msra.gmra.mxu1 %v6816_v36 }
0x2b51   : > { %9308 = vmatpush3.bf16.msra.mxu0 %v10197_v16  ;;  %9330 = vmatpush3.bf16.msra.mxu1 %v10198_v4 }
0x2b52   : > { %9309 = vmatprep.subr.bf16.mxu0 %v10199_v3  ;;  %9331 = vmatprep.subr.bf16.mxu1 %v10200_v31 }
0x2b55   : > { %9310 = vmatpush3.bf16.msra.mxu0 %v10201_v47  ;;  %9332 = vmatpush3.bf16.msra.mxu1 %v10202_v49 }
0x2b56   : > { %9311 = vmatprep.subr.bf16.mxu0 %v10203_v26  ;;  %9333 = vmatprep.subr.bf16.mxu1 %v10204_v42 }
0x2b59   : > { %9312 = vmatpush3.bf16.msra.mxu0 %v10205_v21  ;;  %9334 = vmatpush3.bf16.msra.mxu1 %v10206_v38 }
0x2b5a   : > { %9313 = vmatprep.subr.bf16.mxu0 %v10207_v44  ;;  %9335 = vmatprep.subr.bf16.mxu1 %v10208_v60 }
0x2b5d   : > { %9314 = vmatpush3.bf16.msra.mxu0 %v10209_v43  ;;  %9336 = vmatpush3.bf16.msra.mxu1 %v10210_v55 }
0x2b5e   : > { %9315 = vmatprep.subr.bf16.mxu0 %v10211_v7  ;;  %9337 = vmatprep.subr.bf16.mxu1 %v10212_v57 }
0x2b61   : > { %9316 = vmatpush3.bf16.msra.mxu0 %v10213_v54  ;;  %9338 = vmatpush3.bf16.msra.mxu1 %v10214_v59  ;;  %v8866_v59 = vld [vmem:[%s12903_s25] ss:$0 sm:$0xff] }
0x2b62   : > { %v6722_v32 = vpop.f32.mrf.mxu0  ;;  %v6765_v33 = vpop.f32.mrf.mxu1  ;;  %9317 = vmatprep.subr.bf16.mxu0 %v10215_v35  ;;  %9339 = vmatprep.subr.bf16.mxu1 %v10216_v5 }
0x2b63   : > { %v6723_v13 = vadd.f32 %v6722_v32, %v5761_v40  ;;  %v6766_v18 = vadd.f32 %v6765_v33, %v5769_v1 }
0x2b64   : > { %v6724_v34 = vpop.f32.mrf.mxu0  ;;  %v6767_v29 = vpop.f32.mrf.mxu1 }
0x2b65   : > { %9318 = vmatpush3.bf16.msra.mxu0 %v10217_v27  ;;  %9340 = vmatpush3.bf16.msra.mxu1 %v10218_v19  ;;  %v6725_v50 = vadd.f32 %v6724_v34, %v5765_v62  ;;  %v6768_v17 = vadd.f32 %v6767_v29, %v5773_v25  ;;  %v6786_v56 = vmax.f32 %v6723_v13, 0.0  ;;  %v6788_v61 = vmax.f32 %v6766_v18, 0.0 }
0x2b66   : > { %v6726_v6 = vpop.f32.mrf.mxu0  ;;  %v6769_v20 = vpop.f32.mrf.mxu1  ;;  %9319 = vmatprep.subr.bf16.mxu0 %v10219_v37  ;;  %9341 = vmatprep.subr.bf16.mxu1 %v10220_v51 }
0x2b67   : > { %v6727_v58 = vadd.f32 %v6726_v6, %v5761_v40  ;;  %v6770_v24 = vadd.f32 %v6769_v20, %v5769_v1  ;;  %v6787_v11 = vmax.f32 %v6725_v50, 0.0  ;;  %v6789_v23 = vmax.f32 %v6768_v17, 0.0 }
0x2b68   : > { %v6728_v15 = vpop.f32.mrf.mxu0  ;;  %v6771_v48 = vpop.f32.mrf.mxu1 }
0x2b69   : > { %v6729_v53 = vadd.f32 %v6728_v15, %v5765_v62  ;;  %v6772_v46 = vadd.f32 %v6771_v48, %v5773_v25  ;;  %9320 = vmatpush3.bf16.msra.mxu0 %v10221_v39  ;;  %9342 = vmatpush3.bf16.msra.mxu1 %v10222_v45  ;;  %v6802_v8 = vmax.f32 %v6727_v58, 0.0  ;;  %v6804_v10 = vmax.f32 %v6770_v24, 0.0 }
0x2b6a   : > { %9321 = vmatprep.subr.bf16.mxu0 %v10223_v28  ;;  %9343 = vmatprep.subr.bf16.mxu1 %v10224_v52 }
0x2b6b   : > { %v6803_v22 = vmax.f32 %v6729_v53, 0.0  ;;  %v6805_v12 = vmax.f32 %v6772_v46, 0.0  ;;  %v6818_v4 = vpack.c.bf16 %v6802_v8, %v6786_v56  ;;  %v6820_v41 = vpack.c.bf16 %v6804_v10, %v6788_v61 }
0x2b6d   : > { %v6819_v63 = vpack.c.bf16 %v6803_v22, %v6787_v11  ;;  %v6821_v16 = vpack.c.bf16 %v6805_v12, %v6789_v23  ;;  %9322 = vmatpush3.bf16.msra.mxu0 %v10225_v2  ;;  %9344 = vmatpush3.bf16.msra.mxu1 %v10226_v9 }
0x2b6f   : > { %8131 = vmatprep.mubr.bf16.mxu0 %v6819_v63  ;;  %8172 = vmatprep.mubr.bf16.mxu1 %v6821_v16 }
0x2b70   : > { %8132 = vmatmul.mubr.bf16.vlgmr.msra.gmra.mxu0 %v6818_v4  ;;  %8173 = vmatmul.mubr.bf16.vlgmr.msra.gmra.mxu1 %v6820_v41 }
0x2bd0   : > { %v9191_v36 = vpop.f32.mrf.mxu0  ;;  %v9213_v3 = vpop.f32.mrf.mxu1 }
0x2bd2   : > { %v9192_v31 = vpop.f32.mrf.mxu0  ;;  %v9214_v47 = vpop.f32.mrf.mxu1 }
0x2bd3   : > { %v9193_v54 = vadd.f32 %v9192_v31, %v9191_v36  ;;  %v9215_v37 = vadd.f32 %v9214_v47, %v9213_v3 }
0x2bd4   : > { %v9194_v49 = vpop.f32.mrf.mxu0  ;;  %v9216_v26 = vpop.f32.mrf.mxu1 }
0x2bd5   : > { %v7888_v19 = vadd.f32 %v9193_v54, %v8866_v59 }
0x2bd6   : > { %v9195_v42 = vpop.f32.mrf.mxu0  ;;  %v9217_v21 = vpop.f32.mrf.mxu1 }
0x2bd7   : > { %v9196_v32 = vadd.f32 %v9195_v42, %v9194_v49  ;;  %v7929_v25 = vadd.f32 %v9215_v37, %v7888_v19  ;;  %v9218_v34 = vadd.f32 %v9217_v21, %v9216_v26 }
0x2bd9   : > { %v7891_v40 = vadd.f32 %v9196_v32, %v8866_v59  ;;  %v10372_v32 = vld [vmem:[%s11517_s12] sm:$0x7] }
0x2bdb   : > { %v7932_v6 = vadd.f32 %v9218_v34, %v7891_v40 }
0x2bf0   : > { %v9235_v38 = vpop.f32.mrf.mxu0  ;;  %v9257_v44 = vpop.f32.mrf.mxu1 }
0x2bf2   : > { %v9236_v60 = vpop.f32.mrf.mxu0  ;;  %v9258_v43 = vpop.f32.mrf.mxu1 }
0x2bf3   : > { %v9237_v51 = vadd.f32 %v9236_v60, %v9235_v38  ;;  %v9259_v20 = vadd.f32 %v9258_v43, %v9257_v44 }
0x2bf4   : > { %v9238_v55 = vpop.f32.mrf.mxu0  ;;  %v9260_v7 = vpop.f32.mrf.mxu1 }
0x2bf5   : > { %v7970_v29 = vadd.f32 %v9237_v51, %v7929_v25 }
0x2bf6   : > { %v9239_v57 = vpop.f32.mrf.mxu0  ;;  %v9261_v35 = vpop.f32.mrf.mxu1 }
0x2bf7   : > { %v9240_v39 = vadd.f32 %v9239_v57, %v9238_v55  ;;  %v8011_v50 = vadd.f32 %v9259_v20, %v7970_v29  ;;  %v9262_v24 = vadd.f32 %v9261_v35, %v9260_v7 }
0x2bf9   : > { %v7973_v17 = vadd.f32 %v9240_v39, %v7932_v6 }
0x2bfb   : > { %v8014_v53 = vadd.f32 %v9262_v24, %v7973_v17 }
0x2c10   : > { %v9279_v5 = vpop.f32.mrf.mxu0  ;;  %v9301_v27 = vpop.f32.mrf.mxu1 }
0x2c12   : > { %v9280_v33 = vpop.f32.mrf.mxu0  ;;  %v9302_v62 = vpop.f32.mrf.mxu1 }
0x2c13   : > { %v9281_v28 = vadd.f32 %v9280_v33, %v9279_v5  ;;  %v9303_v46 = vadd.f32 %v9302_v62, %v9301_v27  ;;  %v10371_v5 = vld [vmem:[%s11512_s21] sm:$0x7]  ;;  %v8214_v33 = vrot.slane %v10372_v32, %v11623_v14 }
0x2c14   : > { %v9282_v1 = vpop.f32.mrf.mxu0  ;;  %v9304_v45 = vpop.f32.mrf.mxu1  ;;  %v8208_v27 = vrot.slane %v10371_v5, %v11623_v14 }
0x2c15   : > { %v8052_v13 = vadd.f32 %v9281_v28, %v8011_v50 }
0x2c16   : > { %v9283_v52 = vpop.f32.mrf.mxu0  ;;  %v9305_v58 = vpop.f32.mrf.mxu1 }
0x2c17   : > { %v9284_v18 = vadd.f32 %v9283_v52, %v9282_v1  ;;  %v8093_v8 = vadd.f32 %v9303_v46, %v8052_v13  ;;  %v9306_v12 = vadd.f32 %v9305_v58, %v9304_v45 }
0x2c19   : > { %v8055_v10 = vadd.f32 %v9284_v18, %v8014_v53 }
0x2c1b   : > { %v8096_v4 = vadd.f32 %v9306_v12, %v8055_v10 }
0x2c30   : > { %v9323_v15 = vpop.f32.mrf.mxu0  ;;  %v9345_v48 = vpop.f32.mrf.mxu1 }
0x2c32   : > { %v9324_v2 = vpop.f32.mrf.mxu0  ;;  %v9346_v9 = vpop.f32.mrf.mxu1 }
0x2c33   : > { %v9325_v11 = vadd.f32 %v9324_v2, %v9323_v15  ;;  %v9347_v61 = vadd.f32 %v9346_v9, %v9345_v48 }
0x2c34   : > { %v9326_v23 = vpop.f32.mrf.mxu0  ;;  %v9348_v22 = vpop.f32.mrf.mxu1 }
0x2c35   : > { %v8134_v56 = vadd.f32 %v9325_v11, %v8093_v8 }
0x2c36   : > { %v9327_v63 = vpop.f32.mrf.mxu0  ;;  %v9349_v16 = vpop.f32.mrf.mxu1 }
0x2c37   : > { %v8175_v41 = vadd.f32 %v9347_v61, %v8134_v56  ;;  %v9328_v36 = vadd.f32 %v9327_v63, %v9326_v23  ;;  %v9350_v31 = vadd.f32 %v9349_v16, %v9348_v22 }
0x2c39   : > { %v8137_v3 = vadd.f32 %v9328_v36, %v8096_v4  ;;  %v8181_v47 = vadd.f32 %v8175_v41, %v12465_v0 }
0x2c3b   : > { %v8178_v49 = vadd.f32 %v9350_v31, %v8137_v3  ;;  %8183 = vadd.xlane.f32.xlu0 %v8181_v47 }
0x2c3d   : > { %v8182_v26 = vadd.f32 %v8178_v49, %v12472_v30 }
0x2c3f   : > { %8185 = vadd.xlane.f32.xlu1 %v8182_v26 }
0x2cc4   : > { %v8184_v42 = vpop.xlane.xlu0 %8183 }
0x2cc5   : > { %v8187_v21 = vmul.f32 0.0078125, %v8184_v42 }
0x2cc7   : > { %v8189_v38 = vsub.f32 %v8181_v47, %v8187_v21 }
0x2cc8   : > { %v8186_v44 = vpop.xlane.xlu1 %8185 }
0x2cc9   : > { %v8188_v60 = vmul.f32 0.0078125, %v8186_v44  ;;  %v8191_v43 = vmul.f32 %v8189_v38, %v8189_v38 }
0x2ccb   : > { %v8190_v55 = vsub.f32 %v8182_v26, %v8188_v60  ;;  %8193 = vadd.xlane.f32.xlu0 %v8191_v43 }
0x2ccd   : > { %v8192_v7 = vmul.f32 %v8190_v55, %v8190_v55 }
0x2ccf   : > { %8195 = vadd.xlane.f32.xlu1 %v8192_v7 }
0x2d54   : > { %v8194_v57 = vpop.xlane.xlu0 %8193 }
0x2d55   : > { %v8197_v54 = vmul.f32 0.0078125, %v8194_v57 }
0x2d57   : > { %v8199_v0 = vadd.f32 1e-05, %v8197_v54 }
0x2d58   : > { %v8196_v59 = vpop.xlane.xlu1 %8195 }
0x2d59   : > { %10363 = vrsqrt.f32 %v8199_v0  ;;  %v8198_v35 = vmul.f32 0.0078125, %v8196_v59 }
0x2d5b   : > { %v8200_v30 = vadd.f32 1e-05, %v8198_v35 }
0x2d5d   : > { %10365 = vrsqrt.f32 %v8200_v30 }
0x2d66   : > { %v10364_v19 = vpop.eup %10363 }
0x2d67   : > { %v8203_v37 = vmul.f32 %v10364_v19, %v8189_v38 }
0x2d69   : > { %v8209_v51 = vmul.f32 %v8208_v27, %v8203_v37 }
0x2d6a   : > { %v10366_v62 = vpop.eup %10365 }
0x2d6b   : > { %v8215_v25 = vadd.f32 %v8214_v33, %v8209_v51  ;;  %v8204_v40 = vmul.f32 %v10366_v62, %v8190_v55 }
0x2d6d   : > { %8217 = vst [vmem:[#allocation2] sm:$0xff] %v8215_v25  ;;  %v8210_v1 = vmul.f32 %v8208_v27, %v8204_v40  ;;  %8222 = sbr.rel (%p8995_p12) target bundleno = 11644 (0x2d7c), region = 156 }
0x2d6f   : > { %v8216_v34 = vadd.f32 %v8214_v33, %v8210_v1 }
0x2d71   : > { %8218 = vst [vmem:[#allocation2 + $0x8] sm:$0xff] %v8216_v34 }
0x2d74   : > { %v8223_v29 = vld [vmem:[#allocation2] sm:$0xff] }
0x2d78   : > { %v8224_v39 = vld [vmem:[#allocation2 + $0x8] sm:$0xff] }
0x2d79   : > { %v9009_v45 = vpack.c.bf16 %v8224_v39, %v8223_v29 }
0x2d7b   : > { %9010 = vst [vmem:[%s12905_s23] sm:$0xff] %v9009_v45  }
0x2d7c PF: > { %s12906_s30 = sld [smem:[#allocation35_spill]] }
0x2d7d   : > { %s12907_s27 = sld [smem:[#allocation33_spill]] }
0x2d7e   : > { %s12908_s28 = sld [smem:[#allocation34_spill]] }
0x2d7f   : > { %s12909_s29 = sld [smem:[#allocation36_spill]] }
0x2d82   : > { %p47_p13 = scmp.ge.s32.totalorder %s12906_s30, 4  }
0x2d84   :  { %49 = sbr.rel (!%p47_p13) target bundleno = 35 (0x23), region = 294 }
0x2d89   :  { %8240 = vsyncpa [#allocation4], 1 }
0x2d8a   :  { %8242 = vsyncpa [#allocation4 + $0x1], 1 }
0x2d8b   :  { %8243 = vsyncpa [#allocation6], 1 }
0x2d8c   :  { %8245 = vsyncpa [#allocation6 + $0x1], 1 }
0x2d8d   :  { %8246 = vsyncpa [#allocation9], 1 }
0x2d8e   :  { %8248 = vsyncpa [#allocation9 + $0x1], 1 }
0x2d8f   :  { %8249 = vsyncpa [#allocation12], 1 }
0x2d90   :  { %8251 = vsyncpa [#allocation12 + $0x1], 1 }
0x2d91   :  { %8252 = vsyncpa [#allocation15], 1 }
0x2d92   :  { %8254 = vsyncpa [#allocation15 + $0x1], 1 }
0x2d93   :  { %8255 = vsyncpa [#allocation18], 1 }
0x2d94   :  { %8257 = vsyncpa [#allocation18 + $0x1], 1 }
0x2d95   :  { %8258 = vsyncpa [#allocation21], 1 }
0x2d96   :  { %8260 = vsyncpa [#allocation21 + $0x1], 1 }
0x2d97   :  { %8261 = vsyncpa [#allocation24], 1 }
0x2d98   :  { %8263 = vsyncpa [#allocation24 + $0x1], 1 }

</bundles_post_ra>
